<compile_context>
chip_gen: v6e
topology: v6e:2x2x1
jax: 0.10.0
libtpu: 0.0.40
codegen_flags: <defaults>
</compile_context>

<pallas_src>
import jax
import jax.numpy as jnp
from jax.experimental import pallas as pl
from jax.experimental.pallas import tpu as pltpu


def _lstm_rec_kernel(gx_ref, whh_ref, states_ref, hn_ref, cn_ref, h_scr, c_scr):
    """LSTM recurrence over one time chunk.

    Grid = (batch_shards, time_chunks); time chunks run sequentially ("arbitrary").
      gx_ref:     (T_CHUNK, TB, 4H) f32   precomputed x_t @ W_ih^T + (b_ih + b_hh)
      whh_ref:    (H, 4H)           bf16  recurrent weight (resident across the grid)
      states_ref: (T_CHUNK, TB, H)        hidden states for the chunk (lane-dense block store)
      hn_ref, cn_ref: (TB, H) f32         final hidden / cell state
      h_scr, c_scr:   (TB, H) f32 VMEM    carries across time chunks
    """
    t = pl.program_id(1)
    H = h_scr.shape[-1]
    t_chunk = gx_ref.shape[0]

    @pl.when(t == 0)
    def _():
        h_scr[...] = jnp.zeros_like(h_scr)
        c_scr[...] = jnp.zeros_like(c_scr)

    whh = whh_ref[...]                       # hoisted out of the step loop (bf16)

    def step(s, carry):
        h, c = carry                         # f32 carries
        # Recurrent projection on the MXU: bf16 inputs, f32 accumulation.
        gates = gx_ref[s] + jnp.dot(h.astype(whh.dtype), whh,
                                    preferred_element_type=jnp.float32)  # (TB, 4H)
        # PyTorch gate order [i, f, g, o]; with H a multiple of 128 these slices are lane-aligned.
        i_g = jax.nn.sigmoid(gates[:, 0 * H:1 * H])
        f_g = jax.nn.sigmoid(gates[:, 1 * H:2 * H])
        g_g = jnp.tanh(gates[:, 2 * H:3 * H])
        o_g = jax.nn.sigmoid(gates[:, 3 * H:4 * H])
        c_new = f_g * c + i_g * g_g
        h_new = o_g * jnp.tanh(c_new)
        states_ref[s] = h_new.astype(states_ref.dtype)
        return (h_new, c_new)

    # Fully unrolled: gives the LLO scheduler visibility across steps (MXU push for step s+1
    # overlaps with VPU/EUP work of step s).
    h_fin, c_fin = jax.lax.fori_loop(0, t_chunk, step, (h_scr[...], c_scr[...]),
                                     unroll=True)
    h_scr[...] = h_fin
    c_scr[...] = c_fin

    @pl.when(t == pl.num_programs(1) - 1)
    def _():
        hn_ref[...] = h_fin.astype(hn_ref.dtype)
        cn_ref[...] = c_fin.astype(cn_ref.dtype)


def _pick_time_chunk(seq_len, target=16):
    """Largest chunk <= target dividing seq_len (exact grid, no masking).

    Note: for v7x (64 MiB VMEM) re-derive `target` so 2x(T_CHUNK,TB,4H) gate buffers +
    2x(T_CHUNK,TB,H) state buffers + weights stay well under the scoped VMEM limit.
    """
    c = min(seq_len, target)
    while seq_len % c != 0:
        c -= 1
    return c


def _pick_batch_shards(batch):
    """Use 2 batch shards (megacore parallel axis) only if each shard keeps >=16 rows."""
    return 2 if batch % 32 == 0 else 1


def lstm_layer_pallas(gx, w_hh_t, *, out_dtype=jnp.float32, time_chunk=16):
    """gx: (S, B, 4H) f32 precomputed input gates; w_hh_t: (H, 4H) bf16.

    Returns (states (S,B,H) out_dtype, h_n (B,H) f32, c_n (B,H) f32).
    """
    S, B, G = gx.shape
    H = w_hh_t.shape[0]
    assert G == 4 * H

    t_chunk = _pick_time_chunk(S, time_chunk)
    n_chunks = S // t_chunk
    n_b = _pick_batch_shards(B)
    tb = B // n_b

    states, h_n, c_n = pl.pallas_call(
        _lstm_rec_kernel,
        out_shape=(jax.ShapeDtypeStruct((S, B, H), out_dtype),
                   jax.ShapeDtypeStruct((B, H), jnp.float32),
                   jax.ShapeDtypeStruct((B, H), jnp.float32)),
        grid_spec=pltpu.PrefetchScalarGridSpec(
            num_scalar_prefetch=0,
            grid=(n_b, n_chunks),
            in_specs=[
                pl.BlockSpec((t_chunk, tb, 4 * H), lambda b, t: (t, b, 0)),  # gate-input chunk
                pl.BlockSpec((H, 4 * H), lambda b, t: (0, 0)),               # W_hh^T (resident)
            ],
            out_specs=[
                pl.BlockSpec((t_chunk, tb, H), lambda b, t: (t, b, 0)),      # states chunk
                pl.BlockSpec((tb, H), lambda b, t: (b, 0)),                  # final h
                pl.BlockSpec((tb, H), lambda b, t: (b, 0)),                  # final c
            ],
            scratch_shapes=[pltpu.VMEM((tb, H), jnp.float32),                # h carry
                            pltpu.VMEM((tb, H), jnp.float32)],               # c carry
        ),
        # Batch shards are independent (megacore); time chunks are inherently sequential.
        compiler_params=pltpu.CompilerParams(
            dimension_semantics=("parallel", "arbitrary")),
    )(gx, w_hh_t)
    return states, h_n, c_n


def make_encoder_params(key, n_tokens, emb_dim, hid_dim, n_layers):
    """PyTorch-shaped params; LSTM weights stored pre-transposed and pre-cast to bf16."""
    keys = jax.random.split(key, 1 + 4 * n_layers)
    emb = jax.random.normal(keys[0], (n_tokens, emb_dim), jnp.float32)
    k = 1.0 / jnp.sqrt(jnp.float32(hid_dim))
    layers = []
    for l in range(n_layers):
        in_dim = emb_dim if l == 0 else hid_dim
        kw = keys[1 + 4 * l: 1 + 4 * (l + 1)]
        w_ih = jax.random.uniform(kw[0], (4 * hid_dim, in_dim), jnp.float32, -k, k)
        w_hh = jax.random.uniform(kw[1], (4 * hid_dim, hid_dim), jnp.float32, -k, k)
        b_ih = jax.random.uniform(kw[2], (4 * hid_dim,), jnp.float32, -k, k)
        b_hh = jax.random.uniform(kw[3], (4 * hid_dim,), jnp.float32, -k, k)
        layers.append(dict(w_ih_t=w_ih.T.astype(jnp.bfloat16),
                           w_hh_t=w_hh.T.astype(jnp.bfloat16),
                           bias=(b_ih + b_hh)))
    return dict(embedding=emb, layers=layers)


@jax.jit
def encoder_forward(params, src):
    """src: (S, B) int32 -> (states (S,B,H), (h_n, c_n) each (n_layers,B,H))."""
    x = params["embedding"][src]                      # (S, B, E) f32 embedding gather (glue)
    # TODO(synk): nn.Dropout is identity in eval mode; training-mode dropout masks not implemented.
    n_layers = len(params["layers"])
    h_list, c_list = [], []
    for li, layer in enumerate(params["layers"]):
        # Hoisted input projection for ALL timesteps: one large MXU-friendly GEMM
        # (bf16 inputs, f32 accumulation), bias folded in so the recurrence adds nothing extra.
        gx = jnp.einsum("sbe,eg->sbg", x.astype(jnp.bfloat16), layer["w_ih_t"],
                        preferred_element_type=jnp.float32) + layer["bias"]
        out_dtype = jnp.float32 if li == n_layers - 1 else jnp.bfloat16   # bf16 inter-layer acts
        x, h_n, c_n = lstm_layer_pallas(gx, layer["w_hh_t"], out_dtype=out_dtype)
        h_list.append(h_n)
        c_list.append(c_n)
    states = x
    hidden = (jnp.stack(h_list, axis=0), jnp.stack(c_list, axis=0))
    return states, hidden


def _reference_forward(params, src):
    """Pure-JAX reference (lax.scan) following the same bf16-matmul / f32-carry numerics."""
    x = params["embedding"][src]
    n_layers = len(params["layers"])
    h_list, c_list = [], []
    for li, layer in enumerate(params["layers"]):
        whh = layer["w_hh_t"]
        H = whh.shape[0]
        B = x.shape[1]
        gx = jnp.einsum("sbe,eg->sbg", x.astype(jnp.bfloat16), layer["w_ih_t"],
                        preferred_element_type=jnp.float32) + layer["bias"]

        def step(carry, g_t, whh=whh, H=H):
            h, c = carry
            gates = g_t + jnp.dot(h.astype(jnp.bfloat16), whh,
                                  preferred_element_type=jnp.float32)
            i = jax.nn.sigmoid(gates[:, 0 * H:1 * H])
            f = jax.nn.sigmoid(gates[:, 1 * H:2 * H])
            g = jnp.tanh(gates[:, 2 * H:3 * H])
            o = jax.nn.sigmoid(gates[:, 3 * H:4 * H])
            c = f * c + i * g
            h = o * jnp.tanh(c)
            return (h, c), h

        init = (jnp.zeros((B, H), jnp.float32), jnp.zeros((B, H), jnp.float32))
        (h_n, c_n), states = jax.lax.scan(step, init, gx)
        h_list.append(h_n)
        c_list.append(c_n)
        x = states if li == n_layers - 1 else states.astype(jnp.bfloat16)
    return x, (jnp.stack(h_list, 0), jnp.stack(c_list, 0))


if __name__ == "__main__":
    # Small but lane/sublane-aligned shapes (H multiple of 128 keeps gate slices lane-aligned;
    # B multiple of 32 activates the 2-way batch-shard "parallel" axis; S spans multiple chunks).
    n_tokens, emb_dim, hid_dim, n_layers = 100, 128, 128, 2
    seq_len, batch = 64, 32

    key = jax.random.PRNGKey(0)
    pkey, skey = jax.random.split(key)
    params = make_encoder_params(pkey, n_tokens, emb_dim, hid_dim, n_layers)
    src = jax.random.randint(skey, (seq_len, batch), 0, n_tokens, jnp.int32)

    states, (h_n, c_n) = encoder_forward(params, src)
    jax.block_until_ready((states, h_n, c_n))

    # Sanity check against the pure-JAX reference.
    ref_states, (ref_h, ref_c) = _reference_forward(params, src)
    assert states.shape == (seq_len, batch, hid_dim)
    assert h_n.shape == (n_layers, batch, hid_dim)
    assert c_n.shape == (n_layers, batch, hid_dim)
    assert jnp.allclose(states, ref_states, atol=1e-2, rtol=1e-2)
    assert jnp.allclose(h_n, ref_h, atol=1e-2, rtol=1e-2)
    assert jnp.allclose(c_n, ref_c, atol=1e-2, rtol=1e-2)

    print("KERNEL_OK")
</pallas_src>

<mosaic_0001>
module attributes {stable_mosaic.version = 11 : i64} {
  func.func @_lstm_rec_kernel(%arg0: i32, %arg1: i32, %arg2: memref<16x16x512xf32, #tpu.memory_space<vmem>>, %arg3: memref<128x512xbf16, #tpu.memory_space<vmem>>, %arg4: memref<16x16x128xbf16, #tpu.memory_space<vmem>>, %arg5: memref<16x128xf32, #tpu.memory_space<vmem>>, %arg6: memref<16x128xf32, #tpu.memory_space<vmem>>, %arg7: memref<16x128xf32, #tpu.memory_space<vmem>>, %arg8: memref<16x128xf32, #tpu.memory_space<vmem>>) attributes {dimension_semantics = [#tpu.dimension_semantics<parallel>, #tpu.dimension_semantics<arbitrary>], iteration_bounds = array<i64: 2, 4>, scalar_prefetch = 0 : i64, scratch_operands = 2 : i64, tpu.core_type = #tpu.core_type<tc>, window_params = [{transform_indices = @transform_0, window_bounds = array<i64: 16, 16, 512>}, {pipeline_mode = #tpu.pipeline_mode<synchronous>, transform_indices = @transform_1, window_bounds = array<i64: 128, 512>}, {transform_indices = @transform_2, window_bounds = array<i64: 16, 16, 128>}, {transform_indices = @transform_3, window_bounds = array<i64: 16, 128>}, {transform_indices = @transform_4, window_bounds = array<i64: 16, 128>}]} {
    %c0_i32 = arith.constant 0 : i32
    %0 = arith.cmpi eq, %arg1, %c0_i32 : i32
    %1 = arith.extui %0 : i1 to i32
    %c0_i32_0 = arith.constant 0 : i32
    %2 = arith.cmpi ne, %1, %c0_i32_0 : i32
    scf.if %2 {
      %cst_140 = arith.constant 0.000000e+00 : f32
      %587 = vector.broadcast %cst_140 : f32 to vector<16x128xf32>
      %c0_141 = arith.constant 0 : index
      %c0_142 = arith.constant 0 : index
      %588 = vector.load %arg7[%c0_141, %c0_142] : memref<16x128xf32, #tpu.memory_space<vmem>>, vector<16x128xf32>
      tpu.vector_store %arg7[%c0_141, %c0_142], %587 {strides = array<i32>} : memref<16x128xf32, #tpu.memory_space<vmem>>, vector<16x128xf32>,
      %cst_143 = arith.constant 0.000000e+00 : f32
      %589 = vector.broadcast %cst_143 : f32 to vector<16x128xf32>
      %c0_144 = arith.constant 0 : index
      %c0_145 = arith.constant 0 : index
      %590 = vector.load %arg8[%c0_144, %c0_145] : memref<16x128xf32, #tpu.memory_space<vmem>>, vector<16x128xf32>
      tpu.vector_store %arg8[%c0_144, %c0_145], %589 {strides = array<i32>} : memref<16x128xf32, #tpu.memory_space<vmem>>, vector<16x128xf32>,
    } else {
    }
    %c0 = arith.constant 0 : index
    %c0_1 = arith.constant 0 : index
    %3 = vector.load %arg3[%c0, %c0_1] : memref<128x512xbf16, #tpu.memory_space<vmem>>, vector<128x512xbf16>
    %c0_2 = arith.constant 0 : index
    %c0_3 = arith.constant 0 : index
    %4 = vector.load %arg7[%c0_2, %c0_3] : memref<16x128xf32, #tpu.memory_space<vmem>>, vector<16x128xf32>
    %c0_4 = arith.constant 0 : index
    %c0_5 = arith.constant 0 : index
    %5 = vector.load %arg8[%c0_4, %c0_5] : memref<16x128xf32, #tpu.memory_space<vmem>>, vector<16x128xf32>
    %c0_i32_6 = arith.constant 0 : i32
    %6 = arith.index_cast %c0_i32_6 : i32 to index
    %c0_7 = arith.constant 0 : index
    %c0_8 = arith.constant 0 : index
    %7 = vector.load %arg2[%6, %c0_7, %c0_8] : memref<16x16x512xf32, #tpu.memory_space<vmem>>, vector<1x16x512xf32>
    %8 = vector.shape_cast %7 : vector<1x16x512xf32> to vector<16x512xf32>
    %9 = arith.truncf %4 : vector<16x128xf32> to vector<16x128xbf16>
    %cst = arith.constant dense<0.000000e+00> : vector<16x512xf32>
    %10 = tpu.matmul %9, %3, %cst {dimension_numbers = #tpu.dot_dimension_numbers<[1], [0], [0], [1], [0, 0, 1, 1], [], []>} : vector<16x128xbf16>, vector<128x512xbf16>, vector<16x512xf32> -> vector<16x512xf32>
    %11 = arith.addf %8, %10 : vector<16x512xf32>
    %12 = vector.extract_strided_slice %11 {offsets = [0, 0], sizes = [16, 128], strides = [1, 1]} : vector<16x512xf32> to vector<16x128xf32>
    %13 = arith.negf %12 : vector<16x128xf32>
    %14 = math.exp %13 : vector<16x128xf32>
    %cst_9 = arith.constant 1.000000e+00 : f32
    %15 = vector.broadcast %cst_9 : f32 to vector<16x128xf32>
    %16 = arith.addf %15, %14 : vector<16x128xf32>
    %17 = arith.divf %15, %16 : vector<16x128xf32>
    %18 = vector.extract_strided_slice %11 {offsets = [0, 128], sizes = [16, 128], strides = [1, 1]} : vector<16x512xf32> to vector<16x128xf32>
    %19 = arith.negf %18 : vector<16x128xf32>
    %20 = math.exp %19 : vector<16x128xf32>
    %cst_10 = arith.constant 1.000000e+00 : f32
    %21 = vector.broadcast %cst_10 : f32 to vector<16x128xf32>
    %22 = arith.addf %21, %20 : vector<16x128xf32>
    %23 = arith.divf %21, %22 : vector<16x128xf32>
    %24 = vector.extract_strided_slice %11 {offsets = [0, 256], sizes = [16, 128], strides = [1, 1]} : vector<16x512xf32> to vector<16x128xf32>
    %25 = math.tanh %24 : vector<16x128xf32>
    %26 = vector.extract_strided_slice %11 {offsets = [0, 384], sizes = [16, 128], strides = [1, 1]} : vector<16x512xf32> to vector<16x128xf32>
    %27 = arith.negf %26 : vector<16x128xf32>
    %28 = math.exp %27 : vector<16x128xf32>
    %cst_11 = arith.constant 1.000000e+00 : f32
    %29 = vector.broadcast %cst_11 : f32 to vector<16x128xf32>
    %30 = arith.addf %29, %28 : vector<16x128xf32>
    %31 = arith.divf %29, %30 : vector<16x128xf32>
    %32 = arith.mulf %23, %5 : vector<16x128xf32>
    %33 = arith.mulf %17, %25 : vector<16x128xf32>
    %34 = arith.addf %32, %33 : vector<16x128xf32>
    %35 = math.tanh %34 : vector<16x128xf32>
    %36 = arith.mulf %31, %35 : vector<16x128xf32>
    %37 = arith.truncf %36 : vector<16x128xf32> to vector<16x128xbf16>
    %38 = arith.index_cast %c0_i32_6 : i32 to index
    %c0_12 = arith.constant 0 : index
    %c0_13 = arith.constant 0 : index
    %39 = vector.load %arg4[%38, %c0_12, %c0_13] : memref<16x16x128xbf16, #tpu.memory_space<vmem>>, vector<1x16x128xbf16>
    %40 = vector.shape_cast %39 : vector<1x16x128xbf16> to vector<16x128xbf16>
    %41 = vector.shape_cast %37 : vector<16x128xbf16> to vector<1x16x128xbf16>
    tpu.vector_store %arg4[%38, %c0_12, %c0_13], %41 {strides = array<i32>} : memref<16x16x128xbf16, #tpu.memory_space<vmem>>, vector<1x16x128xbf16>,
    %c1_i32 = arith.constant 1 : i32
    %42 = arith.index_cast %c1_i32 : i32 to index
    %c0_14 = arith.constant 0 : index
    %c0_15 = arith.constant 0 : index
    %43 = vector.load %arg2[%42, %c0_14, %c0_15] : memref<16x16x512xf32, #tpu.memory_space<vmem>>, vector<1x16x512xf32>
    %44 = vector.shape_cast %43 : vector<1x16x512xf32> to vector<16x512xf32>
    %45 = arith.truncf %36 : vector<16x128xf32> to vector<16x128xbf16>
    %cst_16 = arith.constant dense<0.000000e+00> : vector<16x512xf32>
    %46 = tpu.matmul %45, %3, %cst_16 {dimension_numbers = #tpu.dot_dimension_numbers<[1], [0], [0], [1], [0, 0, 1, 1], [], []>} : vector<16x128xbf16>, vector<128x512xbf16>, vector<16x512xf32> -> vector<16x512xf32>
    %47 = arith.addf %44, %46 : vector<16x512xf32>
    %48 = vector.extract_strided_slice %47 {offsets = [0, 0], sizes = [16, 128], strides = [1, 1]} : vector<16x512xf32> to vector<16x128xf32>
    %49 = arith.negf %48 : vector<16x128xf32>
    %50 = math.exp %49 : vector<16x128xf32>
    %cst_17 = arith.constant 1.000000e+00 : f32
    %51 = vector.broadcast %cst_17 : f32 to vector<16x128xf32>
    %52 = arith.addf %51, %50 : vector<16x128xf32>
    %53 = arith.divf %51, %52 : vector<16x128xf32>
    %54 = vector.extract_strided_slice %47 {offsets = [0, 128], sizes = [16, 128], strides = [1, 1]} : vector<16x512xf32> to vector<16x128xf32>
    %55 = arith.negf %54 : vector<16x128xf32>
    %56 = math.exp %55 : vector<16x128xf32>
    %cst_18 = arith.constant 1.000000e+00 : f32
    %57 = vector.broadcast %cst_18 : f32 to vector<16x128xf32>
    %58 = arith.addf %57, %56 : vector<16x128xf32>
    %59 = arith.divf %57, %58 : vector<16x128xf32>
    %60 = vector.extract_strided_slice %47 {offsets = [0, 256], sizes = [16, 128], strides = [1, 1]} : vector<16x512xf32> to vector<16x128xf32>
    %61 = math.tanh %60 : vector<16x128xf32>
    %62 = vector.extract_strided_slice %47 {offsets = [0, 384], sizes = [16, 128], strides = [1, 1]} : vector<16x512xf32> to vector<16x128xf32>
    %63 = arith.negf %62 : vector<16x128xf32>
    %64 = math.exp %63 : vector<16x128xf32>
    %cst_19 = arith.constant 1.000000e+00 : f32
    %65 = vector.broadcast %cst_19 : f32 to vector<16x128xf32>
    %66 = arith.addf %65, %64 : vector<16x128xf32>
    %67 = arith.divf %65, %66 : vector<16x128xf32>
    %68 = arith.mulf %59, %34 : vector<16x128xf32>
    %69 = arith.mulf %53, %61 : vector<16x128xf32>
    %70 = arith.addf %68, %69 : vector<16x128xf32>
    %71 = math.tanh %70 : vector<16x128xf32>
    %72 = arith.mulf %67, %71 : vector<16x128xf32>
    %73 = arith.truncf %72 : vector<16x128xf32> to vector<16x128xbf16>
    %74 = arith.index_cast %c1_i32 : i32 to index
    %c0_20 = arith.constant 0 : index
    %c0_21 = arith.constant 0 : index
    %75 = vector.load %arg4[%74, %c0_20, %c0_21] : memref<16x16x128xbf16, #tpu.memory_space<vmem>>, vector<1x16x128xbf16>
    %76 = vector.shape_cast %75 : vector<1x16x128xbf16> to vector<16x128xbf16>
    %77 = vector.shape_cast %73 : vector<16x128xbf16> to vector<1x16x128xbf16>
    tpu.vector_store %arg4[%74, %c0_20, %c0_21], %77 {strides = array<i32>} : memref<16x16x128xbf16, #tpu.memory_space<vmem>>, vector<1x16x128xbf16>,
    %c2_i32 = arith.constant 2 : i32
    %78 = arith.index_cast %c2_i32 : i32 to index
    %c0_22 = arith.constant 0 : index
    %c0_23 = arith.constant 0 : index
    %79 = vector.load %arg2[%78, %c0_22, %c0_23] : memref<16x16x512xf32, #tpu.memory_space<vmem>>, vector<1x16x512xf32>
    %80 = vector.shape_cast %79 : vector<1x16x512xf32> to vector<16x512xf32>
    %81 = arith.truncf %72 : vector<16x128xf32> to vector<16x128xbf16>
    %cst_24 = arith.constant dense<0.000000e+00> : vector<16x512xf32>
    %82 = tpu.matmul %81, %3, %cst_24 {dimension_numbers = #tpu.dot_dimension_numbers<[1], [0], [0], [1], [0, 0, 1, 1], [], []>} : vector<16x128xbf16>, vector<128x512xbf16>, vector<16x512xf32> -> vector<16x512xf32>
    %83 = arith.addf %80, %82 : vector<16x512xf32>
    %84 = vector.extract_strided_slice %83 {offsets = [0, 0], sizes = [16, 128], strides = [1, 1]} : vector<16x512xf32> to vector<16x128xf32>
    %85 = arith.negf %84 : vector<16x128xf32>
    %86 = math.exp %85 : vector<16x128xf32>
    %cst_25 = arith.constant 1.000000e+00 : f32
    %87 = vector.broadcast %cst_25 : f32 to vector<16x128xf32>
    %88 = arith.addf %87, %86 : vector<16x128xf32>
    %89 = arith.divf %87, %88 : vector<16x128xf32>
    %90 = vector.extract_strided_slice %83 {offsets = [0, 128], sizes = [16, 128], strides = [1, 1]} : vector<16x512xf32> to vector<16x128xf32>
    %91 = arith.negf %90 : vector<16x128xf32>
    %92 = math.exp %91 : vector<16x128xf32>
    %cst_26 = arith.constant 1.000000e+00 : f32
    %93 = vector.broadcast %cst_26 : f32 to vector<16x128xf32>
    %94 = arith.addf %93, %92 : vector<16x128xf32>
    %95 = arith.divf %93, %94 : vector<16x128xf32>
    %96 = vector.extract_strided_slice %83 {offsets = [0, 256], sizes = [16, 128], strides = [1, 1]} : vector<16x512xf32> to vector<16x128xf32>
    %97 = math.tanh %96 : vector<16x128xf32>
    %98 = vector.extract_strided_slice %83 {offsets = [0, 384], sizes = [16, 128], strides = [1, 1]} : vector<16x512xf32> to vector<16x128xf32>
    %99 = arith.negf %98 : vector<16x128xf32>
    %100 = math.exp %99 : vector<16x128xf32>
    %cst_27 = arith.constant 1.000000e+00 : f32
    %101 = vector.broadcast %cst_27 : f32 to vector<16x128xf32>
    %102 = arith.addf %101, %100 : vector<16x128xf32>
    %103 = arith.divf %101, %102 : vector<16x128xf32>
    %104 = arith.mulf %95, %70 : vector<16x128xf32>
    %105 = arith.mulf %89, %97 : vector<16x128xf32>
    %106 = arith.addf %104, %105 : vector<16x128xf32>
    %107 = math.tanh %106 : vector<16x128xf32>
    %108 = arith.mulf %103, %107 : vector<16x128xf32>
    %109 = arith.truncf %108 : vector<16x128xf32> to vector<16x128xbf16>
    %110 = arith.index_cast %c2_i32 : i32 to index
    %c0_28 = arith.constant 0 : index
    %c0_29 = arith.constant 0 : index
    %111 = vector.load %arg4[%110, %c0_28, %c0_29] : memref<16x16x128xbf16, #tpu.memory_space<vmem>>, vector<1x16x128xbf16>
    %112 = vector.shape_cast %111 : vector<1x16x128xbf16> to vector<16x128xbf16>
    %113 = vector.shape_cast %109 : vector<16x128xbf16> to vector<1x16x128xbf16>
    tpu.vector_store %arg4[%110, %c0_28, %c0_29], %113 {strides = array<i32>} : memref<16x16x128xbf16, #tpu.memory_space<vmem>>, vector<1x16x128xbf16>,
    %c3_i32 = arith.constant 3 : i32
    %114 = arith.index_cast %c3_i32 : i32 to index
    %c0_30 = arith.constant 0 : index
    %c0_31 = arith.constant 0 : index
    %115 = vector.load %arg2[%114, %c0_30, %c0_31] : memref<16x16x512xf32, #tpu.memory_space<vmem>>, vector<1x16x512xf32>
    %116 = vector.shape_cast %115 : vector<1x16x512xf32> to vector<16x512xf32>
    %117 = arith.truncf %108 : vector<16x128xf32> to vector<16x128xbf16>
    %cst_32 = arith.constant dense<0.000000e+00> : vector<16x512xf32>
    %118 = tpu.matmul %117, %3, %cst_32 {dimension_numbers = #tpu.dot_dimension_numbers<[1], [0], [0], [1], [0, 0, 1, 1], [], []>} : vector<16x128xbf16>, vector<128x512xbf16>, vector<16x512xf32> -> vector<16x512xf32>
    %119 = arith.addf %116, %118 : vector<16x512xf32>
    %120 = vector.extract_strided_slice %119 {offsets = [0, 0], sizes = [16, 128], strides = [1, 1]} : vector<16x512xf32> to vector<16x128xf32>
    %121 = arith.negf %120 : vector<16x128xf32>
    %122 = math.exp %121 : vector<16x128xf32>
    %cst_33 = arith.constant 1.000000e+00 : f32
    %123 = vector.broadcast %cst_33 : f32 to vector<16x128xf32>
    %124 = arith.addf %123, %122 : vector<16x128xf32>
    %125 = arith.divf %123, %124 : vector<16x128xf32>
    %126 = vector.extract_strided_slice %119 {offsets = [0, 128], sizes = [16, 128], strides = [1, 1]} : vector<16x512xf32> to vector<16x128xf32>
    %127 = arith.negf %126 : vector<16x128xf32>
    %128 = math.exp %127 : vector<16x128xf32>
    %cst_34 = arith.constant 1.000000e+00 : f32
    %129 = vector.broadcast %cst_34 : f32 to vector<16x128xf32>
    %130 = arith.addf %129, %128 : vector<16x128xf32>
    %131 = arith.divf %129, %130 : vector<16x128xf32>
    %132 = vector.extract_strided_slice %119 {offsets = [0, 256], sizes = [16, 128], strides = [1, 1]} : vector<16x512xf32> to vector<16x128xf32>
    %133 = math.tanh %132 : vector<16x128xf32>
    %134 = vector.extract_strided_slice %119 {offsets = [0, 384], sizes = [16, 128], strides = [1, 1]} : vector<16x512xf32> to vector<16x128xf32>
    %135 = arith.negf %134 : vector<16x128xf32>
    %136 = math.exp %135 : vector<16x128xf32>
    %cst_35 = arith.constant 1.000000e+00 : f32
    %137 = vector.broadcast %cst_35 : f32 to vector<16x128xf32>
    %138 = arith.addf %137, %136 : vector<16x128xf32>
    %139 = arith.divf %137, %138 : vector<16x128xf32>
    %140 = arith.mulf %131, %106 : vector<16x128xf32>
    %141 = arith.mulf %125, %133 : vector<16x128xf32>
    %142 = arith.addf %140, %141 : vector<16x128xf32>
    %143 = math.tanh %142 : vector<16x128xf32>
    %144 = arith.mulf %139, %143 : vector<16x128xf32>
    %145 = arith.truncf %144 : vector<16x128xf32> to vector<16x128xbf16>
    %146 = arith.index_cast %c3_i32 : i32 to index
    %c0_36 = arith.constant 0 : index
    %c0_37 = arith.constant 0 : index
    %147 = vector.load %arg4[%146, %c0_36, %c0_37] : memref<16x16x128xbf16, #tpu.memory_space<vmem>>, vector<1x16x128xbf16>
    %148 = vector.shape_cast %147 : vector<1x16x128xbf16> to vector<16x128xbf16>
    %149 = vector.shape_cast %145 : vector<16x128xbf16> to vector<1x16x128xbf16>
    tpu.vector_store %arg4[%146, %c0_36, %c0_37], %149 {strides = array<i32>} : memref<16x16x128xbf16, #tpu.memory_space<vmem>>, vector<1x16x128xbf16>,
    %c4_i32 = arith.constant 4 : i32
    %150 = arith.index_cast %c4_i32 : i32 to index
    %c0_38 = arith.constant 0 : index
    %c0_39 = arith.constant 0 : index
    %151 = vector.load %arg2[%150, %c0_38, %c0_39] : memref<16x16x512xf32, #tpu.memory_space<vmem>>, vector<1x16x512xf32>
    %152 = vector.shape_cast %151 : vector<1x16x512xf32> to vector<16x512xf32>
    %153 = arith.truncf %144 : vector<16x128xf32> to vector<16x128xbf16>
    %cst_40 = arith.constant dense<0.000000e+00> : vector<16x512xf32>
    %154 = tpu.matmul %153, %3, %cst_40 {dimension_numbers = #tpu.dot_dimension_numbers<[1], [0], [0], [1], [0, 0, 1, 1], [], []>} : vector<16x128xbf16>, vector<128x512xbf16>, vector<16x512xf32> -> vector<16x512xf32>
    %155 = arith.addf %152, %154 : vector<16x512xf32>
    %156 = vector.extract_strided_slice %155 {offsets = [0, 0], sizes = [16, 128], strides = [1, 1]} : vector<16x512xf32> to vector<16x128xf32>
    %157 = arith.negf %156 : vector<16x128xf32>
    %158 = math.exp %157 : vector<16x128xf32>
    %cst_41 = arith.constant 1.000000e+00 : f32
    %159 = vector.broadcast %cst_41 : f32 to vector<16x128xf32>
    %160 = arith.addf %159, %158 : vector<16x128xf32>
    %161 = arith.divf %159, %160 : vector<16x128xf32>
    %162 = vector.extract_strided_slice %155 {offsets = [0, 128], sizes = [16, 128], strides = [1, 1]} : vector<16x512xf32> to vector<16x128xf32>
    %163 = arith.negf %162 : vector<16x128xf32>
    %164 = math.exp %163 : vector<16x128xf32>
    %cst_42 = arith.constant 1.000000e+00 : f32
    %165 = vector.broadcast %cst_42 : f32 to vector<16x128xf32>
    %166 = arith.addf %165, %164 : vector<16x128xf32>
    %167 = arith.divf %165, %166 : vector<16x128xf32>
    %168 = vector.extract_strided_slice %155 {offsets = [0, 256], sizes = [16, 128], strides = [1, 1]} : vector<16x512xf32> to vector<16x128xf32>
    %169 = math.tanh %168 : vector<16x128xf32>
    %170 = vector.extract_strided_slice %155 {offsets = [0, 384], sizes = [16, 128], strides = [1, 1]} : vector<16x512xf32> to vector<16x128xf32>
    %171 = arith.negf %170 : vector<16x128xf32>
    %172 = math.exp %171 : vector<16x128xf32>
    %cst_43 = arith.constant 1.000000e+00 : f32
    %173 = vector.broadcast %cst_43 : f32 to vector<16x128xf32>
    %174 = arith.addf %173, %172 : vector<16x128xf32>
    %175 = arith.divf %173, %174 : vector<16x128xf32>
    %176 = arith.mulf %167, %142 : vector<16x128xf32>
    %177 = arith.mulf %161, %169 : vector<16x128xf32>
    %178 = arith.addf %176, %177 : vector<16x128xf32>
    %179 = math.tanh %178 : vector<16x128xf32>
    %180 = arith.mulf %175, %179 : vector<16x128xf32>
    %181 = arith.truncf %180 : vector<16x128xf32> to vector<16x128xbf16>
    %182 = arith.index_cast %c4_i32 : i32 to index
    %c0_44 = arith.constant 0 : index
    %c0_45 = arith.constant 0 : index
    %183 = vector.load %arg4[%182, %c0_44, %c0_45] : memref<16x16x128xbf16, #tpu.memory_space<vmem>>, vector<1x16x128xbf16>
    %184 = vector.shape_cast %183 : vector<1x16x128xbf16> to vector<16x128xbf16>
    %185 = vector.shape_cast %181 : vector<16x128xbf16> to vector<1x16x128xbf16>
    tpu.vector_store %arg4[%182, %c0_44, %c0_45], %185 {strides = array<i32>} : memref<16x16x128xbf16, #tpu.memory_space<vmem>>, vector<1x16x128xbf16>,
    %c5_i32 = arith.constant 5 : i32
    %186 = arith.index_cast %c5_i32 : i32 to index
    %c0_46 = arith.constant 0 : index
    %c0_47 = arith.constant 0 : index
    %187 = vector.load %arg2[%186, %c0_46, %c0_47] : memref<16x16x512xf32, #tpu.memory_space<vmem>>, vector<1x16x512xf32>
    %188 = vector.shape_cast %187 : vector<1x16x512xf32> to vector<16x512xf32>
    %189 = arith.truncf %180 : vector<16x128xf32> to vector<16x128xbf16>
    %cst_48 = arith.constant dense<0.000000e+00> : vector<16x512xf32>
    %190 = tpu.matmul %189, %3, %cst_48 {dimension_numbers = #tpu.dot_dimension_numbers<[1], [0], [0], [1], [0, 0, 1, 1], [], []>} : vector<16x128xbf16>, vector<128x512xbf16>, vector<16x512xf32> -> vector<16x512xf32>
    %191 = arith.addf %188, %190 : vector<16x512xf32>
    %192 = vector.extract_strided_slice %191 {offsets = [0, 0], sizes = [16, 128], strides = [1, 1]} : vector<16x512xf32> to vector<16x128xf32>
    %193 = arith.negf %192 : vector<16x128xf32>
    %194 = math.exp %193 : vector<16x128xf32>
    %cst_49 = arith.constant 1.000000e+00 : f32
    %195 = vector.broadcast %cst_49 : f32 to vector<16x128xf32>
    %196 = arith.addf %195, %194 : vector<16x128xf32>
    %197 = arith.divf %195, %196 : vector<16x128xf32>
    %198 = vector.extract_strided_slice %191 {offsets = [0, 128], sizes = [16, 128], strides = [1, 1]} : vector<16x512xf32> to vector<16x128xf32>
    %199 = arith.negf %198 : vector<16x128xf32>
    %200 = math.exp %199 : vector<16x128xf32>
    %cst_50 = arith.constant 1.000000e+00 : f32
    %201 = vector.broadcast %cst_50 : f32 to vector<16x128xf32>
    %202 = arith.addf %201, %200 : vector<16x128xf32>
    %203 = arith.divf %201, %202 : vector<16x128xf32>
    %204 = vector.extract_strided_slice %191 {offsets = [0, 256], sizes = [16, 128], strides = [1, 1]} : vector<16x512xf32> to vector<16x128xf32>
    %205 = math.tanh %204 : vector<16x128xf32>
    %206 = vector.extract_strided_slice %191 {offsets = [0, 384], sizes = [16, 128], strides = [1, 1]} : vector<16x512xf32> to vector<16x128xf32>
    %207 = arith.negf %206 : vector<16x128xf32>
    %208 = math.exp %207 : vector<16x128xf32>
    %cst_51 = arith.constant 1.000000e+00 : f32
    %209 = vector.broadcast %cst_51 : f32 to vector<16x128xf32>
    %210 = arith.addf %209, %208 : vector<16x128xf32>
    %211 = arith.divf %209, %210 : vector<16x128xf32>
    %212 = arith.mulf %203, %178 : vector<16x128xf32>
    %213 = arith.mulf %197, %205 : vector<16x128xf32>
    %214 = arith.addf %212, %213 : vector<16x128xf32>
    %215 = math.tanh %214 : vector<16x128xf32>
    %216 = arith.mulf %211, %215 : vector<16x128xf32>
    %217 = arith.truncf %216 : vector<16x128xf32> to vector<16x128xbf16>
    %218 = arith.index_cast %c5_i32 : i32 to index
    %c0_52 = arith.constant 0 : index
    %c0_53 = arith.constant 0 : index
    %219 = vector.load %arg4[%218, %c0_52, %c0_53] : memref<16x16x128xbf16, #tpu.memory_space<vmem>>, vector<1x16x128xbf16>
    %220 = vector.shape_cast %219 : vector<1x16x128xbf16> to vector<16x128xbf16>
    %221 = vector.shape_cast %217 : vector<16x128xbf16> to vector<1x16x128xbf16>
    tpu.vector_store %arg4[%218, %c0_52, %c0_53], %221 {strides = array<i32>} : memref<16x16x128xbf16, #tpu.memory_space<vmem>>, vector<1x16x128xbf16>,
    %c6_i32 = arith.constant 6 : i32
    %222 = arith.index_cast %c6_i32 : i32 to index
    %c0_54 = arith.constant 0 : index
    %c0_55 = arith.constant 0 : index
    %223 = vector.load %arg2[%222, %c0_54, %c0_55] : memref<16x16x512xf32, #tpu.memory_space<vmem>>, vector<1x16x512xf32>
    %224 = vector.shape_cast %223 : vector<1x16x512xf32> to vector<16x512xf32>
    %225 = arith.truncf %216 : vector<16x128xf32> to vector<16x128xbf16>
    %cst_56 = arith.constant dense<0.000000e+00> : vector<16x512xf32>
    %226 = tpu.matmul %225, %3, %cst_56 {dimension_numbers = #tpu.dot_dimension_numbers<[1], [0], [0], [1], [0, 0, 1, 1], [], []>} : vector<16x128xbf16>, vector<128x512xbf16>, vector<16x512xf32> -> vector<16x512xf32>
    %227 = arith.addf %224, %226 : vector<16x512xf32>
    %228 = vector.extract_strided_slice %227 {offsets = [0, 0], sizes = [16, 128], strides = [1, 1]} : vector<16x512xf32> to vector<16x128xf32>
    %229 = arith.negf %228 : vector<16x128xf32>
    %230 = math.exp %229 : vector<16x128xf32>
    %cst_57 = arith.constant 1.000000e+00 : f32
    %231 = vector.broadcast %cst_57 : f32 to vector<16x128xf32>
    %232 = arith.addf %231, %230 : vector<16x128xf32>
    %233 = arith.divf %231, %232 : vector<16x128xf32>
    %234 = vector.extract_strided_slice %227 {offsets = [0, 128], sizes = [16, 128], strides = [1, 1]} : vector<16x512xf32> to vector<16x128xf32>
    %235 = arith.negf %234 : vector<16x128xf32>
    %236 = math.exp %235 : vector<16x128xf32>
    %cst_58 = arith.constant 1.000000e+00 : f32
    %237 = vector.broadcast %cst_58 : f32 to vector<16x128xf32>
    %238 = arith.addf %237, %236 : vector<16x128xf32>
    %239 = arith.divf %237, %238 : vector<16x128xf32>
    %240 = vector.extract_strided_slice %227 {offsets = [0, 256], sizes = [16, 128], strides = [1, 1]} : vector<16x512xf32> to vector<16x128xf32>
    %241 = math.tanh %240 : vector<16x128xf32>
    %242 = vector.extract_strided_slice %227 {offsets = [0, 384], sizes = [16, 128], strides = [1, 1]} : vector<16x512xf32> to vector<16x128xf32>
    %243 = arith.negf %242 : vector<16x128xf32>
    %244 = math.exp %243 : vector<16x128xf32>
    %cst_59 = arith.constant 1.000000e+00 : f32
    %245 = vector.broadcast %cst_59 : f32 to vector<16x128xf32>
    %246 = arith.addf %245, %244 : vector<16x128xf32>
    %247 = arith.divf %245, %246 : vector<16x128xf32>
    %248 = arith.mulf %239, %214 : vector<16x128xf32>
    %249 = arith.mulf %233, %241 : vector<16x128xf32>
    %250 = arith.addf %248, %249 : vector<16x128xf32>
    %251 = math.tanh %250 : vector<16x128xf32>
    %252 = arith.mulf %247, %251 : vector<16x128xf32>
    %253 = arith.truncf %252 : vector<16x128xf32> to vector<16x128xbf16>
    %254 = arith.index_cast %c6_i32 : i32 to index
    %c0_60 = arith.constant 0 : index
    %c0_61 = arith.constant 0 : index
    %255 = vector.load %arg4[%254, %c0_60, %c0_61] : memref<16x16x128xbf16, #tpu.memory_space<vmem>>, vector<1x16x128xbf16>
    %256 = vector.shape_cast %255 : vector<1x16x128xbf16> to vector<16x128xbf16>
    %257 = vector.shape_cast %253 : vector<16x128xbf16> to vector<1x16x128xbf16>
    tpu.vector_store %arg4[%254, %c0_60, %c0_61], %257 {strides = array<i32>} : memref<16x16x128xbf16, #tpu.memory_space<vmem>>, vector<1x16x128xbf16>,
    %c7_i32 = arith.constant 7 : i32
    %258 = arith.index_cast %c7_i32 : i32 to index
    %c0_62 = arith.constant 0 : index
    %c0_63 = arith.constant 0 : index
    %259 = vector.load %arg2[%258, %c0_62, %c0_63] : memref<16x16x512xf32, #tpu.memory_space<vmem>>, vector<1x16x512xf32>
    %260 = vector.shape_cast %259 : vector<1x16x512xf32> to vector<16x512xf32>
    %261 = arith.truncf %252 : vector<16x128xf32> to vector<16x128xbf16>
    %cst_64 = arith.constant dense<0.000000e+00> : vector<16x512xf32>
    %262 = tpu.matmul %261, %3, %cst_64 {dimension_numbers = #tpu.dot_dimension_numbers<[1], [0], [0], [1], [0, 0, 1, 1], [], []>} : vector<16x128xbf16>, vector<128x512xbf16>, vector<16x512xf32> -> vector<16x512xf32>
    %263 = arith.addf %260, %262 : vector<16x512xf32>
    %264 = vector.extract_strided_slice %263 {offsets = [0, 0], sizes = [16, 128], strides = [1, 1]} : vector<16x512xf32> to vector<16x128xf32>
    %265 = arith.negf %264 : vector<16x128xf32>
    %266 = math.exp %265 : vector<16x128xf32>
    %cst_65 = arith.constant 1.000000e+00 : f32
    %267 = vector.broadcast %cst_65 : f32 to vector<16x128xf32>
    %268 = arith.addf %267, %266 : vector<16x128xf32>
    %269 = arith.divf %267, %268 : vector<16x128xf32>
    %270 = vector.extract_strided_slice %263 {offsets = [0, 128], sizes = [16, 128], strides = [1, 1]} : vector<16x512xf32> to vector<16x128xf32>
    %271 = arith.negf %270 : vector<16x128xf32>
    %272 = math.exp %271 : vector<16x128xf32>
    %cst_66 = arith.constant 1.000000e+00 : f32
    %273 = vector.broadcast %cst_66 : f32 to vector<16x128xf32>
    %274 = arith.addf %273, %272 : vector<16x128xf32>
    %275 = arith.divf %273, %274 : vector<16x128xf32>
    %276 = vector.extract_strided_slice %263 {offsets = [0, 256], sizes = [16, 128], strides = [1, 1]} : vector<16x512xf32> to vector<16x128xf32>
    %277 = math.tanh %276 : vector<16x128xf32>
    %278 = vector.extract_strided_slice %263 {offsets = [0, 384], sizes = [16, 128], strides = [1, 1]} : vector<16x512xf32> to vector<16x128xf32>
    %279 = arith.negf %278 : vector<16x128xf32>
    %280 = math.exp %279 : vector<16x128xf32>
    %cst_67 = arith.constant 1.000000e+00 : f32
    %281 = vector.broadcast %cst_67 : f32 to vector<16x128xf32>
    %282 = arith.addf %281, %280 : vector<16x128xf32>
    %283 = arith.divf %281, %282 : vector<16x128xf32>
    %284 = arith.mulf %275, %250 : vector<16x128xf32>
    %285 = arith.mulf %269, %277 : vector<16x128xf32>
    %286 = arith.addf %284, %285 : vector<16x128xf32>
    %287 = math.tanh %286 : vector<16x128xf32>
    %288 = arith.mulf %283, %287 : vector<16x128xf32>
    %289 = arith.truncf %288 : vector<16x128xf32> to vector<16x128xbf16>
    %290 = arith.index_cast %c7_i32 : i32 to index
    %c0_68 = arith.constant 0 : index
    %c0_69 = arith.constant 0 : index
    %291 = vector.load %arg4[%290, %c0_68, %c0_69] : memref<16x16x128xbf16, #tpu.memory_space<vmem>>, vector<1x16x128xbf16>
    %292 = vector.shape_cast %291 : vector<1x16x128xbf16> to vector<16x128xbf16>
    %293 = vector.shape_cast %289 : vector<16x128xbf16> to vector<1x16x128xbf16>
    tpu.vector_store %arg4[%290, %c0_68, %c0_69], %293 {strides = array<i32>} : memref<16x16x128xbf16, #tpu.memory_space<vmem>>, vector<1x16x128xbf16>,
    %c8_i32 = arith.constant 8 : i32
    %294 = arith.index_cast %c8_i32 : i32 to index
    %c0_70 = arith.constant 0 : index
    %c0_71 = arith.constant 0 : index
    %295 = vector.load %arg2[%294, %c0_70, %c0_71] : memref<16x16x512xf32, #tpu.memory_space<vmem>>, vector<1x16x512xf32>
    %296 = vector.shape_cast %295 : vector<1x16x512xf32> to vector<16x512xf32>
    %297 = arith.truncf %288 : vector<16x128xf32> to vector<16x128xbf16>
    %cst_72 = arith.constant dense<0.000000e+00> : vector<16x512xf32>
    %298 = tpu.matmul %297, %3, %cst_72 {dimension_numbers = #tpu.dot_dimension_numbers<[1], [0], [0], [1], [0, 0, 1, 1], [], []>} : vector<16x128xbf16>, vector<128x512xbf16>, vector<16x512xf32> -> vector<16x512xf32>
    %299 = arith.addf %296, %298 : vector<16x512xf32>
    %300 = vector.extract_strided_slice %299 {offsets = [0, 0], sizes = [16, 128], strides = [1, 1]} : vector<16x512xf32> to vector<16x128xf32>
    %301 = arith.negf %300 : vector<16x128xf32>
    %302 = math.exp %301 : vector<16x128xf32>
    %cst_73 = arith.constant 1.000000e+00 : f32
    %303 = vector.broadcast %cst_73 : f32 to vector<16x128xf32>
    %304 = arith.addf %303, %302 : vector<16x128xf32>
    %305 = arith.divf %303, %304 : vector<16x128xf32>
    %306 = vector.extract_strided_slice %299 {offsets = [0, 128], sizes = [16, 128], strides = [1, 1]} : vector<16x512xf32> to vector<16x128xf32>
    %307 = arith.negf %306 : vector<16x128xf32>
    %308 = math.exp %307 : vector<16x128xf32>
    %cst_74 = arith.constant 1.000000e+00 : f32
    %309 = vector.broadcast %cst_74 : f32 to vector<16x128xf32>
    %310 = arith.addf %309, %308 : vector<16x128xf32>
    %311 = arith.divf %309, %310 : vector<16x128xf32>
    %312 = vector.extract_strided_slice %299 {offsets = [0, 256], sizes = [16, 128], strides = [1, 1]} : vector<16x512xf32> to vector<16x128xf32>
    %313 = math.tanh %312 : vector<16x128xf32>
    %314 = vector.extract_strided_slice %299 {offsets = [0, 384], sizes = [16, 128], strides = [1, 1]} : vector<16x512xf32> to vector<16x128xf32>
    %315 = arith.negf %314 : vector<16x128xf32>
    %316 = math.exp %315 : vector<16x128xf32>
    %cst_75 = arith.constant 1.000000e+00 : f32
    %317 = vector.broadcast %cst_75 : f32 to vector<16x128xf32>
    %318 = arith.addf %317, %316 : vector<16x128xf32>
    %319 = arith.divf %317, %318 : vector<16x128xf32>
    %320 = arith.mulf %311, %286 : vector<16x128xf32>
    %321 = arith.mulf %305, %313 : vector<16x128xf32>
    %322 = arith.addf %320, %321 : vector<16x128xf32>
    %323 = math.tanh %322 : vector<16x128xf32>
    %324 = arith.mulf %319, %323 : vector<16x128xf32>
    %325 = arith.truncf %324 : vector<16x128xf32> to vector<16x128xbf16>
    %326 = arith.index_cast %c8_i32 : i32 to index
    %c0_76 = arith.constant 0 : index
    %c0_77 = arith.constant 0 : index
    %327 = vector.load %arg4[%326, %c0_76, %c0_77] : memref<16x16x128xbf16, #tpu.memory_space<vmem>>, vector<1x16x128xbf16>
    %328 = vector.shape_cast %327 : vector<1x16x128xbf16> to vector<16x128xbf16>
    %329 = vector.shape_cast %325 : vector<16x128xbf16> to vector<1x16x128xbf16>
    tpu.vector_store %arg4[%326, %c0_76, %c0_77], %329 {strides = array<i32>} : memref<16x16x128xbf16, #tpu.memory_space<vmem>>, vector<1x16x128xbf16>,
    %c9_i32 = arith.constant 9 : i32
    %330 = arith.index_cast %c9_i32 : i32 to index
    %c0_78 = arith.constant 0 : index
    %c0_79 = arith.constant 0 : index
    %331 = vector.load %arg2[%330, %c0_78, %c0_79] : memref<16x16x512xf32, #tpu.memory_space<vmem>>, vector<1x16x512xf32>
    %332 = vector.shape_cast %331 : vector<1x16x512xf32> to vector<16x512xf32>
    %333 = arith.truncf %324 : vector<16x128xf32> to vector<16x128xbf16>
    %cst_80 = arith.constant dense<0.000000e+00> : vector<16x512xf32>
    %334 = tpu.matmul %333, %3, %cst_80 {dimension_numbers = #tpu.dot_dimension_numbers<[1], [0], [0], [1], [0, 0, 1, 1], [], []>} : vector<16x128xbf16>, vector<128x512xbf16>, vector<16x512xf32> -> vector<16x512xf32>
    %335 = arith.addf %332, %334 : vector<16x512xf32>
    %336 = vector.extract_strided_slice %335 {offsets = [0, 0], sizes = [16, 128], strides = [1, 1]} : vector<16x512xf32> to vector<16x128xf32>
    %337 = arith.negf %336 : vector<16x128xf32>
    %338 = math.exp %337 : vector<16x128xf32>
    %cst_81 = arith.constant 1.000000e+00 : f32
    %339 = vector.broadcast %cst_81 : f32 to vector<16x128xf32>
    %340 = arith.addf %339, %338 : vector<16x128xf32>
    %341 = arith.divf %339, %340 : vector<16x128xf32>
    %342 = vector.extract_strided_slice %335 {offsets = [0, 128], sizes = [16, 128], strides = [1, 1]} : vector<16x512xf32> to vector<16x128xf32>
    %343 = arith.negf %342 : vector<16x128xf32>
    %344 = math.exp %343 : vector<16x128xf32>
    %cst_82 = arith.constant 1.000000e+00 : f32
    %345 = vector.broadcast %cst_82 : f32 to vector<16x128xf32>
    %346 = arith.addf %345, %344 : vector<16x128xf32>
    %347 = arith.divf %345, %346 : vector<16x128xf32>
    %348 = vector.extract_strided_slice %335 {offsets = [0, 256], sizes = [16, 128], strides = [1, 1]} : vector<16x512xf32> to vector<16x128xf32>
    %349 = math.tanh %348 : vector<16x128xf32>
    %350 = vector.extract_strided_slice %335 {offsets = [0, 384], sizes = [16, 128], strides = [1, 1]} : vector<16x512xf32> to vector<16x128xf32>
    %351 = arith.negf %350 : vector<16x128xf32>
    %352 = math.exp %351 : vector<16x128xf32>
    %cst_83 = arith.constant 1.000000e+00 : f32
    %353 = vector.broadcast %cst_83 : f32 to vector<16x128xf32>
    %354 = arith.addf %353, %352 : vector<16x128xf32>
    %355 = arith.divf %353, %354 : vector<16x128xf32>
    %356 = arith.mulf %347, %322 : vector<16x128xf32>
    %357 = arith.mulf %341, %349 : vector<16x128xf32>
    %358 = arith.addf %356, %357 : vector<16x128xf32>
    %359 = math.tanh %358 : vector<16x128xf32>
    %360 = arith.mulf %355, %359 : vector<16x128xf32>
    %361 = arith.truncf %360 : vector<16x128xf32> to vector<16x128xbf16>
    %362 = arith.index_cast %c9_i32 : i32 to index
    %c0_84 = arith.constant 0 : index
    %c0_85 = arith.constant 0 : index
    %363 = vector.load %arg4[%362, %c0_84, %c0_85] : memref<16x16x128xbf16, #tpu.memory_space<vmem>>, vector<1x16x128xbf16>
    %364 = vector.shape_cast %363 : vector<1x16x128xbf16> to vector<16x128xbf16>
    %365 = vector.shape_cast %361 : vector<16x128xbf16> to vector<1x16x128xbf16>
    tpu.vector_store %arg4[%362, %c0_84, %c0_85], %365 {strides = array<i32>} : memref<16x16x128xbf16, #tpu.memory_space<vmem>>, vector<1x16x128xbf16>,
    %c10_i32 = arith.constant 10 : i32
    %366 = arith.index_cast %c10_i32 : i32 to index
    %c0_86 = arith.constant 0 : index
    %c0_87 = arith.constant 0 : index
    %367 = vector.load %arg2[%366, %c0_86, %c0_87] : memref<16x16x512xf32, #tpu.memory_space<vmem>>, vector<1x16x512xf32>
    %368 = vector.shape_cast %367 : vector<1x16x512xf32> to vector<16x512xf32>
    %369 = arith.truncf %360 : vector<16x128xf32> to vector<16x128xbf16>
    %cst_88 = arith.constant dense<0.000000e+00> : vector<16x512xf32>
    %370 = tpu.matmul %369, %3, %cst_88 {dimension_numbers = #tpu.dot_dimension_numbers<[1], [0], [0], [1], [0, 0, 1, 1], [], []>} : vector<16x128xbf16>, vector<128x512xbf16>, vector<16x512xf32> -> vector<16x512xf32>
    %371 = arith.addf %368, %370 : vector<16x512xf32>
    %372 = vector.extract_strided_slice %371 {offsets = [0, 0], sizes = [16, 128], strides = [1, 1]} : vector<16x512xf32> to vector<16x128xf32>
    %373 = arith.negf %372 : vector<16x128xf32>
    %374 = math.exp %373 : vector<16x128xf32>
    %cst_89 = arith.constant 1.000000e+00 : f32
    %375 = vector.broadcast %cst_89 : f32 to vector<16x128xf32>
    %376 = arith.addf %375, %374 : vector<16x128xf32>
    %377 = arith.divf %375, %376 : vector<16x128xf32>
    %378 = vector.extract_strided_slice %371 {offsets = [0, 128], sizes = [16, 128], strides = [1, 1]} : vector<16x512xf32> to vector<16x128xf32>
    %379 = arith.negf %378 : vector<16x128xf32>
    %380 = math.exp %379 : vector<16x128xf32>
    %cst_90 = arith.constant 1.000000e+00 : f32
    %381 = vector.broadcast %cst_90 : f32 to vector<16x128xf32>
    %382 = arith.addf %381, %380 : vector<16x128xf32>
    %383 = arith.divf %381, %382 : vector<16x128xf32>
    %384 = vector.extract_strided_slice %371 {offsets = [0, 256], sizes = [16, 128], strides = [1, 1]} : vector<16x512xf32> to vector<16x128xf32>
    %385 = math.tanh %384 : vector<16x128xf32>
    %386 = vector.extract_strided_slice %371 {offsets = [0, 384], sizes = [16, 128], strides = [1, 1]} : vector<16x512xf32> to vector<16x128xf32>
    %387 = arith.negf %386 : vector<16x128xf32>
    %388 = math.exp %387 : vector<16x128xf32>
    %cst_91 = arith.constant 1.000000e+00 : f32
    %389 = vector.broadcast %cst_91 : f32 to vector<16x128xf32>
    %390 = arith.addf %389, %388 : vector<16x128xf32>
    %391 = arith.divf %389, %390 : vector<16x128xf32>
    %392 = arith.mulf %383, %358 : vector<16x128xf32>
    %393 = arith.mulf %377, %385 : vector<16x128xf32>
    %394 = arith.addf %392, %393 : vector<16x128xf32>
    %395 = math.tanh %394 : vector<16x128xf32>
    %396 = arith.mulf %391, %395 : vector<16x128xf32>
    %397 = arith.truncf %396 : vector<16x128xf32> to vector<16x128xbf16>
    %398 = arith.index_cast %c10_i32 : i32 to index
    %c0_92 = arith.constant 0 : index
    %c0_93 = arith.constant 0 : index
    %399 = vector.load %arg4[%398, %c0_92, %c0_93] : memref<16x16x128xbf16, #tpu.memory_space<vmem>>, vector<1x16x128xbf16>
    %400 = vector.shape_cast %399 : vector<1x16x128xbf16> to vector<16x128xbf16>
    %401 = vector.shape_cast %397 : vector<16x128xbf16> to vector<1x16x128xbf16>
    tpu.vector_store %arg4[%398, %c0_92, %c0_93], %401 {strides = array<i32>} : memref<16x16x128xbf16, #tpu.memory_space<vmem>>, vector<1x16x128xbf16>,
    %c11_i32 = arith.constant 11 : i32
    %402 = arith.index_cast %c11_i32 : i32 to index
    %c0_94 = arith.constant 0 : index
    %c0_95 = arith.constant 0 : index
    %403 = vector.load %arg2[%402, %c0_94, %c0_95] : memref<16x16x512xf32, #tpu.memory_space<vmem>>, vector<1x16x512xf32>
    %404 = vector.shape_cast %403 : vector<1x16x512xf32> to vector<16x512xf32>
    %405 = arith.truncf %396 : vector<16x128xf32> to vector<16x128xbf16>
    %cst_96 = arith.constant dense<0.000000e+00> : vector<16x512xf32>
    %406 = tpu.matmul %405, %3, %cst_96 {dimension_numbers = #tpu.dot_dimension_numbers<[1], [0], [0], [1], [0, 0, 1, 1], [], []>} : vector<16x128xbf16>, vector<128x512xbf16>, vector<16x512xf32> -> vector<16x512xf32>
    %407 = arith.addf %404, %406 : vector<16x512xf32>
    %408 = vector.extract_strided_slice %407 {offsets = [0, 0], sizes = [16, 128], strides = [1, 1]} : vector<16x512xf32> to vector<16x128xf32>
    %409 = arith.negf %408 : vector<16x128xf32>
    %410 = math.exp %409 : vector<16x128xf32>
    %cst_97 = arith.constant 1.000000e+00 : f32
    %411 = vector.broadcast %cst_97 : f32 to vector<16x128xf32>
    %412 = arith.addf %411, %410 : vector<16x128xf32>
    %413 = arith.divf %411, %412 : vector<16x128xf32>
    %414 = vector.extract_strided_slice %407 {offsets = [0, 128], sizes = [16, 128], strides = [1, 1]} : vector<16x512xf32> to vector<16x128xf32>
    %415 = arith.negf %414 : vector<16x128xf32>
    %416 = math.exp %415 : vector<16x128xf32>
    %cst_98 = arith.constant 1.000000e+00 : f32
    %417 = vector.broadcast %cst_98 : f32 to vector<16x128xf32>
    %418 = arith.addf %417, %416 : vector<16x128xf32>
    %419 = arith.divf %417, %418 : vector<16x128xf32>
    %420 = vector.extract_strided_slice %407 {offsets = [0, 256], sizes = [16, 128], strides = [1, 1]} : vector<16x512xf32> to vector<16x128xf32>
    %421 = math.tanh %420 : vector<16x128xf32>
    %422 = vector.extract_strided_slice %407 {offsets = [0, 384], sizes = [16, 128], strides = [1, 1]} : vector<16x512xf32> to vector<16x128xf32>
    %423 = arith.negf %422 : vector<16x128xf32>
    %424 = math.exp %423 : vector<16x128xf32>
    %cst_99 = arith.constant 1.000000e+00 : f32
    %425 = vector.broadcast %cst_99 : f32 to vector<16x128xf32>
    %426 = arith.addf %425, %424 : vector<16x128xf32>
    %427 = arith.divf %425, %426 : vector<16x128xf32>
    %428 = arith.mulf %419, %394 : vector<16x128xf32>
    %429 = arith.mulf %413, %421 : vector<16x128xf32>
    %430 = arith.addf %428, %429 : vector<16x128xf32>
    %431 = math.tanh %430 : vector<16x128xf32>
    %432 = arith.mulf %427, %431 : vector<16x128xf32>
    %433 = arith.truncf %432 : vector<16x128xf32> to vector<16x128xbf16>
    %434 = arith.index_cast %c11_i32 : i32 to index
    %c0_100 = arith.constant 0 : index
    %c0_101 = arith.constant 0 : index
    %435 = vector.load %arg4[%434, %c0_100, %c0_101] : memref<16x16x128xbf16, #tpu.memory_space<vmem>>, vector<1x16x128xbf16>
    %436 = vector.shape_cast %435 : vector<1x16x128xbf16> to vector<16x128xbf16>
    %437 = vector.shape_cast %433 : vector<16x128xbf16> to vector<1x16x128xbf16>
    tpu.vector_store %arg4[%434, %c0_100, %c0_101], %437 {strides = array<i32>} : memref<16x16x128xbf16, #tpu.memory_space<vmem>>, vector<1x16x128xbf16>,
    %c12_i32 = arith.constant 12 : i32
    %438 = arith.index_cast %c12_i32 : i32 to index
    %c0_102 = arith.constant 0 : index
    %c0_103 = arith.constant 0 : index
    %439 = vector.load %arg2[%438, %c0_102, %c0_103] : memref<16x16x512xf32, #tpu.memory_space<vmem>>, vector<1x16x512xf32>
    %440 = vector.shape_cast %439 : vector<1x16x512xf32> to vector<16x512xf32>
    %441 = arith.truncf %432 : vector<16x128xf32> to vector<16x128xbf16>
    %cst_104 = arith.constant dense<0.000000e+00> : vector<16x512xf32>
    %442 = tpu.matmul %441, %3, %cst_104 {dimension_numbers = #tpu.dot_dimension_numbers<[1], [0], [0], [1], [0, 0, 1, 1], [], []>} : vector<16x128xbf16>, vector<128x512xbf16>, vector<16x512xf32> -> vector<16x512xf32>
    %443 = arith.addf %440, %442 : vector<16x512xf32>
    %444 = vector.extract_strided_slice %443 {offsets = [0, 0], sizes = [16, 128], strides = [1, 1]} : vector<16x512xf32> to vector<16x128xf32>
    %445 = arith.negf %444 : vector<16x128xf32>
    %446 = math.exp %445 : vector<16x128xf32>
    %cst_105 = arith.constant 1.000000e+00 : f32
    %447 = vector.broadcast %cst_105 : f32 to vector<16x128xf32>
    %448 = arith.addf %447, %446 : vector<16x128xf32>
    %449 = arith.divf %447, %448 : vector<16x128xf32>
    %450 = vector.extract_strided_slice %443 {offsets = [0, 128], sizes = [16, 128], strides = [1, 1]} : vector<16x512xf32> to vector<16x128xf32>
    %451 = arith.negf %450 : vector<16x128xf32>
    %452 = math.exp %451 : vector<16x128xf32>
    %cst_106 = arith.constant 1.000000e+00 : f32
    %453 = vector.broadcast %cst_106 : f32 to vector<16x128xf32>
    %454 = arith.addf %453, %452 : vector<16x128xf32>
    %455 = arith.divf %453, %454 : vector<16x128xf32>
    %456 = vector.extract_strided_slice %443 {offsets = [0, 256], sizes = [16, 128], strides = [1, 1]} : vector<16x512xf32> to vector<16x128xf32>
    %457 = math.tanh %456 : vector<16x128xf32>
    %458 = vector.extract_strided_slice %443 {offsets = [0, 384], sizes = [16, 128], strides = [1, 1]} : vector<16x512xf32> to vector<16x128xf32>
    %459 = arith.negf %458 : vector<16x128xf32>
    %460 = math.exp %459 : vector<16x128xf32>
    %cst_107 = arith.constant 1.000000e+00 : f32
    %461 = vector.broadcast %cst_107 : f32 to vector<16x128xf32>
    %462 = arith.addf %461, %460 : vector<16x128xf32>
    %463 = arith.divf %461, %462 : vector<16x128xf32>
    %464 = arith.mulf %455, %430 : vector<16x128xf32>
    %465 = arith.mulf %449, %457 : vector<16x128xf32>
    %466 = arith.addf %464, %465 : vector<16x128xf32>
    %467 = math.tanh %466 : vector<16x128xf32>
    %468 = arith.mulf %463, %467 : vector<16x128xf32>
    %469 = arith.truncf %468 : vector<16x128xf32> to vector<16x128xbf16>
    %470 = arith.index_cast %c12_i32 : i32 to index
    %c0_108 = arith.constant 0 : index
    %c0_109 = arith.constant 0 : index
    %471 = vector.load %arg4[%470, %c0_108, %c0_109] : memref<16x16x128xbf16, #tpu.memory_space<vmem>>, vector<1x16x128xbf16>
    %472 = vector.shape_cast %471 : vector<1x16x128xbf16> to vector<16x128xbf16>
    %473 = vector.shape_cast %469 : vector<16x128xbf16> to vector<1x16x128xbf16>
    tpu.vector_store %arg4[%470, %c0_108, %c0_109], %473 {strides = array<i32>} : memref<16x16x128xbf16, #tpu.memory_space<vmem>>, vector<1x16x128xbf16>,
    %c13_i32 = arith.constant 13 : i32
    %474 = arith.index_cast %c13_i32 : i32 to index
    %c0_110 = arith.constant 0 : index
    %c0_111 = arith.constant 0 : index
    %475 = vector.load %arg2[%474, %c0_110, %c0_111] : memref<16x16x512xf32, #tpu.memory_space<vmem>>, vector<1x16x512xf32>
    %476 = vector.shape_cast %475 : vector<1x16x512xf32> to vector<16x512xf32>
    %477 = arith.truncf %468 : vector<16x128xf32> to vector<16x128xbf16>
    %cst_112 = arith.constant dense<0.000000e+00> : vector<16x512xf32>
    %478 = tpu.matmul %477, %3, %cst_112 {dimension_numbers = #tpu.dot_dimension_numbers<[1], [0], [0], [1], [0, 0, 1, 1], [], []>} : vector<16x128xbf16>, vector<128x512xbf16>, vector<16x512xf32> -> vector<16x512xf32>
    %479 = arith.addf %476, %478 : vector<16x512xf32>
    %480 = vector.extract_strided_slice %479 {offsets = [0, 0], sizes = [16, 128], strides = [1, 1]} : vector<16x512xf32> to vector<16x128xf32>
    %481 = arith.negf %480 : vector<16x128xf32>
    %482 = math.exp %481 : vector<16x128xf32>
    %cst_113 = arith.constant 1.000000e+00 : f32
    %483 = vector.broadcast %cst_113 : f32 to vector<16x128xf32>
    %484 = arith.addf %483, %482 : vector<16x128xf32>
    %485 = arith.divf %483, %484 : vector<16x128xf32>
    %486 = vector.extract_strided_slice %479 {offsets = [0, 128], sizes = [16, 128], strides = [1, 1]} : vector<16x512xf32> to vector<16x128xf32>
    %487 = arith.negf %486 : vector<16x128xf32>
    %488 = math.exp %487 : vector<16x128xf32>
    %cst_114 = arith.constant 1.000000e+00 : f32
    %489 = vector.broadcast %cst_114 : f32 to vector<16x128xf32>
    %490 = arith.addf %489, %488 : vector<16x128xf32>
    %491 = arith.divf %489, %490 : vector<16x128xf32>
    %492 = vector.extract_strided_slice %479 {offsets = [0, 256], sizes = [16, 128], strides = [1, 1]} : vector<16x512xf32> to vector<16x128xf32>
    %493 = math.tanh %492 : vector<16x128xf32>
    %494 = vector.extract_strided_slice %479 {offsets = [0, 384], sizes = [16, 128], strides = [1, 1]} : vector<16x512xf32> to vector<16x128xf32>
    %495 = arith.negf %494 : vector<16x128xf32>
    %496 = math.exp %495 : vector<16x128xf32>
    %cst_115 = arith.constant 1.000000e+00 : f32
    %497 = vector.broadcast %cst_115 : f32 to vector<16x128xf32>
    %498 = arith.addf %497, %496 : vector<16x128xf32>
    %499 = arith.divf %497, %498 : vector<16x128xf32>
    %500 = arith.mulf %491, %466 : vector<16x128xf32>
    %501 = arith.mulf %485, %493 : vector<16x128xf32>
    %502 = arith.addf %500, %501 : vector<16x128xf32>
    %503 = math.tanh %502 : vector<16x128xf32>
    %504 = arith.mulf %499, %503 : vector<16x128xf32>
    %505 = arith.truncf %504 : vector<16x128xf32> to vector<16x128xbf16>
    %506 = arith.index_cast %c13_i32 : i32 to index
    %c0_116 = arith.constant 0 : index
    %c0_117 = arith.constant 0 : index
    %507 = vector.load %arg4[%506, %c0_116, %c0_117] : memref<16x16x128xbf16, #tpu.memory_space<vmem>>, vector<1x16x128xbf16>
    %508 = vector.shape_cast %507 : vector<1x16x128xbf16> to vector<16x128xbf16>
    %509 = vector.shape_cast %505 : vector<16x128xbf16> to vector<1x16x128xbf16>
    tpu.vector_store %arg4[%506, %c0_116, %c0_117], %509 {strides = array<i32>} : memref<16x16x128xbf16, #tpu.memory_space<vmem>>, vector<1x16x128xbf16>,
    %c14_i32 = arith.constant 14 : i32
    %510 = arith.index_cast %c14_i32 : i32 to index
    %c0_118 = arith.constant 0 : index
    %c0_119 = arith.constant 0 : index
    %511 = vector.load %arg2[%510, %c0_118, %c0_119] : memref<16x16x512xf32, #tpu.memory_space<vmem>>, vector<1x16x512xf32>
    %512 = vector.shape_cast %511 : vector<1x16x512xf32> to vector<16x512xf32>
    %513 = arith.truncf %504 : vector<16x128xf32> to vector<16x128xbf16>
    %cst_120 = arith.constant dense<0.000000e+00> : vector<16x512xf32>
    %514 = tpu.matmul %513, %3, %cst_120 {dimension_numbers = #tpu.dot_dimension_numbers<[1], [0], [0], [1], [0, 0, 1, 1], [], []>} : vector<16x128xbf16>, vector<128x512xbf16>, vector<16x512xf32> -> vector<16x512xf32>
    %515 = arith.addf %512, %514 : vector<16x512xf32>
    %516 = vector.extract_strided_slice %515 {offsets = [0, 0], sizes = [16, 128], strides = [1, 1]} : vector<16x512xf32> to vector<16x128xf32>
    %517 = arith.negf %516 : vector<16x128xf32>
    %518 = math.exp %517 : vector<16x128xf32>
    %cst_121 = arith.constant 1.000000e+00 : f32
    %519 = vector.broadcast %cst_121 : f32 to vector<16x128xf32>
    %520 = arith.addf %519, %518 : vector<16x128xf32>
    %521 = arith.divf %519, %520 : vector<16x128xf32>
    %522 = vector.extract_strided_slice %515 {offsets = [0, 128], sizes = [16, 128], strides = [1, 1]} : vector<16x512xf32> to vector<16x128xf32>
    %523 = arith.negf %522 : vector<16x128xf32>
    %524 = math.exp %523 : vector<16x128xf32>
    %cst_122 = arith.constant 1.000000e+00 : f32
    %525 = vector.broadcast %cst_122 : f32 to vector<16x128xf32>
    %526 = arith.addf %525, %524 : vector<16x128xf32>
    %527 = arith.divf %525, %526 : vector<16x128xf32>
    %528 = vector.extract_strided_slice %515 {offsets = [0, 256], sizes = [16, 128], strides = [1, 1]} : vector<16x512xf32> to vector<16x128xf32>
    %529 = math.tanh %528 : vector<16x128xf32>
    %530 = vector.extract_strided_slice %515 {offsets = [0, 384], sizes = [16, 128], strides = [1, 1]} : vector<16x512xf32> to vector<16x128xf32>
    %531 = arith.negf %530 : vector<16x128xf32>
    %532 = math.exp %531 : vector<16x128xf32>
    %cst_123 = arith.constant 1.000000e+00 : f32
    %533 = vector.broadcast %cst_123 : f32 to vector<16x128xf32>
    %534 = arith.addf %533, %532 : vector<16x128xf32>
    %535 = arith.divf %533, %534 : vector<16x128xf32>
    %536 = arith.mulf %527, %502 : vector<16x128xf32>
    %537 = arith.mulf %521, %529 : vector<16x128xf32>
    %538 = arith.addf %536, %537 : vector<16x128xf32>
    %539 = math.tanh %538 : vector<16x128xf32>
    %540 = arith.mulf %535, %539 : vector<16x128xf32>
    %541 = arith.truncf %540 : vector<16x128xf32> to vector<16x128xbf16>
    %542 = arith.index_cast %c14_i32 : i32 to index
    %c0_124 = arith.constant 0 : index
    %c0_125 = arith.constant 0 : index
    %543 = vector.load %arg4[%542, %c0_124, %c0_125] : memref<16x16x128xbf16, #tpu.memory_space<vmem>>, vector<1x16x128xbf16>
    %544 = vector.shape_cast %543 : vector<1x16x128xbf16> to vector<16x128xbf16>
    %545 = vector.shape_cast %541 : vector<16x128xbf16> to vector<1x16x128xbf16>
    tpu.vector_store %arg4[%542, %c0_124, %c0_125], %545 {strides = array<i32>} : memref<16x16x128xbf16, #tpu.memory_space<vmem>>, vector<1x16x128xbf16>,
    %c15_i32 = arith.constant 15 : i32
    %546 = arith.index_cast %c15_i32 : i32 to index
    %c0_126 = arith.constant 0 : index
    %c0_127 = arith.constant 0 : index
    %547 = vector.load %arg2[%546, %c0_126, %c0_127] : memref<16x16x512xf32, #tpu.memory_space<vmem>>, vector<1x16x512xf32>
    %548 = vector.shape_cast %547 : vector<1x16x512xf32> to vector<16x512xf32>
    %549 = arith.truncf %540 : vector<16x128xf32> to vector<16x128xbf16>
    %cst_128 = arith.constant dense<0.000000e+00> : vector<16x512xf32>
    %550 = tpu.matmul %549, %3, %cst_128 {dimension_numbers = #tpu.dot_dimension_numbers<[1], [0], [0], [1], [0, 0, 1, 1], [], []>} : vector<16x128xbf16>, vector<128x512xbf16>, vector<16x512xf32> -> vector<16x512xf32>
    %551 = arith.addf %548, %550 : vector<16x512xf32>
    %552 = vector.extract_strided_slice %551 {offsets = [0, 0], sizes = [16, 128], strides = [1, 1]} : vector<16x512xf32> to vector<16x128xf32>
    %553 = arith.negf %552 : vector<16x128xf32>
    %554 = math.exp %553 : vector<16x128xf32>
    %cst_129 = arith.constant 1.000000e+00 : f32
    %555 = vector.broadcast %cst_129 : f32 to vector<16x128xf32>
    %556 = arith.addf %555, %554 : vector<16x128xf32>
    %557 = arith.divf %555, %556 : vector<16x128xf32>
    %558 = vector.extract_strided_slice %551 {offsets = [0, 128], sizes = [16, 128], strides = [1, 1]} : vector<16x512xf32> to vector<16x128xf32>
    %559 = arith.negf %558 : vector<16x128xf32>
    %560 = math.exp %559 : vector<16x128xf32>
    %cst_130 = arith.constant 1.000000e+00 : f32
    %561 = vector.broadcast %cst_130 : f32 to vector<16x128xf32>
    %562 = arith.addf %561, %560 : vector<16x128xf32>
    %563 = arith.divf %561, %562 : vector<16x128xf32>
    %564 = vector.extract_strided_slice %551 {offsets = [0, 256], sizes = [16, 128], strides = [1, 1]} : vector<16x512xf32> to vector<16x128xf32>
    %565 = math.tanh %564 : vector<16x128xf32>
    %566 = vector.extract_strided_slice %551 {offsets = [0, 384], sizes = [16, 128], strides = [1, 1]} : vector<16x512xf32> to vector<16x128xf32>
    %567 = arith.negf %566 : vector<16x128xf32>
    %568 = math.exp %567 : vector<16x128xf32>
    %cst_131 = arith.constant 1.000000e+00 : f32
    %569 = vector.broadcast %cst_131 : f32 to vector<16x128xf32>
    %570 = arith.addf %569, %568 : vector<16x128xf32>
    %571 = arith.divf %569, %570 : vector<16x128xf32>
    %572 = arith.mulf %563, %538 : vector<16x128xf32>
    %573 = arith.mulf %557, %565 : vector<16x128xf32>
    %574 = arith.addf %572, %573 : vector<16x128xf32>
    %575 = math.tanh %574 : vector<16x128xf32>
    %576 = arith.mulf %571, %575 : vector<16x128xf32>
    %577 = arith.truncf %576 : vector<16x128xf32> to vector<16x128xbf16>
    %578 = arith.index_cast %c15_i32 : i32 to index
    %c0_132 = arith.constant 0 : index
    %c0_133 = arith.constant 0 : index
    %579 = vector.load %arg4[%578, %c0_132, %c0_133] : memref<16x16x128xbf16, #tpu.memory_space<vmem>>, vector<1x16x128xbf16>
    %580 = vector.shape_cast %579 : vector<1x16x128xbf16> to vector<16x128xbf16>
    %581 = vector.shape_cast %577 : vector<16x128xbf16> to vector<1x16x128xbf16>
    tpu.vector_store %arg4[%578, %c0_132, %c0_133], %581 {strides = array<i32>} : memref<16x16x128xbf16, #tpu.memory_space<vmem>>, vector<1x16x128xbf16>,
    %c16_i32 = arith.constant 16 : i32
    %c0_134 = arith.constant 0 : index
    %c0_135 = arith.constant 0 : index
    %582 = vector.load %arg7[%c0_134, %c0_135] : memref<16x128xf32, #tpu.memory_space<vmem>>, vector<16x128xf32>
    tpu.vector_store %arg7[%c0_134, %c0_135], %576 {strides = array<i32>} : memref<16x128xf32, #tpu.memory_space<vmem>>, vector<16x128xf32>,
    %c0_136 = arith.constant 0 : index
    %c0_137 = arith.constant 0 : index
    %583 = vector.load %arg8[%c0_136, %c0_137] : memref<16x128xf32, #tpu.memory_space<vmem>>, vector<16x128xf32>
    tpu.vector_store %arg8[%c0_136, %c0_137], %574 {strides = array<i32>} : memref<16x128xf32, #tpu.memory_space<vmem>>, vector<16x128xf32>,
    %c3_i32_138 = arith.constant 3 : i32
    %584 = arith.cmpi eq, %arg1, %c3_i32_138 : i32
    %585 = arith.extui %584 : i1 to i32
    %c0_i32_139 = arith.constant 0 : i32
    %586 = arith.cmpi ne, %585, %c0_i32_139 : i32
    scf.if %586 {
      %c0_140 = arith.constant 0 : index
      %c0_141 = arith.constant 0 : index
      %587 = vector.load %arg5[%c0_140, %c0_141] : memref<16x128xf32, #tpu.memory_space<vmem>>, vector<16x128xf32>
      tpu.vector_store %arg5[%c0_140, %c0_141], %576 {strides = array<i32>} : memref<16x128xf32, #tpu.memory_space<vmem>>, vector<16x128xf32>,
      %c0_142 = arith.constant 0 : index
      %c0_143 = arith.constant 0 : index
      %588 = vector.load %arg6[%c0_142, %c0_143] : memref<16x128xf32, #tpu.memory_space<vmem>>, vector<16x128xf32>
      tpu.vector_store %arg6[%c0_142, %c0_143], %574 {strides = array<i32>} : memref<16x128xf32, #tpu.memory_space<vmem>>, vector<16x128xf32>,
    } else {
    }
    return
  }
  func.func @transform_0(%arg0: i32, %arg1: i32) -> (i32, i32, i32) {
    %c0_i32 = arith.constant 0 : i32
    %c0_i32_0 = arith.constant 0 : i32
    return %arg1, %arg0, %c0_i32 : i32, i32, i32
  }
  func.func @transform_1(%arg0: i32, %arg1: i32) -> (i32, i32) {
    %c0_i32 = arith.constant 0 : i32
    %c0_i32_0 = arith.constant 0 : i32
    %c0_i32_1 = arith.constant 0 : i32
    return %c0_i32, %c0_i32_0 : i32, i32
  }
  func.func @transform_2(%arg0: i32, %arg1: i32) -> (i32, i32, i32) {
    %c0_i32 = arith.constant 0 : i32
    %c0_i32_0 = arith.constant 0 : i32
    return %arg1, %arg0, %c0_i32 : i32, i32, i32
  }
  func.func @transform_3(%arg0: i32, %arg1: i32) -> (i32, i32) {
    %c0_i32 = arith.constant 0 : i32
    %c0_i32_0 = arith.constant 0 : i32
    return %arg0, %c0_i32 : i32, i32
  }
  func.func @transform_4(%arg0: i32, %arg1: i32) -> (i32, i32) {
    %c0_i32 = arith.constant 0 : i32
    %c0_i32_0 = arith.constant 0 : i32
    return %arg0, %c0_i32 : i32, i32
  }
}

module attributes {stable_mosaic.version = 11 : i64} {
  func.func @_lstm_rec_kernel(%arg0: i32, %arg1: i32, %arg2: memref<16x16x512xf32, #tpu.memory_space<vmem>>, %arg3: memref<128x512xbf16, #tpu.memory_space<vmem>>, %arg4: memref<16x16x128xf32, #tpu.memory_space<vmem>>, %arg5: memref<16x128xf32, #tpu.memory_space<vmem>>, %arg6: memref<16x128xf32, #tpu.memory_space<vmem>>, %arg7: memref<16x128xf32, #tpu.memory_space<vmem>>, %arg8: memref<16x128xf32, #tpu.memory_space<vmem>>) attributes {dimension_semantics = [#tpu.dimension_semantics<parallel>, #tpu.dimension_semantics<arbitrary>], iteration_bounds = array<i64: 2, 4>, scalar_prefetch = 0 : i64, scratch_operands = 2 : i64, tpu.core_type = #tpu.core_type<tc>, window_params = [{transform_indices = @transform_0, window_bounds = array<i64: 16, 16, 512>}, {pipeline_mode = #tpu.pipeline_mode<synchronous>, transform_indices = @transform_1, window_bounds = array<i64: 128, 512>}, {transform_indices = @transform_2, window_bounds = array<i64: 16, 16, 128>}, {transform_indices = @transform_3, window_bounds = array<i64: 16, 128>}, {transform_indices = @transform_4, window_bounds = array<i64: 16, 128>}]} {
    %c0_i32 = arith.constant 0 : i32
    %0 = arith.cmpi eq, %arg1, %c0_i32 : i32
    %1 = arith.extui %0 : i1 to i32
    %c0_i32_0 = arith.constant 0 : i32
    %2 = arith.cmpi ne, %1, %c0_i32_0 : i32
    scf.if %2 {
      %cst_140 = arith.constant 0.000000e+00 : f32
      %571 = vector.broadcast %cst_140 : f32 to vector<16x128xf32>
      %c0_141 = arith.constant 0 : index
      %c0_142 = arith.constant 0 : index
      %572 = vector.load %arg7[%c0_141, %c0_142] : memref<16x128xf32, #tpu.memory_space<vmem>>, vector<16x128xf32>
      tpu.vector_store %arg7[%c0_141, %c0_142], %571 {strides = array<i32>} : memref<16x128xf32, #tpu.memory_space<vmem>>, vector<16x128xf32>,
      %cst_143 = arith.constant 0.000000e+00 : f32
      %573 = vector.broadcast %cst_143 : f32 to vector<16x128xf32>
      %c0_144 = arith.constant 0 : index
      %c0_145 = arith.constant 0 : index
      %574 = vector.load %arg8[%c0_144, %c0_145] : memref<16x128xf32, #tpu.memory_space<vmem>>, vector<16x128xf32>
      tpu.vector_store %arg8[%c0_144, %c0_145], %573 {strides = array<i32>} : memref<16x128xf32, #tpu.memory_space<vmem>>, vector<16x128xf32>,
    } else {
    }
    %c0 = arith.constant 0 : index
    %c0_1 = arith.constant 0 : index
    %3 = vector.load %arg3[%c0, %c0_1] : memref<128x512xbf16, #tpu.memory_space<vmem>>, vector<128x512xbf16>
    %c0_2 = arith.constant 0 : index
    %c0_3 = arith.constant 0 : index
    %4 = vector.load %arg7[%c0_2, %c0_3] : memref<16x128xf32, #tpu.memory_space<vmem>>, vector<16x128xf32>
    %c0_4 = arith.constant 0 : index
    %c0_5 = arith.constant 0 : index
    %5 = vector.load %arg8[%c0_4, %c0_5] : memref<16x128xf32, #tpu.memory_space<vmem>>, vector<16x128xf32>
    %c0_i32_6 = arith.constant 0 : i32
    %6 = arith.index_cast %c0_i32_6 : i32 to index
    %c0_7 = arith.constant 0 : index
    %c0_8 = arith.constant 0 : index
    %7 = vector.load %arg2[%6, %c0_7, %c0_8] : memref<16x16x512xf32, #tpu.memory_space<vmem>>, vector<1x16x512xf32>
    %8 = vector.shape_cast %7 : vector<1x16x512xf32> to vector<16x512xf32>
    %9 = arith.truncf %4 : vector<16x128xf32> to vector<16x128xbf16>
    %cst = arith.constant dense<0.000000e+00> : vector<16x512xf32>
    %10 = tpu.matmul %9, %3, %cst {dimension_numbers = #tpu.dot_dimension_numbers<[1], [0], [0], [1], [0, 0, 1, 1], [], []>} : vector<16x128xbf16>, vector<128x512xbf16>, vector<16x512xf32> -> vector<16x512xf32>
    %11 = arith.addf %8, %10 : vector<16x512xf32>
    %12 = vector.extract_strided_slice %11 {offsets = [0, 0], sizes = [16, 128], strides = [1, 1]} : vector<16x512xf32> to vector<16x128xf32>
    %13 = arith.negf %12 : vector<16x128xf32>
    %14 = math.exp %13 : vector<16x128xf32>
    %cst_9 = arith.constant 1.000000e+00 : f32
    %15 = vector.broadcast %cst_9 : f32 to vector<16x128xf32>
    %16 = arith.addf %15, %14 : vector<16x128xf32>
    %17 = arith.divf %15, %16 : vector<16x128xf32>
    %18 = vector.extract_strided_slice %11 {offsets = [0, 128], sizes = [16, 128], strides = [1, 1]} : vector<16x512xf32> to vector<16x128xf32>
    %19 = arith.negf %18 : vector<16x128xf32>
    %20 = math.exp %19 : vector<16x128xf32>
    %cst_10 = arith.constant 1.000000e+00 : f32
    %21 = vector.broadcast %cst_10 : f32 to vector<16x128xf32>
    %22 = arith.addf %21, %20 : vector<16x128xf32>
    %23 = arith.divf %21, %22 : vector<16x128xf32>
    %24 = vector.extract_strided_slice %11 {offsets = [0, 256], sizes = [16, 128], strides = [1, 1]} : vector<16x512xf32> to vector<16x128xf32>
    %25 = math.tanh %24 : vector<16x128xf32>
    %26 = vector.extract_strided_slice %11 {offsets = [0, 384], sizes = [16, 128], strides = [1, 1]} : vector<16x512xf32> to vector<16x128xf32>
    %27 = arith.negf %26 : vector<16x128xf32>
    %28 = math.exp %27 : vector<16x128xf32>
    %cst_11 = arith.constant 1.000000e+00 : f32
    %29 = vector.broadcast %cst_11 : f32 to vector<16x128xf32>
    %30 = arith.addf %29, %28 : vector<16x128xf32>
    %31 = arith.divf %29, %30 : vector<16x128xf32>
    %32 = arith.mulf %23, %5 : vector<16x128xf32>
    %33 = arith.mulf %17, %25 : vector<16x128xf32>
    %34 = arith.addf %32, %33 : vector<16x128xf32>
    %35 = math.tanh %34 : vector<16x128xf32>
    %36 = arith.mulf %31, %35 : vector<16x128xf32>
    %37 = arith.index_cast %c0_i32_6 : i32 to index
    %c0_12 = arith.constant 0 : index
    %c0_13 = arith.constant 0 : index
    %38 = vector.load %arg4[%37, %c0_12, %c0_13] : memref<16x16x128xf32, #tpu.memory_space<vmem>>, vector<1x16x128xf32>
    %39 = vector.shape_cast %38 : vector<1x16x128xf32> to vector<16x128xf32>
    %40 = vector.shape_cast %36 : vector<16x128xf32> to vector<1x16x128xf32>
    tpu.vector_store %arg4[%37, %c0_12, %c0_13], %40 {strides = array<i32>} : memref<16x16x128xf32, #tpu.memory_space<vmem>>, vector<1x16x128xf32>,
    %c1_i32 = arith.constant 1 : i32
    %41 = arith.index_cast %c1_i32 : i32 to index
    %c0_14 = arith.constant 0 : index
    %c0_15 = arith.constant 0 : index
    %42 = vector.load %arg2[%41, %c0_14, %c0_15] : memref<16x16x512xf32, #tpu.memory_space<vmem>>, vector<1x16x512xf32>
    %43 = vector.shape_cast %42 : vector<1x16x512xf32> to vector<16x512xf32>
    %44 = arith.truncf %36 : vector<16x128xf32> to vector<16x128xbf16>
    %cst_16 = arith.constant dense<0.000000e+00> : vector<16x512xf32>
    %45 = tpu.matmul %44, %3, %cst_16 {dimension_numbers = #tpu.dot_dimension_numbers<[1], [0], [0], [1], [0, 0, 1, 1], [], []>} : vector<16x128xbf16>, vector<128x512xbf16>, vector<16x512xf32> -> vector<16x512xf32>
    %46 = arith.addf %43, %45 : vector<16x512xf32>
    %47 = vector.extract_strided_slice %46 {offsets = [0, 0], sizes = [16, 128], strides = [1, 1]} : vector<16x512xf32> to vector<16x128xf32>
    %48 = arith.negf %47 : vector<16x128xf32>
    %49 = math.exp %48 : vector<16x128xf32>
    %cst_17 = arith.constant 1.000000e+00 : f32
    %50 = vector.broadcast %cst_17 : f32 to vector<16x128xf32>
    %51 = arith.addf %50, %49 : vector<16x128xf32>
    %52 = arith.divf %50, %51 : vector<16x128xf32>
    %53 = vector.extract_strided_slice %46 {offsets = [0, 128], sizes = [16, 128], strides = [1, 1]} : vector<16x512xf32> to vector<16x128xf32>
    %54 = arith.negf %53 : vector<16x128xf32>
    %55 = math.exp %54 : vector<16x128xf32>
    %cst_18 = arith.constant 1.000000e+00 : f32
    %56 = vector.broadcast %cst_18 : f32 to vector<16x128xf32>
    %57 = arith.addf %56, %55 : vector<16x128xf32>
    %58 = arith.divf %56, %57 : vector<16x128xf32>
    %59 = vector.extract_strided_slice %46 {offsets = [0, 256], sizes = [16, 128], strides = [1, 1]} : vector<16x512xf32> to vector<16x128xf32>
    %60 = math.tanh %59 : vector<16x128xf32>
    %61 = vector.extract_strided_slice %46 {offsets = [0, 384], sizes = [16, 128], strides = [1, 1]} : vector<16x512xf32> to vector<16x128xf32>
    %62 = arith.negf %61 : vector<16x128xf32>
    %63 = math.exp %62 : vector<16x128xf32>
    %cst_19 = arith.constant 1.000000e+00 : f32
    %64 = vector.broadcast %cst_19 : f32 to vector<16x128xf32>
    %65 = arith.addf %64, %63 : vector<16x128xf32>
    %66 = arith.divf %64, %65 : vector<16x128xf32>
    %67 = arith.mulf %58, %34 : vector<16x128xf32>
    %68 = arith.mulf %52, %60 : vector<16x128xf32>
    %69 = arith.addf %67, %68 : vector<16x128xf32>
    %70 = math.tanh %69 : vector<16x128xf32>
    %71 = arith.mulf %66, %70 : vector<16x128xf32>
    %72 = arith.index_cast %c1_i32 : i32 to index
    %c0_20 = arith.constant 0 : index
    %c0_21 = arith.constant 0 : index
    %73 = vector.load %arg4[%72, %c0_20, %c0_21] : memref<16x16x128xf32, #tpu.memory_space<vmem>>, vector<1x16x128xf32>
    %74 = vector.shape_cast %73 : vector<1x16x128xf32> to vector<16x128xf32>
    %75 = vector.shape_cast %71 : vector<16x128xf32> to vector<1x16x128xf32>
    tpu.vector_store %arg4[%72, %c0_20, %c0_21], %75 {strides = array<i32>} : memref<16x16x128xf32, #tpu.memory_space<vmem>>, vector<1x16x128xf32>,
    %c2_i32 = arith.constant 2 : i32
    %76 = arith.index_cast %c2_i32 : i32 to index
    %c0_22 = arith.constant 0 : index
    %c0_23 = arith.constant 0 : index
    %77 = vector.load %arg2[%76, %c0_22, %c0_23] : memref<16x16x512xf32, #tpu.memory_space<vmem>>, vector<1x16x512xf32>
    %78 = vector.shape_cast %77 : vector<1x16x512xf32> to vector<16x512xf32>
    %79 = arith.truncf %71 : vector<16x128xf32> to vector<16x128xbf16>
    %cst_24 = arith.constant dense<0.000000e+00> : vector<16x512xf32>
    %80 = tpu.matmul %79, %3, %cst_24 {dimension_numbers = #tpu.dot_dimension_numbers<[1], [0], [0], [1], [0, 0, 1, 1], [], []>} : vector<16x128xbf16>, vector<128x512xbf16>, vector<16x512xf32> -> vector<16x512xf32>
    %81 = arith.addf %78, %80 : vector<16x512xf32>
    %82 = vector.extract_strided_slice %81 {offsets = [0, 0], sizes = [16, 128], strides = [1, 1]} : vector<16x512xf32> to vector<16x128xf32>
    %83 = arith.negf %82 : vector<16x128xf32>
    %84 = math.exp %83 : vector<16x128xf32>
    %cst_25 = arith.constant 1.000000e+00 : f32
    %85 = vector.broadcast %cst_25 : f32 to vector<16x128xf32>
    %86 = arith.addf %85, %84 : vector<16x128xf32>
    %87 = arith.divf %85, %86 : vector<16x128xf32>
    %88 = vector.extract_strided_slice %81 {offsets = [0, 128], sizes = [16, 128], strides = [1, 1]} : vector<16x512xf32> to vector<16x128xf32>
    %89 = arith.negf %88 : vector<16x128xf32>
    %90 = math.exp %89 : vector<16x128xf32>
    %cst_26 = arith.constant 1.000000e+00 : f32
    %91 = vector.broadcast %cst_26 : f32 to vector<16x128xf32>
    %92 = arith.addf %91, %90 : vector<16x128xf32>
    %93 = arith.divf %91, %92 : vector<16x128xf32>
    %94 = vector.extract_strided_slice %81 {offsets = [0, 256], sizes = [16, 128], strides = [1, 1]} : vector<16x512xf32> to vector<16x128xf32>
    %95 = math.tanh %94 : vector<16x128xf32>
    %96 = vector.extract_strided_slice %81 {offsets = [0, 384], sizes = [16, 128], strides = [1, 1]} : vector<16x512xf32> to vector<16x128xf32>
    %97 = arith.negf %96 : vector<16x128xf32>
    %98 = math.exp %97 : vector<16x128xf32>
    %cst_27 = arith.constant 1.000000e+00 : f32
    %99 = vector.broadcast %cst_27 : f32 to vector<16x128xf32>
    %100 = arith.addf %99, %98 : vector<16x128xf32>
    %101 = arith.divf %99, %100 : vector<16x128xf32>
    %102 = arith.mulf %93, %69 : vector<16x128xf32>
    %103 = arith.mulf %87, %95 : vector<16x128xf32>
    %104 = arith.addf %102, %103 : vector<16x128xf32>
    %105 = math.tanh %104 : vector<16x128xf32>
    %106 = arith.mulf %101, %105 : vector<16x128xf32>
    %107 = arith.index_cast %c2_i32 : i32 to index
    %c0_28 = arith.constant 0 : index
    %c0_29 = arith.constant 0 : index
    %108 = vector.load %arg4[%107, %c0_28, %c0_29] : memref<16x16x128xf32, #tpu.memory_space<vmem>>, vector<1x16x128xf32>
    %109 = vector.shape_cast %108 : vector<1x16x128xf32> to vector<16x128xf32>
    %110 = vector.shape_cast %106 : vector<16x128xf32> to vector<1x16x128xf32>
    tpu.vector_store %arg4[%107, %c0_28, %c0_29], %110 {strides = array<i32>} : memref<16x16x128xf32, #tpu.memory_space<vmem>>, vector<1x16x128xf32>,
    %c3_i32 = arith.constant 3 : i32
    %111 = arith.index_cast %c3_i32 : i32 to index
    %c0_30 = arith.constant 0 : index
    %c0_31 = arith.constant 0 : index
    %112 = vector.load %arg2[%111, %c0_30, %c0_31] : memref<16x16x512xf32, #tpu.memory_space<vmem>>, vector<1x16x512xf32>
    %113 = vector.shape_cast %112 : vector<1x16x512xf32> to vector<16x512xf32>
    %114 = arith.truncf %106 : vector<16x128xf32> to vector<16x128xbf16>
    %cst_32 = arith.constant dense<0.000000e+00> : vector<16x512xf32>
    %115 = tpu.matmul %114, %3, %cst_32 {dimension_numbers = #tpu.dot_dimension_numbers<[1], [0], [0], [1], [0, 0, 1, 1], [], []>} : vector<16x128xbf16>, vector<128x512xbf16>, vector<16x512xf32> -> vector<16x512xf32>
    %116 = arith.addf %113, %115 : vector<16x512xf32>
    %117 = vector.extract_strided_slice %116 {offsets = [0, 0], sizes = [16, 128], strides = [1, 1]} : vector<16x512xf32> to vector<16x128xf32>
    %118 = arith.negf %117 : vector<16x128xf32>
    %119 = math.exp %118 : vector<16x128xf32>
    %cst_33 = arith.constant 1.000000e+00 : f32
    %120 = vector.broadcast %cst_33 : f32 to vector<16x128xf32>
    %121 = arith.addf %120, %119 : vector<16x128xf32>
    %122 = arith.divf %120, %121 : vector<16x128xf32>
    %123 = vector.extract_strided_slice %116 {offsets = [0, 128], sizes = [16, 128], strides = [1, 1]} : vector<16x512xf32> to vector<16x128xf32>
    %124 = arith.negf %123 : vector<16x128xf32>
    %125 = math.exp %124 : vector<16x128xf32>
    %cst_34 = arith.constant 1.000000e+00 : f32
    %126 = vector.broadcast %cst_34 : f32 to vector<16x128xf32>
    %127 = arith.addf %126, %125 : vector<16x128xf32>
    %128 = arith.divf %126, %127 : vector<16x128xf32>
    %129 = vector.extract_strided_slice %116 {offsets = [0, 256], sizes = [16, 128], strides = [1, 1]} : vector<16x512xf32> to vector<16x128xf32>
    %130 = math.tanh %129 : vector<16x128xf32>
    %131 = vector.extract_strided_slice %116 {offsets = [0, 384], sizes = [16, 128], strides = [1, 1]} : vector<16x512xf32> to vector<16x128xf32>
    %132 = arith.negf %131 : vector<16x128xf32>
    %133 = math.exp %132 : vector<16x128xf32>
    %cst_35 = arith.constant 1.000000e+00 : f32
    %134 = vector.broadcast %cst_35 : f32 to vector<16x128xf32>
    %135 = arith.addf %134, %133 : vector<16x128xf32>
    %136 = arith.divf %134, %135 : vector<16x128xf32>
    %137 = arith.mulf %128, %104 : vector<16x128xf32>
    %138 = arith.mulf %122, %130 : vector<16x128xf32>
    %139 = arith.addf %137, %138 : vector<16x128xf32>
    %140 = math.tanh %139 : vector<16x128xf32>
    %141 = arith.mulf %136, %140 : vector<16x128xf32>
    %142 = arith.index_cast %c3_i32 : i32 to index
    %c0_36 = arith.constant 0 : index
    %c0_37 = arith.constant 0 : index
    %143 = vector.load %arg4[%142, %c0_36, %c0_37] : memref<16x16x128xf32, #tpu.memory_space<vmem>>, vector<1x16x128xf32>
    %144 = vector.shape_cast %143 : vector<1x16x128xf32> to vector<16x128xf32>
    %145 = vector.shape_cast %141 : vector<16x128xf32> to vector<1x16x128xf32>
    tpu.vector_store %arg4[%142, %c0_36, %c0_37], %145 {strides = array<i32>} : memref<16x16x128xf32, #tpu.memory_space<vmem>>, vector<1x16x128xf32>,
    %c4_i32 = arith.constant 4 : i32
    %146 = arith.index_cast %c4_i32 : i32 to index
    %c0_38 = arith.constant 0 : index
    %c0_39 = arith.constant 0 : index
    %147 = vector.load %arg2[%146, %c0_38, %c0_39] : memref<16x16x512xf32, #tpu.memory_space<vmem>>, vector<1x16x512xf32>
    %148 = vector.shape_cast %147 : vector<1x16x512xf32> to vector<16x512xf32>
    %149 = arith.truncf %141 : vector<16x128xf32> to vector<16x128xbf16>
    %cst_40 = arith.constant dense<0.000000e+00> : vector<16x512xf32>
    %150 = tpu.matmul %149, %3, %cst_40 {dimension_numbers = #tpu.dot_dimension_numbers<[1], [0], [0], [1], [0, 0, 1, 1], [], []>} : vector<16x128xbf16>, vector<128x512xbf16>, vector<16x512xf32> -> vector<16x512xf32>
    %151 = arith.addf %148, %150 : vector<16x512xf32>
    %152 = vector.extract_strided_slice %151 {offsets = [0, 0], sizes = [16, 128], strides = [1, 1]} : vector<16x512xf32> to vector<16x128xf32>
    %153 = arith.negf %152 : vector<16x128xf32>
    %154 = math.exp %153 : vector<16x128xf32>
    %cst_41 = arith.constant 1.000000e+00 : f32
    %155 = vector.broadcast %cst_41 : f32 to vector<16x128xf32>
    %156 = arith.addf %155, %154 : vector<16x128xf32>
    %157 = arith.divf %155, %156 : vector<16x128xf32>
    %158 = vector.extract_strided_slice %151 {offsets = [0, 128], sizes = [16, 128], strides = [1, 1]} : vector<16x512xf32> to vector<16x128xf32>
    %159 = arith.negf %158 : vector<16x128xf32>
    %160 = math.exp %159 : vector<16x128xf32>
    %cst_42 = arith.constant 1.000000e+00 : f32
    %161 = vector.broadcast %cst_42 : f32 to vector<16x128xf32>
    %162 = arith.addf %161, %160 : vector<16x128xf32>
    %163 = arith.divf %161, %162 : vector<16x128xf32>
    %164 = vector.extract_strided_slice %151 {offsets = [0, 256], sizes = [16, 128], strides = [1, 1]} : vector<16x512xf32> to vector<16x128xf32>
    %165 = math.tanh %164 : vector<16x128xf32>
    %166 = vector.extract_strided_slice %151 {offsets = [0, 384], sizes = [16, 128], strides = [1, 1]} : vector<16x512xf32> to vector<16x128xf32>
    %167 = arith.negf %166 : vector<16x128xf32>
    %168 = math.exp %167 : vector<16x128xf32>
    %cst_43 = arith.constant 1.000000e+00 : f32
    %169 = vector.broadcast %cst_43 : f32 to vector<16x128xf32>
    %170 = arith.addf %169, %168 : vector<16x128xf32>
    %171 = arith.divf %169, %170 : vector<16x128xf32>
    %172 = arith.mulf %163, %139 : vector<16x128xf32>
    %173 = arith.mulf %157, %165 : vector<16x128xf32>
    %174 = arith.addf %172, %173 : vector<16x128xf32>
    %175 = math.tanh %174 : vector<16x128xf32>
    %176 = arith.mulf %171, %175 : vector<16x128xf32>
    %177 = arith.index_cast %c4_i32 : i32 to index
    %c0_44 = arith.constant 0 : index
    %c0_45 = arith.constant 0 : index
    %178 = vector.load %arg4[%177, %c0_44, %c0_45] : memref<16x16x128xf32, #tpu.memory_space<vmem>>, vector<1x16x128xf32>
    %179 = vector.shape_cast %178 : vector<1x16x128xf32> to vector<16x128xf32>
    %180 = vector.shape_cast %176 : vector<16x128xf32> to vector<1x16x128xf32>
    tpu.vector_store %arg4[%177, %c0_44, %c0_45], %180 {strides = array<i32>} : memref<16x16x128xf32, #tpu.memory_space<vmem>>, vector<1x16x128xf32>,
    %c5_i32 = arith.constant 5 : i32
    %181 = arith.index_cast %c5_i32 : i32 to index
    %c0_46 = arith.constant 0 : index
    %c0_47 = arith.constant 0 : index
    %182 = vector.load %arg2[%181, %c0_46, %c0_47] : memref<16x16x512xf32, #tpu.memory_space<vmem>>, vector<1x16x512xf32>
    %183 = vector.shape_cast %182 : vector<1x16x512xf32> to vector<16x512xf32>
    %184 = arith.truncf %176 : vector<16x128xf32> to vector<16x128xbf16>
    %cst_48 = arith.constant dense<0.000000e+00> : vector<16x512xf32>
    %185 = tpu.matmul %184, %3, %cst_48 {dimension_numbers = #tpu.dot_dimension_numbers<[1], [0], [0], [1], [0, 0, 1, 1], [], []>} : vector<16x128xbf16>, vector<128x512xbf16>, vector<16x512xf32> -> vector<16x512xf32>
    %186 = arith.addf %183, %185 : vector<16x512xf32>
    %187 = vector.extract_strided_slice %186 {offsets = [0, 0], sizes = [16, 128], strides = [1, 1]} : vector<16x512xf32> to vector<16x128xf32>
    %188 = arith.negf %187 : vector<16x128xf32>
    %189 = math.exp %188 : vector<16x128xf32>
    %cst_49 = arith.constant 1.000000e+00 : f32
    %190 = vector.broadcast %cst_49 : f32 to vector<16x128xf32>
    %191 = arith.addf %190, %189 : vector<16x128xf32>
    %192 = arith.divf %190, %191 : vector<16x128xf32>
    %193 = vector.extract_strided_slice %186 {offsets = [0, 128], sizes = [16, 128], strides = [1, 1]} : vector<16x512xf32> to vector<16x128xf32>
    %194 = arith.negf %193 : vector<16x128xf32>
    %195 = math.exp %194 : vector<16x128xf32>
    %cst_50 = arith.constant 1.000000e+00 : f32
    %196 = vector.broadcast %cst_50 : f32 to vector<16x128xf32>
    %197 = arith.addf %196, %195 : vector<16x128xf32>
    %198 = arith.divf %196, %197 : vector<16x128xf32>
    %199 = vector.extract_strided_slice %186 {offsets = [0, 256], sizes = [16, 128], strides = [1, 1]} : vector<16x512xf32> to vector<16x128xf32>
    %200 = math.tanh %199 : vector<16x128xf32>
    %201 = vector.extract_strided_slice %186 {offsets = [0, 384], sizes = [16, 128], strides = [1, 1]} : vector<16x512xf32> to vector<16x128xf32>
    %202 = arith.negf %201 : vector<16x128xf32>
    %203 = math.exp %202 : vector<16x128xf32>
    %cst_51 = arith.constant 1.000000e+00 : f32
    %204 = vector.broadcast %cst_51 : f32 to vector<16x128xf32>
    %205 = arith.addf %204, %203 : vector<16x128xf32>
    %206 = arith.divf %204, %205 : vector<16x128xf32>
    %207 = arith.mulf %198, %174 : vector<16x128xf32>
    %208 = arith.mulf %192, %200 : vector<16x128xf32>
    %209 = arith.addf %207, %208 : vector<16x128xf32>
    %210 = math.tanh %209 : vector<16x128xf32>
    %211 = arith.mulf %206, %210 : vector<16x128xf32>
    %212 = arith.index_cast %c5_i32 : i32 to index
    %c0_52 = arith.constant 0 : index
    %c0_53 = arith.constant 0 : index
    %213 = vector.load %arg4[%212, %c0_52, %c0_53] : memref<16x16x128xf32, #tpu.memory_space<vmem>>, vector<1x16x128xf32>
    %214 = vector.shape_cast %213 : vector<1x16x128xf32> to vector<16x128xf32>
    %215 = vector.shape_cast %211 : vector<16x128xf32> to vector<1x16x128xf32>
    tpu.vector_store %arg4[%212, %c0_52, %c0_53], %215 {strides = array<i32>} : memref<16x16x128xf32, #tpu.memory_space<vmem>>, vector<1x16x128xf32>,
    %c6_i32 = arith.constant 6 : i32
    %216 = arith.index_cast %c6_i32 : i32 to index
    %c0_54 = arith.constant 0 : index
    %c0_55 = arith.constant 0 : index
    %217 = vector.load %arg2[%216, %c0_54, %c0_55] : memref<16x16x512xf32, #tpu.memory_space<vmem>>, vector<1x16x512xf32>
    %218 = vector.shape_cast %217 : vector<1x16x512xf32> to vector<16x512xf32>
    %219 = arith.truncf %211 : vector<16x128xf32> to vector<16x128xbf16>
    %cst_56 = arith.constant dense<0.000000e+00> : vector<16x512xf32>
    %220 = tpu.matmul %219, %3, %cst_56 {dimension_numbers = #tpu.dot_dimension_numbers<[1], [0], [0], [1], [0, 0, 1, 1], [], []>} : vector<16x128xbf16>, vector<128x512xbf16>, vector<16x512xf32> -> vector<16x512xf32>
    %221 = arith.addf %218, %220 : vector<16x512xf32>
    %222 = vector.extract_strided_slice %221 {offsets = [0, 0], sizes = [16, 128], strides = [1, 1]} : vector<16x512xf32> to vector<16x128xf32>
    %223 = arith.negf %222 : vector<16x128xf32>
    %224 = math.exp %223 : vector<16x128xf32>
    %cst_57 = arith.constant 1.000000e+00 : f32
    %225 = vector.broadcast %cst_57 : f32 to vector<16x128xf32>
    %226 = arith.addf %225, %224 : vector<16x128xf32>
    %227 = arith.divf %225, %226 : vector<16x128xf32>
    %228 = vector.extract_strided_slice %221 {offsets = [0, 128], sizes = [16, 128], strides = [1, 1]} : vector<16x512xf32> to vector<16x128xf32>
    %229 = arith.negf %228 : vector<16x128xf32>
    %230 = math.exp %229 : vector<16x128xf32>
    %cst_58 = arith.constant 1.000000e+00 : f32
    %231 = vector.broadcast %cst_58 : f32 to vector<16x128xf32>
    %232 = arith.addf %231, %230 : vector<16x128xf32>
    %233 = arith.divf %231, %232 : vector<16x128xf32>
    %234 = vector.extract_strided_slice %221 {offsets = [0, 256], sizes = [16, 128], strides = [1, 1]} : vector<16x512xf32> to vector<16x128xf32>
    %235 = math.tanh %234 : vector<16x128xf32>
    %236 = vector.extract_strided_slice %221 {offsets = [0, 384], sizes = [16, 128], strides = [1, 1]} : vector<16x512xf32> to vector<16x128xf32>
    %237 = arith.negf %236 : vector<16x128xf32>
    %238 = math.exp %237 : vector<16x128xf32>
    %cst_59 = arith.constant 1.000000e+00 : f32
    %239 = vector.broadcast %cst_59 : f32 to vector<16x128xf32>
    %240 = arith.addf %239, %238 : vector<16x128xf32>
    %241 = arith.divf %239, %240 : vector<16x128xf32>
    %242 = arith.mulf %233, %209 : vector<16x128xf32>
    %243 = arith.mulf %227, %235 : vector<16x128xf32>
    %244 = arith.addf %242, %243 : vector<16x128xf32>
    %245 = math.tanh %244 : vector<16x128xf32>
    %246 = arith.mulf %241, %245 : vector<16x128xf32>
    %247 = arith.index_cast %c6_i32 : i32 to index
    %c0_60 = arith.constant 0 : index
    %c0_61 = arith.constant 0 : index
    %248 = vector.load %arg4[%247, %c0_60, %c0_61] : memref<16x16x128xf32, #tpu.memory_space<vmem>>, vector<1x16x128xf32>
    %249 = vector.shape_cast %248 : vector<1x16x128xf32> to vector<16x128xf32>
    %250 = vector.shape_cast %246 : vector<16x128xf32> to vector<1x16x128xf32>
    tpu.vector_store %arg4[%247, %c0_60, %c0_61], %250 {strides = array<i32>} : memref<16x16x128xf32, #tpu.memory_space<vmem>>, vector<1x16x128xf32>,
    %c7_i32 = arith.constant 7 : i32
    %251 = arith.index_cast %c7_i32 : i32 to index
    %c0_62 = arith.constant 0 : index
    %c0_63 = arith.constant 0 : index
    %252 = vector.load %arg2[%251, %c0_62, %c0_63] : memref<16x16x512xf32, #tpu.memory_space<vmem>>, vector<1x16x512xf32>
    %253 = vector.shape_cast %252 : vector<1x16x512xf32> to vector<16x512xf32>
    %254 = arith.truncf %246 : vector<16x128xf32> to vector<16x128xbf16>
    %cst_64 = arith.constant dense<0.000000e+00> : vector<16x512xf32>
    %255 = tpu.matmul %254, %3, %cst_64 {dimension_numbers = #tpu.dot_dimension_numbers<[1], [0], [0], [1], [0, 0, 1, 1], [], []>} : vector<16x128xbf16>, vector<128x512xbf16>, vector<16x512xf32> -> vector<16x512xf32>
    %256 = arith.addf %253, %255 : vector<16x512xf32>
    %257 = vector.extract_strided_slice %256 {offsets = [0, 0], sizes = [16, 128], strides = [1, 1]} : vector<16x512xf32> to vector<16x128xf32>
    %258 = arith.negf %257 : vector<16x128xf32>
    %259 = math.exp %258 : vector<16x128xf32>
    %cst_65 = arith.constant 1.000000e+00 : f32
    %260 = vector.broadcast %cst_65 : f32 to vector<16x128xf32>
    %261 = arith.addf %260, %259 : vector<16x128xf32>
    %262 = arith.divf %260, %261 : vector<16x128xf32>
    %263 = vector.extract_strided_slice %256 {offsets = [0, 128], sizes = [16, 128], strides = [1, 1]} : vector<16x512xf32> to vector<16x128xf32>
    %264 = arith.negf %263 : vector<16x128xf32>
    %265 = math.exp %264 : vector<16x128xf32>
    %cst_66 = arith.constant 1.000000e+00 : f32
    %266 = vector.broadcast %cst_66 : f32 to vector<16x128xf32>
    %267 = arith.addf %266, %265 : vector<16x128xf32>
    %268 = arith.divf %266, %267 : vector<16x128xf32>
    %269 = vector.extract_strided_slice %256 {offsets = [0, 256], sizes = [16, 128], strides = [1, 1]} : vector<16x512xf32> to vector<16x128xf32>
    %270 = math.tanh %269 : vector<16x128xf32>
    %271 = vector.extract_strided_slice %256 {offsets = [0, 384], sizes = [16, 128], strides = [1, 1]} : vector<16x512xf32> to vector<16x128xf32>
    %272 = arith.negf %271 : vector<16x128xf32>
    %273 = math.exp %272 : vector<16x128xf32>
    %cst_67 = arith.constant 1.000000e+00 : f32
    %274 = vector.broadcast %cst_67 : f32 to vector<16x128xf32>
    %275 = arith.addf %274, %273 : vector<16x128xf32>
    %276 = arith.divf %274, %275 : vector<16x128xf32>
    %277 = arith.mulf %268, %244 : vector<16x128xf32>
    %278 = arith.mulf %262, %270 : vector<16x128xf32>
    %279 = arith.addf %277, %278 : vector<16x128xf32>
    %280 = math.tanh %279 : vector<16x128xf32>
    %281 = arith.mulf %276, %280 : vector<16x128xf32>
    %282 = arith.index_cast %c7_i32 : i32 to index
    %c0_68 = arith.constant 0 : index
    %c0_69 = arith.constant 0 : index
    %283 = vector.load %arg4[%282, %c0_68, %c0_69] : memref<16x16x128xf32, #tpu.memory_space<vmem>>, vector<1x16x128xf32>
    %284 = vector.shape_cast %283 : vector<1x16x128xf32> to vector<16x128xf32>
    %285 = vector.shape_cast %281 : vector<16x128xf32> to vector<1x16x128xf32>
    tpu.vector_store %arg4[%282, %c0_68, %c0_69], %285 {strides = array<i32>} : memref<16x16x128xf32, #tpu.memory_space<vmem>>, vector<1x16x128xf32>,
    %c8_i32 = arith.constant 8 : i32
    %286 = arith.index_cast %c8_i32 : i32 to index
    %c0_70 = arith.constant 0 : index
    %c0_71 = arith.constant 0 : index
    %287 = vector.load %arg2[%286, %c0_70, %c0_71] : memref<16x16x512xf32, #tpu.memory_space<vmem>>, vector<1x16x512xf32>
    %288 = vector.shape_cast %287 : vector<1x16x512xf32> to vector<16x512xf32>
    %289 = arith.truncf %281 : vector<16x128xf32> to vector<16x128xbf16>
    %cst_72 = arith.constant dense<0.000000e+00> : vector<16x512xf32>
    %290 = tpu.matmul %289, %3, %cst_72 {dimension_numbers = #tpu.dot_dimension_numbers<[1], [0], [0], [1], [0, 0, 1, 1], [], []>} : vector<16x128xbf16>, vector<128x512xbf16>, vector<16x512xf32> -> vector<16x512xf32>
    %291 = arith.addf %288, %290 : vector<16x512xf32>
    %292 = vector.extract_strided_slice %291 {offsets = [0, 0], sizes = [16, 128], strides = [1, 1]} : vector<16x512xf32> to vector<16x128xf32>
    %293 = arith.negf %292 : vector<16x128xf32>
    %294 = math.exp %293 : vector<16x128xf32>
    %cst_73 = arith.constant 1.000000e+00 : f32
    %295 = vector.broadcast %cst_73 : f32 to vector<16x128xf32>
    %296 = arith.addf %295, %294 : vector<16x128xf32>
    %297 = arith.divf %295, %296 : vector<16x128xf32>
    %298 = vector.extract_strided_slice %291 {offsets = [0, 128], sizes = [16, 128], strides = [1, 1]} : vector<16x512xf32> to vector<16x128xf32>
    %299 = arith.negf %298 : vector<16x128xf32>
    %300 = math.exp %299 : vector<16x128xf32>
    %cst_74 = arith.constant 1.000000e+00 : f32
    %301 = vector.broadcast %cst_74 : f32 to vector<16x128xf32>
    %302 = arith.addf %301, %300 : vector<16x128xf32>
    %303 = arith.divf %301, %302 : vector<16x128xf32>
    %304 = vector.extract_strided_slice %291 {offsets = [0, 256], sizes = [16, 128], strides = [1, 1]} : vector<16x512xf32> to vector<16x128xf32>
    %305 = math.tanh %304 : vector<16x128xf32>
    %306 = vector.extract_strided_slice %291 {offsets = [0, 384], sizes = [16, 128], strides = [1, 1]} : vector<16x512xf32> to vector<16x128xf32>
    %307 = arith.negf %306 : vector<16x128xf32>
    %308 = math.exp %307 : vector<16x128xf32>
    %cst_75 = arith.constant 1.000000e+00 : f32
    %309 = vector.broadcast %cst_75 : f32 to vector<16x128xf32>
    %310 = arith.addf %309, %308 : vector<16x128xf32>
    %311 = arith.divf %309, %310 : vector<16x128xf32>
    %312 = arith.mulf %303, %279 : vector<16x128xf32>
    %313 = arith.mulf %297, %305 : vector<16x128xf32>
    %314 = arith.addf %312, %313 : vector<16x128xf32>
    %315 = math.tanh %314 : vector<16x128xf32>
    %316 = arith.mulf %311, %315 : vector<16x128xf32>
    %317 = arith.index_cast %c8_i32 : i32 to index
    %c0_76 = arith.constant 0 : index
    %c0_77 = arith.constant 0 : index
    %318 = vector.load %arg4[%317, %c0_76, %c0_77] : memref<16x16x128xf32, #tpu.memory_space<vmem>>, vector<1x16x128xf32>
    %319 = vector.shape_cast %318 : vector<1x16x128xf32> to vector<16x128xf32>
    %320 = vector.shape_cast %316 : vector<16x128xf32> to vector<1x16x128xf32>
    tpu.vector_store %arg4[%317, %c0_76, %c0_77], %320 {strides = array<i32>} : memref<16x16x128xf32, #tpu.memory_space<vmem>>, vector<1x16x128xf32>,
    %c9_i32 = arith.constant 9 : i32
    %321 = arith.index_cast %c9_i32 : i32 to index
    %c0_78 = arith.constant 0 : index
    %c0_79 = arith.constant 0 : index
    %322 = vector.load %arg2[%321, %c0_78, %c0_79] : memref<16x16x512xf32, #tpu.memory_space<vmem>>, vector<1x16x512xf32>
    %323 = vector.shape_cast %322 : vector<1x16x512xf32> to vector<16x512xf32>
    %324 = arith.truncf %316 : vector<16x128xf32> to vector<16x128xbf16>
    %cst_80 = arith.constant dense<0.000000e+00> : vector<16x512xf32>
    %325 = tpu.matmul %324, %3, %cst_80 {dimension_numbers = #tpu.dot_dimension_numbers<[1], [0], [0], [1], [0, 0, 1, 1], [], []>} : vector<16x128xbf16>, vector<128x512xbf16>, vector<16x512xf32> -> vector<16x512xf32>
    %326 = arith.addf %323, %325 : vector<16x512xf32>
    %327 = vector.extract_strided_slice %326 {offsets = [0, 0], sizes = [16, 128], strides = [1, 1]} : vector<16x512xf32> to vector<16x128xf32>
    %328 = arith.negf %327 : vector<16x128xf32>
    %329 = math.exp %328 : vector<16x128xf32>
    %cst_81 = arith.constant 1.000000e+00 : f32
    %330 = vector.broadcast %cst_81 : f32 to vector<16x128xf32>
    %331 = arith.addf %330, %329 : vector<16x128xf32>
    %332 = arith.divf %330, %331 : vector<16x128xf32>
    %333 = vector.extract_strided_slice %326 {offsets = [0, 128], sizes = [16, 128], strides = [1, 1]} : vector<16x512xf32> to vector<16x128xf32>
    %334 = arith.negf %333 : vector<16x128xf32>
    %335 = math.exp %334 : vector<16x128xf32>
    %cst_82 = arith.constant 1.000000e+00 : f32
    %336 = vector.broadcast %cst_82 : f32 to vector<16x128xf32>
    %337 = arith.addf %336, %335 : vector<16x128xf32>
    %338 = arith.divf %336, %337 : vector<16x128xf32>
    %339 = vector.extract_strided_slice %326 {offsets = [0, 256], sizes = [16, 128], strides = [1, 1]} : vector<16x512xf32> to vector<16x128xf32>
    %340 = math.tanh %339 : vector<16x128xf32>
    %341 = vector.extract_strided_slice %326 {offsets = [0, 384], sizes = [16, 128], strides = [1, 1]} : vector<16x512xf32> to vector<16x128xf32>
    %342 = arith.negf %341 : vector<16x128xf32>
    %343 = math.exp %342 : vector<16x128xf32>
    %cst_83 = arith.constant 1.000000e+00 : f32
    %344 = vector.broadcast %cst_83 : f32 to vector<16x128xf32>
    %345 = arith.addf %344, %343 : vector<16x128xf32>
    %346 = arith.divf %344, %345 : vector<16x128xf32>
    %347 = arith.mulf %338, %314 : vector<16x128xf32>
    %348 = arith.mulf %332, %340 : vector<16x128xf32>
    %349 = arith.addf %347, %348 : vector<16x128xf32>
    %350 = math.tanh %349 : vector<16x128xf32>
    %351 = arith.mulf %346, %350 : vector<16x128xf32>
    %352 = arith.index_cast %c9_i32 : i32 to index
    %c0_84 = arith.constant 0 : index
    %c0_85 = arith.constant 0 : index
    %353 = vector.load %arg4[%352, %c0_84, %c0_85] : memref<16x16x128xf32, #tpu.memory_space<vmem>>, vector<1x16x128xf32>
    %354 = vector.shape_cast %353 : vector<1x16x128xf32> to vector<16x128xf32>
    %355 = vector.shape_cast %351 : vector<16x128xf32> to vector<1x16x128xf32>
    tpu.vector_store %arg4[%352, %c0_84, %c0_85], %355 {strides = array<i32>} : memref<16x16x128xf32, #tpu.memory_space<vmem>>, vector<1x16x128xf32>,
    %c10_i32 = arith.constant 10 : i32
    %356 = arith.index_cast %c10_i32 : i32 to index
    %c0_86 = arith.constant 0 : index
    %c0_87 = arith.constant 0 : index
    %357 = vector.load %arg2[%356, %c0_86, %c0_87] : memref<16x16x512xf32, #tpu.memory_space<vmem>>, vector<1x16x512xf32>
    %358 = vector.shape_cast %357 : vector<1x16x512xf32> to vector<16x512xf32>
    %359 = arith.truncf %351 : vector<16x128xf32> to vector<16x128xbf16>
    %cst_88 = arith.constant dense<0.000000e+00> : vector<16x512xf32>
    %360 = tpu.matmul %359, %3, %cst_88 {dimension_numbers = #tpu.dot_dimension_numbers<[1], [0], [0], [1], [0, 0, 1, 1], [], []>} : vector<16x128xbf16>, vector<128x512xbf16>, vector<16x512xf32> -> vector<16x512xf32>
    %361 = arith.addf %358, %360 : vector<16x512xf32>
    %362 = vector.extract_strided_slice %361 {offsets = [0, 0], sizes = [16, 128], strides = [1, 1]} : vector<16x512xf32> to vector<16x128xf32>
    %363 = arith.negf %362 : vector<16x128xf32>
    %364 = math.exp %363 : vector<16x128xf32>
    %cst_89 = arith.constant 1.000000e+00 : f32
    %365 = vector.broadcast %cst_89 : f32 to vector<16x128xf32>
    %366 = arith.addf %365, %364 : vector<16x128xf32>
    %367 = arith.divf %365, %366 : vector<16x128xf32>
    %368 = vector.extract_strided_slice %361 {offsets = [0, 128], sizes = [16, 128], strides = [1, 1]} : vector<16x512xf32> to vector<16x128xf32>
    %369 = arith.negf %368 : vector<16x128xf32>
    %370 = math.exp %369 : vector<16x128xf32>
    %cst_90 = arith.constant 1.000000e+00 : f32
    %371 = vector.broadcast %cst_90 : f32 to vector<16x128xf32>
    %372 = arith.addf %371, %370 : vector<16x128xf32>
    %373 = arith.divf %371, %372 : vector<16x128xf32>
    %374 = vector.extract_strided_slice %361 {offsets = [0, 256], sizes = [16, 128], strides = [1, 1]} : vector<16x512xf32> to vector<16x128xf32>
    %375 = math.tanh %374 : vector<16x128xf32>
    %376 = vector.extract_strided_slice %361 {offsets = [0, 384], sizes = [16, 128], strides = [1, 1]} : vector<16x512xf32> to vector<16x128xf32>
    %377 = arith.negf %376 : vector<16x128xf32>
    %378 = math.exp %377 : vector<16x128xf32>
    %cst_91 = arith.constant 1.000000e+00 : f32
    %379 = vector.broadcast %cst_91 : f32 to vector<16x128xf32>
    %380 = arith.addf %379, %378 : vector<16x128xf32>
    %381 = arith.divf %379, %380 : vector<16x128xf32>
    %382 = arith.mulf %373, %349 : vector<16x128xf32>
    %383 = arith.mulf %367, %375 : vector<16x128xf32>
    %384 = arith.addf %382, %383 : vector<16x128xf32>
    %385 = math.tanh %384 : vector<16x128xf32>
    %386 = arith.mulf %381, %385 : vector<16x128xf32>
    %387 = arith.index_cast %c10_i32 : i32 to index
    %c0_92 = arith.constant 0 : index
    %c0_93 = arith.constant 0 : index
    %388 = vector.load %arg4[%387, %c0_92, %c0_93] : memref<16x16x128xf32, #tpu.memory_space<vmem>>, vector<1x16x128xf32>
    %389 = vector.shape_cast %388 : vector<1x16x128xf32> to vector<16x128xf32>
    %390 = vector.shape_cast %386 : vector<16x128xf32> to vector<1x16x128xf32>
    tpu.vector_store %arg4[%387, %c0_92, %c0_93], %390 {strides = array<i32>} : memref<16x16x128xf32, #tpu.memory_space<vmem>>, vector<1x16x128xf32>,
    %c11_i32 = arith.constant 11 : i32
    %391 = arith.index_cast %c11_i32 : i32 to index
    %c0_94 = arith.constant 0 : index
    %c0_95 = arith.constant 0 : index
    %392 = vector.load %arg2[%391, %c0_94, %c0_95] : memref<16x16x512xf32, #tpu.memory_space<vmem>>, vector<1x16x512xf32>
    %393 = vector.shape_cast %392 : vector<1x16x512xf32> to vector<16x512xf32>
    %394 = arith.truncf %386 : vector<16x128xf32> to vector<16x128xbf16>
    %cst_96 = arith.constant dense<0.000000e+00> : vector<16x512xf32>
    %395 = tpu.matmul %394, %3, %cst_96 {dimension_numbers = #tpu.dot_dimension_numbers<[1], [0], [0], [1], [0, 0, 1, 1], [], []>} : vector<16x128xbf16>, vector<128x512xbf16>, vector<16x512xf32> -> vector<16x512xf32>
    %396 = arith.addf %393, %395 : vector<16x512xf32>
    %397 = vector.extract_strided_slice %396 {offsets = [0, 0], sizes = [16, 128], strides = [1, 1]} : vector<16x512xf32> to vector<16x128xf32>
    %398 = arith.negf %397 : vector<16x128xf32>
    %399 = math.exp %398 : vector<16x128xf32>
    %cst_97 = arith.constant 1.000000e+00 : f32
    %400 = vector.broadcast %cst_97 : f32 to vector<16x128xf32>
    %401 = arith.addf %400, %399 : vector<16x128xf32>
    %402 = arith.divf %400, %401 : vector<16x128xf32>
    %403 = vector.extract_strided_slice %396 {offsets = [0, 128], sizes = [16, 128], strides = [1, 1]} : vector<16x512xf32> to vector<16x128xf32>
    %404 = arith.negf %403 : vector<16x128xf32>
    %405 = math.exp %404 : vector<16x128xf32>
    %cst_98 = arith.constant 1.000000e+00 : f32
    %406 = vector.broadcast %cst_98 : f32 to vector<16x128xf32>
    %407 = arith.addf %406, %405 : vector<16x128xf32>
    %408 = arith.divf %406, %407 : vector<16x128xf32>
    %409 = vector.extract_strided_slice %396 {offsets = [0, 256], sizes = [16, 128], strides = [1, 1]} : vector<16x512xf32> to vector<16x128xf32>
    %410 = math.tanh %409 : vector<16x128xf32>
    %411 = vector.extract_strided_slice %396 {offsets = [0, 384], sizes = [16, 128], strides = [1, 1]} : vector<16x512xf32> to vector<16x128xf32>
    %412 = arith.negf %411 : vector<16x128xf32>
    %413 = math.exp %412 : vector<16x128xf32>
    %cst_99 = arith.constant 1.000000e+00 : f32
    %414 = vector.broadcast %cst_99 : f32 to vector<16x128xf32>
    %415 = arith.addf %414, %413 : vector<16x128xf32>
    %416 = arith.divf %414, %415 : vector<16x128xf32>
    %417 = arith.mulf %408, %384 : vector<16x128xf32>
    %418 = arith.mulf %402, %410 : vector<16x128xf32>
    %419 = arith.addf %417, %418 : vector<16x128xf32>
    %420 = math.tanh %419 : vector<16x128xf32>
    %421 = arith.mulf %416, %420 : vector<16x128xf32>
    %422 = arith.index_cast %c11_i32 : i32 to index
    %c0_100 = arith.constant 0 : index
    %c0_101 = arith.constant 0 : index
    %423 = vector.load %arg4[%422, %c0_100, %c0_101] : memref<16x16x128xf32, #tpu.memory_space<vmem>>, vector<1x16x128xf32>
    %424 = vector.shape_cast %423 : vector<1x16x128xf32> to vector<16x128xf32>
    %425 = vector.shape_cast %421 : vector<16x128xf32> to vector<1x16x128xf32>
    tpu.vector_store %arg4[%422, %c0_100, %c0_101], %425 {strides = array<i32>} : memref<16x16x128xf32, #tpu.memory_space<vmem>>, vector<1x16x128xf32>,
    %c12_i32 = arith.constant 12 : i32
    %426 = arith.index_cast %c12_i32 : i32 to index
    %c0_102 = arith.constant 0 : index
    %c0_103 = arith.constant 0 : index
    %427 = vector.load %arg2[%426, %c0_102, %c0_103] : memref<16x16x512xf32, #tpu.memory_space<vmem>>, vector<1x16x512xf32>
    %428 = vector.shape_cast %427 : vector<1x16x512xf32> to vector<16x512xf32>
    %429 = arith.truncf %421 : vector<16x128xf32> to vector<16x128xbf16>
    %cst_104 = arith.constant dense<0.000000e+00> : vector<16x512xf32>
    %430 = tpu.matmul %429, %3, %cst_104 {dimension_numbers = #tpu.dot_dimension_numbers<[1], [0], [0], [1], [0, 0, 1, 1], [], []>} : vector<16x128xbf16>, vector<128x512xbf16>, vector<16x512xf32> -> vector<16x512xf32>
    %431 = arith.addf %428, %430 : vector<16x512xf32>
    %432 = vector.extract_strided_slice %431 {offsets = [0, 0], sizes = [16, 128], strides = [1, 1]} : vector<16x512xf32> to vector<16x128xf32>
    %433 = arith.negf %432 : vector<16x128xf32>
    %434 = math.exp %433 : vector<16x128xf32>
    %cst_105 = arith.constant 1.000000e+00 : f32
    %435 = vector.broadcast %cst_105 : f32 to vector<16x128xf32>
    %436 = arith.addf %435, %434 : vector<16x128xf32>
    %437 = arith.divf %435, %436 : vector<16x128xf32>
    %438 = vector.extract_strided_slice %431 {offsets = [0, 128], sizes = [16, 128], strides = [1, 1]} : vector<16x512xf32> to vector<16x128xf32>
    %439 = arith.negf %438 : vector<16x128xf32>
    %440 = math.exp %439 : vector<16x128xf32>
    %cst_106 = arith.constant 1.000000e+00 : f32
    %441 = vector.broadcast %cst_106 : f32 to vector<16x128xf32>
    %442 = arith.addf %441, %440 : vector<16x128xf32>
    %443 = arith.divf %441, %442 : vector<16x128xf32>
    %444 = vector.extract_strided_slice %431 {offsets = [0, 256], sizes = [16, 128], strides = [1, 1]} : vector<16x512xf32> to vector<16x128xf32>
    %445 = math.tanh %444 : vector<16x128xf32>
    %446 = vector.extract_strided_slice %431 {offsets = [0, 384], sizes = [16, 128], strides = [1, 1]} : vector<16x512xf32> to vector<16x128xf32>
    %447 = arith.negf %446 : vector<16x128xf32>
    %448 = math.exp %447 : vector<16x128xf32>
    %cst_107 = arith.constant 1.000000e+00 : f32
    %449 = vector.broadcast %cst_107 : f32 to vector<16x128xf32>
    %450 = arith.addf %449, %448 : vector<16x128xf32>
    %451 = arith.divf %449, %450 : vector<16x128xf32>
    %452 = arith.mulf %443, %419 : vector<16x128xf32>
    %453 = arith.mulf %437, %445 : vector<16x128xf32>
    %454 = arith.addf %452, %453 : vector<16x128xf32>
    %455 = math.tanh %454 : vector<16x128xf32>
    %456 = arith.mulf %451, %455 : vector<16x128xf32>
    %457 = arith.index_cast %c12_i32 : i32 to index
    %c0_108 = arith.constant 0 : index
    %c0_109 = arith.constant 0 : index
    %458 = vector.load %arg4[%457, %c0_108, %c0_109] : memref<16x16x128xf32, #tpu.memory_space<vmem>>, vector<1x16x128xf32>
    %459 = vector.shape_cast %458 : vector<1x16x128xf32> to vector<16x128xf32>
    %460 = vector.shape_cast %456 : vector<16x128xf32> to vector<1x16x128xf32>
    tpu.vector_store %arg4[%457, %c0_108, %c0_109], %460 {strides = array<i32>} : memref<16x16x128xf32, #tpu.memory_space<vmem>>, vector<1x16x128xf32>,
    %c13_i32 = arith.constant 13 : i32
    %461 = arith.index_cast %c13_i32 : i32 to index
    %c0_110 = arith.constant 0 : index
    %c0_111 = arith.constant 0 : index
    %462 = vector.load %arg2[%461, %c0_110, %c0_111] : memref<16x16x512xf32, #tpu.memory_space<vmem>>, vector<1x16x512xf32>
    %463 = vector.shape_cast %462 : vector<1x16x512xf32> to vector<16x512xf32>
    %464 = arith.truncf %456 : vector<16x128xf32> to vector<16x128xbf16>
    %cst_112 = arith.constant dense<0.000000e+00> : vector<16x512xf32>
    %465 = tpu.matmul %464, %3, %cst_112 {dimension_numbers = #tpu.dot_dimension_numbers<[1], [0], [0], [1], [0, 0, 1, 1], [], []>} : vector<16x128xbf16>, vector<128x512xbf16>, vector<16x512xf32> -> vector<16x512xf32>
    %466 = arith.addf %463, %465 : vector<16x512xf32>
    %467 = vector.extract_strided_slice %466 {offsets = [0, 0], sizes = [16, 128], strides = [1, 1]} : vector<16x512xf32> to vector<16x128xf32>
    %468 = arith.negf %467 : vector<16x128xf32>
    %469 = math.exp %468 : vector<16x128xf32>
    %cst_113 = arith.constant 1.000000e+00 : f32
    %470 = vector.broadcast %cst_113 : f32 to vector<16x128xf32>
    %471 = arith.addf %470, %469 : vector<16x128xf32>
    %472 = arith.divf %470, %471 : vector<16x128xf32>
    %473 = vector.extract_strided_slice %466 {offsets = [0, 128], sizes = [16, 128], strides = [1, 1]} : vector<16x512xf32> to vector<16x128xf32>
    %474 = arith.negf %473 : vector<16x128xf32>
    %475 = math.exp %474 : vector<16x128xf32>
    %cst_114 = arith.constant 1.000000e+00 : f32
    %476 = vector.broadcast %cst_114 : f32 to vector<16x128xf32>
    %477 = arith.addf %476, %475 : vector<16x128xf32>
    %478 = arith.divf %476, %477 : vector<16x128xf32>
    %479 = vector.extract_strided_slice %466 {offsets = [0, 256], sizes = [16, 128], strides = [1, 1]} : vector<16x512xf32> to vector<16x128xf32>
    %480 = math.tanh %479 : vector<16x128xf32>
    %481 = vector.extract_strided_slice %466 {offsets = [0, 384], sizes = [16, 128], strides = [1, 1]} : vector<16x512xf32> to vector<16x128xf32>
    %482 = arith.negf %481 : vector<16x128xf32>
    %483 = math.exp %482 : vector<16x128xf32>
    %cst_115 = arith.constant 1.000000e+00 : f32
    %484 = vector.broadcast %cst_115 : f32 to vector<16x128xf32>
    %485 = arith.addf %484, %483 : vector<16x128xf32>
    %486 = arith.divf %484, %485 : vector<16x128xf32>
    %487 = arith.mulf %478, %454 : vector<16x128xf32>
    %488 = arith.mulf %472, %480 : vector<16x128xf32>
    %489 = arith.addf %487, %488 : vector<16x128xf32>
    %490 = math.tanh %489 : vector<16x128xf32>
    %491 = arith.mulf %486, %490 : vector<16x128xf32>
    %492 = arith.index_cast %c13_i32 : i32 to index
    %c0_116 = arith.constant 0 : index
    %c0_117 = arith.constant 0 : index
    %493 = vector.load %arg4[%492, %c0_116, %c0_117] : memref<16x16x128xf32, #tpu.memory_space<vmem>>, vector<1x16x128xf32>
    %494 = vector.shape_cast %493 : vector<1x16x128xf32> to vector<16x128xf32>
    %495 = vector.shape_cast %491 : vector<16x128xf32> to vector<1x16x128xf32>
    tpu.vector_store %arg4[%492, %c0_116, %c0_117], %495 {strides = array<i32>} : memref<16x16x128xf32, #tpu.memory_space<vmem>>, vector<1x16x128xf32>,
    %c14_i32 = arith.constant 14 : i32
    %496 = arith.index_cast %c14_i32 : i32 to index
    %c0_118 = arith.constant 0 : index
    %c0_119 = arith.constant 0 : index
    %497 = vector.load %arg2[%496, %c0_118, %c0_119] : memref<16x16x512xf32, #tpu.memory_space<vmem>>, vector<1x16x512xf32>
    %498 = vector.shape_cast %497 : vector<1x16x512xf32> to vector<16x512xf32>
    %499 = arith.truncf %491 : vector<16x128xf32> to vector<16x128xbf16>
    %cst_120 = arith.constant dense<0.000000e+00> : vector<16x512xf32>
    %500 = tpu.matmul %499, %3, %cst_120 {dimension_numbers = #tpu.dot_dimension_numbers<[1], [0], [0], [1], [0, 0, 1, 1], [], []>} : vector<16x128xbf16>, vector<128x512xbf16>, vector<16x512xf32> -> vector<16x512xf32>
    %501 = arith.addf %498, %500 : vector<16x512xf32>
    %502 = vector.extract_strided_slice %501 {offsets = [0, 0], sizes = [16, 128], strides = [1, 1]} : vector<16x512xf32> to vector<16x128xf32>
    %503 = arith.negf %502 : vector<16x128xf32>
    %504 = math.exp %503 : vector<16x128xf32>
    %cst_121 = arith.constant 1.000000e+00 : f32
    %505 = vector.broadcast %cst_121 : f32 to vector<16x128xf32>
    %506 = arith.addf %505, %504 : vector<16x128xf32>
    %507 = arith.divf %505, %506 : vector<16x128xf32>
    %508 = vector.extract_strided_slice %501 {offsets = [0, 128], sizes = [16, 128], strides = [1, 1]} : vector<16x512xf32> to vector<16x128xf32>
    %509 = arith.negf %508 : vector<16x128xf32>
    %510 = math.exp %509 : vector<16x128xf32>
    %cst_122 = arith.constant 1.000000e+00 : f32
    %511 = vector.broadcast %cst_122 : f32 to vector<16x128xf32>
    %512 = arith.addf %511, %510 : vector<16x128xf32>
    %513 = arith.divf %511, %512 : vector<16x128xf32>
    %514 = vector.extract_strided_slice %501 {offsets = [0, 256], sizes = [16, 128], strides = [1, 1]} : vector<16x512xf32> to vector<16x128xf32>
    %515 = math.tanh %514 : vector<16x128xf32>
    %516 = vector.extract_strided_slice %501 {offsets = [0, 384], sizes = [16, 128], strides = [1, 1]} : vector<16x512xf32> to vector<16x128xf32>
    %517 = arith.negf %516 : vector<16x128xf32>
    %518 = math.exp %517 : vector<16x128xf32>
    %cst_123 = arith.constant 1.000000e+00 : f32
    %519 = vector.broadcast %cst_123 : f32 to vector<16x128xf32>
    %520 = arith.addf %519, %518 : vector<16x128xf32>
    %521 = arith.divf %519, %520 : vector<16x128xf32>
    %522 = arith.mulf %513, %489 : vector<16x128xf32>
    %523 = arith.mulf %507, %515 : vector<16x128xf32>
    %524 = arith.addf %522, %523 : vector<16x128xf32>
    %525 = math.tanh %524 : vector<16x128xf32>
    %526 = arith.mulf %521, %525 : vector<16x128xf32>
    %527 = arith.index_cast %c14_i32 : i32 to index
    %c0_124 = arith.constant 0 : index
    %c0_125 = arith.constant 0 : index
    %528 = vector.load %arg4[%527, %c0_124, %c0_125] : memref<16x16x128xf32, #tpu.memory_space<vmem>>, vector<1x16x128xf32>
    %529 = vector.shape_cast %528 : vector<1x16x128xf32> to vector<16x128xf32>
    %530 = vector.shape_cast %526 : vector<16x128xf32> to vector<1x16x128xf32>
    tpu.vector_store %arg4[%527, %c0_124, %c0_125], %530 {strides = array<i32>} : memref<16x16x128xf32, #tpu.memory_space<vmem>>, vector<1x16x128xf32>,
    %c15_i32 = arith.constant 15 : i32
    %531 = arith.index_cast %c15_i32 : i32 to index
    %c0_126 = arith.constant 0 : index
    %c0_127 = arith.constant 0 : index
    %532 = vector.load %arg2[%531, %c0_126, %c0_127] : memref<16x16x512xf32, #tpu.memory_space<vmem>>, vector<1x16x512xf32>
    %533 = vector.shape_cast %532 : vector<1x16x512xf32> to vector<16x512xf32>
    %534 = arith.truncf %526 : vector<16x128xf32> to vector<16x128xbf16>
    %cst_128 = arith.constant dense<0.000000e+00> : vector<16x512xf32>
    %535 = tpu.matmul %534, %3, %cst_128 {dimension_numbers = #tpu.dot_dimension_numbers<[1], [0], [0], [1], [0, 0, 1, 1], [], []>} : vector<16x128xbf16>, vector<128x512xbf16>, vector<16x512xf32> -> vector<16x512xf32>
    %536 = arith.addf %533, %535 : vector<16x512xf32>
    %537 = vector.extract_strided_slice %536 {offsets = [0, 0], sizes = [16, 128], strides = [1, 1]} : vector<16x512xf32> to vector<16x128xf32>
    %538 = arith.negf %537 : vector<16x128xf32>
    %539 = math.exp %538 : vector<16x128xf32>
    %cst_129 = arith.constant 1.000000e+00 : f32
    %540 = vector.broadcast %cst_129 : f32 to vector<16x128xf32>
    %541 = arith.addf %540, %539 : vector<16x128xf32>
    %542 = arith.divf %540, %541 : vector<16x128xf32>
    %543 = vector.extract_strided_slice %536 {offsets = [0, 128], sizes = [16, 128], strides = [1, 1]} : vector<16x512xf32> to vector<16x128xf32>
    %544 = arith.negf %543 : vector<16x128xf32>
    %545 = math.exp %544 : vector<16x128xf32>
    %cst_130 = arith.constant 1.000000e+00 : f32
    %546 = vector.broadcast %cst_130 : f32 to vector<16x128xf32>
    %547 = arith.addf %546, %545 : vector<16x128xf32>
    %548 = arith.divf %546, %547 : vector<16x128xf32>
    %549 = vector.extract_strided_slice %536 {offsets = [0, 256], sizes = [16, 128], strides = [1, 1]} : vector<16x512xf32> to vector<16x128xf32>
    %550 = math.tanh %549 : vector<16x128xf32>
    %551 = vector.extract_strided_slice %536 {offsets = [0, 384], sizes = [16, 128], strides = [1, 1]} : vector<16x512xf32> to vector<16x128xf32>
    %552 = arith.negf %551 : vector<16x128xf32>
    %553 = math.exp %552 : vector<16x128xf32>
    %cst_131 = arith.constant 1.000000e+00 : f32
    %554 = vector.broadcast %cst_131 : f32 to vector<16x128xf32>
    %555 = arith.addf %554, %553 : vector<16x128xf32>
    %556 = arith.divf %554, %555 : vector<16x128xf32>
    %557 = arith.mulf %548, %524 : vector<16x128xf32>
    %558 = arith.mulf %542, %550 : vector<16x128xf32>
    %559 = arith.addf %557, %558 : vector<16x128xf32>
    %560 = math.tanh %559 : vector<16x128xf32>
    %561 = arith.mulf %556, %560 : vector<16x128xf32>
    %562 = arith.index_cast %c15_i32 : i32 to index
    %c0_132 = arith.constant 0 : index
    %c0_133 = arith.constant 0 : index
    %563 = vector.load %arg4[%562, %c0_132, %c0_133] : memref<16x16x128xf32, #tpu.memory_space<vmem>>, vector<1x16x128xf32>
    %564 = vector.shape_cast %563 : vector<1x16x128xf32> to vector<16x128xf32>
    %565 = vector.shape_cast %561 : vector<16x128xf32> to vector<1x16x128xf32>
    tpu.vector_store %arg4[%562, %c0_132, %c0_133], %565 {strides = array<i32>} : memref<16x16x128xf32, #tpu.memory_space<vmem>>, vector<1x16x128xf32>,
    %c16_i32 = arith.constant 16 : i32
    %c0_134 = arith.constant 0 : index
    %c0_135 = arith.constant 0 : index
    %566 = vector.load %arg7[%c0_134, %c0_135] : memref<16x128xf32, #tpu.memory_space<vmem>>, vector<16x128xf32>
    tpu.vector_store %arg7[%c0_134, %c0_135], %561 {strides = array<i32>} : memref<16x128xf32, #tpu.memory_space<vmem>>, vector<16x128xf32>,
    %c0_136 = arith.constant 0 : index
    %c0_137 = arith.constant 0 : index
    %567 = vector.load %arg8[%c0_136, %c0_137] : memref<16x128xf32, #tpu.memory_space<vmem>>, vector<16x128xf32>
    tpu.vector_store %arg8[%c0_136, %c0_137], %559 {strides = array<i32>} : memref<16x128xf32, #tpu.memory_space<vmem>>, vector<16x128xf32>,
    %c3_i32_138 = arith.constant 3 : i32
    %568 = arith.cmpi eq, %arg1, %c3_i32_138 : i32
    %569 = arith.extui %568 : i1 to i32
    %c0_i32_139 = arith.constant 0 : i32
    %570 = arith.cmpi ne, %569, %c0_i32_139 : i32
    scf.if %570 {
      %c0_140 = arith.constant 0 : index
      %c0_141 = arith.constant 0 : index
      %571 = vector.load %arg5[%c0_140, %c0_141] : memref<16x128xf32, #tpu.memory_space<vmem>>, vector<16x128xf32>
      tpu.vector_store %arg5[%c0_140, %c0_141], %561 {strides = array<i32>} : memref<16x128xf32, #tpu.memory_space<vmem>>, vector<16x128xf32>,
      %c0_142 = arith.constant 0 : index
      %c0_143 = arith.constant 0 : index
      %572 = vector.load %arg6[%c0_142, %c0_143] : memref<16x128xf32, #tpu.memory_space<vmem>>, vector<16x128xf32>
      tpu.vector_store %arg6[%c0_142, %c0_143], %559 {strides = array<i32>} : memref<16x128xf32, #tpu.memory_space<vmem>>, vector<16x128xf32>,
    } else {
    }
    return
  }
  func.func @transform_0(%arg0: i32, %arg1: i32) -> (i32, i32, i32) {
    %c0_i32 = arith.constant 0 : i32
    %c0_i32_0 = arith.constant 0 : i32
    return %arg1, %arg0, %c0_i32 : i32, i32, i32
  }
  func.func @transform_1(%arg0: i32, %arg1: i32) -> (i32, i32) {
    %c0_i32 = arith.constant 0 : i32
    %c0_i32_0 = arith.constant 0 : i32
    %c0_i32_1 = arith.constant 0 : i32
    return %c0_i32, %c0_i32_0 : i32, i32
  }
  func.func @transform_2(%arg0: i32, %arg1: i32) -> (i32, i32, i32) {
    %c0_i32 = arith.constant 0 : i32
    %c0_i32_0 = arith.constant 0 : i32
    return %arg1, %arg0, %c0_i32 : i32, i32, i32
  }
  func.func @transform_3(%arg0: i32, %arg1: i32) -> (i32, i32) {
    %c0_i32 = arith.constant 0 : i32
    %c0_i32_0 = arith.constant 0 : i32
    return %arg0, %c0_i32 : i32, i32
  }
  func.func @transform_4(%arg0: i32, %arg1: i32) -> (i32, i32) {
    %c0_i32 = arith.constant 0 : i32
    %c0_i32_0 = arith.constant 0 : i32
    return %arg0, %c0_i32 : i32, i32
  }
}

</mosaic_0001>

<bundles_post_ra>
// kernel: encoder_forward.3
= control target key start
LH: loop header
LB: loop body
LE: loop exit
PB: predicated region body
PF: predicated region fallthrough
CT: control target
= control target key end

     0   :  { %s6328_s0 = inlined_call_operand.vmem [shape: f32[64,32,512], index: 0, kind: input, shape index: {}]   ;;  %s6329_s1 = inlined_call_operand.vmem [shape: bf16[128,512], index: 1, kind: input, shape index: {}]   ;;  %s6330_s2 = inlined_call_operand.hbm [shape: f32[64,32,128], index: 2, kind: output, shape index: {0}]   ;;  %s6331_s3 = inlined_call_operand.vmem [shape: f32[32,128], index: 3, kind: output, shape index: {1}]   ;;  %s6332_s4 = inlined_call_operand.vmem [shape: f32[32,128], index: 4, kind: output, shape index: {2}]  }
   0x1   :  { %6333 = sst [smem:[#allocation10_spill]] %s6328_s0 }
   0x2   :  { %6334 = sst [smem:[#allocation11_spill]] %s6331_s3 }
   0x3   :  { %10 = vsyncpa [#allocation6], 0 }
   0x4   :  { %12 = vsyncpa [#allocation6 + $0x1], 0  ;;  %s4552_s15 = smov 0   ;;  %s4554_s16 = smov 0  }
   0x5   :  { %s4556_s17 = smov 0   ;;  %s4558_s18 = smov 0  }
   0x6   :  { %s4560_s19 = smov 0   ;;  %s4562_s20 = smov 0  }
   0x7   :  { %s4564_s21 = smov 0   ;;  %s4566_s22 = smov 0  }
   0x8 LB: > { %s3409_s23 = sadd.s32 4294967295, %s4516_s22   ;;  %s3410_s24 = sadd.s32 4294967294, %s4516_s22   ;;  %s4516_s22 = sphi %s4566_s22, %s18_s22   ;;  %s4512_s21 = sphi %s4564_s21, %s6346_s21   ;;  %s4508_s20 = sphi %s4562_s20, %s6345_s20   ;;  %s4504_s19 = sphi %s4560_s19, %s6344_s19   ;;  %s4500_s18 = sphi %s4558_s18, %s6343_s18   ;;  %s4496_s17 = sphi %s4556_s17, %s6342_s17   ;;  %s4492_s16 = sphi %s4554_s16, %s6341_s16   ;;  %s4488_s15 = sphi %s4552_s15, %s6340_s15  }
   0x9   : > { %s27_s25 = sadd.s32 1, %s4508_s20  ;;  %s30_s26 = sadd.s32 1, %s4512_s21 }
   0xa   : > { %p28_p0 = scmp.ge.s32.totalorder %s27_s25, 4  ;;  %p46_p1 = scmp.ne.s32.totalorder %s4496_s17, %s4492_s16 }
   0xb   : > { %p47_p2 = scmp.eq.s32.totalorder %s4516_s22, 0  ;;  %p99_p5 = scmp.eq.s32.totalorder %s3409_s23, 7 }
   0xc   : > { %s6348_s25 = smov (%p28_p0, %s27_s25), 0  ;;  %s6350_s26 = smov (!%p28_p0, %s30_s26), %s4512_s21 }
   0xd   : > { %s34_s27 = ssub.s32 %s4508_s20, %s6348_s25  ;;  %p4604_p3 = por %p47_p2, %p46_p1 }
   0xe   : > { %p32_p4 = scmp.ge.s32.totalorder %s6350_s26, 2  ;;  %p104_p6 = scmp.ne.s32.totalorder %s4492_s16, %s4488_s15 }
   0xf   : > { %p105_p7 = scmp.eq.s32.totalorder %s3410_s24, 7  ;;  %p4612_p8 = por %p99_p5, %p46_p1 }
  0x10   : > { %s6352_s26 = smov (%p32_p4, %s6350_s26), 0  ;;  %s39_s7 = sadd.s32 1, %s4496_s17 }
  0x11   : > { %p4616_p9 = por %p105_p7, %p104_p6  ;;  %s35_s5 = ssub.s32 %s4512_s21, %s6352_s26 }
  0x12   : > { %s36_s6 = sor.u32 %s35_s5, %s34_s27  ;;  %p3412_p11 = scmp.ge.s32.totalorder %s4516_s22, 8 }
  0x13   : > { %p37_p10 = scmp.eq.s32.totalorder %s36_s6, 0 }
  0x14   : > { %176 = sbr.rel (%p3412_p11) target bundleno = 99 (0x63), region = 20 }
  0x15   : > { %s4624_s8 = scalar_select %p37_p10, %s4496_s17, %s39_s7  }
  0x19   : > { %179 = sbr.rel (!%p4604_p3) target bundleno = 99 (0x63), region = 24  ;;  %s181_s9 = sand.u32 (%p4604_p3), 1, %s4496_s17  }
  0x1a   : > { %s3713_s10 = sshll.u32 (%p4604_p3), %s4512_s21, 3  ;;  %s3413_s11 = sshll.u32 (%p4604_p3), %s181_s9, 10 }
  0x1b   : > { %s3714_s12 = sshll.u32 (%p4604_p3), %s4508_s20, 8  ;;  %s6338_s0 = sld [smem:[#allocation10_spill]] (%p4604_p3) }
  0x1c   : > { %s188_s13 = sadd.s32 (%p4604_p3), %s3714_s12, %s3713_s10  ;;  %s4640_s28 = scalar_lea.vmem (%p4604_p3), [#allocation4], %s3413_s11 }
  0x1d   : > { %s3418_s14 = sshll.u32 (%p4604_p3), %s188_s13, 3 }
  0x21   : > { %s4635_s27 = scalar_lea.vmem %s6338_s0, %s3418_s14 }
  0x22   : > { %v203_v0 = vld [vmem:[%s4635_s27] sm:$0xff]  ;;  %v205_v1 = vld [vmem:[%s4635_s27 + $0x8] sm:$0xff]  ;;  %v207_v2 = vld [vmem:[%s4635_s27 + $0x10] sm:$0xff] }
  0x23   : > { %204 = vst [vmem:[%s4640_s28] sm:$0xff] %v203_v0  ;;  %206 = vst [vmem:[%s4640_s28 + $0x8] sm:$0xff] %v205_v1  ;;  %v209_v3 = vld [vmem:[%s4635_s27 + $0x18] sm:$0xff]  ;;  %v211_v4 = vld [vmem:[%s4635_s27 + $0x20] sm:$0xff] }
  0x24   : > { %208 = vst [vmem:[%s4640_s28 + $0x10] sm:$0xff] %v207_v2  ;;  %v213_v5 = vld [vmem:[%s4635_s27 + $0x28] sm:$0xff]  ;;  %210 = vst [vmem:[%s4640_s28 + $0x18] sm:$0xff] %v209_v3  ;;  %v215_v6 = vld [vmem:[%s4635_s27 + $0x30] sm:$0xff] }
  0x25   : > { %212 = vst [vmem:[%s4640_s28 + $0x20] sm:$0xff] %v211_v4  ;;  %214 = vst [vmem:[%s4640_s28 + $0x28] sm:$0xff] %v213_v5  ;;  %v217_v7 = vld [vmem:[%s4635_s27 + $0x38] sm:$0xff]  ;;  %v219_v8 = vld [vmem:[%s4635_s27 + $0x80] sm:$0xff] }
  0x26   : > { %216 = vst [vmem:[%s4640_s28 + $0x30] sm:$0xff] %v215_v6  ;;  %218 = vst [vmem:[%s4640_s28 + $0x38] sm:$0xff] %v217_v7  ;;  %v221_v9 = vld [vmem:[%s4635_s27 + $0x88] sm:$0xff]  ;;  %v223_v10 = vld [vmem:[%s4635_s27 + $0x90] sm:$0xff] }
  0x27   : > { %220 = vst [vmem:[%s4640_s28 + $0x40] sm:$0xff] %v219_v8  ;;  %v225_v11 = vld [vmem:[%s4635_s27 + $0x98] sm:$0xff]  ;;  %222 = vst [vmem:[%s4640_s28 + $0x48] sm:$0xff] %v221_v9  ;;  %v227_v12 = vld [vmem:[%s4635_s27 + $0xa0] sm:$0xff] }
  0x28   : > { %224 = vst [vmem:[%s4640_s28 + $0x50] sm:$0xff] %v223_v10  ;;  %226 = vst [vmem:[%s4640_s28 + $0x58] sm:$0xff] %v225_v11  ;;  %v229_v13 = vld [vmem:[%s4635_s27 + $0xa8] sm:$0xff]  ;;  %v231_v14 = vld [vmem:[%s4635_s27 + $0xb0] sm:$0xff] }
  0x29   : > { %228 = vst [vmem:[%s4640_s28 + $0x60] sm:$0xff] %v227_v12  ;;  %230 = vst [vmem:[%s4640_s28 + $0x68] sm:$0xff] %v229_v13  ;;  %v233_v15 = vld [vmem:[%s4635_s27 + $0xb8] sm:$0xff]  ;;  %v235_v16 = vld [vmem:[%s4635_s27 + $0x100] sm:$0xff] }
  0x2a   : > { %232 = vst [vmem:[%s4640_s28 + $0x70] sm:$0xff] %v231_v14  ;;  %v237_v17 = vld [vmem:[%s4635_s27 + $0x108] sm:$0xff]  ;;  %234 = vst [vmem:[%s4640_s28 + $0x78] sm:$0xff] %v233_v15  ;;  %v239_v18 = vld [vmem:[%s4635_s27 + $0x110] sm:$0xff] }
  0x2b   : > { %236 = vst [vmem:[%s4640_s28 + $0x80] sm:$0xff] %v235_v16  ;;  %238 = vst [vmem:[%s4640_s28 + $0x88] sm:$0xff] %v237_v17  ;;  %v241_v19 = vld [vmem:[%s4635_s27 + $0x118] sm:$0xff]  ;;  %v243_v20 = vld [vmem:[%s4635_s27 + $0x120] sm:$0xff] }
  0x2c   : > { %240 = vst [vmem:[%s4640_s28 + $0x90] sm:$0xff] %v239_v18  ;;  %242 = vst [vmem:[%s4640_s28 + $0x98] sm:$0xff] %v241_v19  ;;  %v245_v21 = vld [vmem:[%s4635_s27 + $0x128] sm:$0xff]  ;;  %v247_v22 = vld [vmem:[%s4635_s27 + $0x130] sm:$0xff] }
  0x2d   : > { %244 = vst [vmem:[%s4640_s28 + $0xa0] sm:$0xff] %v243_v20  ;;  %v249_v23 = vld [vmem:[%s4635_s27 + $0x138] sm:$0xff]  ;;  %246 = vst [vmem:[%s4640_s28 + $0xa8] sm:$0xff] %v245_v21  ;;  %v251_v24 = vld [vmem:[%s4635_s27 + $0x180] sm:$0xff] }
  0x2e   : > { %248 = vst [vmem:[%s4640_s28 + $0xb0] sm:$0xff] %v247_v22  ;;  %250 = vst [vmem:[%s4640_s28 + $0xb8] sm:$0xff] %v249_v23  ;;  %v253_v25 = vld [vmem:[%s4635_s27 + $0x188] sm:$0xff]  ;;  %v255_v26 = vld [vmem:[%s4635_s27 + $0x190] sm:$0xff] }
  0x2f   : > { %252 = vst [vmem:[%s4640_s28 + $0xc0] sm:$0xff] %v251_v24  ;;  %254 = vst [vmem:[%s4640_s28 + $0xc8] sm:$0xff] %v253_v25  ;;  %v257_v27 = vld [vmem:[%s4635_s27 + $0x198] sm:$0xff]  ;;  %v259_v28 = vld [vmem:[%s4635_s27 + $0x1a0] sm:$0xff] }
  0x30   : > { %256 = vst [vmem:[%s4640_s28 + $0xd0] sm:$0xff] %v255_v26  ;;  %v261_v29 = vld [vmem:[%s4635_s27 + $0x1a8] sm:$0xff]  ;;  %258 = vst [vmem:[%s4640_s28 + $0xd8] sm:$0xff] %v257_v27  ;;  %v263_v30 = vld [vmem:[%s4635_s27 + $0x1b0] sm:$0xff] }
  0x31   : > { %260 = vst [vmem:[%s4640_s28 + $0xe0] sm:$0xff] %v259_v28  ;;  %262 = vst [vmem:[%s4640_s28 + $0xe8] sm:$0xff] %v261_v29  ;;  %v265_v31 = vld [vmem:[%s4635_s27 + $0x1b8] sm:$0xff]  ;;  %v267_v32 = vld [vmem:[%s4635_s27 + $0x200] sm:$0xff] }
  0x32   : > { %264 = vst [vmem:[%s4640_s28 + $0xf0] sm:$0xff] %v263_v30  ;;  %266 = vst [vmem:[%s4640_s28 + $0xf8] sm:$0xff] %v265_v31  ;;  %v269_v33 = vld [vmem:[%s4635_s27 + $0x208] sm:$0xff]  ;;  %v271_v34 = vld [vmem:[%s4635_s27 + $0x210] sm:$0xff] }
  0x33   : > { %268 = vst [vmem:[%s4640_s28 + $0x100] sm:$0xff] %v267_v32  ;;  %v273_v35 = vld [vmem:[%s4635_s27 + $0x218] sm:$0xff]  ;;  %270 = vst [vmem:[%s4640_s28 + $0x108] sm:$0xff] %v269_v33  ;;  %v275_v36 = vld [vmem:[%s4635_s27 + $0x220] sm:$0xff] }
  0x34   : > { %272 = vst [vmem:[%s4640_s28 + $0x110] sm:$0xff] %v271_v34  ;;  %274 = vst [vmem:[%s4640_s28 + $0x118] sm:$0xff] %v273_v35  ;;  %v277_v37 = vld [vmem:[%s4635_s27 + $0x228] sm:$0xff]  ;;  %v279_v38 = vld [vmem:[%s4635_s27 + $0x230] sm:$0xff] }
  0x35   : > { %276 = vst [vmem:[%s4640_s28 + $0x120] sm:$0xff] %v275_v36  ;;  %278 = vst [vmem:[%s4640_s28 + $0x128] sm:$0xff] %v277_v37  ;;  %v281_v39 = vld [vmem:[%s4635_s27 + $0x238] sm:$0xff]  ;;  %v283_v40 = vld [vmem:[%s4635_s27 + $0x280] sm:$0xff] }
  0x36   : > { %280 = vst [vmem:[%s4640_s28 + $0x130] sm:$0xff] %v279_v38  ;;  %v285_v41 = vld [vmem:[%s4635_s27 + $0x288] sm:$0xff]  ;;  %282 = vst [vmem:[%s4640_s28 + $0x138] sm:$0xff] %v281_v39  ;;  %v287_v42 = vld [vmem:[%s4635_s27 + $0x290] sm:$0xff] }
  0x37   : > { %284 = vst [vmem:[%s4640_s28 + $0x140] sm:$0xff] %v283_v40  ;;  %286 = vst [vmem:[%s4640_s28 + $0x148] sm:$0xff] %v285_v41  ;;  %v289_v43 = vld [vmem:[%s4635_s27 + $0x298] sm:$0xff]  ;;  %v291_v44 = vld [vmem:[%s4635_s27 + $0x2a0] sm:$0xff] }
  0x38   : > { %288 = vst [vmem:[%s4640_s28 + $0x150] sm:$0xff] %v287_v42  ;;  %290 = vst [vmem:[%s4640_s28 + $0x158] sm:$0xff] %v289_v43  ;;  %v293_v45 = vld [vmem:[%s4635_s27 + $0x2a8] sm:$0xff]  ;;  %v295_v46 = vld [vmem:[%s4635_s27 + $0x2b0] sm:$0xff] }
  0x39   : > { %292 = vst [vmem:[%s4640_s28 + $0x160] sm:$0xff] %v291_v44  ;;  %v297_v47 = vld [vmem:[%s4635_s27 + $0x2b8] sm:$0xff]  ;;  %294 = vst [vmem:[%s4640_s28 + $0x168] sm:$0xff] %v293_v45  ;;  %v299_v48 = vld [vmem:[%s4635_s27 + $0x300] sm:$0xff] }
  0x3a   : > { %296 = vst [vmem:[%s4640_s28 + $0x170] sm:$0xff] %v295_v46  ;;  %298 = vst [vmem:[%s4640_s28 + $0x178] sm:$0xff] %v297_v47  ;;  %v301_v49 = vld [vmem:[%s4635_s27 + $0x308] sm:$0xff]  ;;  %v303_v50 = vld [vmem:[%s4635_s27 + $0x310] sm:$0xff] }
  0x3b   : > { %300 = vst [vmem:[%s4640_s28 + $0x180] sm:$0xff] %v299_v48  ;;  %302 = vst [vmem:[%s4640_s28 + $0x188] sm:$0xff] %v301_v49  ;;  %v305_v51 = vld [vmem:[%s4635_s27 + $0x318] sm:$0xff]  ;;  %v307_v52 = vld [vmem:[%s4635_s27 + $0x320] sm:$0xff] }
  0x3c   : > { %304 = vst [vmem:[%s4640_s28 + $0x190] sm:$0xff] %v303_v50  ;;  %v309_v53 = vld [vmem:[%s4635_s27 + $0x328] sm:$0xff]  ;;  %306 = vst [vmem:[%s4640_s28 + $0x198] sm:$0xff] %v305_v51  ;;  %v311_v54 = vld [vmem:[%s4635_s27 + $0x330] sm:$0xff] }
  0x3d   : > { %308 = vst [vmem:[%s4640_s28 + $0x1a0] sm:$0xff] %v307_v52  ;;  %310 = vst [vmem:[%s4640_s28 + $0x1a8] sm:$0xff] %v309_v53  ;;  %v313_v55 = vld [vmem:[%s4635_s27 + $0x338] sm:$0xff]  ;;  %v315_v56 = vld [vmem:[%s4635_s27 + $0x380] sm:$0xff] }
  0x3e   : > { %312 = vst [vmem:[%s4640_s28 + $0x1b0] sm:$0xff] %v311_v54  ;;  %314 = vst [vmem:[%s4640_s28 + $0x1b8] sm:$0xff] %v313_v55  ;;  %v317_v57 = vld [vmem:[%s4635_s27 + $0x388] sm:$0xff]  ;;  %v319_v58 = vld [vmem:[%s4635_s27 + $0x390] sm:$0xff] }
  0x3f   : > { %316 = vst [vmem:[%s4640_s28 + $0x1c0] sm:$0xff] %v315_v56  ;;  %v321_v59 = vld [vmem:[%s4635_s27 + $0x398] sm:$0xff]  ;;  %318 = vst [vmem:[%s4640_s28 + $0x1c8] sm:$0xff] %v317_v57  ;;  %v323_v60 = vld [vmem:[%s4635_s27 + $0x3a0] sm:$0xff] }
  0x40   : > { %320 = vst [vmem:[%s4640_s28 + $0x1d0] sm:$0xff] %v319_v58  ;;  %322 = vst [vmem:[%s4640_s28 + $0x1d8] sm:$0xff] %v321_v59  ;;  %v325_v61 = vld [vmem:[%s4635_s27 + $0x3a8] sm:$0xff]  ;;  %v327_v62 = vld [vmem:[%s4635_s27 + $0x3b0] sm:$0xff] }
  0x41   : > { %324 = vst [vmem:[%s4640_s28 + $0x1e0] sm:$0xff] %v323_v60  ;;  %326 = vst [vmem:[%s4640_s28 + $0x1e8] sm:$0xff] %v325_v61  ;;  %v329_v63 = vld [vmem:[%s4635_s27 + $0x3b8] sm:$0xff]  ;;  %v331_v0 = vld [vmem:[%s4635_s27 + $0x400] sm:$0xff] }
  0x42   : > { %328 = vst [vmem:[%s4640_s28 + $0x1f0] sm:$0xff] %v327_v62  ;;  %v333_v1 = vld [vmem:[%s4635_s27 + $0x408] sm:$0xff]  ;;  %330 = vst [vmem:[%s4640_s28 + $0x1f8] sm:$0xff] %v329_v63  ;;  %v335_v2 = vld [vmem:[%s4635_s27 + $0x410] sm:$0xff] }
  0x43   : > { %332 = vst [vmem:[%s4640_s28 + $0x200] sm:$0xff] %v331_v0  ;;  %334 = vst [vmem:[%s4640_s28 + $0x208] sm:$0xff] %v333_v1  ;;  %v337_v3 = vld [vmem:[%s4635_s27 + $0x418] sm:$0xff]  ;;  %v339_v4 = vld [vmem:[%s4635_s27 + $0x420] sm:$0xff] }
  0x44   : > { %336 = vst [vmem:[%s4640_s28 + $0x210] sm:$0xff] %v335_v2  ;;  %338 = vst [vmem:[%s4640_s28 + $0x218] sm:$0xff] %v337_v3  ;;  %v341_v5 = vld [vmem:[%s4635_s27 + $0x428] sm:$0xff]  ;;  %v343_v6 = vld [vmem:[%s4635_s27 + $0x430] sm:$0xff] }
  0x45   : > { %340 = vst [vmem:[%s4640_s28 + $0x220] sm:$0xff] %v339_v4  ;;  %v345_v7 = vld [vmem:[%s4635_s27 + $0x438] sm:$0xff]  ;;  %342 = vst [vmem:[%s4640_s28 + $0x228] sm:$0xff] %v341_v5  ;;  %v347_v8 = vld [vmem:[%s4635_s27 + $0x480] sm:$0xff] }
  0x46   : > { %344 = vst [vmem:[%s4640_s28 + $0x230] sm:$0xff] %v343_v6  ;;  %346 = vst [vmem:[%s4640_s28 + $0x238] sm:$0xff] %v345_v7  ;;  %v349_v9 = vld [vmem:[%s4635_s27 + $0x488] sm:$0xff]  ;;  %v351_v10 = vld [vmem:[%s4635_s27 + $0x490] sm:$0xff] }
  0x47   : > { %348 = vst [vmem:[%s4640_s28 + $0x240] sm:$0xff] %v347_v8  ;;  %350 = vst [vmem:[%s4640_s28 + $0x248] sm:$0xff] %v349_v9  ;;  %v353_v11 = vld [vmem:[%s4635_s27 + $0x498] sm:$0xff]  ;;  %v355_v12 = vld [vmem:[%s4635_s27 + $0x4a0] sm:$0xff] }
  0x48   : > { %352 = vst [vmem:[%s4640_s28 + $0x250] sm:$0xff] %v351_v10  ;;  %v357_v13 = vld [vmem:[%s4635_s27 + $0x4a8] sm:$0xff]  ;;  %354 = vst [vmem:[%s4640_s28 + $0x258] sm:$0xff] %v353_v11  ;;  %v359_v14 = vld [vmem:[%s4635_s27 + $0x4b0] sm:$0xff] }
  0x49   : > { %356 = vst [vmem:[%s4640_s28 + $0x260] sm:$0xff] %v355_v12  ;;  %358 = vst [vmem:[%s4640_s28 + $0x268] sm:$0xff] %v357_v13  ;;  %v361_v15 = vld [vmem:[%s4635_s27 + $0x4b8] sm:$0xff]  ;;  %v363_v16 = vld [vmem:[%s4635_s27 + $0x500] sm:$0xff] }
  0x4a   : > { %360 = vst [vmem:[%s4640_s28 + $0x270] sm:$0xff] %v359_v14  ;;  %362 = vst [vmem:[%s4640_s28 + $0x278] sm:$0xff] %v361_v15  ;;  %v365_v17 = vld [vmem:[%s4635_s27 + $0x508] sm:$0xff]  ;;  %v367_v18 = vld [vmem:[%s4635_s27 + $0x510] sm:$0xff] }
  0x4b   : > { %364 = vst [vmem:[%s4640_s28 + $0x280] sm:$0xff] %v363_v16  ;;  %v369_v19 = vld [vmem:[%s4635_s27 + $0x518] sm:$0xff]  ;;  %366 = vst [vmem:[%s4640_s28 + $0x288] sm:$0xff] %v365_v17  ;;  %v371_v20 = vld [vmem:[%s4635_s27 + $0x520] sm:$0xff] }
  0x4c   : > { %368 = vst [vmem:[%s4640_s28 + $0x290] sm:$0xff] %v367_v18  ;;  %370 = vst [vmem:[%s4640_s28 + $0x298] sm:$0xff] %v369_v19  ;;  %v373_v21 = vld [vmem:[%s4635_s27 + $0x528] sm:$0xff]  ;;  %v375_v22 = vld [vmem:[%s4635_s27 + $0x530] sm:$0xff] }
  0x4d   : > { %372 = vst [vmem:[%s4640_s28 + $0x2a0] sm:$0xff] %v371_v20  ;;  %374 = vst [vmem:[%s4640_s28 + $0x2a8] sm:$0xff] %v373_v21  ;;  %v377_v23 = vld [vmem:[%s4635_s27 + $0x538] sm:$0xff]  ;;  %v379_v24 = vld [vmem:[%s4635_s27 + $0x580] sm:$0xff] }
  0x4e   : > { %376 = vst [vmem:[%s4640_s28 + $0x2b0] sm:$0xff] %v375_v22  ;;  %v381_v25 = vld [vmem:[%s4635_s27 + $0x588] sm:$0xff]  ;;  %378 = vst [vmem:[%s4640_s28 + $0x2b8] sm:$0xff] %v377_v23  ;;  %v383_v26 = vld [vmem:[%s4635_s27 + $0x590] sm:$0xff] }
  0x4f   : > { %380 = vst [vmem:[%s4640_s28 + $0x2c0] sm:$0xff] %v379_v24  ;;  %382 = vst [vmem:[%s4640_s28 + $0x2c8] sm:$0xff] %v381_v25  ;;  %v385_v27 = vld [vmem:[%s4635_s27 + $0x598] sm:$0xff]  ;;  %v387_v28 = vld [vmem:[%s4635_s27 + $0x5a0] sm:$0xff] }
  0x50   : > { %384 = vst [vmem:[%s4640_s28 + $0x2d0] sm:$0xff] %v383_v26  ;;  %386 = vst [vmem:[%s4640_s28 + $0x2d8] sm:$0xff] %v385_v27  ;;  %v389_v29 = vld [vmem:[%s4635_s27 + $0x5a8] sm:$0xff]  ;;  %v391_v30 = vld [vmem:[%s4635_s27 + $0x5b0] sm:$0xff] }
  0x51   : > { %388 = vst [vmem:[%s4640_s28 + $0x2e0] sm:$0xff] %v387_v28  ;;  %v393_v31 = vld [vmem:[%s4635_s27 + $0x5b8] sm:$0xff]  ;;  %390 = vst [vmem:[%s4640_s28 + $0x2e8] sm:$0xff] %v389_v29  ;;  %v395_v32 = vld [vmem:[%s4635_s27 + $0x600] sm:$0xff] }
  0x52   : > { %392 = vst [vmem:[%s4640_s28 + $0x2f0] sm:$0xff] %v391_v30  ;;  %394 = vst [vmem:[%s4640_s28 + $0x2f8] sm:$0xff] %v393_v31  ;;  %v397_v33 = vld [vmem:[%s4635_s27 + $0x608] sm:$0xff]  ;;  %v399_v34 = vld [vmem:[%s4635_s27 + $0x610] sm:$0xff] }
  0x53   : > { %396 = vst [vmem:[%s4640_s28 + $0x300] sm:$0xff] %v395_v32  ;;  %398 = vst [vmem:[%s4640_s28 + $0x308] sm:$0xff] %v397_v33  ;;  %v401_v35 = vld [vmem:[%s4635_s27 + $0x618] sm:$0xff]  ;;  %v403_v36 = vld [vmem:[%s4635_s27 + $0x620] sm:$0xff] }
  0x54   : > { %400 = vst [vmem:[%s4640_s28 + $0x310] sm:$0xff] %v399_v34  ;;  %v405_v37 = vld [vmem:[%s4635_s27 + $0x628] sm:$0xff]  ;;  %402 = vst [vmem:[%s4640_s28 + $0x318] sm:$0xff] %v401_v35  ;;  %v407_v38 = vld [vmem:[%s4635_s27 + $0x630] sm:$0xff] }
  0x55   : > { %404 = vst [vmem:[%s4640_s28 + $0x320] sm:$0xff] %v403_v36  ;;  %406 = vst [vmem:[%s4640_s28 + $0x328] sm:$0xff] %v405_v37  ;;  %v409_v39 = vld [vmem:[%s4635_s27 + $0x638] sm:$0xff]  ;;  %v411_v40 = vld [vmem:[%s4635_s27 + $0x680] sm:$0xff] }
  0x56   : > { %408 = vst [vmem:[%s4640_s28 + $0x330] sm:$0xff] %v407_v38  ;;  %410 = vst [vmem:[%s4640_s28 + $0x338] sm:$0xff] %v409_v39  ;;  %v413_v41 = vld [vmem:[%s4635_s27 + $0x688] sm:$0xff]  ;;  %v415_v42 = vld [vmem:[%s4635_s27 + $0x690] sm:$0xff] }
  0x57   : > { %412 = vst [vmem:[%s4640_s28 + $0x340] sm:$0xff] %v411_v40  ;;  %v417_v43 = vld [vmem:[%s4635_s27 + $0x698] sm:$0xff]  ;;  %414 = vst [vmem:[%s4640_s28 + $0x348] sm:$0xff] %v413_v41  ;;  %v419_v44 = vld [vmem:[%s4635_s27 + $0x6a0] sm:$0xff] }
  0x58   : > { %416 = vst [vmem:[%s4640_s28 + $0x350] sm:$0xff] %v415_v42  ;;  %418 = vst [vmem:[%s4640_s28 + $0x358] sm:$0xff] %v417_v43  ;;  %v421_v45 = vld [vmem:[%s4635_s27 + $0x6a8] sm:$0xff]  ;;  %v423_v46 = vld [vmem:[%s4635_s27 + $0x6b0] sm:$0xff] }
  0x59   : > { %420 = vst [vmem:[%s4640_s28 + $0x360] sm:$0xff] %v419_v44  ;;  %422 = vst [vmem:[%s4640_s28 + $0x368] sm:$0xff] %v421_v45  ;;  %v425_v47 = vld [vmem:[%s4635_s27 + $0x6b8] sm:$0xff]  ;;  %v427_v48 = vld [vmem:[%s4635_s27 + $0x700] sm:$0xff] }
  0x5a   : > { %424 = vst [vmem:[%s4640_s28 + $0x370] sm:$0xff] %v423_v46  ;;  %v429_v49 = vld [vmem:[%s4635_s27 + $0x708] sm:$0xff]  ;;  %426 = vst [vmem:[%s4640_s28 + $0x378] sm:$0xff] %v425_v47  ;;  %v431_v50 = vld [vmem:[%s4635_s27 + $0x710] sm:$0xff] }
  0x5b   : > { %428 = vst [vmem:[%s4640_s28 + $0x380] sm:$0xff] %v427_v48  ;;  %430 = vst [vmem:[%s4640_s28 + $0x388] sm:$0xff] %v429_v49  ;;  %v433_v51 = vld [vmem:[%s4635_s27 + $0x718] sm:$0xff]  ;;  %v435_v52 = vld [vmem:[%s4635_s27 + $0x720] sm:$0xff] }
  0x5c   : > { %432 = vst [vmem:[%s4640_s28 + $0x390] sm:$0xff] %v431_v50  ;;  %434 = vst [vmem:[%s4640_s28 + $0x398] sm:$0xff] %v433_v51  ;;  %v437_v53 = vld [vmem:[%s4635_s27 + $0x728] sm:$0xff]  ;;  %v439_v54 = vld [vmem:[%s4635_s27 + $0x730] sm:$0xff] }
  0x5d   : > { %436 = vst [vmem:[%s4640_s28 + $0x3a0] sm:$0xff] %v435_v52  ;;  %v441_v55 = vld [vmem:[%s4635_s27 + $0x738] sm:$0xff]  ;;  %438 = vst [vmem:[%s4640_s28 + $0x3a8] sm:$0xff] %v437_v53  ;;  %v443_v56 = vld [vmem:[%s4635_s27 + $0x780] sm:$0xff] }
  0x5e   : > { %440 = vst [vmem:[%s4640_s28 + $0x3b0] sm:$0xff] %v439_v54  ;;  %442 = vst [vmem:[%s4640_s28 + $0x3b8] sm:$0xff] %v441_v55  ;;  %v445_v57 = vld [vmem:[%s4635_s27 + $0x788] sm:$0xff]  ;;  %v447_v58 = vld [vmem:[%s4635_s27 + $0x790] sm:$0xff] }
  0x5f   : > { %444 = vst [vmem:[%s4640_s28 + $0x3c0] sm:$0xff] %v443_v56  ;;  %446 = vst [vmem:[%s4640_s28 + $0x3c8] sm:$0xff] %v445_v57  ;;  %v449_v59 = vld [vmem:[%s4635_s27 + $0x798] sm:$0xff]  ;;  %v451_v60 = vld [vmem:[%s4635_s27 + $0x7a0] sm:$0xff] }
  0x60   : > { %448 = vst [vmem:[%s4640_s28 + $0x3d0] sm:$0xff] %v447_v58  ;;  %v453_v61 = vld [vmem:[%s4635_s27 + $0x7a8] sm:$0xff]  ;;  %450 = vst [vmem:[%s4640_s28 + $0x3d8] sm:$0xff] %v449_v59  ;;  %v455_v62 = vld [vmem:[%s4635_s27 + $0x7b0] sm:$0xff] }
  0x61   : > { %452 = vst [vmem:[%s4640_s28 + $0x3e0] sm:$0xff] %v451_v60  ;;  %454 = vst [vmem:[%s4640_s28 + $0x3e8] sm:$0xff] %v453_v61  ;;  %v457_v63 = vld [vmem:[%s4635_s27 + $0x7b8] sm:$0xff] }
  0x62   : > { %456 = vst [vmem:[%s4640_s28 + $0x3f0] sm:$0xff] %v455_v62  ;;  %458 = vst [vmem:[%s4640_s28 + $0x3f8] sm:$0xff] %v457_v63 }
  0x63 PF: > { %p3419_p12 = scmp.ge.s32.totalorder %s4516_s22, 1  ;;  %p463_p13 = scmp.lt.s32.totalorder %s4516_s22, 9 }
  0x65   : > { %p464_p0 = pnand %p3419_p12, %p463_p13 }
  0x66   : > { %s4898_s5 = sand.u32 (!%p464_p0), 1, %s4492_s16   ;;  %s4901_s6 = sshll.u32 (!%p464_p0), %s4504_s19, 1 }
  0x67   : > { %467 = sbr.rel (%p464_p0) target bundleno = 4243 (0x1093), region = 47  ;;  %s3420_s7 = sshll.u32 (!%p464_p0), %s4898_s5, 10 }
  0x68   : > { %s3421_s9 = sshll.u32 (!%p464_p0), %s4898_s5, 8  ;;  %p510_p1 = scmp.lt.s32.totalorder (!%p464_p0), %s4901_s6, 3 }
  0x69   : > { %s6339_s3 = sld [smem:[#allocation11_spill]] (!%p464_p0)  ;;  %s4917_s28 = scalar_lea.vmem (!%p464_p0), [#allocation4], %s3420_s7 }
  0x6a   : > { %s4919_s19 = scalar_lea.vmem (!%p464_p0), [#allocation5], %s3421_s9  ;;  %p3426_p2 = scmp.ne.s32.totalorder (!%p464_p0), %s4500_s18, 0 }
  0x6c   : > { %s511_s10 = scalar_select %p510_p1, %s4901_s6, 3 }
  0x6d   : > { %525 = sbr.rel (%p3426_p2) target bundleno = 117 (0x75), region = 55 }
  0x6e   : > { %s3423_s11 = sshll.u32 %s511_s10, 3 }
  0x6f   : > { %s4910_s14 = scalar_lea.vmem %s6339_s3, %s3423_s11  ;;  %s4915_s27 = scalar_lea.vmem %s6332_s4, %s3423_s11 }
  0x72   : > { %v4518_v0 = vmov 0.0  }
  0x73   : > { %526 = vst [vmem:[#allocation2] sm:$0xff] %v4518_v0  ;;  %527 = vst [vmem:[#allocation2 + $0x8] sm:$0xff] %v4518_v0 }
  0x74   : > { %528 = vst [vmem:[#allocation3 + $0x8] sm:$0xff] %v4518_v0  ;;  %529 = vst [vmem:[#allocation3] sm:$0xff] %v4518_v0 }
  0x75 PF: > { %v4925_v1 = vld [vmem:[%s6329_s1 + $0xe4] ss:$16 sps:$4 sm:$0xff]   ;;  %v4930_v2 = vld [vmem:[%s6329_s1 + $0xe0] ss:$16 sps:$4 sm:$0xff]   ;;  %v4519_v3 = vmov 0   ;;  %v567_v39 = vld [vmem:[%s4917_s28 + $0x8] sm:$0xff] }
  0x76   : > { %767 = vmatprep.mubr.bf16.mxu0 %v4519_v3  ;;  %810 = vmatprep.mubr.bf16.mxu1 %v4519_v3  ;;  %v4938_v4 = vld [vmem:[%s6329_s1 + $0xc4] ss:$16 sps:$4 sm:$0xff]   ;;  %v4944_v5 = vld [vmem:[%s6329_s1 + $0xc0] ss:$16 sps:$4 sm:$0xff]   ;;  %v4955_v7 = vld [vmem:[%s6329_s1 + $0xec] ss:$16 sps:$4 sm:$0xff]  }
  0x77   : > { %735 = vmatprep.subr.bf16.mxu0 %v4925_v1  ;;  %v4950_v6 = vld [vmem:[%s6329_s1 + $0xa4] ss:$16 sps:$4 sm:$0xff]   ;;  %v4960_v8 = vld [vmem:[%s6329_s1 + $0xe8] ss:$16 sps:$4 sm:$0xff]   ;;  %v4966_v9 = vld [vmem:[%s6329_s1 + $0xa0] ss:$16 sps:$4 sm:$0xff]   ;;  %778 = vmatprep.subr.bf16.mxu1 %v4955_v7 }
  0x78   : > { %736 = vmatpush1.bf16.msra.mxu0 %v4930_v2  ;;  %v4973_v10 = vld [vmem:[%s6329_s1 + $0x84] ss:$16 sps:$4 sm:$0xff]   ;;  %779 = vmatpush1.bf16.msra.mxu1 %v4960_v8  ;;  %v4979_v11 = vld [vmem:[%s6329_s1 + $0xcc] ss:$16 sps:$4 sm:$0xff]   ;;  %v4984_v12 = vld [vmem:[%s6329_s1 + $0xc8] ss:$16 sps:$4 sm:$0xff]  }
  0x79   : > { %737 = vmatprep.subr.bf16.mxu0 %v4938_v4  ;;  %780 = vmatprep.subr.bf16.mxu1 %v4979_v11  ;;  %v4991_v13 = vld [vmem:[%s6329_s1 + $0x80] ss:$16 sps:$4 sm:$0xff]   ;;  %v4996_v14 = vld [vmem:[%s6329_s1 + $0x64] ss:$16 sps:$4 sm:$0xff]   ;;  %v5001_v15 = vld [vmem:[%s6329_s1 + $0xac] ss:$16 sps:$4 sm:$0xff]  }
  0x7a   : > { %v5008_v16 = vld [vmem:[%s6329_s1 + $0xa8] ss:$16 sps:$4 sm:$0xff]   ;;  %v5014_v17 = vld [vmem:[%s6329_s1 + $0x8c] ss:$16 sps:$4 sm:$0xff]   ;;  %v5020_v18 = vld [vmem:[%s6329_s1 + $0x60] ss:$16 sps:$4 sm:$0xff]  }
  0x7b   : > { %v5026_v19 = vld [vmem:[%s6329_s1 + $0x44] ss:$16 sps:$4 sm:$0xff]   ;;  %v5032_v20 = vld [vmem:[%s6329_s1 + $0x88] ss:$16 sps:$4 sm:$0xff]   ;;  %v5038_v21 = vld [vmem:[%s6329_s1 + $0x6c] ss:$16 sps:$4 sm:$0xff]  }
  0x7c   : > { %738 = vmatpush1.bf16.msra.mxu0 %v4944_v5  ;;  %781 = vmatpush1.bf16.msra.mxu1 %v4984_v12  ;;  %v5044_v22 = vld [vmem:[%s6329_s1 + $0x40] ss:$16 sps:$4 sm:$0xff]   ;;  %v5050_v23 = vld [vmem:[%s6329_s1 + $0x24] ss:$16 sps:$4 sm:$0xff]   ;;  %v5056_v24 = vld [vmem:[%s6329_s1 + $0x68] ss:$16 sps:$4 sm:$0xff]  }
  0x7d   : > { %739 = vmatprep.subr.bf16.mxu0 %v4950_v6  ;;  %782 = vmatprep.subr.bf16.mxu1 %v5001_v15  ;;  %v5062_v25 = vld [vmem:[%s6329_s1 + $0x4c] ss:$16 sps:$4 sm:$0xff]   ;;  %v5068_v26 = vld [vmem:[%s6329_s1 + $0x20] ss:$16 sps:$4 sm:$0xff]   ;;  %v5074_v27 = vld [vmem:[%s6329_s1 + $0x4] ss:$16 sps:$4 sm:$0xff]  }
  0x7e   : > { %v5080_v28 = vld [vmem:[%s6329_s1 + $0x48] ss:$16 sps:$4 sm:$0xff]   ;;  %v5086_v29 = vld [vmem:[%s6329_s1 + $0x2c] ss:$16 sps:$4 sm:$0xff]   ;;  %v5092_v30 = vld [vmem:[%s6329_s1] ss:$16 sps:$4 sm:$0xff]  }
  0x7f   : > { %v562_v31 = vld [vmem:[#allocation2] sm:$0xff]  ;;  %v563_v32 = vld [vmem:[#allocation2 + $0x8] sm:$0xff]  ;;  %v569_v55 = vld [vmem:[%s4917_s28 + $0x18] sm:$0xff]  ;;  %p3705_p3 = scmp.ne.s32.totalorder %s4500_s18, 3 }
  0x80   : > { %740 = vmatpush1.bf16.msra.mxu0 %v4966_v9  ;;  %783 = vmatpush1.bf16.msra.mxu1 %v5008_v16  ;;  %v5099_v33 = vld [vmem:[%s6329_s1 + $0x28] ss:$16 sps:$4 sm:$0xff]   ;;  %v5105_v34 = vld [vmem:[%s6329_s1 + $0xc] ss:$16 sps:$4 sm:$0xff]   ;;  %v574_v35 = vpack.c.bf16 %v563_v32, %v562_v31  ;;  %v566_v37 = vld [vmem:[%s4917_s28] sm:$0xff] }
  0x81   : > { %741 = vmatprep.subr.bf16.mxu0 %v4973_v10  ;;  %784 = vmatprep.subr.bf16.mxu1 %v5014_v17  ;;  %v5112_v36 = vld [vmem:[%s6329_s1 + $0x8] ss:$16 sps:$4 sm:$0xff]   ;;  %v570_v42 = vld [vmem:[%s4917_s28 + $0x20] sm:$0xff]  ;;  %v568_v57 = vld [vmem:[%s4917_s28 + $0x10] sm:$0xff] }
  0x82   : > { %v571_v46 = vld [vmem:[%s4917_s28 + $0x28] sm:$0xff]  ;;  %v573_v59 = vld [vmem:[%s4917_s28 + $0x38] sm:$0xff]  ;;  %v572_v32 = vld [vmem:[%s4917_s28 + $0x30] sm:$0xff] }
  0x84   : > { %742 = vmatpush1.bf16.msra.mxu0 %v4991_v13  ;;  %785 = vmatpush1.bf16.msra.mxu1 %v5032_v20 }
  0x85   : > { %743 = vmatprep.subr.bf16.mxu0 %v4996_v14  ;;  %786 = vmatprep.subr.bf16.mxu1 %v5038_v21 }
  0x88   : > { %744 = vmatpush1.bf16.msra.mxu0 %v5020_v18  ;;  %787 = vmatpush1.bf16.msra.mxu1 %v5056_v24 }
  0x89   : > { %745 = vmatprep.subr.bf16.mxu0 %v5026_v19  ;;  %788 = vmatprep.subr.bf16.mxu1 %v5062_v25 }
  0x8c   : > { %746 = vmatpush1.bf16.msra.mxu0 %v5044_v22  ;;  %789 = vmatpush1.bf16.msra.mxu1 %v5080_v28 }
  0x8d   : > { %747 = vmatprep.subr.bf16.mxu0 %v5050_v23  ;;  %790 = vmatprep.subr.bf16.mxu1 %v5086_v29 }
  0x90   : > { %748 = vmatpush1.bf16.msra.mxu0 %v5068_v26  ;;  %791 = vmatpush1.bf16.msra.mxu1 %v5099_v33 }
  0x91   : > { %749 = vmatprep.subr.bf16.mxu0 %v5074_v27  ;;  %792 = vmatprep.subr.bf16.mxu1 %v5105_v34 }
  0x94   : > { %750 = vmatpush1.bf16.msra.mxu0 %v5092_v30  ;;  %793 = vmatpush1.bf16.msra.mxu1 %v5112_v36 }
  0x95   : > { %889 = vmatprep.subr.bf16.mxu0 %v4925_v1  ;;  %932 = vmatprep.subr.bf16.mxu1 %v4955_v7 }
  0x97   : > { %768 = vmatmul.mubr.bf16.vlgmr.msra.gmra.mxu0 %v574_v35  ;;  %811 = vmatmul.mubr.bf16.vlgmr.msra.gmra.mxu1 %v574_v35 }
  0x98   : > { %890 = vmatpush1.bf16.msra.mxu0 %v4930_v2  ;;  %921 = vmatprep.mubr.bf16.mxu0 %v4519_v3 }
  0x99   : > { %891 = vmatprep.subr.bf16.mxu0 %v4938_v4  ;;  %933 = vmatpush1.bf16.msra.mxu1 %v4960_v8 }
  0x9a   : > { %934 = vmatprep.subr.bf16.mxu1 %v4979_v11  ;;  %964 = vmatprep.mubr.bf16.mxu1 %v4519_v3 }
  0x9c   : > { %892 = vmatpush1.bf16.msra.mxu0 %v4944_v5 }
  0x9d   : > { %893 = vmatprep.subr.bf16.mxu0 %v4950_v6  ;;  %935 = vmatpush1.bf16.msra.mxu1 %v4984_v12 }
  0x9e   : > { %936 = vmatprep.subr.bf16.mxu1 %v5001_v15 }
  0xa0   : > { %894 = vmatpush1.bf16.msra.mxu0 %v4966_v9 }
  0xa1   : > { %895 = vmatprep.subr.bf16.mxu0 %v4973_v10  ;;  %937 = vmatpush1.bf16.msra.mxu1 %v5008_v16 }
  0xa2   : > { %938 = vmatprep.subr.bf16.mxu1 %v5014_v17 }
  0xa4   : > { %896 = vmatpush1.bf16.msra.mxu0 %v4991_v13 }
  0xa5   : > { %897 = vmatprep.subr.bf16.mxu0 %v4996_v14  ;;  %939 = vmatpush1.bf16.msra.mxu1 %v5032_v20 }
  0xa6   : > { %940 = vmatprep.subr.bf16.mxu1 %v5038_v21 }
  0xa8   : > { %898 = vmatpush1.bf16.msra.mxu0 %v5020_v18 }
  0xa9   : > { %899 = vmatprep.subr.bf16.mxu0 %v5026_v19  ;;  %941 = vmatpush1.bf16.msra.mxu1 %v5056_v24 }
  0xaa   : > { %942 = vmatprep.subr.bf16.mxu1 %v5062_v25 }
  0xac   : > { %900 = vmatpush1.bf16.msra.mxu0 %v5044_v22 }
  0xad   : > { %901 = vmatprep.subr.bf16.mxu0 %v5050_v23  ;;  %943 = vmatpush1.bf16.msra.mxu1 %v5080_v28 }
  0xae   : > { %944 = vmatprep.subr.bf16.mxu1 %v5086_v29 }
  0xb0   : > { %902 = vmatpush1.bf16.msra.mxu0 %v5068_v26 }
  0xb1   : > { %903 = vmatprep.subr.bf16.mxu0 %v5074_v27  ;;  %945 = vmatpush1.bf16.msra.mxu1 %v5099_v33 }
  0xb2   : > { %946 = vmatprep.subr.bf16.mxu1 %v5105_v34 }
  0xb4   : > { %904 = vmatpush1.bf16.msra.mxu0 %v5092_v30 }
  0xb5   : > { %1044 = vmatprep.subr.bf16.mxu0 %v4925_v1  ;;  %947 = vmatpush1.bf16.msra.mxu1 %v5112_v36 }
  0xb6   : > { %1087 = vmatprep.subr.bf16.mxu1 %v4955_v7 }
 0x157   : > { %v769_v38 = vpop.f32.mrf.mxu0  ;;  %v812_v49 = vpop.f32.mrf.mxu1 }
 0x158   : > { %v821_v40 = vadd.f32 %v769_v38, %v566_v37  ;;  %v823_v61 = vadd.f32 %v812_v49, %v568_v57 }
 0x159   : > { %v771_v41 = vpop.f32.mrf.mxu0  ;;  %v814_v53 = vpop.f32.mrf.mxu1 }
 0x15a   : > { %v3459_v43 = vmul.f32 -1.442695, %v821_v40  ;;  %v822_v44 = vadd.f32 %v771_v41, %v567_v39  ;;  %v824_v58 = vadd.f32 %v814_v53, %v569_v55 }
 0x15b   : > { %v773_v45 = vpop.f32.mrf.mxu0  ;;  %v816_v56 = vpop.f32.mrf.mxu1 }
 0x15c   : > { %3850 = vpow2.f32 %v3459_v43  ;;  %v3461_v47 = vmul.f32 -1.442695, %v822_v44  ;;  %v825_v48 = vadd.f32 %v773_v45, %v570_v42  ;;  %v3463_v62 = vmul.f32 -1.442695, %v824_v58 }
 0x15d   : > { %v775_v50 = vpop.f32.mrf.mxu0  ;;  %v818_v60 = vpop.f32.mrf.mxu1  ;;  %v827_v40 = vadd.f32 %v816_v56, %v572_v32 }
 0x15e   : > { %3852 = vpow2.f32 %v3461_v47  ;;  %v3460_v51 = vmul.f32 -1.442695, %v825_v48  ;;  %v826_v52 = vadd.f32 %v775_v50, %v571_v46  ;;  %v828_v63 = vadd.f32 %v818_v60, %v573_v59  ;;  %v564_v47 = vld [vmem:[#allocation3 + $0x8] sm:$0xff] }
 0x160   : > { %3854 = vpow2.f32 %v3460_v51  ;;  %v3462_v54 = vmul.f32 -1.442695, %v826_v52  ;;  %v3464_v37 = vmul.f32 -1.442695, %v828_v63 }
 0x162   : > { %3856 = vpow2.f32 %v3462_v54  ;;  %v565_v54 = vld [vmem:[#allocation3] sm:$0xff] }
 0x163   : > { %3858 = vtanh.f32 %v823_v61 }
 0x164   : > { %3860 = vpow2.f32 %v3463_v62 }
 0x169   : > { %v3851_v0 = vpop.eup %3850 }
 0x16a   : > { %v835_v31 = vadd.f32 1.0, %v3851_v0 }
 0x16b   : > { %v3853_v35 = vpop.eup %3852 }
 0x16c   : > { %3862 = vrcp.f32 %v835_v31  ;;  %v847_v38 = vadd.f32 1.0, %v3853_v35 }
 0x16d   : > { %v3855_v39 = vpop.eup %3854 }
 0x16e   : > { %3864 = vrcp.f32 %v847_v38  ;;  %v836_v41 = vadd.f32 1.0, %v3855_v39  ;;  %v3465_v38 = vld [vmem:[%s4917_s28 + $0x40] sm:$0xff] }
 0x16f   : > { %v3857_v42 = vpop.eup %3856  ;;  %3866 = vpow2.f32 %v3464_v37 }
 0x170   : > { %3868 = vrcp.f32 %v836_v41  ;;  %v848_v43 = vadd.f32 1.0, %v3857_v42  ;;  %v3859_v44 = vpop.eup %3858 }
 0x171   : > { %3870 = vtanh.f32 %v827_v40  ;;  %v3861_v45 = vpop.eup %3860  ;;  %v3466_v40 = vld [vmem:[%s4917_s28 + $0x48] sm:$0xff] }
 0x172   : > { %3872 = vrcp.f32 %v848_v43  ;;  %v861_v49 = vadd.f32 1.0, %v3861_v45 }
 0x174   : > { %3874 = vrcp.f32 %v861_v49 }
 0x179   : > { %v3863_v46 = vpop.eup %3862 }
 0x17a   : > { %v869_v52 = vmul.f32 %v3863_v46, %v3859_v44  ;;  %v3469_v44 = vld [vmem:[%s4917_s28 + $0x60] sm:$0xff] }
 0x17b   : > { %v3865_v48 = vpop.eup %3864 }
 0x17c   : > { %v3867_v50 = vpop.eup %3866  ;;  %v867_v51 = vmul.f32 %v3865_v48, %v564_v47  ;;  %v3470_v48 = vld [vmem:[%s4917_s28 + $0x68] sm:$0xff] }
 0x17d   : > { %v3869_v53 = vpop.eup %3868  ;;  %v862_v58 = vadd.f32 1.0, %v3867_v50 }
 0x17e   : > { %v3871_v55 = vpop.eup %3870  ;;  %v5160_v56 = vadd.f32 %v869_v52, %v867_v51 }
 0x17f   : > { %v3873_v57 = vpop.eup %3872  ;;  %v870_v60 = vmul.f32 %v3871_v55, %v3869_v53  ;;  %v3468_v55 = vld [vmem:[%s4917_s28 + $0x58] sm:$0xff] }
 0x180   : > { %3876 = vtanh.f32 %v5160_v56  ;;  %v868_v59 = vmul.f32 %v3873_v57, %v565_v54 }
 0x181   : > { %3878 = vrcp.f32 %v862_v58  ;;  %v3875_v62 = vpop.eup %3874 }
 0x182   : > { %v5163_v61 = vadd.f32 %v870_v60, %v868_v59  ;;  %v3472_v60 = vld [vmem:[%s4917_s28 + $0x78] sm:$0xff] }
 0x184   : > { %3880 = vtanh.f32 %v5163_v61 }
 0x18d   : > { %v3877_v63 = vpop.eup %3876 }
 0x18e   : > { %v875_v0 = vmul.f32 %v3877_v63, %v3875_v62  ;;  %v3879_v31 = vpop.eup %3878  ;;  %v3467_v63 = vld [vmem:[%s4917_s28 + $0x50] sm:$0xff] }
 0x190   : > { %877 = vst [vmem:[%s4919_s19] sm:$0xff] %v875_v0 }
 0x191   : > { %v3881_v32 = vpop.eup %3880 }
 0x192   : > { %v876_v35 = vmul.f32 %v3881_v32, %v3879_v31 }
 0x194   : > { %878 = vst [vmem:[%s4919_s19 + $0x8] sm:$0xff] %v876_v35  ;;  %v888_v37 = vpack.c.bf16 %v876_v35, %v875_v0 }
 0x196   : > { %922 = vmatmul.mubr.bf16.vlgmr.msra.gmra.mxu0 %v888_v37  ;;  %965 = vmatmul.mubr.bf16.vlgmr.msra.gmra.mxu1 %v888_v37 }
 0x197   : > { %1045 = vmatpush1.bf16.msra.mxu0 %v4930_v2  ;;  %1088 = vmatpush1.bf16.msra.mxu1 %v4960_v8 }
 0x198   : > { %1046 = vmatprep.subr.bf16.mxu0 %v4938_v4  ;;  %1089 = vmatprep.subr.bf16.mxu1 %v4979_v11 }
 0x199   : > { %1076 = vmatprep.mubr.bf16.mxu0 %v4519_v3  ;;  %1119 = vmatprep.mubr.bf16.mxu1 %v4519_v3 }
 0x19b   : > { %1047 = vmatpush1.bf16.msra.mxu0 %v4944_v5  ;;  %1090 = vmatpush1.bf16.msra.mxu1 %v4984_v12 }
 0x19c   : > { %1048 = vmatprep.subr.bf16.mxu0 %v4950_v6  ;;  %1091 = vmatprep.subr.bf16.mxu1 %v5001_v15 }
 0x19f   : > { %1049 = vmatpush1.bf16.msra.mxu0 %v4966_v9  ;;  %1092 = vmatpush1.bf16.msra.mxu1 %v5008_v16 }
 0x1a0   : > { %1050 = vmatprep.subr.bf16.mxu0 %v4973_v10  ;;  %1093 = vmatprep.subr.bf16.mxu1 %v5014_v17 }
 0x1a3   : > { %1051 = vmatpush1.bf16.msra.mxu0 %v4991_v13  ;;  %1094 = vmatpush1.bf16.msra.mxu1 %v5032_v20 }
 0x1a4   : > { %1052 = vmatprep.subr.bf16.mxu0 %v4996_v14  ;;  %1095 = vmatprep.subr.bf16.mxu1 %v5038_v21 }
 0x1a7   : > { %1053 = vmatpush1.bf16.msra.mxu0 %v5020_v18  ;;  %1096 = vmatpush1.bf16.msra.mxu1 %v5056_v24 }
 0x1a8   : > { %1054 = vmatprep.subr.bf16.mxu0 %v5026_v19  ;;  %1097 = vmatprep.subr.bf16.mxu1 %v5062_v25 }
 0x1ab   : > { %1055 = vmatpush1.bf16.msra.mxu0 %v5044_v22  ;;  %1098 = vmatpush1.bf16.msra.mxu1 %v5080_v28 }
 0x1ac   : > { %1056 = vmatprep.subr.bf16.mxu0 %v5050_v23  ;;  %1099 = vmatprep.subr.bf16.mxu1 %v5086_v29 }
 0x1af   : > { %1057 = vmatpush1.bf16.msra.mxu0 %v5068_v26  ;;  %1100 = vmatpush1.bf16.msra.mxu1 %v5099_v33 }
 0x1b0   : > { %1058 = vmatprep.subr.bf16.mxu0 %v5074_v27  ;;  %1101 = vmatprep.subr.bf16.mxu1 %v5105_v34 }
 0x1b3   : > { %1059 = vmatpush1.bf16.msra.mxu0 %v5092_v30  ;;  %1102 = vmatpush1.bf16.msra.mxu1 %v5112_v36 }
 0x1b4   : > { %1199 = vmatprep.subr.bf16.mxu0 %v4925_v1  ;;  %1242 = vmatprep.subr.bf16.mxu1 %v4955_v7 }
 0x256   : > { %v923_v39 = vpop.f32.mrf.mxu0  ;;  %v966_v42 = vpop.f32.mrf.mxu1 }
 0x257   : > { %v975_v41 = vadd.f32 %v3465_v38, %v923_v39  ;;  %v977_v35 = vadd.f32 %v3467_v63, %v966_v42  ;;  %v3471_v38 = vld [vmem:[%s4917_s28 + $0x70] sm:$0xff] }
 0x258   : > { %v925_v43 = vpop.f32.mrf.mxu0  ;;  %v968_v50 = vpop.f32.mrf.mxu1 }
 0x259   : > { %v3473_v45 = vmul.f32 -1.442695, %v975_v41  ;;  %v976_v46 = vadd.f32 %v3466_v40, %v925_v43  ;;  %v978_v59 = vadd.f32 %v3468_v55, %v968_v50 }
 0x25a   : > { %v927_v47 = vpop.f32.mrf.mxu0  ;;  %v970_v57 = vpop.f32.mrf.mxu1 }
 0x25b   : > { %3882 = vpow2.f32 %v3473_v45  ;;  %v3475_v49 = vmul.f32 -1.442695, %v976_v46  ;;  %v979_v51 = vadd.f32 %v3469_v44, %v927_v47  ;;  %v3477_v0 = vmul.f32 -1.442695, %v978_v59 }
 0x25c   : > { %v929_v52 = vpop.f32.mrf.mxu0  ;;  %v972_v62 = vpop.f32.mrf.mxu1  ;;  %v981_v44 = vadd.f32 %v3471_v38, %v970_v57 }
 0x25d   : > { %3884 = vpow2.f32 %v3475_v49  ;;  %v3474_v53 = vmul.f32 -1.442695, %v979_v51  ;;  %v980_v54 = vadd.f32 %v3470_v48, %v929_v52  ;;  %v982_v31 = vadd.f32 %v3472_v60, %v972_v62 }
 0x25f   : > { %3886 = vpow2.f32 %v3474_v53  ;;  %v3476_v58 = vmul.f32 -1.442695, %v980_v54  ;;  %v3478_v40 = vmul.f32 -1.442695, %v982_v31 }
 0x261   : > { %3888 = vpow2.f32 %v3476_v58 }
 0x262   : > { %3890 = vpow2.f32 %v3477_v0 }
 0x268   : > { %v3883_v32 = vpop.eup %3882 }
 0x269   : > { %v989_v37 = vadd.f32 1.0, %v3883_v32 }
 0x26a   : > { %v3885_v39 = vpop.eup %3884 }
 0x26b   : > { %3892 = vrcp.f32 %v989_v37  ;;  %v1001_v41 = vadd.f32 1.0, %v3885_v39 }
 0x26c   : > { %v3887_v43 = vpop.eup %3886  ;;  %3894 = vtanh.f32 %v977_v35 }
 0x26d   : > { %3896 = vrcp.f32 %v1001_v41  ;;  %v990_v45 = vadd.f32 1.0, %v3887_v43  ;;  %v3482_v41 = vld [vmem:[%s4917_s28 + $0x88] sm:$0xff] }
 0x26e   : > { %v3889_v46 = vpop.eup %3888  ;;  %3898 = vpow2.f32 %v3478_v40 }
 0x26f   : > { %3900 = vrcp.f32 %v990_v45  ;;  %v1002_v47 = vadd.f32 1.0, %v3889_v46  ;;  %v3891_v48 = vpop.eup %3890  ;;  %v3485_v46 = vld [vmem:[%s4917_s28 + $0xa0] sm:$0xff] }
 0x270   : > { %3902 = vtanh.f32 %v981_v44  ;;  %v1015_v51 = vadd.f32 1.0, %v3891_v48 }
 0x271   : > { %3904 = vrcp.f32 %v1002_v47 }
 0x272   : > { %3906 = vrcp.f32 %v1015_v51 }
 0x278   : > { %v3893_v42 = vpop.eup %3892 }
 0x279   : > { %v3895_v49 = vpop.eup %3894 }
 0x27a   : > { %v3897_v50 = vpop.eup %3896  ;;  %v1023_v53 = vmul.f32 %v3895_v49, %v3893_v42  ;;  %v3486_v49 = vld [vmem:[%s4917_s28 + $0xa8] sm:$0xff] }
 0x27b   : > { %v3899_v52 = vpop.eup %3898  ;;  %v1021_v54 = vmul.f32 %v3897_v50, %v5160_v56 }
 0x27c   : > { %v3901_v55 = vpop.eup %3900  ;;  %v1016_v60 = vadd.f32 1.0, %v3899_v52 }
 0x27d   : > { %v3903_v57 = vpop.eup %3902  ;;  %v5211_v58 = vadd.f32 %v1023_v53, %v1021_v54 }
 0x27e   : > { %v3905_v59 = vpop.eup %3904  ;;  %v1024_v62 = vmul.f32 %v3903_v57, %v3901_v55  ;;  %v3484_v57 = vld [vmem:[%s4917_s28 + $0x98] sm:$0xff] }
 0x27f   : > { %v1022_v63 = vmul.f32 %v3905_v59, %v5163_v61  ;;  %3908 = vtanh.f32 %v5211_v58  ;;  %v3907_v56 = vpop.eup %3906  ;;  %v3481_v61 = vld [vmem:[%s4917_s28 + $0x80] sm:$0xff] }
 0x280   : > { %3910 = vrcp.f32 %v1016_v60 }
 0x281   : > { %v5215_v0 = vadd.f32 %v1024_v62, %v1022_v63  ;;  %v3488_v63 = vld [vmem:[%s4917_s28 + $0xb8] sm:$0xff] }
 0x283   : > { %3912 = vtanh.f32 %v5215_v0 }
 0x28c   : > { %v3909_v31 = vpop.eup %3908 }
 0x28d   : > { %v1029_v32 = vmul.f32 %v3909_v31, %v3907_v56  ;;  %v3911_v35 = vpop.eup %3910  ;;  %v3483_v31 = vld [vmem:[%s4917_s28 + $0x90] sm:$0xff] }
 0x28f   : > { %3479 = vst [vmem:[%s4919_s19 + $0x10] sm:$0xff] %v1029_v32 }
 0x290   : > { %v3913_v37 = vpop.eup %3912 }
 0x291   : > { %v1030_v38 = vmul.f32 %v3913_v37, %v3911_v35 }
 0x293   : > { %3480 = vst [vmem:[%s4919_s19 + $0x18] sm:$0xff] %v1030_v38  ;;  %v1043_v39 = vpack.c.bf16 %v1030_v38, %v1029_v32 }
 0x295   : > { %1077 = vmatmul.mubr.bf16.vlgmr.msra.gmra.mxu0 %v1043_v39  ;;  %1120 = vmatmul.mubr.bf16.vlgmr.msra.gmra.mxu1 %v1043_v39 }
 0x296   : > { %1200 = vmatpush1.bf16.msra.mxu0 %v4930_v2  ;;  %1243 = vmatpush1.bf16.msra.mxu1 %v4960_v8 }
 0x297   : > { %1201 = vmatprep.subr.bf16.mxu0 %v4938_v4  ;;  %1244 = vmatprep.subr.bf16.mxu1 %v4979_v11 }
 0x298   : > { %1231 = vmatprep.mubr.bf16.mxu0 %v4519_v3  ;;  %1274 = vmatprep.mubr.bf16.mxu1 %v4519_v3 }
 0x29a   : > { %1202 = vmatpush1.bf16.msra.mxu0 %v4944_v5  ;;  %1245 = vmatpush1.bf16.msra.mxu1 %v4984_v12 }
 0x29b   : > { %1203 = vmatprep.subr.bf16.mxu0 %v4950_v6  ;;  %1246 = vmatprep.subr.bf16.mxu1 %v5001_v15 }
 0x29e   : > { %1204 = vmatpush1.bf16.msra.mxu0 %v4966_v9  ;;  %1247 = vmatpush1.bf16.msra.mxu1 %v5008_v16 }
 0x29f   : > { %1205 = vmatprep.subr.bf16.mxu0 %v4973_v10  ;;  %1248 = vmatprep.subr.bf16.mxu1 %v5014_v17 }
 0x2a2   : > { %1206 = vmatpush1.bf16.msra.mxu0 %v4991_v13  ;;  %1249 = vmatpush1.bf16.msra.mxu1 %v5032_v20 }
 0x2a3   : > { %1207 = vmatprep.subr.bf16.mxu0 %v4996_v14  ;;  %1250 = vmatprep.subr.bf16.mxu1 %v5038_v21 }
 0x2a6   : > { %1208 = vmatpush1.bf16.msra.mxu0 %v5020_v18  ;;  %1251 = vmatpush1.bf16.msra.mxu1 %v5056_v24 }
 0x2a7   : > { %1209 = vmatprep.subr.bf16.mxu0 %v5026_v19  ;;  %1252 = vmatprep.subr.bf16.mxu1 %v5062_v25 }
 0x2aa   : > { %1210 = vmatpush1.bf16.msra.mxu0 %v5044_v22  ;;  %1253 = vmatpush1.bf16.msra.mxu1 %v5080_v28 }
 0x2ab   : > { %1211 = vmatprep.subr.bf16.mxu0 %v5050_v23  ;;  %1254 = vmatprep.subr.bf16.mxu1 %v5086_v29 }
 0x2ae   : > { %1212 = vmatpush1.bf16.msra.mxu0 %v5068_v26  ;;  %1255 = vmatpush1.bf16.msra.mxu1 %v5099_v33 }
 0x2af   : > { %1213 = vmatprep.subr.bf16.mxu0 %v5074_v27  ;;  %1256 = vmatprep.subr.bf16.mxu1 %v5105_v34 }
 0x2b2   : > { %1214 = vmatpush1.bf16.msra.mxu0 %v5092_v30  ;;  %1257 = vmatpush1.bf16.msra.mxu1 %v5112_v36 }
 0x2b3   : > { %1354 = vmatprep.subr.bf16.mxu0 %v4925_v1  ;;  %1397 = vmatprep.subr.bf16.mxu1 %v4955_v7 }
 0x355   : > { %v1078_v40 = vpop.f32.mrf.mxu0  ;;  %v1121_v44 = vpop.f32.mrf.mxu1 }
 0x356   : > { %v1130_v43 = vadd.f32 %v3481_v61, %v1078_v40  ;;  %v1132_v38 = vadd.f32 %v3483_v31, %v1121_v44  ;;  %v3487_v61 = vld [vmem:[%s4917_s28 + $0xb0] sm:$0xff] }
 0x357   : > { %v1080_v45 = vpop.f32.mrf.mxu0  ;;  %v1123_v51 = vpop.f32.mrf.mxu1 }
 0x358   : > { %v3489_v47 = vmul.f32 -1.442695, %v1130_v43  ;;  %v1131_v48 = vadd.f32 %v3482_v41, %v1080_v45  ;;  %v1133_v62 = vadd.f32 %v3484_v57, %v1123_v51 }
 0x359   : > { %v1082_v42 = vpop.f32.mrf.mxu0  ;;  %v1125_v59 = vpop.f32.mrf.mxu1 }
 0x35a   : > { %3914 = vpow2.f32 %v3489_v47  ;;  %v3491_v50 = vmul.f32 -1.442695, %v1131_v48  ;;  %v1134_v52 = vadd.f32 %v3485_v46, %v1082_v42  ;;  %v3493_v32 = vmul.f32 -1.442695, %v1133_v62 }
 0x35b   : > { %v1084_v53 = vpop.f32.mrf.mxu0  ;;  %v1127_v56 = vpop.f32.mrf.mxu1  ;;  %v1136_v46 = vadd.f32 %v3487_v61, %v1125_v59 }
 0x35c   : > { %3916 = vpow2.f32 %v3491_v50  ;;  %v3490_v54 = vmul.f32 -1.442695, %v1134_v52  ;;  %v1135_v55 = vadd.f32 %v3486_v49, %v1084_v53  ;;  %v1137_v35 = vadd.f32 %v3488_v63, %v1127_v56 }
 0x35e   : > { %3918 = vpow2.f32 %v3490_v54  ;;  %v3492_v60 = vmul.f32 -1.442695, %v1135_v55  ;;  %v3494_v41 = vmul.f32 -1.442695, %v1137_v35 }
 0x360   : > { %3920 = vpow2.f32 %v3492_v60 }
 0x361   : > { %3922 = vpow2.f32 %v3493_v32 }
 0x367   : > { %v3915_v37 = vpop.eup %3914 }
 0x368   : > { %v1144_v39 = vadd.f32 1.0, %v3915_v37 }
 0x369   : > { %v3917_v40 = vpop.eup %3916 }
 0x36a   : > { %3924 = vrcp.f32 %v1144_v39  ;;  %v1156_v43 = vadd.f32 1.0, %v3917_v40 }
 0x36b   : > { %v3919_v45 = vpop.eup %3918  ;;  %3926 = vtanh.f32 %v1132_v38 }
 0x36c   : > { %3928 = vrcp.f32 %v1156_v43  ;;  %v1145_v47 = vadd.f32 1.0, %v3919_v45  ;;  %v3503_v45 = vld [vmem:[%s4917_s28 + $0xf0] sm:$0xff] }
 0x36d   : > { %v3921_v48 = vpop.eup %3920  ;;  %3930 = vpow2.f32 %v3494_v41 }
 0x36e   : > { %3932 = vrcp.f32 %v1145_v47  ;;  %v1157_v42 = vadd.f32 1.0, %v3921_v48  ;;  %v3923_v49 = vpop.eup %3922 }
 0x36f   : > { %3934 = vtanh.f32 %v1136_v46  ;;  %v1170_v52 = vadd.f32 1.0, %v3923_v49 }
 0x370   : > { %3936 = vrcp.f32 %v1157_v42 }
 0x371   : > { %3938 = vrcp.f32 %v1170_v52 }
 0x377   : > { %v3925_v44 = vpop.eup %3924 }
 0x378   : > { %v3927_v50 = vpop.eup %3926 }
 0x379   : > { %v3929_v51 = vpop.eup %3928  ;;  %v1178_v54 = vmul.f32 %v3927_v50, %v3925_v44 }
 0x37a   : > { %v3931_v53 = vpop.eup %3930  ;;  %v1176_v55 = vmul.f32 %v3929_v51, %v5211_v58 }
 0x37b   : > { %v3933_v57 = vpop.eup %3932  ;;  %v1171_v63 = vadd.f32 1.0, %v3931_v53 }
 0x37c   : > { %v3935_v59 = vpop.eup %3934  ;;  %v5263_v60 = vadd.f32 %v1178_v54, %v1176_v55 }
 0x37d   : > { %v3937_v62 = vpop.eup %3936  ;;  %v1179_v56 = vmul.f32 %v3935_v59, %v3933_v57 }
 0x37e   : > { %v1177_v31 = vmul.f32 %v3937_v62, %v5215_v0  ;;  %3940 = vtanh.f32 %v5263_v60  ;;  %v3939_v58 = vpop.eup %3938 }
 0x37f   : > { %3942 = vrcp.f32 %v1171_v63 }
 0x380   : > { %v5267_v32 = vadd.f32 %v1179_v56, %v1177_v31 }
 0x382   : > { %3944 = vtanh.f32 %v5267_v32 }
 0x38b   : > { %v3941_v35 = vpop.eup %3940 }
 0x38c   : > { %v1184_v37 = vmul.f32 %v3941_v35, %v3939_v58  ;;  %v3943_v38 = vpop.eup %3942 }
 0x38e   : > { %3495 = vst [vmem:[%s4919_s19 + $0x20] sm:$0xff] %v1184_v37 }
 0x38f   : > { %v3945_v39 = vpop.eup %3944 }
 0x390   : > { %v1185_v61 = vmul.f32 %v3945_v39, %v3943_v38 }
 0x392   : > { %3496 = vst [vmem:[%s4919_s19 + $0x28] sm:$0xff] %v1185_v61  ;;  %v1198_v40 = vpack.c.bf16 %v1185_v61, %v1184_v37 }
 0x394   : > { %1232 = vmatmul.mubr.bf16.vlgmr.msra.gmra.mxu0 %v1198_v40  ;;  %1275 = vmatmul.mubr.bf16.vlgmr.msra.gmra.mxu1 %v1198_v40 }
 0x395   : > { %1355 = vmatpush1.bf16.msra.mxu0 %v4930_v2  ;;  %1398 = vmatpush1.bf16.msra.mxu1 %v4960_v8  ;;  %v3497_v2 = vld [vmem:[%s4917_s28 + $0xc0] sm:$0xff] }
 0x396   : > { %1356 = vmatprep.subr.bf16.mxu0 %v4938_v4  ;;  %1399 = vmatprep.subr.bf16.mxu1 %v4979_v11 }
 0x397   : > { %1386 = vmatprep.mubr.bf16.mxu0 %v4519_v3  ;;  %1429 = vmatprep.mubr.bf16.mxu1 %v4519_v3 }
 0x399   : > { %1357 = vmatpush1.bf16.msra.mxu0 %v4944_v5  ;;  %1400 = vmatpush1.bf16.msra.mxu1 %v4984_v12  ;;  %v3498_v5 = vld [vmem:[%s4917_s28 + $0xc8] sm:$0xff] }
 0x39a   : > { %1358 = vmatprep.subr.bf16.mxu0 %v4950_v6  ;;  %1401 = vmatprep.subr.bf16.mxu1 %v5001_v15 }
 0x39d   : > { %1359 = vmatpush1.bf16.msra.mxu0 %v4966_v9  ;;  %1402 = vmatpush1.bf16.msra.mxu1 %v5008_v16 }
 0x39e   : > { %1360 = vmatprep.subr.bf16.mxu0 %v4973_v10  ;;  %1403 = vmatprep.subr.bf16.mxu1 %v5014_v17  ;;  %v3501_v10 = vld [vmem:[%s4917_s28 + $0xe0] sm:$0xff] }
 0x3a1   : > { %1361 = vmatpush1.bf16.msra.mxu0 %v4991_v13  ;;  %1404 = vmatpush1.bf16.msra.mxu1 %v5032_v20 }
 0x3a2   : > { %1362 = vmatprep.subr.bf16.mxu0 %v4996_v14  ;;  %1405 = vmatprep.subr.bf16.mxu1 %v5038_v21  ;;  %v3502_v14 = vld [vmem:[%s4917_s28 + $0xe8] sm:$0xff] }
 0x3a5   : > { %1363 = vmatpush1.bf16.msra.mxu0 %v5020_v18  ;;  %1406 = vmatpush1.bf16.msra.mxu1 %v5056_v24 }
 0x3a6   : > { %1364 = vmatprep.subr.bf16.mxu0 %v5026_v19  ;;  %1407 = vmatprep.subr.bf16.mxu1 %v5062_v25  ;;  %v3500_v19 = vld [vmem:[%s4917_s28 + $0xd8] sm:$0xff]  ;;  %v3499_v25 = vld [vmem:[%s4917_s28 + $0xd0] sm:$0xff] }
 0x3a9   : > { %1365 = vmatpush1.bf16.msra.mxu0 %v5044_v22  ;;  %1408 = vmatpush1.bf16.msra.mxu1 %v5080_v28 }
 0x3aa   : > { %1366 = vmatprep.subr.bf16.mxu0 %v5050_v23  ;;  %1409 = vmatprep.subr.bf16.mxu1 %v5086_v29  ;;  %v3504_v23 = vld [vmem:[%s4917_s28 + $0xf8] sm:$0xff] }
 0x3ad   : > { %1367 = vmatpush1.bf16.msra.mxu0 %v5068_v26  ;;  %1410 = vmatpush1.bf16.msra.mxu1 %v5099_v33 }
 0x3ae   : > { %1368 = vmatprep.subr.bf16.mxu0 %v5074_v27  ;;  %1411 = vmatprep.subr.bf16.mxu1 %v5105_v34 }
 0x3b1   : > { %1369 = vmatpush1.bf16.msra.mxu0 %v5092_v30  ;;  %1412 = vmatpush1.bf16.msra.mxu1 %v5112_v36 }
 0x3b2   : > { %1509 = vmatprep.subr.bf16.mxu0 %v4925_v1  ;;  %1552 = vmatprep.subr.bf16.mxu1 %v4955_v7 }
 0x454   : > { %v1233_v4 = vpop.f32.mrf.mxu0  ;;  %v1276_v8 = vpop.f32.mrf.mxu1 }
 0x455   : > { %v1285_v6 = vadd.f32 %v3497_v2, %v1233_v4  ;;  %v1287_v41 = vadd.f32 %v3499_v25, %v1276_v8  ;;  %v5443_v25 = vld [vmem:[%s6329_s1 + $0x4c] ss:$16 sps:$4 sm:$0xff]  }
 0x456   : > { %v1235_v9 = vpop.f32.mrf.mxu0  ;;  %v1278_v16 = vpop.f32.mrf.mxu1 }
 0x457   : > { %v3505_v11 = vmul.f32 -1.442695, %v1285_v6  ;;  %v1286_v12 = vadd.f32 %v3498_v5, %v1235_v9  ;;  %v1288_v22 = vadd.f32 %v3500_v19, %v1278_v16  ;;  %v5333_v9 = vld [vmem:[%s6329_s1 + $0xe8] ss:$16 sps:$4 sm:$0xff]   ;;  %v5377_v16 = vld [vmem:[%s6329_s1 + $0xa0] ss:$16 sps:$4 sm:$0xff]  }
 0x458   : > { %v1237_v13 = vpop.f32.mrf.mxu0  ;;  %v1280_v20 = vpop.f32.mrf.mxu1  ;;  %v5407_v19 = vld [vmem:[%s6329_s1 + $0x88] ss:$16 sps:$4 sm:$0xff]  }
 0x459   : > { %3946 = vpow2.f32 %v3505_v11  ;;  %v3507_v15 = vmul.f32 -1.442695, %v1286_v12  ;;  %v1289_v1 = vadd.f32 %v3501_v10, %v1237_v13  ;;  %v3509_v26 = vmul.f32 -1.442695, %v1288_v22  ;;  %v5339_v10 = vld [vmem:[%s6329_s1 + $0xc4] ss:$16 sps:$4 sm:$0xff]  }
 0x45a   : > { %v1239_v17 = vpop.f32.mrf.mxu0  ;;  %v1282_v24 = vpop.f32.mrf.mxu1  ;;  %v1291_v49 = vadd.f32 %v3503_v45, %v1280_v20  ;;  %v5345_v11 = vld [vmem:[%s6329_s1 + $0xcc] ss:$16 sps:$4 sm:$0xff]   ;;  %v5353_v12 = vld [vmem:[%s6329_s1 + $0xc0] ss:$16 sps:$4 sm:$0xff]   ;;  %v5359_v13 = vld [vmem:[%s6329_s1 + $0xc8] ss:$16 sps:$4 sm:$0xff]  }
 0x45b   : > { %3948 = vpow2.f32 %v3507_v15  ;;  %v3506_v7 = vmul.f32 -1.442695, %v1289_v1  ;;  %v1290_v18 = vadd.f32 %v3502_v14, %v1239_v17  ;;  %v1292_v27 = vadd.f32 %v3504_v23, %v1282_v24  ;;  %v5365_v14 = vld [vmem:[%s6329_s1 + $0xa4] ss:$16 sps:$4 sm:$0xff]   ;;  %v5371_v15 = vld [vmem:[%s6329_s1 + $0xac] ss:$16 sps:$4 sm:$0xff]  }
 0x45c   : > { %v5383_v1 = vld [vmem:[%s6329_s1 + $0xa8] ss:$16 sps:$4 sm:$0xff]   ;;  %v5389_v17 = vld [vmem:[%s6329_s1 + $0x84] ss:$16 sps:$4 sm:$0xff]   ;;  %v5425_v22 = vld [vmem:[%s6329_s1 + $0x60] ss:$16 sps:$4 sm:$0xff]  }
 0x45d   : > { %3950 = vpow2.f32 %v3506_v7  ;;  %v3508_v21 = vmul.f32 -1.442695, %v1290_v18  ;;  %v3510_v47 = vmul.f32 -1.442695, %v1292_v27  ;;  %v5395_v7 = vld [vmem:[%s6329_s1 + $0x8c] ss:$16 sps:$4 sm:$0xff]  }
 0x45e   : > { %v5401_v18 = vld [vmem:[%s6329_s1 + $0x80] ss:$16 sps:$4 sm:$0xff]   ;;  %v5413_v20 = vld [vmem:[%s6329_s1 + $0x64] ss:$16 sps:$4 sm:$0xff]   ;;  %v5431_v23 = vld [vmem:[%s6329_s1 + $0x68] ss:$16 sps:$4 sm:$0xff]  }
 0x45f   : > { %3952 = vpow2.f32 %v3508_v21  ;;  %v5419_v21 = vld [vmem:[%s6329_s1 + $0x6c] ss:$16 sps:$4 sm:$0xff]   ;;  %v5437_v24 = vld [vmem:[%s6329_s1 + $0x44] ss:$16 sps:$4 sm:$0xff]  }
 0x460   : > { %3954 = vpow2.f32 %v3509_v26  ;;  %v5449_v26 = vld [vmem:[%s6329_s1 + $0x40] ss:$16 sps:$4 sm:$0xff]   ;;  %v5456_v27 = vld [vmem:[%s6329_s1 + $0x24] ss:$16 sps:$4 sm:$0xff]  }
 0x466   : > { %v3947_v0 = vpop.eup %3946 }
 0x467   : > { %v1299_v43 = vadd.f32 1.0, %v3947_v0  ;;  %v5463_v0 = vld [vmem:[%s6329_s1 + $0x20] ss:$16 sps:$4 sm:$0xff]  }
 0x468   : > { %v3949_v46 = vpop.eup %3948 }
 0x469   : > { %3956 = vrcp.f32 %v1299_v43  ;;  %v1311_v48 = vadd.f32 1.0, %v3949_v46  ;;  %v3517_v46 = vld [vmem:[%s4917_s28 + $0x120] sm:$0xff] }
 0x46a   : > { %v3951_v42 = vpop.eup %3950  ;;  %3958 = vtanh.f32 %v1287_v41 }
 0x46b   : > { %3960 = vrcp.f32 %v1311_v48  ;;  %v1300_v44 = vadd.f32 1.0, %v3951_v42 }
 0x46c   : > { %v3953_v50 = vpop.eup %3952  ;;  %3962 = vpow2.f32 %v3510_v47 }
 0x46d   : > { %3964 = vrcp.f32 %v1300_v44  ;;  %v1312_v51 = vadd.f32 1.0, %v3953_v50  ;;  %v3955_v52 = vpop.eup %3954 }
 0x46e   : > { %3966 = vtanh.f32 %v1291_v49  ;;  %v1325_v57 = vadd.f32 1.0, %v3955_v52  ;;  %v3518_v49 = vld [vmem:[%s4917_s28 + $0x128] sm:$0xff] }
 0x46f   : > { %3968 = vrcp.f32 %v1312_v51 }
 0x470   : > { %3970 = vrcp.f32 %v1325_v57 }
 0x476   : > { %v3957_v53 = vpop.eup %3956 }
 0x477   : > { %v3959_v54 = vpop.eup %3958 }
 0x478   : > { %v3961_v55 = vpop.eup %3960  ;;  %v1333_v62 = vmul.f32 %v3959_v54, %v3957_v53 }
 0x479   : > { %v3963_v59 = vpop.eup %3962  ;;  %v1331_v63 = vmul.f32 %v3961_v55, %v5263_v60  ;;  %v3516_v55 = vld [vmem:[%s4917_s28 + $0x118] sm:$0xff] }
 0x47a   : > { %v3965_v56 = vpop.eup %3964  ;;  %v1326_v37 = vadd.f32 1.0, %v3963_v59 }
 0x47b   : > { %v3967_v31 = vpop.eup %3966  ;;  %v5315_v58 = vadd.f32 %v1333_v62, %v1331_v63  ;;  %v3520_v63 = vld [vmem:[%s4917_s28 + $0x138] sm:$0xff] }
 0x47c   : > { %v3969_v35 = vpop.eup %3968  ;;  %v1334_v38 = vmul.f32 %v3967_v31, %v3965_v56  ;;  %v3515_v31 = vld [vmem:[%s4917_s28 + $0x110] sm:$0xff] }
 0x47d   : > { %v1332_v39 = vmul.f32 %v3969_v35, %v5267_v32  ;;  %3972 = vtanh.f32 %v5315_v58  ;;  %v3971_v60 = vpop.eup %3970  ;;  %v5327_v32 = vld [vmem:[%s6329_s1 + $0xe0] ss:$16 sps:$4 sm:$0xff]  }
 0x47e   : > { %3974 = vrcp.f32 %v1326_v37 }
 0x47f   : > { %v5319_v61 = vadd.f32 %v1334_v38, %v1332_v39 }
 0x481   : > { %3976 = vtanh.f32 %v5319_v61 }
 0x48a   : > { %v3973_v40 = vpop.eup %3972 }
 0x48b   : > { %v1339_v2 = vmul.f32 %v3973_v40, %v3971_v60  ;;  %v3975_v4 = vpop.eup %3974  ;;  %v3519_v40 = vld [vmem:[%s4917_s28 + $0x130] sm:$0xff] }
 0x48d   : > { %3511 = vst [vmem:[%s4919_s19 + $0x30] sm:$0xff] %v1339_v2 }
 0x48e   : > { %v3977_v5 = vpop.eup %3976 }
 0x48f   : > { %v1340_v6 = vmul.f32 %v3977_v5, %v3975_v4 }
 0x491   : > { %3512 = vst [vmem:[%s4919_s19 + $0x38] sm:$0xff] %v1340_v6  ;;  %v1353_v8 = vpack.c.bf16 %v1340_v6, %v1339_v2 }
 0x493   : > { %1387 = vmatmul.mubr.bf16.vlgmr.msra.gmra.mxu0 %v1353_v8  ;;  %1430 = vmatmul.mubr.bf16.vlgmr.msra.gmra.mxu1 %v1353_v8 }
 0x494   : > { %1510 = vmatpush1.bf16.msra.mxu0 %v5327_v32  ;;  %1553 = vmatpush1.bf16.msra.mxu1 %v5333_v9 }
 0x495   : > { %1511 = vmatprep.subr.bf16.mxu0 %v5339_v10  ;;  %1554 = vmatprep.subr.bf16.mxu1 %v5345_v11 }
 0x496   : > { %1541 = vmatprep.mubr.bf16.mxu0 %v4519_v3  ;;  %1584 = vmatprep.mubr.bf16.mxu1 %v4519_v3 }
 0x498   : > { %1512 = vmatpush1.bf16.msra.mxu0 %v5353_v12  ;;  %1555 = vmatpush1.bf16.msra.mxu1 %v5359_v13 }
 0x499   : > { %1513 = vmatprep.subr.bf16.mxu0 %v5365_v14  ;;  %1556 = vmatprep.subr.bf16.mxu1 %v5371_v15 }
 0x49c   : > { %1514 = vmatpush1.bf16.msra.mxu0 %v5377_v16  ;;  %1557 = vmatpush1.bf16.msra.mxu1 %v5383_v1 }
 0x49d   : > { %1515 = vmatprep.subr.bf16.mxu0 %v5389_v17  ;;  %1558 = vmatprep.subr.bf16.mxu1 %v5395_v7 }
 0x4a0   : > { %1516 = vmatpush1.bf16.msra.mxu0 %v5401_v18  ;;  %1559 = vmatpush1.bf16.msra.mxu1 %v5407_v19 }
 0x4a1   : > { %1517 = vmatprep.subr.bf16.mxu0 %v5413_v20  ;;  %1560 = vmatprep.subr.bf16.mxu1 %v5419_v21 }
 0x4a4   : > { %1518 = vmatpush1.bf16.msra.mxu0 %v5425_v22  ;;  %1561 = vmatpush1.bf16.msra.mxu1 %v5431_v23 }
 0x4a5   : > { %1519 = vmatprep.subr.bf16.mxu0 %v5437_v24  ;;  %1562 = vmatprep.subr.bf16.mxu1 %v5443_v25 }
 0x4a8   : > { %1520 = vmatpush1.bf16.msra.mxu0 %v5449_v26  ;;  %1563 = vmatpush1.bf16.msra.mxu1 %v5080_v28  ;;  %v5470_v28 = vld [vmem:[%s6329_s1 + $0x4] ss:$16 sps:$4 sm:$0xff]  }
 0x4a9   : > { %1521 = vmatprep.subr.bf16.mxu0 %v5456_v27  ;;  %1564 = vmatprep.subr.bf16.mxu1 %v5086_v29  ;;  %v5479_v29 = vld [vmem:[%s6329_s1 + $0xe4] ss:$16 sps:$4 sm:$0xff]  }
 0x4ac   : > { %1522 = vmatpush1.bf16.msra.mxu0 %v5463_v0  ;;  %1565 = vmatpush1.bf16.msra.mxu1 %v5099_v33  ;;  %v5485_v33 = vld [vmem:[%s6329_s1 + $0xec] ss:$16 sps:$4 sm:$0xff]  }
 0x4ad   : > { %1523 = vmatprep.subr.bf16.mxu0 %v5470_v28  ;;  %1566 = vmatprep.subr.bf16.mxu1 %v5105_v34  ;;  %v3513_v34 = vld [vmem:[%s4917_s28 + $0x100] sm:$0xff] }
 0x4b0   : > { %1524 = vmatpush1.bf16.msra.mxu0 %v5092_v30  ;;  %1567 = vmatpush1.bf16.msra.mxu1 %v5112_v36  ;;  %v3514_v30 = vld [vmem:[%s4917_s28 + $0x108] sm:$0xff] }
 0x4b1   : > { %1664 = vmatprep.subr.bf16.mxu0 %v5479_v29  ;;  %1707 = vmatprep.subr.bf16.mxu1 %v5485_v33 }
 0x553   : > { %v1388_v41 = vpop.f32.mrf.mxu0  ;;  %v1431_v36 = vpop.f32.mrf.mxu1 }
 0x554   : > { %v1440_v43 = vadd.f32 %v3513_v34, %v1388_v41  ;;  %v1442_v39 = vadd.f32 %v3515_v31, %v1431_v36 }
 0x555   : > { %v1390_v45 = vpop.f32.mrf.mxu0  ;;  %v1433_v50 = vpop.f32.mrf.mxu1 }
 0x556   : > { %v3521_v47 = vmul.f32 -1.442695, %v1440_v43  ;;  %v1441_v48 = vadd.f32 %v3514_v30, %v1390_v45  ;;  %v1443_v62 = vadd.f32 %v3516_v55, %v1433_v50 }
 0x557   : > { %v1392_v42 = vpop.f32.mrf.mxu0  ;;  %v1435_v57 = vpop.f32.mrf.mxu1 }
 0x558   : > { %3978 = vpow2.f32 %v3521_v47  ;;  %v3523_v44 = vmul.f32 -1.442695, %v1441_v48  ;;  %v1444_v51 = vadd.f32 %v3517_v46, %v1392_v42  ;;  %v3525_v35 = vmul.f32 -1.442695, %v1443_v62 }
 0x559   : > { %v1394_v52 = vpop.f32.mrf.mxu0  ;;  %v1437_v56 = vpop.f32.mrf.mxu1  ;;  %v1446_v8 = vadd.f32 %v3519_v40, %v1435_v57  ;;  %v5565_v40 = vld [vmem:[%s6329_s1 + $0x8] ss:$16 sps:$4 sm:$0xff]  }
 0x55a   : > { %3980 = vpow2.f32 %v3523_v44  ;;  %v3522_v53 = vmul.f32 -1.442695, %v1444_v51  ;;  %v1445_v54 = vadd.f32 %v3518_v49, %v1394_v52  ;;  %v1447_v37 = vadd.f32 %v3520_v63, %v1437_v56 }
 0x55c   : > { %3982 = vpow2.f32 %v3522_v53  ;;  %v3524_v59 = vmul.f32 -1.442695, %v1445_v54  ;;  %v3526_v4 = vmul.f32 -1.442695, %v1447_v37  ;;  %v5539_v37 = vld [vmem:[%s6329_s1 + $0x2c] ss:$16 sps:$4 sm:$0xff]  }
 0x55e   : > { %3984 = vpow2.f32 %v3524_v59 }
 0x55f   : > { %3986 = vpow2.f32 %v3525_v35 }
 0x565   : > { %v3979_v38 = vpop.eup %3978 }
 0x566   : > { %v1454_v60 = vadd.f32 1.0, %v3979_v38  ;;  %v5546_v38 = vld [vmem:[%s6329_s1 + $0x28] ss:$16 sps:$4 sm:$0xff]  }
 0x567   : > { %v3981_v2 = vpop.eup %3980 }
 0x568   : > { %3988 = vrcp.f32 %v1454_v60  ;;  %v1466_v5 = vadd.f32 1.0, %v3981_v2  ;;  %v5559_v60 = vld [vmem:[%s6329_s1] ss:$16 sps:$4 sm:$0xff]  }
 0x569   : > { %v3983_v6 = vpop.eup %3982  ;;  %3990 = vtanh.f32 %v1442_v39  ;;  %v5553_v39 = vld [vmem:[%s6329_s1 + $0xc] ss:$16 sps:$4 sm:$0xff]   ;;  %v3529_v2 = vld [vmem:[%s4917_s28 + $0x140] sm:$0xff] }
 0x56a   : > { %3992 = vrcp.f32 %v1466_v5  ;;  %v1455_v34 = vadd.f32 1.0, %v3983_v6  ;;  %v3530_v5 = vld [vmem:[%s4917_s28 + $0x148] sm:$0xff] }
 0x56b   : > { %v3985_v41 = vpop.eup %3984  ;;  %3994 = vpow2.f32 %v3526_v4 }
 0x56c   : > { %3996 = vrcp.f32 %v1455_v34  ;;  %v1467_v30 = vadd.f32 1.0, %v3985_v41  ;;  %v3987_v43 = vpop.eup %3986  ;;  %v3533_v41 = vld [vmem:[%s4917_s28 + $0x160] sm:$0xff] }
 0x56d   : > { %3998 = vtanh.f32 %v1446_v8  ;;  %v1480_v47 = vadd.f32 1.0, %v3987_v43 }
 0x56e   : > { %4000 = vrcp.f32 %v1467_v30 }
 0x56f   : > { %4002 = vrcp.f32 %v1480_v47 }
 0x575   : > { %v3989_v36 = vpop.eup %3988 }
 0x576   : > { %v3991_v45 = vpop.eup %3990 }
 0x577   : > { %v3993_v46 = vpop.eup %3992  ;;  %v1488_v42 = vmul.f32 %v3991_v45, %v3989_v36  ;;  %v3534_v45 = vld [vmem:[%s4917_s28 + $0x168] sm:$0xff] }
 0x578   : > { %v3995_v48 = vpop.eup %3994  ;;  %v1486_v49 = vmul.f32 %v3993_v46, %v5315_v58 }
 0x579   : > { %v3997_v44 = vpop.eup %3996  ;;  %v1481_v53 = vadd.f32 1.0, %v3995_v48 }
 0x57a   : > { %v3999_v50 = vpop.eup %3998  ;;  %v5497_v51 = vadd.f32 %v1488_v42, %v1486_v49 }
 0x57b   : > { %v4001_v52 = vpop.eup %4000  ;;  %v1489_v54 = vmul.f32 %v3999_v50, %v3997_v44  ;;  %v3532_v50 = vld [vmem:[%s4917_s28 + $0x158] sm:$0xff] }
 0x57c   : > { %v1487_v55 = vmul.f32 %v4001_v52, %v5319_v61  ;;  %4004 = vtanh.f32 %v5497_v51  ;;  %v4003_v58 = vpop.eup %4002  ;;  %v5532_v61 = vld [vmem:[%s6329_s1 + $0x48] ss:$16 sps:$4 sm:$0xff]  }
 0x57d   : > { %4006 = vrcp.f32 %v1481_v53 }
 0x57e   : > { %v5501_v57 = vadd.f32 %v1489_v54, %v1487_v55  ;;  %v3536_v55 = vld [vmem:[%s4917_s28 + $0x178] sm:$0xff] }
 0x580   : > { %4008 = vtanh.f32 %v5501_v57 }
 0x589   : > { %v4005_v59 = vpop.eup %4004 }
 0x58a   : > { %v1494_v62 = vmul.f32 %v4005_v59, %v4003_v58  ;;  %v4007_v63 = vpop.eup %4006  ;;  %v3531_v59 = vld [vmem:[%s4917_s28 + $0x150] sm:$0xff] }
 0x58c   : > { %3527 = vst [vmem:[%s4919_s19 + $0x40] sm:$0xff] %v1494_v62 }
 0x58d   : > { %v4009_v56 = vpop.eup %4008 }
 0x58e   : > { %v1495_v31 = vmul.f32 %v4009_v56, %v4007_v63 }
 0x590   : > { %3528 = vst [vmem:[%s4919_s19 + $0x48] sm:$0xff] %v1495_v31  ;;  %v1508_v35 = vpack.c.bf16 %v1495_v31, %v1494_v62 }
 0x592   : > { %1542 = vmatmul.mubr.bf16.vlgmr.msra.gmra.mxu0 %v1508_v35  ;;  %1585 = vmatmul.mubr.bf16.vlgmr.msra.gmra.mxu1 %v1508_v35 }
 0x593   : > { %1665 = vmatpush1.bf16.msra.mxu0 %v5327_v32  ;;  %1708 = vmatpush1.bf16.msra.mxu1 %v5333_v9 }
 0x594   : > { %1666 = vmatprep.subr.bf16.mxu0 %v5339_v10  ;;  %1709 = vmatprep.subr.bf16.mxu1 %v5345_v11 }
 0x595   : > { %1696 = vmatprep.mubr.bf16.mxu0 %v4519_v3  ;;  %1739 = vmatprep.mubr.bf16.mxu1 %v4519_v3 }
 0x597   : > { %1667 = vmatpush1.bf16.msra.mxu0 %v5353_v12  ;;  %1710 = vmatpush1.bf16.msra.mxu1 %v5359_v13 }
 0x598   : > { %1668 = vmatprep.subr.bf16.mxu0 %v5365_v14  ;;  %1711 = vmatprep.subr.bf16.mxu1 %v5371_v15 }
 0x59b   : > { %1669 = vmatpush1.bf16.msra.mxu0 %v5377_v16  ;;  %1712 = vmatpush1.bf16.msra.mxu1 %v5383_v1 }
 0x59c   : > { %1670 = vmatprep.subr.bf16.mxu0 %v5389_v17  ;;  %1713 = vmatprep.subr.bf16.mxu1 %v5395_v7 }
 0x59f   : > { %1671 = vmatpush1.bf16.msra.mxu0 %v5401_v18  ;;  %1714 = vmatpush1.bf16.msra.mxu1 %v5407_v19 }
 0x5a0   : > { %1672 = vmatprep.subr.bf16.mxu0 %v5413_v20  ;;  %1715 = vmatprep.subr.bf16.mxu1 %v5419_v21 }
 0x5a3   : > { %1673 = vmatpush1.bf16.msra.mxu0 %v5425_v22  ;;  %1716 = vmatpush1.bf16.msra.mxu1 %v5431_v23 }
 0x5a4   : > { %1674 = vmatprep.subr.bf16.mxu0 %v5437_v24  ;;  %1717 = vmatprep.subr.bf16.mxu1 %v5443_v25 }
 0x5a7   : > { %1675 = vmatpush1.bf16.msra.mxu0 %v5449_v26  ;;  %1718 = vmatpush1.bf16.msra.mxu1 %v5532_v61 }
 0x5a8   : > { %1676 = vmatprep.subr.bf16.mxu0 %v5456_v27  ;;  %1719 = vmatprep.subr.bf16.mxu1 %v5539_v37 }
 0x5ab   : > { %1677 = vmatpush1.bf16.msra.mxu0 %v5463_v0  ;;  %1720 = vmatpush1.bf16.msra.mxu1 %v5546_v38 }
 0x5ac   : > { %1678 = vmatprep.subr.bf16.mxu0 %v5470_v28  ;;  %1721 = vmatprep.subr.bf16.mxu1 %v5553_v39 }
 0x5af   : > { %1679 = vmatpush1.bf16.msra.mxu0 %v5559_v60  ;;  %1722 = vmatpush1.bf16.msra.mxu1 %v5565_v40 }
 0x5b0   : > { %1819 = vmatprep.subr.bf16.mxu0 %v5479_v29  ;;  %1862 = vmatprep.subr.bf16.mxu1 %v5485_v33 }
 0x652   : > { %v1543_v4 = vpop.f32.mrf.mxu0  ;;  %v1586_v8 = vpop.f32.mrf.mxu1 }
 0x653   : > { %v1595_v6 = vadd.f32 %v3529_v2, %v1543_v4  ;;  %v1597_v31 = vadd.f32 %v3531_v59, %v1586_v8  ;;  %v3535_v2 = vld [vmem:[%s4917_s28 + $0x170] sm:$0xff] }
 0x654   : > { %v1545_v34 = vpop.f32.mrf.mxu0  ;;  %v1588_v47 = vpop.f32.mrf.mxu1 }
 0x655   : > { %v3537_v30 = vmul.f32 -1.442695, %v1595_v6  ;;  %v1596_v43 = vadd.f32 %v3530_v5, %v1545_v34  ;;  %v1598_v54 = vadd.f32 %v3532_v50, %v1588_v47 }
 0x656   : > { %v1547_v36 = vpop.f32.mrf.mxu0  ;;  %v1590_v52 = vpop.f32.mrf.mxu1 }
 0x657   : > { %4010 = vpow2.f32 %v3537_v30  ;;  %v3539_v46 = vmul.f32 -1.442695, %v1596_v43  ;;  %v1599_v48 = vadd.f32 %v3533_v41, %v1547_v36  ;;  %v3541_v62 = vmul.f32 -1.442695, %v1598_v54 }
 0x658   : > { %v1549_v42 = vpop.f32.mrf.mxu0  ;;  %v1592_v58 = vpop.f32.mrf.mxu1  ;;  %v1601_v41 = vadd.f32 %v3535_v2, %v1590_v52 }
 0x659   : > { %4012 = vpow2.f32 %v3539_v46  ;;  %v3538_v49 = vmul.f32 -1.442695, %v1599_v48  ;;  %v1600_v44 = vadd.f32 %v3534_v45, %v1549_v42  ;;  %v1602_v63 = vadd.f32 %v3536_v55, %v1592_v58 }
 0x65b   : > { %4014 = vpow2.f32 %v3538_v49  ;;  %v3540_v53 = vmul.f32 -1.442695, %v1600_v44  ;;  %v3542_v5 = vmul.f32 -1.442695, %v1602_v63 }
 0x65d   : > { %4016 = vpow2.f32 %v3540_v53 }
 0x65e   : > { %4018 = vpow2.f32 %v3541_v62 }
 0x664   : > { %v4011_v56 = vpop.eup %4010 }
 0x665   : > { %v1609_v35 = vadd.f32 1.0, %v4011_v56 }
 0x666   : > { %v4013_v4 = vpop.eup %4012 }
 0x667   : > { %4020 = vrcp.f32 %v1609_v35  ;;  %v1621_v6 = vadd.f32 1.0, %v4013_v4 }
 0x668   : > { %v4015_v34 = vpop.eup %4014  ;;  %4022 = vtanh.f32 %v1597_v31 }
 0x669   : > { %4024 = vrcp.f32 %v1621_v6  ;;  %v1610_v30 = vadd.f32 1.0, %v4015_v34  ;;  %v3546_v6 = vld [vmem:[%s4917_s28 + $0x188] sm:$0xff] }
 0x66a   : > { %v4017_v43 = vpop.eup %4016  ;;  %4026 = vpow2.f32 %v3542_v5 }
 0x66b   : > { %4028 = vrcp.f32 %v1610_v30  ;;  %v1622_v36 = vadd.f32 1.0, %v4017_v43  ;;  %v4019_v45 = vpop.eup %4018  ;;  %v3549_v43 = vld [vmem:[%s4917_s28 + $0x1a0] sm:$0xff] }
 0x66c   : > { %4030 = vtanh.f32 %v1601_v41  ;;  %v1635_v48 = vadd.f32 1.0, %v4019_v45 }
 0x66d   : > { %4032 = vrcp.f32 %v1622_v36 }
 0x66e   : > { %4034 = vrcp.f32 %v1635_v48 }
 0x674   : > { %v4021_v8 = vpop.eup %4020 }
 0x675   : > { %v4023_v46 = vpop.eup %4022 }
 0x676   : > { %v4025_v47 = vpop.eup %4024  ;;  %v1643_v49 = vmul.f32 %v4023_v46, %v4021_v8  ;;  %v3550_v46 = vld [vmem:[%s4917_s28 + $0x1a8] sm:$0xff] }
 0x677   : > { %v4027_v42 = vpop.eup %4026  ;;  %v1641_v44 = vmul.f32 %v4025_v47, %v5497_v51 }
 0x678   : > { %v4029_v50 = vpop.eup %4028  ;;  %v1636_v55 = vadd.f32 1.0, %v4027_v42 }
 0x679   : > { %v4031_v52 = vpop.eup %4030  ;;  %v5579_v53 = vadd.f32 %v1643_v49, %v1641_v44 }
 0x67a   : > { %v4033_v54 = vpop.eup %4032  ;;  %v1644_v58 = vmul.f32 %v4031_v52, %v4029_v50  ;;  %v3548_v52 = vld [vmem:[%s4917_s28 + $0x198] sm:$0xff] }
 0x67b   : > { %v1642_v59 = vmul.f32 %v4033_v54, %v5501_v57  ;;  %4036 = vtanh.f32 %v5579_v53  ;;  %v4035_v51 = vpop.eup %4034  ;;  %v3545_v57 = vld [vmem:[%s4917_s28 + $0x180] sm:$0xff] }
 0x67c   : > { %4038 = vrcp.f32 %v1636_v55 }
 0x67d   : > { %v5583_v62 = vadd.f32 %v1644_v58, %v1642_v59  ;;  %v3552_v59 = vld [vmem:[%s4917_s28 + $0x1b8] sm:$0xff] }
 0x67f   : > { %4040 = vtanh.f32 %v5583_v62 }
 0x688   : > { %v4037_v63 = vpop.eup %4036 }
 0x689   : > { %v1649_v56 = vmul.f32 %v4037_v63, %v4035_v51  ;;  %v4039_v31 = vpop.eup %4038  ;;  %v3547_v63 = vld [vmem:[%s4917_s28 + $0x190] sm:$0xff] }
 0x68b   : > { %3543 = vst [vmem:[%s4919_s19 + $0x50] sm:$0xff] %v1649_v56 }
 0x68c   : > { %v4041_v35 = vpop.eup %4040 }
 0x68d   : > { %v1650_v2 = vmul.f32 %v4041_v35, %v4039_v31 }
 0x68f   : > { %3544 = vst [vmem:[%s4919_s19 + $0x58] sm:$0xff] %v1650_v2  ;;  %v1663_v4 = vpack.c.bf16 %v1650_v2, %v1649_v56 }
 0x691   : > { %1697 = vmatmul.mubr.bf16.vlgmr.msra.gmra.mxu0 %v1663_v4  ;;  %1740 = vmatmul.mubr.bf16.vlgmr.msra.gmra.mxu1 %v1663_v4 }
 0x692   : > { %1820 = vmatpush1.bf16.msra.mxu0 %v5327_v32  ;;  %1863 = vmatpush1.bf16.msra.mxu1 %v5333_v9 }
 0x693   : > { %1821 = vmatprep.subr.bf16.mxu0 %v5339_v10  ;;  %1864 = vmatprep.subr.bf16.mxu1 %v5345_v11 }
 0x694   : > { %1851 = vmatprep.mubr.bf16.mxu0 %v4519_v3  ;;  %1894 = vmatprep.mubr.bf16.mxu1 %v4519_v3 }
 0x696   : > { %1822 = vmatpush1.bf16.msra.mxu0 %v5353_v12  ;;  %1865 = vmatpush1.bf16.msra.mxu1 %v5359_v13 }
 0x697   : > { %1823 = vmatprep.subr.bf16.mxu0 %v5365_v14  ;;  %1866 = vmatprep.subr.bf16.mxu1 %v5371_v15 }
 0x69a   : > { %1824 = vmatpush1.bf16.msra.mxu0 %v5377_v16  ;;  %1867 = vmatpush1.bf16.msra.mxu1 %v5383_v1 }
 0x69b   : > { %1825 = vmatprep.subr.bf16.mxu0 %v5389_v17  ;;  %1868 = vmatprep.subr.bf16.mxu1 %v5395_v7 }
 0x69e   : > { %1826 = vmatpush1.bf16.msra.mxu0 %v5401_v18  ;;  %1869 = vmatpush1.bf16.msra.mxu1 %v5407_v19 }
 0x69f   : > { %1827 = vmatprep.subr.bf16.mxu0 %v5413_v20  ;;  %1870 = vmatprep.subr.bf16.mxu1 %v5419_v21 }
 0x6a2   : > { %1828 = vmatpush1.bf16.msra.mxu0 %v5425_v22  ;;  %1871 = vmatpush1.bf16.msra.mxu1 %v5431_v23 }
 0x6a3   : > { %1829 = vmatprep.subr.bf16.mxu0 %v5437_v24  ;;  %1872 = vmatprep.subr.bf16.mxu1 %v5443_v25 }
 0x6a6   : > { %1830 = vmatpush1.bf16.msra.mxu0 %v5449_v26  ;;  %1873 = vmatpush1.bf16.msra.mxu1 %v5532_v61 }
 0x6a7   : > { %1831 = vmatprep.subr.bf16.mxu0 %v5456_v27  ;;  %1874 = vmatprep.subr.bf16.mxu1 %v5539_v37 }
 0x6aa   : > { %1832 = vmatpush1.bf16.msra.mxu0 %v5463_v0  ;;  %1875 = vmatpush1.bf16.msra.mxu1 %v5546_v38 }
 0x6ab   : > { %1833 = vmatprep.subr.bf16.mxu0 %v5470_v28  ;;  %1876 = vmatprep.subr.bf16.mxu1 %v5553_v39 }
 0x6ae   : > { %1834 = vmatpush1.bf16.msra.mxu0 %v5559_v60  ;;  %1877 = vmatpush1.bf16.msra.mxu1 %v5565_v40 }
 0x6af   : > { %1974 = vmatprep.subr.bf16.mxu0 %v5479_v29  ;;  %2017 = vmatprep.subr.bf16.mxu1 %v5485_v33 }
 0x751   : > { %v1698_v5 = vpop.f32.mrf.mxu0  ;;  %v1741_v41 = vpop.f32.mrf.mxu1 }
 0x752   : > { %v1750_v34 = vadd.f32 %v3545_v57, %v1698_v5  ;;  %v1752_v2 = vadd.f32 %v3547_v63, %v1741_v41  ;;  %v3551_v57 = vld [vmem:[%s4917_s28 + $0x1b0] sm:$0xff] }
 0x753   : > { %v1700_v30 = vpop.f32.mrf.mxu0  ;;  %v1743_v48 = vpop.f32.mrf.mxu1 }
 0x754   : > { %v3553_v36 = vmul.f32 -1.442695, %v1750_v34  ;;  %v1751_v45 = vadd.f32 %v3546_v6, %v1700_v30  ;;  %v1753_v58 = vadd.f32 %v3548_v52, %v1743_v48 }
 0x755   : > { %v1702_v8 = vpop.f32.mrf.mxu0  ;;  %v1745_v54 = vpop.f32.mrf.mxu1 }
 0x756   : > { %4042 = vpow2.f32 %v3553_v36  ;;  %v3555_v47 = vmul.f32 -1.442695, %v1751_v45  ;;  %v1754_v42 = vadd.f32 %v3549_v43, %v1702_v8  ;;  %v3557_v56 = vmul.f32 -1.442695, %v1753_v58 }
 0x757   : > { %v1704_v49 = vpop.f32.mrf.mxu0  ;;  %v1747_v51 = vpop.f32.mrf.mxu1  ;;  %v1756_v43 = vadd.f32 %v3551_v57, %v1745_v54 }
 0x758   : > { %4044 = vpow2.f32 %v3555_v47  ;;  %v3554_v44 = vmul.f32 -1.442695, %v1754_v42  ;;  %v1755_v50 = vadd.f32 %v3550_v46, %v1704_v49  ;;  %v1757_v31 = vadd.f32 %v3552_v59, %v1747_v51 }
 0x75a   : > { %4046 = vpow2.f32 %v3554_v44  ;;  %v3556_v55 = vmul.f32 -1.442695, %v1755_v50  ;;  %v3558_v6 = vmul.f32 -1.442695, %v1757_v31 }
 0x75c   : > { %4048 = vpow2.f32 %v3556_v55 }
 0x75d   : > { %4050 = vpow2.f32 %v3557_v56 }
 0x763   : > { %v4043_v35 = vpop.eup %4042 }
 0x764   : > { %v1764_v4 = vadd.f32 1.0, %v4043_v35 }
 0x765   : > { %v4045_v5 = vpop.eup %4044 }
 0x766   : > { %4052 = vrcp.f32 %v1764_v4  ;;  %v1776_v34 = vadd.f32 1.0, %v4045_v5 }
 0x767   : > { %v4047_v30 = vpop.eup %4046  ;;  %4054 = vtanh.f32 %v1752_v2 }
 0x768   : > { %4056 = vrcp.f32 %v1776_v34  ;;  %v1765_v36 = vadd.f32 1.0, %v4047_v30  ;;  %v3562_v34 = vld [vmem:[%s4917_s28 + $0x1c8] sm:$0xff] }
 0x769   : > { %v4049_v45 = vpop.eup %4048  ;;  %4058 = vpow2.f32 %v3558_v6 }
 0x76a   : > { %4060 = vrcp.f32 %v1765_v36  ;;  %v1777_v8 = vadd.f32 1.0, %v4049_v45  ;;  %v4051_v46 = vpop.eup %4050  ;;  %v3565_v45 = vld [vmem:[%s4917_s28 + $0x1e0] sm:$0xff] }
 0x76b   : > { %4062 = vtanh.f32 %v1756_v43  ;;  %v1790_v42 = vadd.f32 1.0, %v4051_v46 }
 0x76c   : > { %4064 = vrcp.f32 %v1777_v8 }
 0x76d   : > { %4066 = vrcp.f32 %v1790_v42 }
 0x773   : > { %v4053_v41 = vpop.eup %4052 }
 0x774   : > { %v4055_v47 = vpop.eup %4054 }
 0x775   : > { %v4057_v48 = vpop.eup %4056  ;;  %v1798_v44 = vmul.f32 %v4055_v47, %v4053_v41  ;;  %v3566_v47 = vld [vmem:[%s4917_s28 + $0x1e8] sm:$0xff] }
 0x776   : > { %v4059_v49 = vpop.eup %4058  ;;  %v1796_v50 = vmul.f32 %v4057_v48, %v5579_v53 }
 0x777   : > { %v4061_v52 = vpop.eup %4060  ;;  %v1791_v59 = vadd.f32 1.0, %v4059_v49 }
 0x778   : > { %v4063_v54 = vpop.eup %4062  ;;  %v5631_v55 = vadd.f32 %v1798_v44, %v1796_v50 }
 0x779   : > { %v4065_v58 = vpop.eup %4064  ;;  %v1799_v51 = vmul.f32 %v4063_v54, %v4061_v52  ;;  %v3564_v54 = vld [vmem:[%s4917_s28 + $0x1d8] sm:$0xff] }
 0x77a   : > { %v1797_v63 = vmul.f32 %v4065_v58, %v5583_v62  ;;  %4068 = vtanh.f32 %v5631_v55  ;;  %v4067_v53 = vpop.eup %4066  ;;  %v3561_v62 = vld [vmem:[%s4917_s28 + $0x1c0] sm:$0xff] }
 0x77b   : > { %4070 = vrcp.f32 %v1791_v59 }
 0x77c   : > { %v5635_v56 = vadd.f32 %v1799_v51, %v1797_v63  ;;  %v3568_v63 = vld [vmem:[%s4917_s28 + $0x1f8] sm:$0xff] }
 0x77e   : > { %4072 = vtanh.f32 %v5635_v56 }
 0x787   : > { %v4069_v31 = vpop.eup %4068 }
 0x788   : > { %v1804_v35 = vmul.f32 %v4069_v31, %v4067_v53  ;;  %v4071_v2 = vpop.eup %4070  ;;  %v3563_v31 = vld [vmem:[%s4917_s28 + $0x1d0] sm:$0xff] }
 0x78a   : > { %3559 = vst [vmem:[%s4919_s19 + $0x60] sm:$0xff] %v1804_v35 }
 0x78b   : > { %v4073_v4 = vpop.eup %4072 }
 0x78c   : > { %v1805_v57 = vmul.f32 %v4073_v4, %v4071_v2 }
 0x78e   : > { %3560 = vst [vmem:[%s4919_s19 + $0x68] sm:$0xff] %v1805_v57  ;;  %v1818_v5 = vpack.c.bf16 %v1805_v57, %v1804_v35 }
 0x790   : > { %1852 = vmatmul.mubr.bf16.vlgmr.msra.gmra.mxu0 %v1818_v5  ;;  %1895 = vmatmul.mubr.bf16.vlgmr.msra.gmra.mxu1 %v1818_v5 }
 0x791   : > { %1975 = vmatpush1.bf16.msra.mxu0 %v5327_v32  ;;  %2018 = vmatpush1.bf16.msra.mxu1 %v5333_v9 }
 0x792   : > { %1976 = vmatprep.subr.bf16.mxu0 %v5339_v10  ;;  %2019 = vmatprep.subr.bf16.mxu1 %v5345_v11 }
 0x793   : > { %2006 = vmatprep.mubr.bf16.mxu0 %v4519_v3  ;;  %2049 = vmatprep.mubr.bf16.mxu1 %v4519_v3 }
 0x795   : > { %1977 = vmatpush1.bf16.msra.mxu0 %v5353_v12  ;;  %2020 = vmatpush1.bf16.msra.mxu1 %v5359_v13 }
 0x796   : > { %1978 = vmatprep.subr.bf16.mxu0 %v5365_v14  ;;  %2021 = vmatprep.subr.bf16.mxu1 %v5371_v15 }
 0x799   : > { %1979 = vmatpush1.bf16.msra.mxu0 %v5377_v16  ;;  %2022 = vmatpush1.bf16.msra.mxu1 %v5383_v1 }
 0x79a   : > { %1980 = vmatprep.subr.bf16.mxu0 %v5389_v17  ;;  %2023 = vmatprep.subr.bf16.mxu1 %v5395_v7 }
 0x79d   : > { %1981 = vmatpush1.bf16.msra.mxu0 %v5401_v18  ;;  %2024 = vmatpush1.bf16.msra.mxu1 %v5407_v19 }
 0x79e   : > { %1982 = vmatprep.subr.bf16.mxu0 %v5413_v20  ;;  %2025 = vmatprep.subr.bf16.mxu1 %v5419_v21 }
 0x7a1   : > { %1983 = vmatpush1.bf16.msra.mxu0 %v5425_v22  ;;  %2026 = vmatpush1.bf16.msra.mxu1 %v5431_v23 }
 0x7a2   : > { %1984 = vmatprep.subr.bf16.mxu0 %v5437_v24  ;;  %2027 = vmatprep.subr.bf16.mxu1 %v5443_v25 }
 0x7a5   : > { %1985 = vmatpush1.bf16.msra.mxu0 %v5449_v26  ;;  %2028 = vmatpush1.bf16.msra.mxu1 %v5532_v61 }
 0x7a6   : > { %1986 = vmatprep.subr.bf16.mxu0 %v5456_v27  ;;  %2029 = vmatprep.subr.bf16.mxu1 %v5539_v37 }
 0x7a9   : > { %1987 = vmatpush1.bf16.msra.mxu0 %v5463_v0  ;;  %2030 = vmatpush1.bf16.msra.mxu1 %v5546_v38 }
 0x7aa   : > { %1988 = vmatprep.subr.bf16.mxu0 %v5470_v28  ;;  %2031 = vmatprep.subr.bf16.mxu1 %v5553_v39 }
 0x7ad   : > { %1989 = vmatpush1.bf16.msra.mxu0 %v5559_v60  ;;  %2032 = vmatpush1.bf16.msra.mxu1 %v5565_v40 }
 0x7ae   : > { %2129 = vmatprep.subr.bf16.mxu0 %v5479_v29  ;;  %2172 = vmatprep.subr.bf16.mxu1 %v5485_v33 }
 0x850   : > { %v1853_v6 = vpop.f32.mrf.mxu0  ;;  %v1896_v43 = vpop.f32.mrf.mxu1 }
 0x851   : > { %v1905_v30 = vadd.f32 %v3561_v62, %v1853_v6  ;;  %v1907_v57 = vadd.f32 %v3563_v31, %v1896_v43  ;;  %v3567_v62 = vld [vmem:[%s4917_s28 + $0x1f0] sm:$0xff] }
 0x852   : > { %v1855_v36 = vpop.f32.mrf.mxu0  ;;  %v1898_v42 = vpop.f32.mrf.mxu1 }
 0x853   : > { %v3569_v8 = vmul.f32 -1.442695, %v1905_v30  ;;  %v1906_v46 = vadd.f32 %v3562_v34, %v1855_v36  ;;  %v1908_v51 = vadd.f32 %v3564_v54, %v1898_v42 }
 0x854   : > { %v1857_v41 = vpop.f32.mrf.mxu0  ;;  %v1900_v58 = vpop.f32.mrf.mxu1 }
 0x855   : > { %4074 = vpow2.f32 %v3569_v8  ;;  %v3571_v48 = vmul.f32 -1.442695, %v1906_v46  ;;  %v1909_v49 = vadd.f32 %v3565_v45, %v1857_v41  ;;  %v3573_v35 = vmul.f32 -1.442695, %v1908_v51 }
 0x856   : > { %v1859_v44 = vpop.f32.mrf.mxu0  ;;  %v1902_v53 = vpop.f32.mrf.mxu1  ;;  %v1911_v45 = vadd.f32 %v3567_v62, %v1900_v58 }
 0x857   : > { %4076 = vpow2.f32 %v3571_v48  ;;  %v3570_v50 = vmul.f32 -1.442695, %v1909_v49  ;;  %v1910_v52 = vadd.f32 %v3566_v47, %v1859_v44  ;;  %v1912_v2 = vadd.f32 %v3568_v63, %v1902_v53 }
 0x859   : > { %4078 = vpow2.f32 %v3570_v50  ;;  %v3572_v59 = vmul.f32 -1.442695, %v1910_v52  ;;  %v3574_v34 = vmul.f32 -1.442695, %v1912_v2 }
 0x85b   : > { %4080 = vpow2.f32 %v3572_v59 }
 0x85c   : > { %4082 = vpow2.f32 %v3573_v35 }
 0x862   : > { %v4075_v4 = vpop.eup %4074 }
 0x863   : > { %v1919_v5 = vadd.f32 1.0, %v4075_v4 }
 0x864   : > { %v4077_v6 = vpop.eup %4076 }
 0x865   : > { %4084 = vrcp.f32 %v1919_v5  ;;  %v1931_v30 = vadd.f32 1.0, %v4077_v6 }
 0x866   : > { %v4079_v36 = vpop.eup %4078  ;;  %4086 = vtanh.f32 %v1907_v57 }
 0x867   : > { %4088 = vrcp.f32 %v1931_v30  ;;  %v1920_v8 = vadd.f32 1.0, %v4079_v36  ;;  %v3583_v36 = vld [vmem:[%s4917_s28 + $0x230] sm:$0xff] }
 0x868   : > { %v4081_v46 = vpop.eup %4080  ;;  %4090 = vpow2.f32 %v3574_v34 }
 0x869   : > { %4092 = vrcp.f32 %v1920_v8  ;;  %v1932_v41 = vadd.f32 1.0, %v4081_v46  ;;  %v4083_v47 = vpop.eup %4082 }
 0x86a   : > { %4094 = vtanh.f32 %v1911_v45  ;;  %v1945_v49 = vadd.f32 1.0, %v4083_v47 }
 0x86b   : > { %4096 = vrcp.f32 %v1932_v41 }
 0x86c   : > { %4098 = vrcp.f32 %v1945_v49 }
 0x872   : > { %v4085_v43 = vpop.eup %4084 }
 0x873   : > { %v4087_v48 = vpop.eup %4086 }
 0x874   : > { %v4089_v42 = vpop.eup %4088  ;;  %v1953_v50 = vmul.f32 %v4087_v48, %v4085_v43 }
 0x875   : > { %v4091_v44 = vpop.eup %4090  ;;  %v1951_v52 = vmul.f32 %v4089_v42, %v5631_v55 }
 0x876   : > { %v4093_v54 = vpop.eup %4092  ;;  %v1946_v63 = vadd.f32 1.0, %v4091_v44 }
 0x877   : > { %v4095_v58 = vpop.eup %4094  ;;  %v5683_v59 = vadd.f32 %v1953_v50, %v1951_v52 }
 0x878   : > { %v4097_v51 = vpop.eup %4096  ;;  %v1954_v53 = vmul.f32 %v4095_v58, %v4093_v54 }
 0x879   : > { %v1952_v31 = vmul.f32 %v4097_v51, %v5635_v56  ;;  %4100 = vtanh.f32 %v5683_v59  ;;  %v4099_v55 = vpop.eup %4098 }
 0x87a   : > { %4102 = vrcp.f32 %v1946_v63 }
 0x87b   : > { %v5687_v35 = vadd.f32 %v1954_v53, %v1952_v31 }
 0x87d   : > { %4104 = vtanh.f32 %v5687_v35 }
 0x886   : > { %v4101_v2 = vpop.eup %4100 }
 0x887   : > { %v1959_v4 = vmul.f32 %v4101_v2, %v4099_v55  ;;  %v4103_v57 = vpop.eup %4102 }
 0x889   : > { %3575 = vst [vmem:[%s4919_s19 + $0x70] sm:$0xff] %v1959_v4 }
 0x88a   : > { %v4105_v5 = vpop.eup %4104 }
 0x88b   : > { %v1960_v62 = vmul.f32 %v4105_v5, %v4103_v57 }
 0x88d   : > { %3576 = vst [vmem:[%s4919_s19 + $0x78] sm:$0xff] %v1960_v62  ;;  %v1973_v6 = vpack.c.bf16 %v1960_v62, %v1959_v4 }
 0x88f   : > { %2007 = vmatmul.mubr.bf16.vlgmr.msra.gmra.mxu0 %v1973_v6  ;;  %2050 = vmatmul.mubr.bf16.vlgmr.msra.gmra.mxu1 %v1973_v6 }
 0x890   : > { %2130 = vmatpush1.bf16.msra.mxu0 %v5327_v32  ;;  %2173 = vmatpush1.bf16.msra.mxu1 %v5333_v9  ;;  %v3577_v32 = vld [vmem:[%s4917_s28 + $0x200] sm:$0xff] }
 0x891   : > { %2131 = vmatprep.subr.bf16.mxu0 %v5339_v10  ;;  %2174 = vmatprep.subr.bf16.mxu1 %v5345_v11  ;;  %v3578_v10 = vld [vmem:[%s4917_s28 + $0x208] sm:$0xff] }
 0x892   : > { %2161 = vmatprep.mubr.bf16.mxu0 %v4519_v3  ;;  %2204 = vmatprep.mubr.bf16.mxu1 %v4519_v3 }
 0x894   : > { %2132 = vmatpush1.bf16.msra.mxu0 %v5353_v12  ;;  %2175 = vmatpush1.bf16.msra.mxu1 %v5359_v13 }
 0x895   : > { %2133 = vmatprep.subr.bf16.mxu0 %v5365_v14  ;;  %2176 = vmatprep.subr.bf16.mxu1 %v5371_v15  ;;  %v3581_v14 = vld [vmem:[%s4917_s28 + $0x220] sm:$0xff] }
 0x898   : > { %2134 = vmatpush1.bf16.msra.mxu0 %v5377_v16  ;;  %2177 = vmatpush1.bf16.msra.mxu1 %v5383_v1 }
 0x899   : > { %2135 = vmatprep.subr.bf16.mxu0 %v5389_v17  ;;  %2178 = vmatprep.subr.bf16.mxu1 %v5395_v7  ;;  %v3582_v17 = vld [vmem:[%s4917_s28 + $0x228] sm:$0xff] }
 0x89c   : > { %2136 = vmatpush1.bf16.msra.mxu0 %v5401_v18  ;;  %2179 = vmatpush1.bf16.msra.mxu1 %v5407_v19 }
 0x89d   : > { %2137 = vmatprep.subr.bf16.mxu0 %v5413_v20  ;;  %2180 = vmatprep.subr.bf16.mxu1 %v5419_v21 }
 0x8a0   : > { %2138 = vmatpush1.bf16.msra.mxu0 %v5425_v22  ;;  %2181 = vmatpush1.bf16.msra.mxu1 %v5431_v23  ;;  %v3580_v23 = vld [vmem:[%s4917_s28 + $0x218] sm:$0xff] }
 0x8a1   : > { %2139 = vmatprep.subr.bf16.mxu0 %v5437_v24  ;;  %2182 = vmatprep.subr.bf16.mxu1 %v5443_v25 }
 0x8a4   : > { %2140 = vmatpush1.bf16.msra.mxu0 %v5449_v26  ;;  %2183 = vmatpush1.bf16.msra.mxu1 %v5532_v61 }
 0x8a5   : > { %2141 = vmatprep.subr.bf16.mxu0 %v5456_v27  ;;  %2184 = vmatprep.subr.bf16.mxu1 %v5539_v37  ;;  %v3584_v27 = vld [vmem:[%s4917_s28 + $0x238] sm:$0xff] }
 0x8a8   : > { %2142 = vmatpush1.bf16.msra.mxu0 %v5463_v0  ;;  %2185 = vmatpush1.bf16.msra.mxu1 %v5546_v38 }
 0x8a9   : > { %2143 = vmatprep.subr.bf16.mxu0 %v5470_v28  ;;  %2186 = vmatprep.subr.bf16.mxu1 %v5553_v39  ;;  %v3579_v28 = vld [vmem:[%s4917_s28 + $0x210] sm:$0xff] }
 0x8ac   : > { %2144 = vmatpush1.bf16.msra.mxu0 %v5559_v60  ;;  %2187 = vmatpush1.bf16.msra.mxu1 %v5565_v40 }
 0x8ad   : > { %2284 = vmatprep.subr.bf16.mxu0 %v5479_v29  ;;  %2327 = vmatprep.subr.bf16.mxu1 %v5485_v33 }
 0x94f   : > { %v2008_v9 = vpop.f32.mrf.mxu0  ;;  %v2051_v12 = vpop.f32.mrf.mxu1 }
 0x950   : > { %v2060_v11 = vadd.f32 %v3577_v32, %v2008_v9  ;;  %v2062_v34 = vadd.f32 %v3579_v28, %v2051_v12  ;;  %v5863_v28 = vld [vmem:[%s6329_s1 + $0x4c] ss:$16 sps:$4 sm:$0xff]  }
 0x951   : > { %v2010_v13 = vpop.f32.mrf.mxu0  ;;  %v2053_v18 = vpop.f32.mrf.mxu1 }
 0x952   : > { %v3585_v15 = vmul.f32 -1.442695, %v2060_v11  ;;  %v2061_v16 = vadd.f32 %v3578_v10, %v2010_v13  ;;  %v2063_v26 = vadd.f32 %v3580_v23, %v2053_v18  ;;  %v5753_v13 = vld [vmem:[%s6329_s1 + $0xe8] ss:$16 sps:$4 sm:$0xff]   ;;  %v5797_v18 = vld [vmem:[%s6329_s1 + $0xa0] ss:$16 sps:$4 sm:$0xff]  }
 0x953   : > { %v2012_v1 = vpop.f32.mrf.mxu0  ;;  %v2055_v24 = vpop.f32.mrf.mxu1  ;;  %v5827_v23 = vld [vmem:[%s6329_s1 + $0x88] ss:$16 sps:$4 sm:$0xff]  }
 0x954   : > { %4106 = vpow2.f32 %v3585_v15  ;;  %v3587_v7 = vmul.f32 -1.442695, %v2061_v16  ;;  %v2064_v19 = vadd.f32 %v3581_v14, %v2012_v1  ;;  %v3589_v29 = vmul.f32 -1.442695, %v2063_v26  ;;  %v5759_v14 = vld [vmem:[%s6329_s1 + $0xc4] ss:$16 sps:$4 sm:$0xff]  }
 0x955   : > { %v2014_v20 = vpop.f32.mrf.mxu0  ;;  %v2057_v0 = vpop.f32.mrf.mxu1  ;;  %v2066_v47 = vadd.f32 %v3583_v36, %v2055_v24  ;;  %v5765_v15 = vld [vmem:[%s6329_s1 + $0xcc] ss:$16 sps:$4 sm:$0xff]   ;;  %v5773_v16 = vld [vmem:[%s6329_s1 + $0xc0] ss:$16 sps:$4 sm:$0xff]   ;;  %v5779_v1 = vld [vmem:[%s6329_s1 + $0xc8] ss:$16 sps:$4 sm:$0xff]  }
 0x956   : > { %4108 = vpow2.f32 %v3587_v7  ;;  %v3586_v21 = vmul.f32 -1.442695, %v2064_v19  ;;  %v2065_v22 = vadd.f32 %v3582_v17, %v2014_v20  ;;  %v2067_v33 = vadd.f32 %v3584_v27, %v2057_v0  ;;  %v5785_v17 = vld [vmem:[%s6329_s1 + $0xa4] ss:$16 sps:$4 sm:$0xff]   ;;  %v5791_v7 = vld [vmem:[%s6329_s1 + $0xac] ss:$16 sps:$4 sm:$0xff]  }
 0x957   : > { %v5803_v19 = vld [vmem:[%s6329_s1 + $0xa8] ss:$16 sps:$4 sm:$0xff]   ;;  %v5809_v20 = vld [vmem:[%s6329_s1 + $0x84] ss:$16 sps:$4 sm:$0xff]   ;;  %v5845_v26 = vld [vmem:[%s6329_s1 + $0x60] ss:$16 sps:$4 sm:$0xff]  }
 0x958   : > { %4110 = vpow2.f32 %v3586_v21  ;;  %v3588_v25 = vmul.f32 -1.442695, %v2065_v22  ;;  %v3590_v8 = vmul.f32 -1.442695, %v2067_v33  ;;  %v5815_v21 = vld [vmem:[%s6329_s1 + $0x8c] ss:$16 sps:$4 sm:$0xff]  }
 0x959   : > { %v5821_v22 = vld [vmem:[%s6329_s1 + $0x80] ss:$16 sps:$4 sm:$0xff]   ;;  %v5833_v24 = vld [vmem:[%s6329_s1 + $0x64] ss:$16 sps:$4 sm:$0xff]   ;;  %v5851_v27 = vld [vmem:[%s6329_s1 + $0x68] ss:$16 sps:$4 sm:$0xff]  }
 0x95a   : > { %4112 = vpow2.f32 %v3588_v25  ;;  %v5839_v25 = vld [vmem:[%s6329_s1 + $0x6c] ss:$16 sps:$4 sm:$0xff]   ;;  %v5857_v0 = vld [vmem:[%s6329_s1 + $0x44] ss:$16 sps:$4 sm:$0xff]  }
 0x95b   : > { %4114 = vpow2.f32 %v3589_v29  ;;  %v5869_v29 = vld [vmem:[%s6329_s1 + $0x40] ss:$16 sps:$4 sm:$0xff]   ;;  %v5876_v33 = vld [vmem:[%s6329_s1 + $0x24] ss:$16 sps:$4 sm:$0xff]  }
 0x961   : > { %v4107_v56 = vpop.eup %4106 }
 0x962   : > { %v2074_v30 = vadd.f32 1.0, %v4107_v56  ;;  %v5883_v56 = vld [vmem:[%s6329_s1 + $0x20] ss:$16 sps:$4 sm:$0xff]  }
 0x963   : > { %v4109_v45 = vpop.eup %4108 }
 0x964   : > { %4116 = vrcp.f32 %v2074_v30  ;;  %v2086_v46 = vadd.f32 1.0, %v4109_v45  ;;  %v3597_v45 = vld [vmem:[%s4917_s28 + $0x260] sm:$0xff] }
 0x965   : > { %v4111_v41 = vpop.eup %4110  ;;  %4118 = vtanh.f32 %v2062_v34 }
 0x966   : > { %4120 = vrcp.f32 %v2086_v46  ;;  %v2075_v43 = vadd.f32 1.0, %v4111_v41 }
 0x967   : > { %v4113_v48 = vpop.eup %4112  ;;  %4122 = vpow2.f32 %v3590_v8 }
 0x968   : > { %4124 = vrcp.f32 %v2075_v43  ;;  %v2087_v42 = vadd.f32 1.0, %v4113_v48  ;;  %v4115_v49 = vpop.eup %4114 }
 0x969   : > { %4126 = vtanh.f32 %v2066_v47  ;;  %v2100_v54 = vadd.f32 1.0, %v4115_v49  ;;  %v3598_v47 = vld [vmem:[%s4917_s28 + $0x268] sm:$0xff] }
 0x96a   : > { %4128 = vrcp.f32 %v2087_v42 }
 0x96b   : > { %4130 = vrcp.f32 %v2100_v54 }
 0x971   : > { %v4117_v44 = vpop.eup %4116 }
 0x972   : > { %v4119_v50 = vpop.eup %4118 }
 0x973   : > { %v4121_v52 = vpop.eup %4120  ;;  %v2108_v51 = vmul.f32 %v4119_v50, %v4117_v44 }
 0x974   : > { %v4123_v58 = vpop.eup %4122  ;;  %v2106_v63 = vmul.f32 %v4121_v52, %v5683_v59  ;;  %v3596_v52 = vld [vmem:[%s4917_s28 + $0x258] sm:$0xff] }
 0x975   : > { %v4125_v53 = vpop.eup %4124  ;;  %v2101_v4 = vadd.f32 1.0, %v4123_v58 }
 0x976   : > { %v4127_v31 = vpop.eup %4126  ;;  %v5735_v55 = vadd.f32 %v2108_v51, %v2106_v63  ;;  %v3600_v63 = vld [vmem:[%s4917_s28 + $0x278] sm:$0xff] }
 0x977   : > { %v4129_v2 = vpop.eup %4128  ;;  %v2109_v57 = vmul.f32 %v4127_v31, %v4125_v53  ;;  %v3595_v31 = vld [vmem:[%s4917_s28 + $0x250] sm:$0xff] }
 0x978   : > { %v2107_v5 = vmul.f32 %v4129_v2, %v5687_v35  ;;  %4132 = vtanh.f32 %v5735_v55  ;;  %v4131_v59 = vpop.eup %4130  ;;  %v5747_v35 = vld [vmem:[%s6329_s1 + $0xe0] ss:$16 sps:$4 sm:$0xff]  }
 0x979   : > { %4134 = vrcp.f32 %v2101_v4 }
 0x97a   : > { %v5739_v62 = vadd.f32 %v2109_v57, %v2107_v5 }
 0x97c   : > { %4136 = vtanh.f32 %v5739_v62 }
 0x985   : > { %v4133_v6 = vpop.eup %4132 }
 0x986   : > { %v2114_v32 = vmul.f32 %v4133_v6, %v4131_v59  ;;  %v4135_v9 = vpop.eup %4134  ;;  %v3599_v6 = vld [vmem:[%s4917_s28 + $0x270] sm:$0xff] }
 0x988   : > { %3591 = vst [vmem:[%s4919_s19 + $0x80] sm:$0xff] %v2114_v32 }
 0x989   : > { %v4137_v10 = vpop.eup %4136 }
 0x98a   : > { %v2115_v11 = vmul.f32 %v4137_v10, %v4135_v9 }
 0x98c   : > { %3592 = vst [vmem:[%s4919_s19 + $0x88] sm:$0xff] %v2115_v11  ;;  %v2128_v12 = vpack.c.bf16 %v2115_v11, %v2114_v32 }
 0x98e   : > { %2162 = vmatmul.mubr.bf16.vlgmr.msra.gmra.mxu0 %v2128_v12  ;;  %2205 = vmatmul.mubr.bf16.vlgmr.msra.gmra.mxu1 %v2128_v12 }
 0x98f   : > { %2285 = vmatpush1.bf16.msra.mxu0 %v5747_v35  ;;  %2328 = vmatpush1.bf16.msra.mxu1 %v5753_v13 }
 0x990   : > { %2286 = vmatprep.subr.bf16.mxu0 %v5759_v14  ;;  %2329 = vmatprep.subr.bf16.mxu1 %v5765_v15 }
 0x991   : > { %2316 = vmatprep.mubr.bf16.mxu0 %v4519_v3  ;;  %2359 = vmatprep.mubr.bf16.mxu1 %v4519_v3 }
 0x993   : > { %2287 = vmatpush1.bf16.msra.mxu0 %v5773_v16  ;;  %2330 = vmatpush1.bf16.msra.mxu1 %v5779_v1 }
 0x994   : > { %2288 = vmatprep.subr.bf16.mxu0 %v5785_v17  ;;  %2331 = vmatprep.subr.bf16.mxu1 %v5791_v7 }
 0x997   : > { %2289 = vmatpush1.bf16.msra.mxu0 %v5797_v18  ;;  %2332 = vmatpush1.bf16.msra.mxu1 %v5803_v19 }
 0x998   : > { %2290 = vmatprep.subr.bf16.mxu0 %v5809_v20  ;;  %2333 = vmatprep.subr.bf16.mxu1 %v5815_v21 }
 0x99b   : > { %2291 = vmatpush1.bf16.msra.mxu0 %v5821_v22  ;;  %2334 = vmatpush1.bf16.msra.mxu1 %v5827_v23 }
 0x99c   : > { %2292 = vmatprep.subr.bf16.mxu0 %v5833_v24  ;;  %2335 = vmatprep.subr.bf16.mxu1 %v5839_v25 }
 0x99f   : > { %2293 = vmatpush1.bf16.msra.mxu0 %v5845_v26  ;;  %2336 = vmatpush1.bf16.msra.mxu1 %v5851_v27 }
 0x9a0   : > { %2294 = vmatprep.subr.bf16.mxu0 %v5857_v0  ;;  %2337 = vmatprep.subr.bf16.mxu1 %v5863_v28 }
 0x9a3   : > { %2295 = vmatpush1.bf16.msra.mxu0 %v5869_v29  ;;  %2338 = vmatpush1.bf16.msra.mxu1 %v5532_v61  ;;  %v5890_v61 = vld [vmem:[%s6329_s1 + $0x4] ss:$16 sps:$4 sm:$0xff]  }
 0x9a4   : > { %2296 = vmatprep.subr.bf16.mxu0 %v5876_v33  ;;  %2339 = vmatprep.subr.bf16.mxu1 %v5539_v37  ;;  %v5899_v37 = vld [vmem:[%s6329_s1 + $0xe4] ss:$16 sps:$4 sm:$0xff]  }
 0x9a7   : > { %2297 = vmatpush1.bf16.msra.mxu0 %v5883_v56  ;;  %2340 = vmatpush1.bf16.msra.mxu1 %v5546_v38  ;;  %v5905_v38 = vld [vmem:[%s6329_s1 + $0xec] ss:$16 sps:$4 sm:$0xff]  }
 0x9a8   : > { %2298 = vmatprep.subr.bf16.mxu0 %v5890_v61  ;;  %2341 = vmatprep.subr.bf16.mxu1 %v5553_v39  ;;  %v3593_v39 = vld [vmem:[%s4917_s28 + $0x240] sm:$0xff] }
 0x9ab   : > { %2299 = vmatpush1.bf16.msra.mxu0 %v5559_v60  ;;  %2342 = vmatpush1.bf16.msra.mxu1 %v5565_v40  ;;  %v3594_v60 = vld [vmem:[%s4917_s28 + $0x248] sm:$0xff] }
 0x9ac   : > { %2439 = vmatprep.subr.bf16.mxu0 %v5899_v37  ;;  %2482 = vmatprep.subr.bf16.mxu1 %v5905_v38 }
 0xa4e   : > { %v2163_v34 = vpop.f32.mrf.mxu0  ;;  %v2206_v40 = vpop.f32.mrf.mxu1 }
 0xa4f   : > { %v2215_v30 = vadd.f32 %v3593_v39, %v2163_v34  ;;  %v2217_v5 = vadd.f32 %v3595_v31, %v2206_v40 }
 0xa50   : > { %v2165_v36 = vpop.f32.mrf.mxu0  ;;  %v2208_v48 = vpop.f32.mrf.mxu1 }
 0xa51   : > { %v3601_v8 = vmul.f32 -1.442695, %v2215_v30  ;;  %v2216_v46 = vadd.f32 %v3594_v60, %v2165_v36  ;;  %v2218_v51 = vadd.f32 %v3596_v52, %v2208_v48 }
 0xa52   : > { %v2167_v41 = vpop.f32.mrf.mxu0  ;;  %v2210_v54 = vpop.f32.mrf.mxu1 }
 0xa53   : > { %4138 = vpow2.f32 %v3601_v8  ;;  %v3603_v43 = vmul.f32 -1.442695, %v2216_v46  ;;  %v2219_v42 = vadd.f32 %v3597_v45, %v2167_v41  ;;  %v3605_v2 = vmul.f32 -1.442695, %v2218_v51 }
 0xa54   : > { %v2169_v49 = vpop.f32.mrf.mxu0  ;;  %v2212_v53 = vpop.f32.mrf.mxu1  ;;  %v2221_v12 = vadd.f32 %v3599_v6, %v2210_v54  ;;  %v5985_v6 = vld [vmem:[%s6329_s1 + $0x8] ss:$16 sps:$4 sm:$0xff]  }
 0xa55   : > { %4140 = vpow2.f32 %v3603_v43  ;;  %v3602_v44 = vmul.f32 -1.442695, %v2219_v42  ;;  %v2220_v50 = vadd.f32 %v3598_v47, %v2169_v49  ;;  %v2222_v4 = vadd.f32 %v3600_v63, %v2212_v53 }
 0xa57   : > { %4142 = vpow2.f32 %v3602_v44  ;;  %v3604_v58 = vmul.f32 -1.442695, %v2220_v50  ;;  %v3606_v9 = vmul.f32 -1.442695, %v2222_v4  ;;  %v5959_v4 = vld [vmem:[%s6329_s1 + $0x2c] ss:$16 sps:$4 sm:$0xff]  }
 0xa59   : > { %4144 = vpow2.f32 %v3604_v58 }
 0xa5a   : > { %4146 = vpow2.f32 %v3605_v2 }
 0xa60   : > { %v4139_v57 = vpop.eup %4138 }
 0xa61   : > { %v2229_v59 = vadd.f32 1.0, %v4139_v57  ;;  %v5966_v57 = vld [vmem:[%s6329_s1 + $0x28] ss:$16 sps:$4 sm:$0xff]  }
 0xa62   : > { %v4141_v32 = vpop.eup %4140 }
 0xa63   : > { %4148 = vrcp.f32 %v2229_v59  ;;  %v2241_v10 = vadd.f32 1.0, %v4141_v32  ;;  %v5979_v59 = vld [vmem:[%s6329_s1] ss:$16 sps:$4 sm:$0xff]  }
 0xa64   : > { %v4143_v11 = vpop.eup %4142  ;;  %4150 = vtanh.f32 %v2217_v5  ;;  %v5973_v5 = vld [vmem:[%s6329_s1 + $0xc] ss:$16 sps:$4 sm:$0xff]   ;;  %v3609_v32 = vld [vmem:[%s4917_s28 + $0x280] sm:$0xff] }
 0xa65   : > { %4152 = vrcp.f32 %v2241_v10  ;;  %v2230_v39 = vadd.f32 1.0, %v4143_v11  ;;  %v3610_v10 = vld [vmem:[%s4917_s28 + $0x288] sm:$0xff] }
 0xa66   : > { %v4145_v34 = vpop.eup %4144  ;;  %4154 = vpow2.f32 %v3606_v9 }
 0xa67   : > { %4156 = vrcp.f32 %v2230_v39  ;;  %v2242_v60 = vadd.f32 1.0, %v4145_v34  ;;  %v4147_v30 = vpop.eup %4146  ;;  %v3613_v34 = vld [vmem:[%s4917_s28 + $0x2a0] sm:$0xff] }
 0xa68   : > { %4158 = vtanh.f32 %v2221_v12  ;;  %v2255_v8 = vadd.f32 1.0, %v4147_v30 }
 0xa69   : > { %4160 = vrcp.f32 %v2242_v60 }
 0xa6a   : > { %4162 = vrcp.f32 %v2255_v8 }
 0xa70   : > { %v4149_v40 = vpop.eup %4148 }
 0xa71   : > { %v4151_v36 = vpop.eup %4150 }
 0xa72   : > { %v4153_v45 = vpop.eup %4152  ;;  %v2263_v41 = vmul.f32 %v4151_v36, %v4149_v40  ;;  %v3614_v36 = vld [vmem:[%s4917_s28 + $0x2a8] sm:$0xff] }
 0xa73   : > { %v4155_v46 = vpop.eup %4154  ;;  %v2261_v47 = vmul.f32 %v4153_v45, %v5735_v55 }
 0xa74   : > { %v4157_v43 = vpop.eup %4156  ;;  %v2256_v44 = vadd.f32 1.0, %v4155_v46 }
 0xa75   : > { %v4159_v48 = vpop.eup %4158  ;;  %v5917_v42 = vadd.f32 %v2263_v41, %v2261_v47 }
 0xa76   : > { %v4161_v49 = vpop.eup %4160  ;;  %v2264_v50 = vmul.f32 %v4159_v48, %v4157_v43  ;;  %v3612_v48 = vld [vmem:[%s4917_s28 + $0x298] sm:$0xff] }
 0xa77   : > { %v2262_v52 = vmul.f32 %v4161_v49, %v5739_v62  ;;  %4164 = vtanh.f32 %v5917_v42  ;;  %v4163_v55 = vpop.eup %4162  ;;  %v5952_v62 = vld [vmem:[%s6329_s1 + $0x48] ss:$16 sps:$4 sm:$0xff]  }
 0xa78   : > { %4166 = vrcp.f32 %v2256_v44 }
 0xa79   : > { %v5921_v54 = vadd.f32 %v2264_v50, %v2262_v52  ;;  %v3616_v52 = vld [vmem:[%s4917_s28 + $0x2b8] sm:$0xff] }
 0xa7b   : > { %4168 = vtanh.f32 %v5921_v54 }
 0xa84   : > { %v4165_v58 = vpop.eup %4164 }
 0xa85   : > { %v2269_v51 = vmul.f32 %v4165_v58, %v4163_v55  ;;  %v4167_v63 = vpop.eup %4166  ;;  %v3611_v58 = vld [vmem:[%s4917_s28 + $0x290] sm:$0xff] }
 0xa87   : > { %3607 = vst [vmem:[%s4919_s19 + $0x90] sm:$0xff] %v2269_v51 }
 0xa88   : > { %v4169_v53 = vpop.eup %4168 }
 0xa89   : > { %v2270_v31 = vmul.f32 %v4169_v53, %v4167_v63 }
 0xa8b   : > { %3608 = vst [vmem:[%s4919_s19 + $0x98] sm:$0xff] %v2270_v31  ;;  %v2283_v2 = vpack.c.bf16 %v2270_v31, %v2269_v51 }
 0xa8d   : > { %2317 = vmatmul.mubr.bf16.vlgmr.msra.gmra.mxu0 %v2283_v2  ;;  %2360 = vmatmul.mubr.bf16.vlgmr.msra.gmra.mxu1 %v2283_v2 }
 0xa8e   : > { %2440 = vmatpush1.bf16.msra.mxu0 %v5747_v35  ;;  %2483 = vmatpush1.bf16.msra.mxu1 %v5753_v13 }
 0xa8f   : > { %2441 = vmatprep.subr.bf16.mxu0 %v5759_v14  ;;  %2484 = vmatprep.subr.bf16.mxu1 %v5765_v15 }
 0xa90   : > { %2471 = vmatprep.mubr.bf16.mxu0 %v4519_v3  ;;  %2514 = vmatprep.mubr.bf16.mxu1 %v4519_v3 }
 0xa92   : > { %2442 = vmatpush1.bf16.msra.mxu0 %v5773_v16  ;;  %2485 = vmatpush1.bf16.msra.mxu1 %v5779_v1 }
 0xa93   : > { %2443 = vmatprep.subr.bf16.mxu0 %v5785_v17  ;;  %2486 = vmatprep.subr.bf16.mxu1 %v5791_v7 }
 0xa96   : > { %2444 = vmatpush1.bf16.msra.mxu0 %v5797_v18  ;;  %2487 = vmatpush1.bf16.msra.mxu1 %v5803_v19 }
 0xa97   : > { %2445 = vmatprep.subr.bf16.mxu0 %v5809_v20  ;;  %2488 = vmatprep.subr.bf16.mxu1 %v5815_v21 }
 0xa9a   : > { %2446 = vmatpush1.bf16.msra.mxu0 %v5821_v22  ;;  %2489 = vmatpush1.bf16.msra.mxu1 %v5827_v23 }
 0xa9b   : > { %2447 = vmatprep.subr.bf16.mxu0 %v5833_v24  ;;  %2490 = vmatprep.subr.bf16.mxu1 %v5839_v25 }
 0xa9e   : > { %2448 = vmatpush1.bf16.msra.mxu0 %v5845_v26  ;;  %2491 = vmatpush1.bf16.msra.mxu1 %v5851_v27 }
 0xa9f   : > { %2449 = vmatprep.subr.bf16.mxu0 %v5857_v0  ;;  %2492 = vmatprep.subr.bf16.mxu1 %v5863_v28 }
 0xaa2   : > { %2450 = vmatpush1.bf16.msra.mxu0 %v5869_v29  ;;  %2493 = vmatpush1.bf16.msra.mxu1 %v5952_v62 }
 0xaa3   : > { %2451 = vmatprep.subr.bf16.mxu0 %v5876_v33  ;;  %2494 = vmatprep.subr.bf16.mxu1 %v5959_v4 }
 0xaa6   : > { %2452 = vmatpush1.bf16.msra.mxu0 %v5883_v56  ;;  %2495 = vmatpush1.bf16.msra.mxu1 %v5966_v57 }
 0xaa7   : > { %2453 = vmatprep.subr.bf16.mxu0 %v5890_v61  ;;  %2496 = vmatprep.subr.bf16.mxu1 %v5973_v5 }
 0xaaa   : > { %2454 = vmatpush1.bf16.msra.mxu0 %v5979_v59  ;;  %2497 = vmatpush1.bf16.msra.mxu1 %v5985_v6 }
 0xaab   : > { %2594 = vmatprep.subr.bf16.mxu0 %v5899_v37  ;;  %2637 = vmatprep.subr.bf16.mxu1 %v5905_v38 }
 0xb4d   : > { %v2318_v9 = vpop.f32.mrf.mxu0  ;;  %v2361_v12 = vpop.f32.mrf.mxu1 }
 0xb4e   : > { %v2370_v11 = vadd.f32 %v3609_v32, %v2318_v9  ;;  %v2372_v31 = vadd.f32 %v3611_v58, %v2361_v12  ;;  %v3615_v32 = vld [vmem:[%s4917_s28 + $0x2b0] sm:$0xff] }
 0xb4f   : > { %v2320_v39 = vpop.f32.mrf.mxu0  ;;  %v2363_v8 = vpop.f32.mrf.mxu1 }
 0xb50   : > { %v3617_v60 = vmul.f32 -1.442695, %v2370_v11  ;;  %v2371_v30 = vadd.f32 %v3610_v10, %v2320_v39  ;;  %v2373_v50 = vadd.f32 %v3612_v48, %v2363_v8 }
 0xb51   : > { %v2322_v40 = vpop.f32.mrf.mxu0  ;;  %v2365_v49 = vpop.f32.mrf.mxu1 }
 0xb52   : > { %4170 = vpow2.f32 %v3617_v60  ;;  %v3619_v45 = vmul.f32 -1.442695, %v2371_v30  ;;  %v2374_v46 = vadd.f32 %v3613_v34, %v2322_v40  ;;  %v3621_v51 = vmul.f32 -1.442695, %v2373_v50 }
 0xb53   : > { %v2324_v41 = vpop.f32.mrf.mxu0  ;;  %v2367_v55 = vpop.f32.mrf.mxu1  ;;  %v2376_v34 = vadd.f32 %v3615_v32, %v2365_v49 }
 0xb54   : > { %4172 = vpow2.f32 %v3619_v45  ;;  %v3618_v47 = vmul.f32 -1.442695, %v2374_v46  ;;  %v2375_v43 = vadd.f32 %v3614_v36, %v2324_v41  ;;  %v2377_v63 = vadd.f32 %v3616_v52, %v2367_v55 }
 0xb56   : > { %4174 = vpow2.f32 %v3618_v47  ;;  %v3620_v44 = vmul.f32 -1.442695, %v2375_v43  ;;  %v3622_v10 = vmul.f32 -1.442695, %v2377_v63 }
 0xb58   : > { %4176 = vpow2.f32 %v3620_v44 }
 0xb59   : > { %4178 = vpow2.f32 %v3621_v51 }
 0xb5f   : > { %v4171_v53 = vpop.eup %4170 }
 0xb60   : > { %v2384_v2 = vadd.f32 1.0, %v4171_v53 }
 0xb61   : > { %v4173_v9 = vpop.eup %4172 }
 0xb62   : > { %4180 = vrcp.f32 %v2384_v2  ;;  %v2396_v11 = vadd.f32 1.0, %v4173_v9 }
 0xb63   : > { %v4175_v39 = vpop.eup %4174  ;;  %4182 = vtanh.f32 %v2372_v31 }
 0xb64   : > { %4184 = vrcp.f32 %v2396_v11  ;;  %v2385_v60 = vadd.f32 1.0, %v4175_v39  ;;  %v3626_v11 = vld [vmem:[%s4917_s28 + $0x2c8] sm:$0xff] }
 0xb65   : > { %v4177_v30 = vpop.eup %4176  ;;  %4186 = vpow2.f32 %v3622_v10 }
 0xb66   : > { %4188 = vrcp.f32 %v2385_v60  ;;  %v2397_v40 = vadd.f32 1.0, %v4177_v30  ;;  %v4179_v36 = vpop.eup %4178  ;;  %v3629_v30 = vld [vmem:[%s4917_s28 + $0x2e0] sm:$0xff] }
 0xb67   : > { %4190 = vtanh.f32 %v2376_v34  ;;  %v2410_v46 = vadd.f32 1.0, %v4179_v36 }
 0xb68   : > { %4192 = vrcp.f32 %v2397_v40 }
 0xb69   : > { %4194 = vrcp.f32 %v2410_v46 }
 0xb6f   : > { %v4181_v12 = vpop.eup %4180 }
 0xb70   : > { %v4183_v45 = vpop.eup %4182 }
 0xb71   : > { %v4185_v8 = vpop.eup %4184  ;;  %v2418_v47 = vmul.f32 %v4183_v45, %v4181_v12  ;;  %v3630_v45 = vld [vmem:[%s4917_s28 + $0x2e8] sm:$0xff] }
 0xb72   : > { %v4187_v41 = vpop.eup %4186  ;;  %v2416_v43 = vmul.f32 %v4185_v8, %v5917_v42 }
 0xb73   : > { %v4189_v48 = vpop.eup %4188  ;;  %v2411_v52 = vadd.f32 1.0, %v4187_v41 }
 0xb74   : > { %v4191_v49 = vpop.eup %4190  ;;  %v5999_v44 = vadd.f32 %v2418_v47, %v2416_v43 }
 0xb75   : > { %v4193_v50 = vpop.eup %4192  ;;  %v2419_v55 = vmul.f32 %v4191_v49, %v4189_v48  ;;  %v3628_v49 = vld [vmem:[%s4917_s28 + $0x2d8] sm:$0xff] }
 0xb76   : > { %v2417_v58 = vmul.f32 %v4193_v50, %v5921_v54  ;;  %4196 = vtanh.f32 %v5999_v44  ;;  %v4195_v42 = vpop.eup %4194  ;;  %v3625_v54 = vld [vmem:[%s4917_s28 + $0x2c0] sm:$0xff] }
 0xb77   : > { %4198 = vrcp.f32 %v2411_v52 }
 0xb78   : > { %v6003_v51 = vadd.f32 %v2419_v55, %v2417_v58  ;;  %v3632_v58 = vld [vmem:[%s4917_s28 + $0x2f8] sm:$0xff] }
 0xb7a   : > { %4200 = vtanh.f32 %v6003_v51 }
 0xb83   : > { %v4197_v63 = vpop.eup %4196 }
 0xb84   : > { %v2424_v53 = vmul.f32 %v4197_v63, %v4195_v42  ;;  %v4199_v31 = vpop.eup %4198  ;;  %v3627_v63 = vld [vmem:[%s4917_s28 + $0x2d0] sm:$0xff] }
 0xb86   : > { %3623 = vst [vmem:[%s4919_s19 + $0xa0] sm:$0xff] %v2424_v53 }
 0xb87   : > { %v4201_v2 = vpop.eup %4200 }
 0xb88   : > { %v2425_v32 = vmul.f32 %v4201_v2, %v4199_v31 }
 0xb8a   : > { %3624 = vst [vmem:[%s4919_s19 + $0xa8] sm:$0xff] %v2425_v32  ;;  %v2438_v9 = vpack.c.bf16 %v2425_v32, %v2424_v53 }
 0xb8c   : > { %2472 = vmatmul.mubr.bf16.vlgmr.msra.gmra.mxu0 %v2438_v9  ;;  %2515 = vmatmul.mubr.bf16.vlgmr.msra.gmra.mxu1 %v2438_v9 }
 0xb8d   : > { %2595 = vmatpush1.bf16.msra.mxu0 %v5747_v35  ;;  %2638 = vmatpush1.bf16.msra.mxu1 %v5753_v13 }
 0xb8e   : > { %2596 = vmatprep.subr.bf16.mxu0 %v5759_v14  ;;  %2639 = vmatprep.subr.bf16.mxu1 %v5765_v15 }
 0xb8f   : > { %2626 = vmatprep.mubr.bf16.mxu0 %v4519_v3  ;;  %2669 = vmatprep.mubr.bf16.mxu1 %v4519_v3 }
 0xb91   : > { %2597 = vmatpush1.bf16.msra.mxu0 %v5773_v16  ;;  %2640 = vmatpush1.bf16.msra.mxu1 %v5779_v1 }
 0xb92   : > { %2598 = vmatprep.subr.bf16.mxu0 %v5785_v17  ;;  %2641 = vmatprep.subr.bf16.mxu1 %v5791_v7 }
 0xb95   : > { %2599 = vmatpush1.bf16.msra.mxu0 %v5797_v18  ;;  %2642 = vmatpush1.bf16.msra.mxu1 %v5803_v19 }
 0xb96   : > { %2600 = vmatprep.subr.bf16.mxu0 %v5809_v20  ;;  %2643 = vmatprep.subr.bf16.mxu1 %v5815_v21 }
 0xb99   : > { %2601 = vmatpush1.bf16.msra.mxu0 %v5821_v22  ;;  %2644 = vmatpush1.bf16.msra.mxu1 %v5827_v23 }
 0xb9a   : > { %2602 = vmatprep.subr.bf16.mxu0 %v5833_v24  ;;  %2645 = vmatprep.subr.bf16.mxu1 %v5839_v25 }
 0xb9d   : > { %2603 = vmatpush1.bf16.msra.mxu0 %v5845_v26  ;;  %2646 = vmatpush1.bf16.msra.mxu1 %v5851_v27 }
 0xb9e   : > { %2604 = vmatprep.subr.bf16.mxu0 %v5857_v0  ;;  %2647 = vmatprep.subr.bf16.mxu1 %v5863_v28 }
 0xba1   : > { %2605 = vmatpush1.bf16.msra.mxu0 %v5869_v29  ;;  %2648 = vmatpush1.bf16.msra.mxu1 %v5952_v62 }
 0xba2   : > { %2606 = vmatprep.subr.bf16.mxu0 %v5876_v33  ;;  %2649 = vmatprep.subr.bf16.mxu1 %v5959_v4 }
 0xba5   : > { %2607 = vmatpush1.bf16.msra.mxu0 %v5883_v56  ;;  %2650 = vmatpush1.bf16.msra.mxu1 %v5966_v57 }
 0xba6   : > { %2608 = vmatprep.subr.bf16.mxu0 %v5890_v61  ;;  %2651 = vmatprep.subr.bf16.mxu1 %v5973_v5 }
 0xba9   : > { %2609 = vmatpush1.bf16.msra.mxu0 %v5979_v59  ;;  %2652 = vmatpush1.bf16.msra.mxu1 %v5985_v6 }
 0xbaa   : > { %2749 = vmatprep.subr.bf16.mxu0 %v5899_v37  ;;  %2792 = vmatprep.subr.bf16.mxu1 %v5905_v38 }
 0xc4c   : > { %v2473_v10 = vpop.f32.mrf.mxu0  ;;  %v2516_v34 = vpop.f32.mrf.mxu1 }
 0xc4d   : > { %v2525_v39 = vadd.f32 %v3625_v54, %v2473_v10  ;;  %v2527_v32 = vadd.f32 %v3627_v63, %v2516_v34  ;;  %v3631_v54 = vld [vmem:[%s4917_s28 + $0x2f0] sm:$0xff] }
 0xc4e   : > { %v2475_v60 = vpop.f32.mrf.mxu0  ;;  %v2518_v46 = vpop.f32.mrf.mxu1 }
 0xc4f   : > { %v3633_v40 = vmul.f32 -1.442695, %v2525_v39  ;;  %v2526_v36 = vadd.f32 %v3626_v11, %v2475_v60  ;;  %v2528_v55 = vadd.f32 %v3628_v49, %v2518_v46 }
 0xc50   : > { %v2477_v12 = vpop.f32.mrf.mxu0  ;;  %v2520_v50 = vpop.f32.mrf.mxu1 }
 0xc51   : > { %4202 = vpow2.f32 %v3633_v40  ;;  %v3635_v8 = vmul.f32 -1.442695, %v2526_v36  ;;  %v2529_v41 = vadd.f32 %v3629_v30, %v2477_v12  ;;  %v3637_v53 = vmul.f32 -1.442695, %v2528_v55 }
 0xc52   : > { %v2479_v47 = vpop.f32.mrf.mxu0  ;;  %v2522_v42 = vpop.f32.mrf.mxu1  ;;  %v2531_v30 = vadd.f32 %v3631_v54, %v2520_v50 }
 0xc53   : > { %4204 = vpow2.f32 %v3635_v8  ;;  %v3634_v43 = vmul.f32 -1.442695, %v2529_v41  ;;  %v2530_v48 = vadd.f32 %v3630_v45, %v2479_v47  ;;  %v2532_v31 = vadd.f32 %v3632_v58, %v2522_v42 }
 0xc55   : > { %4206 = vpow2.f32 %v3634_v43  ;;  %v3636_v52 = vmul.f32 -1.442695, %v2530_v48  ;;  %v3638_v11 = vmul.f32 -1.442695, %v2532_v31 }
 0xc57   : > { %4208 = vpow2.f32 %v3636_v52 }
 0xc58   : > { %4210 = vpow2.f32 %v3637_v53 }
 0xc5e   : > { %v4203_v2 = vpop.eup %4202 }
 0xc5f   : > { %v2539_v9 = vadd.f32 1.0, %v4203_v2 }
 0xc60   : > { %v4205_v10 = vpop.eup %4204 }
 0xc61   : > { %4212 = vrcp.f32 %v2539_v9  ;;  %v2551_v39 = vadd.f32 1.0, %v4205_v10 }
 0xc62   : > { %v4207_v60 = vpop.eup %4206  ;;  %4214 = vtanh.f32 %v2527_v32 }
 0xc63   : > { %4216 = vrcp.f32 %v2551_v39  ;;  %v2540_v40 = vadd.f32 1.0, %v4207_v60  ;;  %v3642_v39 = vld [vmem:[%s4917_s28 + $0x308] sm:$0xff] }
 0xc64   : > { %v4209_v36 = vpop.eup %4208  ;;  %4218 = vpow2.f32 %v3638_v11 }
 0xc65   : > { %4220 = vrcp.f32 %v2540_v40  ;;  %v2552_v12 = vadd.f32 1.0, %v4209_v36  ;;  %v4211_v45 = vpop.eup %4210  ;;  %v3645_v36 = vld [vmem:[%s4917_s28 + $0x320] sm:$0xff] }
 0xc66   : > { %4222 = vtanh.f32 %v2531_v30  ;;  %v2565_v41 = vadd.f32 1.0, %v4211_v45 }
 0xc67   : > { %4224 = vrcp.f32 %v2552_v12 }
 0xc68   : > { %4226 = vrcp.f32 %v2565_v41 }
 0xc6e   : > { %v4213_v34 = vpop.eup %4212 }
 0xc6f   : > { %v4215_v8 = vpop.eup %4214 }
 0xc70   : > { %v4217_v46 = vpop.eup %4216  ;;  %v2573_v43 = vmul.f32 %v4215_v8, %v4213_v34  ;;  %v3646_v8 = vld [vmem:[%s4917_s28 + $0x328] sm:$0xff] }
 0xc71   : > { %v4219_v47 = vpop.eup %4218  ;;  %v2571_v48 = vmul.f32 %v4217_v46, %v5999_v44 }
 0xc72   : > { %v4221_v49 = vpop.eup %4220  ;;  %v2566_v58 = vadd.f32 1.0, %v4219_v47 }
 0xc73   : > { %v4223_v50 = vpop.eup %4222  ;;  %v6051_v52 = vadd.f32 %v2573_v43, %v2571_v48 }
 0xc74   : > { %v4225_v55 = vpop.eup %4224  ;;  %v2574_v42 = vmul.f32 %v4223_v50, %v4221_v49  ;;  %v3644_v50 = vld [vmem:[%s4917_s28 + $0x318] sm:$0xff] }
 0xc75   : > { %v2572_v63 = vmul.f32 %v4225_v55, %v6003_v51  ;;  %4228 = vtanh.f32 %v6051_v52  ;;  %v4227_v44 = vpop.eup %4226  ;;  %v3641_v51 = vld [vmem:[%s4917_s28 + $0x300] sm:$0xff] }
 0xc76   : > { %4230 = vrcp.f32 %v2566_v58 }
 0xc77   : > { %v6055_v53 = vadd.f32 %v2574_v42, %v2572_v63  ;;  %v3648_v63 = vld [vmem:[%s4917_s28 + $0x338] sm:$0xff] }
 0xc79   : > { %4232 = vtanh.f32 %v6055_v53 }
 0xc82   : > { %v4229_v31 = vpop.eup %4228 }
 0xc83   : > { %v2579_v2 = vmul.f32 %v4229_v31, %v4227_v44  ;;  %v4231_v32 = vpop.eup %4230  ;;  %v3643_v31 = vld [vmem:[%s4917_s28 + $0x310] sm:$0xff] }
 0xc85   : > { %3639 = vst [vmem:[%s4919_s19 + $0xb0] sm:$0xff] %v2579_v2 }
 0xc86   : > { %v4233_v9 = vpop.eup %4232 }
 0xc87   : > { %v2580_v54 = vmul.f32 %v4233_v9, %v4231_v32 }
 0xc89   : > { %3640 = vst [vmem:[%s4919_s19 + $0xb8] sm:$0xff] %v2580_v54  ;;  %v2593_v10 = vpack.c.bf16 %v2580_v54, %v2579_v2 }
 0xc8b   : > { %2627 = vmatmul.mubr.bf16.vlgmr.msra.gmra.mxu0 %v2593_v10  ;;  %2670 = vmatmul.mubr.bf16.vlgmr.msra.gmra.mxu1 %v2593_v10 }
 0xc8c   : > { %2750 = vmatpush1.bf16.msra.mxu0 %v5747_v35  ;;  %2793 = vmatpush1.bf16.msra.mxu1 %v5753_v13 }
 0xc8d   : > { %2751 = vmatprep.subr.bf16.mxu0 %v5759_v14  ;;  %2794 = vmatprep.subr.bf16.mxu1 %v5765_v15 }
 0xc8e   : > { %2781 = vmatprep.mubr.bf16.mxu0 %v4519_v3  ;;  %2824 = vmatprep.mubr.bf16.mxu1 %v4519_v3 }
 0xc90   : > { %2752 = vmatpush1.bf16.msra.mxu0 %v5773_v16  ;;  %2795 = vmatpush1.bf16.msra.mxu1 %v5779_v1 }
 0xc91   : > { %2753 = vmatprep.subr.bf16.mxu0 %v5785_v17  ;;  %2796 = vmatprep.subr.bf16.mxu1 %v5791_v7 }
 0xc94   : > { %2754 = vmatpush1.bf16.msra.mxu0 %v5797_v18  ;;  %2797 = vmatpush1.bf16.msra.mxu1 %v5803_v19 }
 0xc95   : > { %2755 = vmatprep.subr.bf16.mxu0 %v5809_v20  ;;  %2798 = vmatprep.subr.bf16.mxu1 %v5815_v21 }
 0xc98   : > { %2756 = vmatpush1.bf16.msra.mxu0 %v5821_v22  ;;  %2799 = vmatpush1.bf16.msra.mxu1 %v5827_v23 }
 0xc99   : > { %2757 = vmatprep.subr.bf16.mxu0 %v5833_v24  ;;  %2800 = vmatprep.subr.bf16.mxu1 %v5839_v25 }
 0xc9c   : > { %2758 = vmatpush1.bf16.msra.mxu0 %v5845_v26  ;;  %2801 = vmatpush1.bf16.msra.mxu1 %v5851_v27 }
 0xc9d   : > { %2759 = vmatprep.subr.bf16.mxu0 %v5857_v0  ;;  %2802 = vmatprep.subr.bf16.mxu1 %v5863_v28 }
 0xca0   : > { %2760 = vmatpush1.bf16.msra.mxu0 %v5869_v29  ;;  %2803 = vmatpush1.bf16.msra.mxu1 %v5952_v62 }
 0xca1   : > { %2761 = vmatprep.subr.bf16.mxu0 %v5876_v33  ;;  %2804 = vmatprep.subr.bf16.mxu1 %v5959_v4 }
 0xca4   : > { %2762 = vmatpush1.bf16.msra.mxu0 %v5883_v56  ;;  %2805 = vmatpush1.bf16.msra.mxu1 %v5966_v57 }
 0xca5   : > { %2763 = vmatprep.subr.bf16.mxu0 %v5890_v61  ;;  %2806 = vmatprep.subr.bf16.mxu1 %v5973_v5 }
 0xca8   : > { %2764 = vmatpush1.bf16.msra.mxu0 %v5979_v59  ;;  %2807 = vmatpush1.bf16.msra.mxu1 %v5985_v6 }
 0xca9   : > { %2904 = vmatprep.subr.bf16.mxu0 %v5899_v37  ;;  %2947 = vmatprep.subr.bf16.mxu1 %v5905_v38 }
 0xd4b   : > { %v2628_v11 = vpop.f32.mrf.mxu0  ;;  %v2671_v30 = vpop.f32.mrf.mxu1 }
 0xd4c   : > { %v2680_v60 = vadd.f32 %v3641_v51, %v2628_v11  ;;  %v2682_v54 = vadd.f32 %v3643_v31, %v2671_v30  ;;  %v3647_v51 = vld [vmem:[%s4917_s28 + $0x330] sm:$0xff] }
 0xd4d   : > { %v2630_v40 = vpop.f32.mrf.mxu0  ;;  %v2673_v41 = vpop.f32.mrf.mxu1 }
 0xd4e   : > { %v3649_v12 = vmul.f32 -1.442695, %v2680_v60  ;;  %v2681_v45 = vadd.f32 %v3642_v39, %v2630_v40  ;;  %v2683_v42 = vadd.f32 %v3644_v50, %v2673_v41 }
 0xd4f   : > { %v2632_v34 = vpop.f32.mrf.mxu0  ;;  %v2675_v55 = vpop.f32.mrf.mxu1 }
 0xd50   : > { %4234 = vpow2.f32 %v3649_v12  ;;  %v3651_v46 = vmul.f32 -1.442695, %v2681_v45  ;;  %v2684_v47 = vadd.f32 %v3645_v36, %v2632_v34  ;;  %v3653_v2 = vmul.f32 -1.442695, %v2683_v42 }
 0xd51   : > { %v2634_v43 = vpop.f32.mrf.mxu0  ;;  %v2677_v44 = vpop.f32.mrf.mxu1  ;;  %v2686_v36 = vadd.f32 %v3647_v51, %v2675_v55 }
 0xd52   : > { %4236 = vpow2.f32 %v3651_v46  ;;  %v3650_v48 = vmul.f32 -1.442695, %v2684_v47  ;;  %v2685_v49 = vadd.f32 %v3646_v8, %v2634_v43  ;;  %v2687_v32 = vadd.f32 %v3648_v63, %v2677_v44 }
 0xd54   : > { %4238 = vpow2.f32 %v3650_v48  ;;  %v3652_v58 = vmul.f32 -1.442695, %v2685_v49  ;;  %v3654_v39 = vmul.f32 -1.442695, %v2687_v32 }
 0xd56   : > { %4240 = vpow2.f32 %v3652_v58 }
 0xd57   : > { %4242 = vpow2.f32 %v3653_v2 }
 0xd5d   : > { %v4235_v9 = vpop.eup %4234 }
 0xd5e   : > { %v2694_v10 = vadd.f32 1.0, %v4235_v9 }
 0xd5f   : > { %v4237_v11 = vpop.eup %4236 }
 0xd60   : > { %4244 = vrcp.f32 %v2694_v10  ;;  %v2706_v60 = vadd.f32 1.0, %v4237_v11 }
 0xd61   : > { %v4239_v40 = vpop.eup %4238  ;;  %4246 = vtanh.f32 %v2682_v54 }
 0xd62   : > { %4248 = vrcp.f32 %v2706_v60  ;;  %v2695_v12 = vadd.f32 1.0, %v4239_v40  ;;  %v3663_v40 = vld [vmem:[%s4917_s28 + $0x370] sm:$0xff] }
 0xd63   : > { %v4241_v45 = vpop.eup %4240  ;;  %4250 = vpow2.f32 %v3654_v39 }
 0xd64   : > { %4252 = vrcp.f32 %v2695_v12  ;;  %v2707_v34 = vadd.f32 1.0, %v4241_v45  ;;  %v4243_v8 = vpop.eup %4242 }
 0xd65   : > { %4254 = vtanh.f32 %v2686_v36  ;;  %v2720_v47 = vadd.f32 1.0, %v4243_v8 }
 0xd66   : > { %4256 = vrcp.f32 %v2707_v34 }
 0xd67   : > { %4258 = vrcp.f32 %v2720_v47 }
 0xd6d   : > { %v4245_v30 = vpop.eup %4244 }
 0xd6e   : > { %v4247_v46 = vpop.eup %4246 }
 0xd6f   : > { %v4249_v41 = vpop.eup %4248  ;;  %v2728_v48 = vmul.f32 %v4247_v46, %v4245_v30 }
 0xd70   : > { %v4251_v43 = vpop.eup %4250  ;;  %v2726_v49 = vmul.f32 %v4249_v41, %v6051_v52 }
 0xd71   : > { %v4253_v50 = vpop.eup %4252  ;;  %v2721_v63 = vadd.f32 1.0, %v4251_v43 }
 0xd72   : > { %v4255_v55 = vpop.eup %4254  ;;  %v6103_v58 = vadd.f32 %v2728_v48, %v2726_v49 }
 0xd73   : > { %v4257_v42 = vpop.eup %4256  ;;  %v2729_v44 = vmul.f32 %v4255_v55, %v4253_v50 }
 0xd74   : > { %v2727_v31 = vmul.f32 %v4257_v42, %v6055_v53  ;;  %4260 = vtanh.f32 %v6103_v58  ;;  %v4259_v52 = vpop.eup %4258 }
 0xd75   : > { %4262 = vrcp.f32 %v2721_v63 }
 0xd76   : > { %v6107_v2 = vadd.f32 %v2729_v44, %v2727_v31 }
 0xd78   : > { %4264 = vtanh.f32 %v6107_v2 }
 0xd81   : > { %v4261_v32 = vpop.eup %4260 }
 0xd82   : > { %v2734_v9 = vmul.f32 %v4261_v32, %v4259_v52  ;;  %v4263_v54 = vpop.eup %4262 }
 0xd84   : > { %3655 = vst [vmem:[%s4919_s19 + $0xc0] sm:$0xff] %v2734_v9 }
 0xd85   : > { %v4265_v10 = vpop.eup %4264 }
 0xd86   : > { %v2735_v51 = vmul.f32 %v4265_v10, %v4263_v54 }
 0xd88   : > { %3656 = vst [vmem:[%s4919_s19 + $0xc8] sm:$0xff] %v2735_v51  ;;  %v2748_v11 = vpack.c.bf16 %v2735_v51, %v2734_v9 }
 0xd8a   : > { %2782 = vmatmul.mubr.bf16.vlgmr.msra.gmra.mxu0 %v2748_v11  ;;  %2825 = vmatmul.mubr.bf16.vlgmr.msra.gmra.mxu1 %v2748_v11 }
 0xd8b   : > { %2905 = vmatpush1.bf16.msra.mxu0 %v5747_v35  ;;  %2948 = vmatpush1.bf16.msra.mxu1 %v5753_v13  ;;  %v3657_v35 = vld [vmem:[%s4917_s28 + $0x340] sm:$0xff] }
 0xd8c   : > { %2906 = vmatprep.subr.bf16.mxu0 %v5759_v14  ;;  %2949 = vmatprep.subr.bf16.mxu1 %v5765_v15  ;;  %v3658_v14 = vld [vmem:[%s4917_s28 + $0x348] sm:$0xff] }
 0xd8d   : > { %2936 = vmatprep.mubr.bf16.mxu0 %v4519_v3  ;;  %2979 = vmatprep.mubr.bf16.mxu1 %v4519_v3 }
 0xd8f   : > { %2907 = vmatpush1.bf16.msra.mxu0 %v5773_v16  ;;  %2950 = vmatpush1.bf16.msra.mxu1 %v5779_v1 }
 0xd90   : > { %2908 = vmatprep.subr.bf16.mxu0 %v5785_v17  ;;  %2951 = vmatprep.subr.bf16.mxu1 %v5791_v7  ;;  %v3661_v17 = vld [vmem:[%s4917_s28 + $0x360] sm:$0xff] }
 0xd93   : > { %2909 = vmatpush1.bf16.msra.mxu0 %v5797_v18  ;;  %2952 = vmatpush1.bf16.msra.mxu1 %v5803_v19 }
 0xd94   : > { %2910 = vmatprep.subr.bf16.mxu0 %v5809_v20  ;;  %2953 = vmatprep.subr.bf16.mxu1 %v5815_v21  ;;  %v3662_v20 = vld [vmem:[%s4917_s28 + $0x368] sm:$0xff] }
 0xd97   : > { %2911 = vmatpush1.bf16.msra.mxu0 %v5821_v22  ;;  %2954 = vmatpush1.bf16.msra.mxu1 %v5827_v23 }
 0xd98   : > { %2912 = vmatprep.subr.bf16.mxu0 %v5833_v24  ;;  %2955 = vmatprep.subr.bf16.mxu1 %v5839_v25 }
 0xd9b   : > { %2913 = vmatpush1.bf16.msra.mxu0 %v5845_v26  ;;  %2956 = vmatpush1.bf16.msra.mxu1 %v5851_v27  ;;  %v3660_v27 = vld [vmem:[%s4917_s28 + $0x358] sm:$0xff] }
 0xd9c   : > { %2914 = vmatprep.subr.bf16.mxu0 %v5857_v0  ;;  %2957 = vmatprep.subr.bf16.mxu1 %v5863_v28 }
 0xd9f   : > { %2915 = vmatpush1.bf16.msra.mxu0 %v5869_v29  ;;  %2958 = vmatpush1.bf16.msra.mxu1 %v5952_v62 }
 0xda0   : > { %2916 = vmatprep.subr.bf16.mxu0 %v5876_v33  ;;  %2959 = vmatprep.subr.bf16.mxu1 %v5959_v4  ;;  %v3664_v33 = vld [vmem:[%s4917_s28 + $0x378] sm:$0xff] }
 0xda3   : > { %2917 = vmatpush1.bf16.msra.mxu0 %v5883_v56  ;;  %2960 = vmatpush1.bf16.msra.mxu1 %v5966_v57 }
 0xda4   : > { %2918 = vmatprep.subr.bf16.mxu0 %v5890_v61  ;;  %2961 = vmatprep.subr.bf16.mxu1 %v5973_v5  ;;  %v3659_v61 = vld [vmem:[%s4917_s28 + $0x350] sm:$0xff] }
 0xda7   : > { %2919 = vmatpush1.bf16.msra.mxu0 %v5979_v59  ;;  %2962 = vmatpush1.bf16.msra.mxu1 %v5985_v6 }
 0xda8   : > { %3059 = vmatprep.subr.bf16.mxu0 %v5899_v37  ;;  %3102 = vmatprep.subr.bf16.mxu1 %v5905_v38 }
 0xe4a   : > { %v2783_v13 = vpop.f32.mrf.mxu0  ;;  %v2826_v16 = vpop.f32.mrf.mxu1 }
 0xe4b   : > { %v2835_v15 = vadd.f32 %v3657_v35, %v2783_v13  ;;  %v2837_v39 = vadd.f32 %v3659_v61, %v2826_v16  ;;  %v4446_v61 = vld [vmem:[%s6329_s1 + $0x40] ss:$16 sps:$4 sm:$0xff]  }
 0xe4c   : > { %v2785_v1 = vpop.f32.mrf.mxu0  ;;  %v2828_v22 = vpop.f32.mrf.mxu1 }
 0xe4d   : > { %v3665_v7 = vmul.f32 -1.442695, %v2835_v15  ;;  %v2836_v18 = vadd.f32 %v3658_v14, %v2785_v1  ;;  %v2838_v29 = vadd.f32 %v3660_v27, %v2828_v22  ;;  %v4427_v1 = vld [vmem:[%s6329_s1 + $0xe8] ss:$16 sps:$4 sm:$0xff]   ;;  %v4440_v27 = vld [vmem:[%s6329_s1 + $0x64] ss:$16 sps:$4 sm:$0xff]  }
 0xe4e   : > { %v2787_v19 = vpop.f32.mrf.mxu0  ;;  %v2830_v0 = vpop.f32.mrf.mxu1  ;;  %v4435_v22 = vld [vmem:[%s6329_s1 + $0xa8] ss:$16 sps:$4 sm:$0xff]  }
 0xe4f   : > { %4266 = vpow2.f32 %v3665_v7  ;;  %v3667_v21 = vmul.f32 -1.442695, %v2836_v18  ;;  %v2839_v23 = vadd.f32 %v3661_v17, %v2787_v19  ;;  %v3669_v37 = vmul.f32 -1.442695, %v2838_v29  ;;  %v4428_v17 = vld [vmem:[%s6329_s1 + $0xc4] ss:$16 sps:$4 sm:$0xff]  }
 0xe50   : > { %v2789_v24 = vpop.f32.mrf.mxu0  ;;  %v2832_v56 = vpop.f32.mrf.mxu1  ;;  %v2841_v8 = vadd.f32 %v3663_v40, %v2830_v0  ;;  %v4429_v7 = vld [vmem:[%s6329_s1 + $0xcc] ss:$16 sps:$4 sm:$0xff]   ;;  %v4430_v18 = vld [vmem:[%s6329_s1 + $0xc0] ss:$16 sps:$4 sm:$0xff]   ;;  %v4431_v19 = vld [vmem:[%s6329_s1 + $0xc8] ss:$16 sps:$4 sm:$0xff]  }
 0xe51   : > { %4268 = vpow2.f32 %v3667_v21  ;;  %v3666_v25 = vmul.f32 -1.442695, %v2839_v23  ;;  %v2840_v26 = vadd.f32 %v3662_v20, %v2789_v24  ;;  %v2842_v38 = vadd.f32 %v3664_v33, %v2832_v56  ;;  %v4432_v20 = vld [vmem:[%s6329_s1 + $0xa4] ss:$16 sps:$4 sm:$0xff]   ;;  %v4433_v21 = vld [vmem:[%s6329_s1 + $0xac] ss:$16 sps:$4 sm:$0xff]  }
 0xe52   : > { %v4436_v23 = vld [vmem:[%s6329_s1 + $0x84] ss:$16 sps:$4 sm:$0xff]   ;;  %v4437_v24 = vld [vmem:[%s6329_s1 + $0x8c] ss:$16 sps:$4 sm:$0xff]   ;;  %v4443_v29 = vld [vmem:[%s6329_s1 + $0x68] ss:$16 sps:$4 sm:$0xff]  }
 0xe53   : > { %4270 = vpow2.f32 %v3666_v25  ;;  %v3668_v28 = vmul.f32 -1.442695, %v2840_v26  ;;  %v3670_v12 = vmul.f32 -1.442695, %v2842_v38  ;;  %v4438_v25 = vld [vmem:[%s6329_s1 + $0x80] ss:$16 sps:$4 sm:$0xff]  }
 0xe54   : > { %v4439_v26 = vld [vmem:[%s6329_s1 + $0x88] ss:$16 sps:$4 sm:$0xff]   ;;  %v4441_v0 = vld [vmem:[%s6329_s1 + $0x6c] ss:$16 sps:$4 sm:$0xff]   ;;  %v4444_v33 = vld [vmem:[%s6329_s1 + $0x44] ss:$16 sps:$4 sm:$0xff]  }
 0xe55   : > { %4272 = vpow2.f32 %v3668_v28  ;;  %v4442_v28 = vld [vmem:[%s6329_s1 + $0x60] ss:$16 sps:$4 sm:$0xff]   ;;  %v4445_v56 = vld [vmem:[%s6329_s1 + $0x4c] ss:$16 sps:$4 sm:$0xff]  }
 0xe56   : > { %4274 = vpow2.f32 %v3669_v37  ;;  %v4447_v37 = vld [vmem:[%s6329_s1 + $0x24] ss:$16 sps:$4 sm:$0xff]   ;;  %v4448_v38 = vld [vmem:[%s6329_s1 + $0x20] ss:$16 sps:$4 sm:$0xff]  }
 0xe5c   : > { %v4267_v53 = vpop.eup %4266 }
 0xe5d   : > { %v2849_v60 = vadd.f32 1.0, %v4267_v53 }
 0xe5e   : > { %v4269_v36 = vpop.eup %4268 }
 0xe5f   : > { %4276 = vrcp.f32 %v2849_v60  ;;  %v2861_v45 = vadd.f32 1.0, %v4269_v36 }
 0xe60   : > { %v4271_v34 = vpop.eup %4270  ;;  %4278 = vtanh.f32 %v2837_v39  ;;  %v3674_v39 = vld [vmem:[%s4917_s28 + $0x388] sm:$0xff] }
 0xe61   : > { %4280 = vrcp.f32 %v2861_v45  ;;  %v2850_v30 = vadd.f32 1.0, %v4271_v34 }
 0xe62   : > { %v4273_v46 = vpop.eup %4272  ;;  %4282 = vpow2.f32 %v3670_v12 }
 0xe63   : > { %4284 = vrcp.f32 %v2850_v30  ;;  %v2862_v41 = vadd.f32 1.0, %v4273_v46  ;;  %v4275_v47 = vpop.eup %4274 }
 0xe64   : > { %4286 = vtanh.f32 %v2841_v8  ;;  %v2875_v50 = vadd.f32 1.0, %v4275_v47  ;;  %v3678_v8 = vld [vmem:[%s4917_s28 + $0x3a8] sm:$0xff]  ;;  %v3676_v47 = vld [vmem:[%s4917_s28 + $0x398] sm:$0xff] }
 0xe65   : > { %4288 = vrcp.f32 %v2862_v41 }
 0xe66   : > { %4290 = vrcp.f32 %v2875_v50  ;;  %v3680_v50 = vld [vmem:[%s4917_s28 + $0x3b8] sm:$0xff] }
 0xe6c   : > { %v4277_v43 = vpop.eup %4276 }
 0xe6d   : > { %v4279_v48 = vpop.eup %4278 }
 0xe6e   : > { %v4281_v49 = vpop.eup %4280  ;;  %v2883_v42 = vmul.f32 %v4279_v48, %v4277_v43 }
 0xe6f   : > { %v4283_v55 = vpop.eup %4282  ;;  %v2881_v63 = vmul.f32 %v4281_v49, %v6103_v58 }
 0xe70   : > { %v4285_v44 = vpop.eup %4284  ;;  %v2876_v9 = vadd.f32 1.0, %v4283_v55 }
 0xe71   : > { %v4287_v31 = vpop.eup %4286  ;;  %v6155_v52 = vadd.f32 %v2883_v42, %v2881_v63  ;;  %v3675_v42 = vld [vmem:[%s4917_s28 + $0x390] sm:$0xff] }
 0xe72   : > { %v4289_v32 = vpop.eup %4288  ;;  %v2884_v54 = vmul.f32 %v4287_v31, %v4285_v44 }
 0xe73   : > { %v2882_v10 = vmul.f32 %v4289_v32, %v6107_v2  ;;  %4292 = vtanh.f32 %v6155_v52  ;;  %v4291_v58 = vpop.eup %4290  ;;  %v4426_v2 = vld [vmem:[%s6329_s1 + $0xe0] ss:$16 sps:$4 sm:$0xff]  }
 0xe74   : > { %4294 = vrcp.f32 %v2876_v9 }
 0xe75   : > { %v6159_v51 = vadd.f32 %v2884_v54, %v2882_v10  ;;  %v3679_v54 = vld [vmem:[%s4917_s28 + $0x3b0] sm:$0xff] }
 0xe77   : > { %4296 = vtanh.f32 %v6159_v51 }
 0xe80   : > { %v4293_v11 = vpop.eup %4292 }
 0xe81   : > { %v2889_v35 = vmul.f32 %v4293_v11, %v4291_v58  ;;  %v4295_v13 = vpop.eup %4294 }
 0xe83   : > { %3671 = vst [vmem:[%s4919_s19 + $0xd0] sm:$0xff] %v2889_v35 }
 0xe84   : > { %v4297_v14 = vpop.eup %4296 }
 0xe85   : > { %v2890_v15 = vmul.f32 %v4297_v14, %v4295_v13 }
 0xe87   : > { %3672 = vst [vmem:[%s4919_s19 + $0xd8] sm:$0xff] %v2890_v15  ;;  %v2903_v16 = vpack.c.bf16 %v2890_v15, %v2889_v35 }
 0xe89   : > { %2937 = vmatmul.mubr.bf16.vlgmr.msra.gmra.mxu0 %v2903_v16  ;;  %2980 = vmatmul.mubr.bf16.vlgmr.msra.gmra.mxu1 %v2903_v16 }
 0xe8a   : > { %3060 = vmatpush1.bf16.msra.mxu0 %v4426_v2  ;;  %3103 = vmatpush1.bf16.msra.mxu1 %v4427_v1 }
 0xe8b   : > { %3061 = vmatprep.subr.bf16.mxu0 %v4428_v17  ;;  %3104 = vmatprep.subr.bf16.mxu1 %v4429_v7 }
 0xe8c   : > { %3091 = vmatprep.mubr.bf16.mxu0 %v4519_v3  ;;  %3134 = vmatprep.mubr.bf16.mxu1 %v4519_v3  ;;  %v4434_v3 = vld [vmem:[%s6329_s1 + $0xa0] ss:$16 sps:$4 sm:$0xff]  }
 0xe8e   : > { %3062 = vmatpush1.bf16.msra.mxu0 %v4430_v18  ;;  %3105 = vmatpush1.bf16.msra.mxu1 %v4431_v19 }
 0xe8f   : > { %3063 = vmatprep.subr.bf16.mxu0 %v4432_v20  ;;  %3106 = vmatprep.subr.bf16.mxu1 %v4433_v21 }
 0xe92   : > { %3064 = vmatpush1.bf16.msra.mxu0 %v4434_v3  ;;  %3107 = vmatpush1.bf16.msra.mxu1 %v4435_v22 }
 0xe93   : > { %3065 = vmatprep.subr.bf16.mxu0 %v4436_v23  ;;  %3108 = vmatprep.subr.bf16.mxu1 %v4437_v24 }
 0xe96   : > { %3066 = vmatpush1.bf16.msra.mxu0 %v4438_v25  ;;  %3109 = vmatpush1.bf16.msra.mxu1 %v4439_v26 }
 0xe97   : > { %3067 = vmatprep.subr.bf16.mxu0 %v4440_v27  ;;  %3110 = vmatprep.subr.bf16.mxu1 %v4441_v0 }
 0xe9a   : > { %3068 = vmatpush1.bf16.msra.mxu0 %v4442_v28  ;;  %3111 = vmatpush1.bf16.msra.mxu1 %v4443_v29 }
 0xe9b   : > { %3069 = vmatprep.subr.bf16.mxu0 %v4444_v33  ;;  %3112 = vmatprep.subr.bf16.mxu1 %v4445_v56 }
 0xe9e   : > { %3070 = vmatpush1.bf16.msra.mxu0 %v4446_v61  ;;  %3113 = vmatpush1.bf16.msra.mxu1 %v5952_v62  ;;  %v4449_v62 = vld [vmem:[%s6329_s1 + $0x4] ss:$16 sps:$4 sm:$0xff]  }
 0xe9f   : > { %3071 = vmatprep.subr.bf16.mxu0 %v4447_v37  ;;  %3114 = vmatprep.subr.bf16.mxu1 %v5959_v4  ;;  %v3673_v4 = vld [vmem:[%s4917_s28 + $0x380] sm:$0xff] }
 0xea0   : > { %v3689_v37 = vld [vmem:[%s4917_s28 + $0x3c0] sm:$0xff] }
 0xea2   : > { %3072 = vmatpush1.bf16.msra.mxu0 %v4448_v38  ;;  %3115 = vmatpush1.bf16.msra.mxu1 %v5966_v57  ;;  %v3677_v57 = vld [vmem:[%s4917_s28 + $0x3a0] sm:$0xff] }
 0xea3   : > { %3073 = vmatprep.subr.bf16.mxu0 %v4449_v62  ;;  %3116 = vmatprep.subr.bf16.mxu1 %v5973_v5  ;;  %v3690_v62 = vld [vmem:[%s4917_s28 + $0x3c8] sm:$0xff] }
 0xea6   : > { %3074 = vmatpush1.bf16.msra.mxu0 %v5979_v59  ;;  %3117 = vmatpush1.bf16.msra.mxu1 %v5985_v6 }
 0xf49   : > { %v2938_v53 = vpop.f32.mrf.mxu0  ;;  %v2981_v40 = vpop.f32.mrf.mxu1 }
 0xf4a   : > { %v2990_v60 = vadd.f32 %v3673_v4, %v2938_v53  ;;  %v2992_v32 = vadd.f32 %v3675_v42, %v2981_v40 }
 0xf4b   : > { %v2940_v36 = vpop.f32.mrf.mxu0  ;;  %v2983_v30 = vpop.f32.mrf.mxu1 }
 0xf4c   : > { %v3681_v12 = vmul.f32 -1.442695, %v2990_v60  ;;  %v2991_v45 = vadd.f32 %v3674_v39, %v2940_v36  ;;  %v2993_v49 = vadd.f32 %v3676_v47, %v2983_v30  ;;  %v3693_v60 = vld [vmem:[%s4917_s28 + $0x3e0] sm:$0xff] }
 0xf4d   : > { %v2942_v34 = vpop.f32.mrf.mxu0  ;;  %v2985_v43 = vpop.f32.mrf.mxu1 }
 0xf4e   : > { %4298 = vpow2.f32 %v3681_v12  ;;  %v3683_v5 = vmul.f32 -1.442695, %v2991_v45  ;;  %v2994_v59 = vadd.f32 %v3677_v57, %v2942_v34  ;;  %v3685_v63 = vmul.f32 -1.442695, %v2993_v49  ;;  %v3694_v12 = vld [vmem:[%s4917_s28 + $0x3e8] sm:$0xff]  ;;  %v3691_v49 = vld [vmem:[%s4917_s28 + $0x3d0] sm:$0xff] }
 0xf4f   : > { %v2944_v46 = vpop.f32.mrf.mxu0  ;;  %v2987_v55 = vpop.f32.mrf.mxu1  ;;  %v2996_v13 = vadd.f32 %v3679_v54, %v2985_v43  ;;  %v3696_v43 = vld [vmem:[%s4917_s28 + $0x3f8] sm:$0xff] }
 0xf50   : > { %4300 = vpow2.f32 %v3683_v5  ;;  %v3682_v6 = vmul.f32 -1.442695, %v2994_v59  ;;  %v2995_v41 = vadd.f32 %v3678_v8, %v2944_v46  ;;  %v2997_v44 = vadd.f32 %v3680_v50, %v2987_v55  ;;  %v3692_v46 = vld [vmem:[%s4917_s28 + $0x3d8] sm:$0xff] }
 0xf52   : > { %4302 = vpow2.f32 %v3682_v6  ;;  %v3684_v48 = vmul.f32 -1.442695, %v2995_v41  ;;  %v3686_v58 = vmul.f32 -1.442695, %v2997_v44 }
 0xf54   : > { %4304 = vpow2.f32 %v3684_v48 }
 0xf55   : > { %4306 = vpow2.f32 %v3685_v63 }
 0xf5b   : > { %v4299_v31 = vpop.eup %4298 }
 0xf5c   : > { %v3004_v9 = vadd.f32 1.0, %v4299_v31  ;;  %v3695_v31 = vld [vmem:[%s4917_s28 + $0x3f0] sm:$0xff] }
 0xf5d   : > { %v4301_v10 = vpop.eup %4300 }
 0xf5e   : > { %4308 = vrcp.f32 %v3004_v9  ;;  %v3016_v11 = vadd.f32 1.0, %v4301_v10 }
 0xf5f   : > { %v4303_v35 = vpop.eup %4302  ;;  %4310 = vtanh.f32 %v2992_v32 }
 0xf60   : > { %4312 = vrcp.f32 %v3016_v11  ;;  %v3005_v14 = vadd.f32 1.0, %v4303_v35 }
 0xf61   : > { %v4305_v15 = vpop.eup %4304  ;;  %4314 = vpow2.f32 %v3686_v58 }
 0xf62   : > { %4316 = vrcp.f32 %v3005_v14  ;;  %v3017_v16 = vadd.f32 1.0, %v4305_v15  ;;  %v4307_v2 = vpop.eup %4306 }
 0xf63   : > { %4318 = vtanh.f32 %v2996_v13  ;;  %v3030_v18 = vadd.f32 1.0, %v4307_v2 }
 0xf64   : > { %4320 = vrcp.f32 %v3017_v16 }
 0xf65   : > { %4322 = vrcp.f32 %v3030_v18 }
 0xf6b   : > { %v4309_v1 = vpop.eup %4308 }
 0xf6c   : > { %v4311_v17 = vpop.eup %4310 }
 0xf6d   : > { %v4313_v7 = vpop.eup %4312  ;;  %v3038_v20 = vmul.f32 %v4311_v17, %v4309_v1 }
 0xf6e   : > { %v4315_v19 = vpop.eup %4314  ;;  %v3036_v21 = vmul.f32 %v4313_v7, %v6155_v52 }
 0xf6f   : > { %v4317_v3 = vpop.eup %4316  ;;  %v3031_v25 = vadd.f32 1.0, %v4315_v19 }
 0xf70   : > { %v4319_v22 = vpop.eup %4318  ;;  %v6253_v23 = vadd.f32 %v3038_v20, %v3036_v21 }
 0xf71   : > { %v4321_v24 = vpop.eup %4320  ;;  %v3039_v26 = vmul.f32 %v4319_v22, %v4317_v3 }
 0xf72   : > { %v3037_v27 = vmul.f32 %v4321_v24, %v6159_v51  ;;  %4324 = vtanh.f32 %v6253_v23  ;;  %v4323_v52 = vpop.eup %4322 }
 0xf73   : > { %4326 = vrcp.f32 %v3031_v25 }
 0xf74   : > { %v6257_v0 = vadd.f32 %v3039_v26, %v3037_v27 }
 0xf76   : > { %4328 = vtanh.f32 %v6257_v0 }
 0xf7f   : > { %v4325_v28 = vpop.eup %4324 }
 0xf80   : > { %v3044_v29 = vmul.f32 %v4325_v28, %v4323_v52  ;;  %v4327_v33 = vpop.eup %4326 }
 0xf82   : > { %3687 = vst [vmem:[%s4919_s19 + $0xe0] sm:$0xff] %v3044_v29 }
 0xf83   : > { %v4329_v56 = vpop.eup %4328 }
 0xf84   : > { %v3045_v61 = vmul.f32 %v4329_v56, %v4327_v33 }
 0xf86   : > { %3688 = vst [vmem:[%s4919_s19 + $0xe8] sm:$0xff] %v3045_v61  ;;  %v3058_v51 = vpack.c.bf16 %v3045_v61, %v3044_v29 }
 0xf88   : > { %3092 = vmatmul.mubr.bf16.vlgmr.msra.gmra.mxu0 %v3058_v51  ;;  %3135 = vmatmul.mubr.bf16.vlgmr.msra.gmra.mxu1 %v3058_v51 }
0x1048   : > { %v3093_v38 = vpop.f32.mrf.mxu0  ;;  %v3136_v53 = vpop.f32.mrf.mxu1 }
0x1049   : > { %v3145_v4 = vadd.f32 %v3689_v37, %v3093_v38  ;;  %v3147_v63 = vadd.f32 %v3691_v49, %v3136_v53 }
0x104a   : > { %v3095_v39 = vpop.f32.mrf.mxu0  ;;  %v3138_v34 = vpop.f32.mrf.mxu1 }
0x104b   : > { %v3697_v40 = vmul.f32 -1.442695, %v3145_v4  ;;  %v3146_v36 = vadd.f32 %v3690_v62, %v3095_v39  ;;  %v3148_v47 = vadd.f32 %v3692_v46, %v3138_v34 }
0x104c   : > { %v3097_v57 = vpop.f32.mrf.mxu0  ;;  %v3140_v6 = vpop.f32.mrf.mxu1 }
0x104d   : > { %4330 = vpow2.f32 %v3697_v40  ;;  %v3699_v45 = vmul.f32 -1.442695, %v3146_v36  ;;  %v3149_v8 = vadd.f32 %v3693_v60, %v3097_v57  ;;  %v3701_v50 = vmul.f32 -1.442695, %v3148_v47 }
0x104e   : > { %v3099_v5 = vpop.f32.mrf.mxu0  ;;  %v3142_v48 = vpop.f32.mrf.mxu1  ;;  %v3151_v58 = vadd.f32 %v3695_v31, %v3140_v6 }
0x104f   : > { %4332 = vpow2.f32 %v3699_v45  ;;  %v3698_v30 = vmul.f32 -1.442695, %v3149_v8  ;;  %v3150_v59 = vadd.f32 %v3694_v12, %v3099_v5  ;;  %v3152_v55 = vadd.f32 %v3696_v43, %v3142_v48 }
0x1051   : > { %4334 = vpow2.f32 %v3698_v30  ;;  %v3700_v41 = vmul.f32 -1.442695, %v3150_v59  ;;  %v3702_v9 = vmul.f32 -1.442695, %v3152_v55 }
0x1053   : > { %4336 = vpow2.f32 %v3700_v41 }
0x1054   : > { %4338 = vpow2.f32 %v3701_v50 }
0x105a   : > { %v4331_v42 = vpop.eup %4330 }
0x105b   : > { %v3159_v44 = vadd.f32 1.0, %v4331_v42 }
0x105c   : > { %v4333_v32 = vpop.eup %4332 }
0x105d   : > { %4340 = vrcp.f32 %v3159_v44  ;;  %v3171_v54 = vadd.f32 1.0, %v4333_v32 }
0x105e   : > { %v4335_v10 = vpop.eup %4334  ;;  %4342 = vtanh.f32 %v3147_v63 }
0x105f   : > { %4344 = vrcp.f32 %v3171_v54  ;;  %v3160_v11 = vadd.f32 1.0, %v4335_v10 }
0x1060   : > { %v4337_v35 = vpop.eup %4336  ;;  %4346 = vpow2.f32 %v3702_v9 }
0x1061   : > { %4348 = vrcp.f32 %v3160_v11  ;;  %v3172_v13 = vadd.f32 1.0, %v4337_v35  ;;  %v4339_v14 = vpop.eup %4338 }
0x1062   : > { %4350 = vtanh.f32 %v3151_v58  ;;  %v3185_v1 = vadd.f32 1.0, %v4339_v14 }
0x1063   : > { %4352 = vrcp.f32 %v3172_v13 }
0x1064   : > { %4354 = vrcp.f32 %v3185_v1 }
0x106a   : > { %v4341_v15 = vpop.eup %4340 }
0x106b   : > { %v4343_v16 = vpop.eup %4342 }
0x106c   : > { %v4345_v2 = vpop.eup %4344  ;;  %v3193_v7 = vmul.f32 %v4343_v16, %v4341_v15 }
0x106d   : > { %v4347_v17 = vpop.eup %4346  ;;  %v3191_v18 = vmul.f32 %v4345_v2, %v6253_v23 }
0x106e   : > { %v4349_v19 = vpop.eup %4348  ;;  %v3186_v22 = vadd.f32 1.0, %v4347_v17 }
0x106f   : > { %v4351_v20 = vpop.eup %4350  ;;  %v3195_v21 = vadd.f32 %v3193_v7, %v3191_v18 }
0x1070   : > { %v4353_v3 = vpop.eup %4352  ;;  %v3194_v24 = vmul.f32 %v4351_v20, %v4349_v19 }
0x1071   : > { %4356 = vtanh.f32 %v3195_v21  ;;  %3206 = vst [vmem:[#allocation3 + $0x8] sm:$0xff] %v3195_v21  ;;  %v3192_v25 = vmul.f32 %v4353_v3, %v6257_v0  ;;  %v4355_v27 = vpop.eup %4354 }
0x1072   : > { %4358 = vrcp.f32 %v3186_v22 }
0x1073   : > { %v3196_v26 = vadd.f32 %v3194_v24, %v3192_v25 }
0x1075   : > { %4360 = vtanh.f32 %v3196_v26  ;;  %3207 = vst [vmem:[#allocation3] sm:$0xff] %v3196_v26 }
0x107e   : > { %v4357_v52 = vpop.eup %4356 }
0x107f   : > { %v3199_v23 = vmul.f32 %v4357_v52, %v4355_v27  ;;  %v4359_v28 = vpop.eup %4358 }
0x1081   : > { %3703 = vst [vmem:[%s4919_s19 + $0xf0] sm:$0xff] %v3199_v23  ;;  %3204 = vst [vmem:[#allocation2] sm:$0xff] %v3199_v23  ;;  %3211 = sbr.rel (%p3705_p3) target bundleno = 4232 (0x1088), region = 59 }
0x1082   : > { %v4361_v29 = vpop.eup %4360 }
0x1083   : > { %v3200_v33 = vmul.f32 %v4361_v29, %v4359_v28 }
0x1085   : > { %3704 = vst [vmem:[%s4919_s19 + $0xf8] sm:$0xff] %v3200_v33  ;;  %3205 = vst [vmem:[#allocation2 + $0x8] sm:$0xff] %v3200_v33 }
0x1086   : > { %3212 = vst [vmem:[%s4910_s14] sm:$0xff] %v3199_v23  ;;  %3214 = vst [vmem:[%s4915_s27] sm:$0xff] %v3195_v21 }
0x1087   : > { %3213 = vst [vmem:[%s4910_s14 + $0x8] sm:$0xff] %v3200_v33  ;;  %3215 = vst [vmem:[%s4915_s27 + $0x8] sm:$0xff] %v3196_v26 }
0x1088 PF: > { %s3217_s28 = scalar_lea.sflag [#allocation6], %s4898_s5 }
0x1089   : > { %s3715_s10 = sshll.u32 %s4500_s18, 6  ;;  %s3253_s12 = sshll.u32 %s4919_s19, 4  ;;  %s3254_s12 = int_to_ptr.vmem [resolvable:$true] %s3253_s12 }
0x108a   : > { %s3240_s11 = sadd.s32 %s3715_s10, %s4901_s6  ;;  %s4520_s5 = smov 256  }
0x108b   : > { %s3710_s13 = sshll.u32 %s3240_s11, 7  ;;  %3716 = sst [smem:[#allocation8]] (%p4612_p8), %s4520_s5 }
0x108c   : > { %s3242_s7 = scalar_lea.hbm %s6330_s2, %s3710_s13  ;;  %s4521_s9 = smov 512  }
0x108d   : > { %3717 = sst [smem:[#allocation8 + $0x1]] (%p4612_p8), %s4521_s9  ;;  %s4522_s23 = smov 2  }
0x108e   : > { %3718 = sst [smem:[#allocation8 + $0x2]] (%p4612_p8), %s4522_s23  ;;  %s4523_s18 = smov 128  }
0x108f   : > { %3719 = sst [smem:[#allocation8 + $0x3]] (%p4612_p8), %s4523_s18  ;;  %s4524_s6 = smov 8  }
0x1090   : > { %3720 = sst [smem:[#allocation8 + $0x4]] (%p4612_p8), %s4523_s18  ;;  %s4525_s19 = smov 131072  }
0x1091   : > { %3721 = sst [smem:[#allocation8 + $0x5]] (%p4612_p8), %s4524_s6  ;;  %s4526_s24 = smov 0  }
0x1092   : > { %3722 = dma.general (%p4612_p8), %s3254_s12, 4096, %s3242_s7, %s3217_s28, %s4525_s19, [#allocation8], %s4526_s24, 0  }
0x1093 PF: > { %p3728_p4 = scmp.ge.s32.totalorder %s4516_s22, 2  ;;  %s3289_s0 = sand.u32 1, %s4488_s15  }
0x1094   : > { %s3290_s3 = scalar_lea.sflag [#allocation6], %s3289_s0 }
0x1095   : > { %p3725_p5 = pnand %p3728_p4, %p4616_p9 }
0x1097   : > { %p3726_p6 = pneg %p3725_p5 }
0x1099   : > { %4483 = dma.done.wait (%p3726_p6), %s3290_s3, 4096  }
0x109a   : > { %4485 = vsyncadd (%p3726_p6), %s3290_s3, 4294963200  ;;  %s18_s22 = sadd.s32 1, %s4516_s22   ;;  %s6340_s15 = smov %s4492_s16 }
0x109b   : > { %p15_p7 = scmp.ge.s32.totalorder %s18_s22, 10   ;;  %s6341_s16 = smov %s4496_s17 }
0x109c   : > { %s6342_s17 = smov %s4624_s8  ;;  %s6343_s18 = smov %s4508_s20 }
0x109d   : > { %s6344_s19 = smov %s4512_s21  ;;  %s6345_s20 = smov %s6348_s25 }
0x109e   : > { %s6346_s21 = smov %s6352_s26  ;;  %17 = sbr.rel (!%p15_p7) target bundleno = 8 (0x8), region = 158 }
0x10a3   :  { %3311 = vsyncpa [#allocation6], 1 }
0x10a4   :  { %3313 = vsyncpa [#allocation6 + $0x1], 1 }

// kernel: encoder_forward.2
= control target key start
LH: loop header
LB: loop body
LE: loop exit
PB: predicated region body
PF: predicated region fallthrough
CT: control target
= control target key end

     0   :  { %s4896_s15 = smov 0   ;;  %s4898_s16 = smov 0   ;;  %s6621_s0 = inlined_call_operand.vmem [shape: f32[64,32,512], index: 0, kind: input, shape index: {}]   ;;  %s6622_s1 = inlined_call_operand.vmem [shape: bf16[128,512], index: 1, kind: input, shape index: {}]   ;;  %s6623_s2 = inlined_call_operand.vmem [shape: bf16[64,32,128], index: 2, kind: output, shape index: {0}]   ;;  %s6624_s3 = inlined_call_operand.vmem [shape: f32[32,128], index: 3, kind: output, shape index: {1}]   ;;  %s6625_s4 = inlined_call_operand.vmem [shape: f32[32,128], index: 4, kind: output, shape index: {2}]  }
   0x1   :  { %s4900_s17 = smov 0   ;;  %s4902_s18 = smov 0  }
   0x2   :  { %s4904_s19 = smov 0   ;;  %s4906_s20 = smov 0  }
   0x3   :  { %s4908_s21 = smov 0  }
   0x4 LB: > { %s24_s22 = sadd.s32 1, %s4859_s19  ;;  %s27_s23 = sadd.s32 1, %s4863_s20  ;;  %s4867_s21 = sphi %s4908_s21, %s15_s21   ;;  %s4863_s20 = sphi %s4906_s20, %s6632_s20   ;;  %s4859_s19 = sphi %s4904_s19, %s6631_s19   ;;  %s4855_s18 = sphi %s4902_s18, %s6630_s18   ;;  %s4851_s17 = sphi %s4900_s17, %s6629_s17   ;;  %s4847_s16 = sphi %s4898_s16, %s6628_s16   ;;  %s4843_s15 = sphi %s4896_s15, %s6627_s15  }
   0x5   : > { %p25_p0 = scmp.ge.s32.totalorder %s24_s22, 4  ;;  %s3645_s24 = sadd.s32 4294967295, %s4867_s21  }
   0x6   : > { %p43_p1 = scmp.ne.s32.totalorder %s4847_s16, %s4843_s15  ;;  %p44_p2 = scmp.eq.s32.totalorder %s4867_s21, 0 }
   0x7   : > { %s6634_s22 = smov (%p25_p0, %s24_s22), 0  ;;  %s6636_s23 = smov (!%p25_p0, %s27_s23), %s4863_s20 }
   0x8   : > { %p29_p3 = scmp.ge.s32.totalorder %s6636_s23, 2  ;;  %p96_p4 = scmp.eq.s32.totalorder %s3645_s24, 7 }
   0x9   : > { %s31_s25 = ssub.s32 %s4859_s19, %s6634_s22  ;;  %p45_p5 = por %p44_p2, %p43_p1 }
   0xa   : > { %s6638_s23 = smov (%p29_p3, %s6636_s23), 0  ;;  %p4944_p6 = por %p96_p4, %p43_p1 }
   0xb   : > { %s32_s27 = ssub.s32 %s4863_s20, %s6638_s23  ;;  %s36_s29 = sadd.s32 1, %s4847_s16 }
   0xc   : > { %s33_s28 = sor.u32 %s32_s27, %s31_s25  ;;  %p3648_p8 = scmp.ge.s32.totalorder %s4867_s21, 8 }
   0xd   : > { %p34_p7 = scmp.eq.s32.totalorder %s33_s28, 0 }
   0xe   : > { %173 = sbr.rel (%p3648_p8) target bundleno = 90 (0x5a), region = 20 }
   0xf   : > { %s4952_s30 = scalar_select %p34_p7, %s4847_s16, %s36_s29  }
  0x13   : > { %176 = sbr.rel (!%p45_p5) target bundleno = 90 (0x5a), region = 24  ;;  %s178_s5 = sand.u32 (%p45_p5), 1, %s4847_s16  }
  0x14   : > { %s3981_s6 = sshll.u32 (%p45_p5), %s4863_s20, 3  ;;  %s3649_s7 = sshll.u32 (%p45_p5), %s178_s5, 10 }
  0x15   : > { %s3982_s8 = sshll.u32 (%p45_p5), %s4859_s19, 8  ;;  %s4966_s14 = scalar_lea.vmem (%p45_p5), [#allocation4], %s3649_s7 }
  0x16   : > { %s185_s9 = sadd.s32 (%p45_p5), %s3982_s8, %s3981_s6 }
  0x17   : > { %s3654_s10 = sshll.u32 (%p45_p5), %s185_s9, 3 }
  0x18   : > { %s4961_s13 = scalar_lea.vmem %s6621_s0, %s3654_s10 }
  0x19   : > { %v200_v0 = vld [vmem:[%s4961_s13] sm:$0xff]  ;;  %v202_v1 = vld [vmem:[%s4961_s13 + $0x8] sm:$0xff]  ;;  %v204_v2 = vld [vmem:[%s4961_s13 + $0x10] sm:$0xff] }
  0x1a   : > { %201 = vst [vmem:[%s4966_s14] sm:$0xff] %v200_v0  ;;  %203 = vst [vmem:[%s4966_s14 + $0x8] sm:$0xff] %v202_v1  ;;  %v206_v3 = vld [vmem:[%s4961_s13 + $0x18] sm:$0xff]  ;;  %v208_v4 = vld [vmem:[%s4961_s13 + $0x20] sm:$0xff] }
  0x1b   : > { %205 = vst [vmem:[%s4966_s14 + $0x10] sm:$0xff] %v204_v2  ;;  %v210_v5 = vld [vmem:[%s4961_s13 + $0x28] sm:$0xff]  ;;  %207 = vst [vmem:[%s4966_s14 + $0x18] sm:$0xff] %v206_v3  ;;  %v212_v6 = vld [vmem:[%s4961_s13 + $0x30] sm:$0xff] }
  0x1c   : > { %209 = vst [vmem:[%s4966_s14 + $0x20] sm:$0xff] %v208_v4  ;;  %211 = vst [vmem:[%s4966_s14 + $0x28] sm:$0xff] %v210_v5  ;;  %v214_v7 = vld [vmem:[%s4961_s13 + $0x38] sm:$0xff]  ;;  %v216_v8 = vld [vmem:[%s4961_s13 + $0x80] sm:$0xff] }
  0x1d   : > { %213 = vst [vmem:[%s4966_s14 + $0x30] sm:$0xff] %v212_v6  ;;  %215 = vst [vmem:[%s4966_s14 + $0x38] sm:$0xff] %v214_v7  ;;  %v218_v9 = vld [vmem:[%s4961_s13 + $0x88] sm:$0xff]  ;;  %v220_v10 = vld [vmem:[%s4961_s13 + $0x90] sm:$0xff] }
  0x1e   : > { %217 = vst [vmem:[%s4966_s14 + $0x40] sm:$0xff] %v216_v8  ;;  %v222_v11 = vld [vmem:[%s4961_s13 + $0x98] sm:$0xff]  ;;  %219 = vst [vmem:[%s4966_s14 + $0x48] sm:$0xff] %v218_v9  ;;  %v224_v12 = vld [vmem:[%s4961_s13 + $0xa0] sm:$0xff] }
  0x1f   : > { %221 = vst [vmem:[%s4966_s14 + $0x50] sm:$0xff] %v220_v10  ;;  %223 = vst [vmem:[%s4966_s14 + $0x58] sm:$0xff] %v222_v11  ;;  %v226_v13 = vld [vmem:[%s4961_s13 + $0xa8] sm:$0xff]  ;;  %v228_v14 = vld [vmem:[%s4961_s13 + $0xb0] sm:$0xff] }
  0x20   : > { %225 = vst [vmem:[%s4966_s14 + $0x60] sm:$0xff] %v224_v12  ;;  %227 = vst [vmem:[%s4966_s14 + $0x68] sm:$0xff] %v226_v13  ;;  %v230_v15 = vld [vmem:[%s4961_s13 + $0xb8] sm:$0xff]  ;;  %v232_v16 = vld [vmem:[%s4961_s13 + $0x100] sm:$0xff] }
  0x21   : > { %229 = vst [vmem:[%s4966_s14 + $0x70] sm:$0xff] %v228_v14  ;;  %v234_v17 = vld [vmem:[%s4961_s13 + $0x108] sm:$0xff]  ;;  %231 = vst [vmem:[%s4966_s14 + $0x78] sm:$0xff] %v230_v15  ;;  %v236_v18 = vld [vmem:[%s4961_s13 + $0x110] sm:$0xff] }
  0x22   : > { %233 = vst [vmem:[%s4966_s14 + $0x80] sm:$0xff] %v232_v16  ;;  %235 = vst [vmem:[%s4966_s14 + $0x88] sm:$0xff] %v234_v17  ;;  %v238_v19 = vld [vmem:[%s4961_s13 + $0x118] sm:$0xff]  ;;  %v240_v20 = vld [vmem:[%s4961_s13 + $0x120] sm:$0xff] }
  0x23   : > { %237 = vst [vmem:[%s4966_s14 + $0x90] sm:$0xff] %v236_v18  ;;  %239 = vst [vmem:[%s4966_s14 + $0x98] sm:$0xff] %v238_v19  ;;  %v242_v21 = vld [vmem:[%s4961_s13 + $0x128] sm:$0xff]  ;;  %v244_v22 = vld [vmem:[%s4961_s13 + $0x130] sm:$0xff] }
  0x24   : > { %241 = vst [vmem:[%s4966_s14 + $0xa0] sm:$0xff] %v240_v20  ;;  %v246_v23 = vld [vmem:[%s4961_s13 + $0x138] sm:$0xff]  ;;  %243 = vst [vmem:[%s4966_s14 + $0xa8] sm:$0xff] %v242_v21  ;;  %v248_v24 = vld [vmem:[%s4961_s13 + $0x180] sm:$0xff] }
  0x25   : > { %245 = vst [vmem:[%s4966_s14 + $0xb0] sm:$0xff] %v244_v22  ;;  %247 = vst [vmem:[%s4966_s14 + $0xb8] sm:$0xff] %v246_v23  ;;  %v250_v25 = vld [vmem:[%s4961_s13 + $0x188] sm:$0xff]  ;;  %v252_v26 = vld [vmem:[%s4961_s13 + $0x190] sm:$0xff] }
  0x26   : > { %249 = vst [vmem:[%s4966_s14 + $0xc0] sm:$0xff] %v248_v24  ;;  %251 = vst [vmem:[%s4966_s14 + $0xc8] sm:$0xff] %v250_v25  ;;  %v254_v27 = vld [vmem:[%s4961_s13 + $0x198] sm:$0xff]  ;;  %v256_v28 = vld [vmem:[%s4961_s13 + $0x1a0] sm:$0xff] }
  0x27   : > { %253 = vst [vmem:[%s4966_s14 + $0xd0] sm:$0xff] %v252_v26  ;;  %v258_v29 = vld [vmem:[%s4961_s13 + $0x1a8] sm:$0xff]  ;;  %255 = vst [vmem:[%s4966_s14 + $0xd8] sm:$0xff] %v254_v27  ;;  %v260_v30 = vld [vmem:[%s4961_s13 + $0x1b0] sm:$0xff] }
  0x28   : > { %257 = vst [vmem:[%s4966_s14 + $0xe0] sm:$0xff] %v256_v28  ;;  %259 = vst [vmem:[%s4966_s14 + $0xe8] sm:$0xff] %v258_v29  ;;  %v262_v31 = vld [vmem:[%s4961_s13 + $0x1b8] sm:$0xff]  ;;  %v264_v32 = vld [vmem:[%s4961_s13 + $0x200] sm:$0xff] }
  0x29   : > { %261 = vst [vmem:[%s4966_s14 + $0xf0] sm:$0xff] %v260_v30  ;;  %263 = vst [vmem:[%s4966_s14 + $0xf8] sm:$0xff] %v262_v31  ;;  %v266_v33 = vld [vmem:[%s4961_s13 + $0x208] sm:$0xff]  ;;  %v268_v34 = vld [vmem:[%s4961_s13 + $0x210] sm:$0xff] }
  0x2a   : > { %265 = vst [vmem:[%s4966_s14 + $0x100] sm:$0xff] %v264_v32  ;;  %v270_v35 = vld [vmem:[%s4961_s13 + $0x218] sm:$0xff]  ;;  %267 = vst [vmem:[%s4966_s14 + $0x108] sm:$0xff] %v266_v33  ;;  %v272_v36 = vld [vmem:[%s4961_s13 + $0x220] sm:$0xff] }
  0x2b   : > { %269 = vst [vmem:[%s4966_s14 + $0x110] sm:$0xff] %v268_v34  ;;  %271 = vst [vmem:[%s4966_s14 + $0x118] sm:$0xff] %v270_v35  ;;  %v274_v37 = vld [vmem:[%s4961_s13 + $0x228] sm:$0xff]  ;;  %v276_v38 = vld [vmem:[%s4961_s13 + $0x230] sm:$0xff] }
  0x2c   : > { %273 = vst [vmem:[%s4966_s14 + $0x120] sm:$0xff] %v272_v36  ;;  %275 = vst [vmem:[%s4966_s14 + $0x128] sm:$0xff] %v274_v37  ;;  %v278_v39 = vld [vmem:[%s4961_s13 + $0x238] sm:$0xff]  ;;  %v280_v40 = vld [vmem:[%s4961_s13 + $0x280] sm:$0xff] }
  0x2d   : > { %277 = vst [vmem:[%s4966_s14 + $0x130] sm:$0xff] %v276_v38  ;;  %v282_v41 = vld [vmem:[%s4961_s13 + $0x288] sm:$0xff]  ;;  %279 = vst [vmem:[%s4966_s14 + $0x138] sm:$0xff] %v278_v39  ;;  %v284_v42 = vld [vmem:[%s4961_s13 + $0x290] sm:$0xff] }
  0x2e   : > { %281 = vst [vmem:[%s4966_s14 + $0x140] sm:$0xff] %v280_v40  ;;  %283 = vst [vmem:[%s4966_s14 + $0x148] sm:$0xff] %v282_v41  ;;  %v286_v43 = vld [vmem:[%s4961_s13 + $0x298] sm:$0xff]  ;;  %v288_v44 = vld [vmem:[%s4961_s13 + $0x2a0] sm:$0xff] }
  0x2f   : > { %285 = vst [vmem:[%s4966_s14 + $0x150] sm:$0xff] %v284_v42  ;;  %287 = vst [vmem:[%s4966_s14 + $0x158] sm:$0xff] %v286_v43  ;;  %v290_v45 = vld [vmem:[%s4961_s13 + $0x2a8] sm:$0xff]  ;;  %v292_v46 = vld [vmem:[%s4961_s13 + $0x2b0] sm:$0xff] }
  0x30   : > { %289 = vst [vmem:[%s4966_s14 + $0x160] sm:$0xff] %v288_v44  ;;  %v294_v47 = vld [vmem:[%s4961_s13 + $0x2b8] sm:$0xff]  ;;  %291 = vst [vmem:[%s4966_s14 + $0x168] sm:$0xff] %v290_v45  ;;  %v296_v48 = vld [vmem:[%s4961_s13 + $0x300] sm:$0xff] }
  0x31   : > { %293 = vst [vmem:[%s4966_s14 + $0x170] sm:$0xff] %v292_v46  ;;  %295 = vst [vmem:[%s4966_s14 + $0x178] sm:$0xff] %v294_v47  ;;  %v298_v49 = vld [vmem:[%s4961_s13 + $0x308] sm:$0xff]  ;;  %v300_v50 = vld [vmem:[%s4961_s13 + $0x310] sm:$0xff] }
  0x32   : > { %297 = vst [vmem:[%s4966_s14 + $0x180] sm:$0xff] %v296_v48  ;;  %299 = vst [vmem:[%s4966_s14 + $0x188] sm:$0xff] %v298_v49  ;;  %v302_v51 = vld [vmem:[%s4961_s13 + $0x318] sm:$0xff]  ;;  %v304_v52 = vld [vmem:[%s4961_s13 + $0x320] sm:$0xff] }
  0x33   : > { %301 = vst [vmem:[%s4966_s14 + $0x190] sm:$0xff] %v300_v50  ;;  %v306_v53 = vld [vmem:[%s4961_s13 + $0x328] sm:$0xff]  ;;  %303 = vst [vmem:[%s4966_s14 + $0x198] sm:$0xff] %v302_v51  ;;  %v308_v54 = vld [vmem:[%s4961_s13 + $0x330] sm:$0xff] }
  0x34   : > { %305 = vst [vmem:[%s4966_s14 + $0x1a0] sm:$0xff] %v304_v52  ;;  %307 = vst [vmem:[%s4966_s14 + $0x1a8] sm:$0xff] %v306_v53  ;;  %v310_v55 = vld [vmem:[%s4961_s13 + $0x338] sm:$0xff]  ;;  %v312_v56 = vld [vmem:[%s4961_s13 + $0x380] sm:$0xff] }
  0x35   : > { %309 = vst [vmem:[%s4966_s14 + $0x1b0] sm:$0xff] %v308_v54  ;;  %311 = vst [vmem:[%s4966_s14 + $0x1b8] sm:$0xff] %v310_v55  ;;  %v314_v57 = vld [vmem:[%s4961_s13 + $0x388] sm:$0xff]  ;;  %v316_v58 = vld [vmem:[%s4961_s13 + $0x390] sm:$0xff] }
  0x36   : > { %313 = vst [vmem:[%s4966_s14 + $0x1c0] sm:$0xff] %v312_v56  ;;  %v318_v59 = vld [vmem:[%s4961_s13 + $0x398] sm:$0xff]  ;;  %315 = vst [vmem:[%s4966_s14 + $0x1c8] sm:$0xff] %v314_v57  ;;  %v320_v60 = vld [vmem:[%s4961_s13 + $0x3a0] sm:$0xff] }
  0x37   : > { %317 = vst [vmem:[%s4966_s14 + $0x1d0] sm:$0xff] %v316_v58  ;;  %319 = vst [vmem:[%s4966_s14 + $0x1d8] sm:$0xff] %v318_v59  ;;  %v322_v61 = vld [vmem:[%s4961_s13 + $0x3a8] sm:$0xff]  ;;  %v324_v62 = vld [vmem:[%s4961_s13 + $0x3b0] sm:$0xff] }
  0x38   : > { %321 = vst [vmem:[%s4966_s14 + $0x1e0] sm:$0xff] %v320_v60  ;;  %323 = vst [vmem:[%s4966_s14 + $0x1e8] sm:$0xff] %v322_v61  ;;  %v326_v63 = vld [vmem:[%s4961_s13 + $0x3b8] sm:$0xff]  ;;  %v328_v0 = vld [vmem:[%s4961_s13 + $0x400] sm:$0xff] }
  0x39   : > { %325 = vst [vmem:[%s4966_s14 + $0x1f0] sm:$0xff] %v324_v62  ;;  %v330_v1 = vld [vmem:[%s4961_s13 + $0x408] sm:$0xff]  ;;  %327 = vst [vmem:[%s4966_s14 + $0x1f8] sm:$0xff] %v326_v63  ;;  %v332_v2 = vld [vmem:[%s4961_s13 + $0x410] sm:$0xff] }
  0x3a   : > { %329 = vst [vmem:[%s4966_s14 + $0x200] sm:$0xff] %v328_v0  ;;  %331 = vst [vmem:[%s4966_s14 + $0x208] sm:$0xff] %v330_v1  ;;  %v334_v3 = vld [vmem:[%s4961_s13 + $0x418] sm:$0xff]  ;;  %v336_v4 = vld [vmem:[%s4961_s13 + $0x420] sm:$0xff] }
  0x3b   : > { %333 = vst [vmem:[%s4966_s14 + $0x210] sm:$0xff] %v332_v2  ;;  %335 = vst [vmem:[%s4966_s14 + $0x218] sm:$0xff] %v334_v3  ;;  %v338_v5 = vld [vmem:[%s4961_s13 + $0x428] sm:$0xff]  ;;  %v340_v6 = vld [vmem:[%s4961_s13 + $0x430] sm:$0xff] }
  0x3c   : > { %337 = vst [vmem:[%s4966_s14 + $0x220] sm:$0xff] %v336_v4  ;;  %v342_v7 = vld [vmem:[%s4961_s13 + $0x438] sm:$0xff]  ;;  %339 = vst [vmem:[%s4966_s14 + $0x228] sm:$0xff] %v338_v5  ;;  %v344_v8 = vld [vmem:[%s4961_s13 + $0x480] sm:$0xff] }
  0x3d   : > { %341 = vst [vmem:[%s4966_s14 + $0x230] sm:$0xff] %v340_v6  ;;  %343 = vst [vmem:[%s4966_s14 + $0x238] sm:$0xff] %v342_v7  ;;  %v346_v9 = vld [vmem:[%s4961_s13 + $0x488] sm:$0xff]  ;;  %v348_v10 = vld [vmem:[%s4961_s13 + $0x490] sm:$0xff] }
  0x3e   : > { %345 = vst [vmem:[%s4966_s14 + $0x240] sm:$0xff] %v344_v8  ;;  %347 = vst [vmem:[%s4966_s14 + $0x248] sm:$0xff] %v346_v9  ;;  %v350_v11 = vld [vmem:[%s4961_s13 + $0x498] sm:$0xff]  ;;  %v352_v12 = vld [vmem:[%s4961_s13 + $0x4a0] sm:$0xff] }
  0x3f   : > { %349 = vst [vmem:[%s4966_s14 + $0x250] sm:$0xff] %v348_v10  ;;  %v354_v13 = vld [vmem:[%s4961_s13 + $0x4a8] sm:$0xff]  ;;  %351 = vst [vmem:[%s4966_s14 + $0x258] sm:$0xff] %v350_v11  ;;  %v356_v14 = vld [vmem:[%s4961_s13 + $0x4b0] sm:$0xff] }
  0x40   : > { %353 = vst [vmem:[%s4966_s14 + $0x260] sm:$0xff] %v352_v12  ;;  %355 = vst [vmem:[%s4966_s14 + $0x268] sm:$0xff] %v354_v13  ;;  %v358_v15 = vld [vmem:[%s4961_s13 + $0x4b8] sm:$0xff]  ;;  %v360_v16 = vld [vmem:[%s4961_s13 + $0x500] sm:$0xff] }
  0x41   : > { %357 = vst [vmem:[%s4966_s14 + $0x270] sm:$0xff] %v356_v14  ;;  %359 = vst [vmem:[%s4966_s14 + $0x278] sm:$0xff] %v358_v15  ;;  %v362_v17 = vld [vmem:[%s4961_s13 + $0x508] sm:$0xff]  ;;  %v364_v18 = vld [vmem:[%s4961_s13 + $0x510] sm:$0xff] }
  0x42   : > { %361 = vst [vmem:[%s4966_s14 + $0x280] sm:$0xff] %v360_v16  ;;  %v366_v19 = vld [vmem:[%s4961_s13 + $0x518] sm:$0xff]  ;;  %363 = vst [vmem:[%s4966_s14 + $0x288] sm:$0xff] %v362_v17  ;;  %v368_v20 = vld [vmem:[%s4961_s13 + $0x520] sm:$0xff] }
  0x43   : > { %365 = vst [vmem:[%s4966_s14 + $0x290] sm:$0xff] %v364_v18  ;;  %367 = vst [vmem:[%s4966_s14 + $0x298] sm:$0xff] %v366_v19  ;;  %v370_v21 = vld [vmem:[%s4961_s13 + $0x528] sm:$0xff]  ;;  %v372_v22 = vld [vmem:[%s4961_s13 + $0x530] sm:$0xff] }
  0x44   : > { %369 = vst [vmem:[%s4966_s14 + $0x2a0] sm:$0xff] %v368_v20  ;;  %371 = vst [vmem:[%s4966_s14 + $0x2a8] sm:$0xff] %v370_v21  ;;  %v374_v23 = vld [vmem:[%s4961_s13 + $0x538] sm:$0xff]  ;;  %v376_v24 = vld [vmem:[%s4961_s13 + $0x580] sm:$0xff] }
  0x45   : > { %373 = vst [vmem:[%s4966_s14 + $0x2b0] sm:$0xff] %v372_v22  ;;  %v378_v25 = vld [vmem:[%s4961_s13 + $0x588] sm:$0xff]  ;;  %375 = vst [vmem:[%s4966_s14 + $0x2b8] sm:$0xff] %v374_v23  ;;  %v380_v26 = vld [vmem:[%s4961_s13 + $0x590] sm:$0xff] }
  0x46   : > { %377 = vst [vmem:[%s4966_s14 + $0x2c0] sm:$0xff] %v376_v24  ;;  %379 = vst [vmem:[%s4966_s14 + $0x2c8] sm:$0xff] %v378_v25  ;;  %v382_v27 = vld [vmem:[%s4961_s13 + $0x598] sm:$0xff]  ;;  %v384_v28 = vld [vmem:[%s4961_s13 + $0x5a0] sm:$0xff] }
  0x47   : > { %381 = vst [vmem:[%s4966_s14 + $0x2d0] sm:$0xff] %v380_v26  ;;  %383 = vst [vmem:[%s4966_s14 + $0x2d8] sm:$0xff] %v382_v27  ;;  %v386_v29 = vld [vmem:[%s4961_s13 + $0x5a8] sm:$0xff]  ;;  %v388_v30 = vld [vmem:[%s4961_s13 + $0x5b0] sm:$0xff] }
  0x48   : > { %385 = vst [vmem:[%s4966_s14 + $0x2e0] sm:$0xff] %v384_v28  ;;  %v390_v31 = vld [vmem:[%s4961_s13 + $0x5b8] sm:$0xff]  ;;  %387 = vst [vmem:[%s4966_s14 + $0x2e8] sm:$0xff] %v386_v29  ;;  %v392_v32 = vld [vmem:[%s4961_s13 + $0x600] sm:$0xff] }
  0x49   : > { %389 = vst [vmem:[%s4966_s14 + $0x2f0] sm:$0xff] %v388_v30  ;;  %391 = vst [vmem:[%s4966_s14 + $0x2f8] sm:$0xff] %v390_v31  ;;  %v394_v33 = vld [vmem:[%s4961_s13 + $0x608] sm:$0xff]  ;;  %v396_v34 = vld [vmem:[%s4961_s13 + $0x610] sm:$0xff] }
  0x4a   : > { %393 = vst [vmem:[%s4966_s14 + $0x300] sm:$0xff] %v392_v32  ;;  %395 = vst [vmem:[%s4966_s14 + $0x308] sm:$0xff] %v394_v33  ;;  %v398_v35 = vld [vmem:[%s4961_s13 + $0x618] sm:$0xff]  ;;  %v400_v36 = vld [vmem:[%s4961_s13 + $0x620] sm:$0xff] }
  0x4b   : > { %397 = vst [vmem:[%s4966_s14 + $0x310] sm:$0xff] %v396_v34  ;;  %v402_v37 = vld [vmem:[%s4961_s13 + $0x628] sm:$0xff]  ;;  %399 = vst [vmem:[%s4966_s14 + $0x318] sm:$0xff] %v398_v35  ;;  %v404_v38 = vld [vmem:[%s4961_s13 + $0x630] sm:$0xff] }
  0x4c   : > { %401 = vst [vmem:[%s4966_s14 + $0x320] sm:$0xff] %v400_v36  ;;  %403 = vst [vmem:[%s4966_s14 + $0x328] sm:$0xff] %v402_v37  ;;  %v406_v39 = vld [vmem:[%s4961_s13 + $0x638] sm:$0xff]  ;;  %v408_v40 = vld [vmem:[%s4961_s13 + $0x680] sm:$0xff] }
  0x4d   : > { %405 = vst [vmem:[%s4966_s14 + $0x330] sm:$0xff] %v404_v38  ;;  %407 = vst [vmem:[%s4966_s14 + $0x338] sm:$0xff] %v406_v39  ;;  %v410_v41 = vld [vmem:[%s4961_s13 + $0x688] sm:$0xff]  ;;  %v412_v42 = vld [vmem:[%s4961_s13 + $0x690] sm:$0xff] }
  0x4e   : > { %409 = vst [vmem:[%s4966_s14 + $0x340] sm:$0xff] %v408_v40  ;;  %v414_v43 = vld [vmem:[%s4961_s13 + $0x698] sm:$0xff]  ;;  %411 = vst [vmem:[%s4966_s14 + $0x348] sm:$0xff] %v410_v41  ;;  %v416_v44 = vld [vmem:[%s4961_s13 + $0x6a0] sm:$0xff] }
  0x4f   : > { %413 = vst [vmem:[%s4966_s14 + $0x350] sm:$0xff] %v412_v42  ;;  %415 = vst [vmem:[%s4966_s14 + $0x358] sm:$0xff] %v414_v43  ;;  %v418_v45 = vld [vmem:[%s4961_s13 + $0x6a8] sm:$0xff]  ;;  %v420_v46 = vld [vmem:[%s4961_s13 + $0x6b0] sm:$0xff] }
  0x50   : > { %417 = vst [vmem:[%s4966_s14 + $0x360] sm:$0xff] %v416_v44  ;;  %419 = vst [vmem:[%s4966_s14 + $0x368] sm:$0xff] %v418_v45  ;;  %v422_v47 = vld [vmem:[%s4961_s13 + $0x6b8] sm:$0xff]  ;;  %v424_v48 = vld [vmem:[%s4961_s13 + $0x700] sm:$0xff] }
  0x51   : > { %421 = vst [vmem:[%s4966_s14 + $0x370] sm:$0xff] %v420_v46  ;;  %v426_v49 = vld [vmem:[%s4961_s13 + $0x708] sm:$0xff]  ;;  %423 = vst [vmem:[%s4966_s14 + $0x378] sm:$0xff] %v422_v47  ;;  %v428_v50 = vld [vmem:[%s4961_s13 + $0x710] sm:$0xff] }
  0x52   : > { %425 = vst [vmem:[%s4966_s14 + $0x380] sm:$0xff] %v424_v48  ;;  %427 = vst [vmem:[%s4966_s14 + $0x388] sm:$0xff] %v426_v49  ;;  %v430_v51 = vld [vmem:[%s4961_s13 + $0x718] sm:$0xff]  ;;  %v432_v52 = vld [vmem:[%s4961_s13 + $0x720] sm:$0xff] }
  0x53   : > { %429 = vst [vmem:[%s4966_s14 + $0x390] sm:$0xff] %v428_v50  ;;  %431 = vst [vmem:[%s4966_s14 + $0x398] sm:$0xff] %v430_v51  ;;  %v434_v53 = vld [vmem:[%s4961_s13 + $0x728] sm:$0xff]  ;;  %v436_v54 = vld [vmem:[%s4961_s13 + $0x730] sm:$0xff] }
  0x54   : > { %433 = vst [vmem:[%s4966_s14 + $0x3a0] sm:$0xff] %v432_v52  ;;  %v438_v55 = vld [vmem:[%s4961_s13 + $0x738] sm:$0xff]  ;;  %435 = vst [vmem:[%s4966_s14 + $0x3a8] sm:$0xff] %v434_v53  ;;  %v440_v56 = vld [vmem:[%s4961_s13 + $0x780] sm:$0xff] }
  0x55   : > { %437 = vst [vmem:[%s4966_s14 + $0x3b0] sm:$0xff] %v436_v54  ;;  %439 = vst [vmem:[%s4966_s14 + $0x3b8] sm:$0xff] %v438_v55  ;;  %v442_v57 = vld [vmem:[%s4961_s13 + $0x788] sm:$0xff]  ;;  %v444_v58 = vld [vmem:[%s4961_s13 + $0x790] sm:$0xff] }
  0x56   : > { %441 = vst [vmem:[%s4966_s14 + $0x3c0] sm:$0xff] %v440_v56  ;;  %443 = vst [vmem:[%s4966_s14 + $0x3c8] sm:$0xff] %v442_v57  ;;  %v446_v59 = vld [vmem:[%s4961_s13 + $0x798] sm:$0xff]  ;;  %v448_v60 = vld [vmem:[%s4961_s13 + $0x7a0] sm:$0xff] }
  0x57   : > { %445 = vst [vmem:[%s4966_s14 + $0x3d0] sm:$0xff] %v444_v58  ;;  %v450_v61 = vld [vmem:[%s4961_s13 + $0x7a8] sm:$0xff]  ;;  %447 = vst [vmem:[%s4966_s14 + $0x3d8] sm:$0xff] %v446_v59  ;;  %v452_v62 = vld [vmem:[%s4961_s13 + $0x7b0] sm:$0xff] }
  0x58   : > { %449 = vst [vmem:[%s4966_s14 + $0x3e0] sm:$0xff] %v448_v60  ;;  %451 = vst [vmem:[%s4966_s14 + $0x3e8] sm:$0xff] %v450_v61  ;;  %v454_v63 = vld [vmem:[%s4961_s13 + $0x7b8] sm:$0xff] }
  0x59   : > { %453 = vst [vmem:[%s4966_s14 + $0x3f0] sm:$0xff] %v452_v62  ;;  %455 = vst [vmem:[%s4966_s14 + $0x3f8] sm:$0xff] %v454_v63 }
  0x5a PF: > { %p3655_p9 = scmp.ge.s32.totalorder %s4867_s21, 1  ;;  %p460_p10 = scmp.lt.s32.totalorder %s4867_s21, 9 }
  0x5c   : > { %p461_p11 = pnand %p3655_p9, %p460_p10 }
  0x5d   : > { %s467_s24 = sand.u32 (!%p461_p11), 1, %s4843_s15   ;;  %s5225_s25 = sshll.u32 (!%p461_p11), %s4855_s18, 1 }
  0x5e   : > { %464 = sbr.rel (%p461_p11) target bundleno = 4237 (0x108d), region = 47  ;;  %s3656_s27 = sshll.u32 (!%p461_p11), %s467_s24, 10 }
  0x5f   : > { %s3657_s28 = sshll.u32 (!%p461_p11), %s467_s24, 7  ;;  %p506_p12 = scmp.lt.s32.totalorder (!%p461_p11), %s5225_s25, 3 }
  0x60   : > { %s5239_s15 = scalar_lea.vmem (!%p461_p11), [#allocation4], %s3656_s27  ;;  %s5241_s18 = scalar_lea.vmem (!%p461_p11), [#allocation5], %s3657_s28 }
  0x61   : > { %p3662_p13 = scmp.ne.s32.totalorder (!%p461_p11), %s4851_s17, 0 }
  0x63   : > { %s507_s29 = scalar_select %p506_p12, %s5225_s25, 3 }
  0x64   : > { %521 = sbr.rel (%p3662_p13) target bundleno = 108 (0x6c), region = 55 }
  0x65   : > { %s3659_s5 = sshll.u32 %s507_s29, 3 }
  0x66   : > { %s5232_s8 = scalar_lea.vmem %s6624_s3, %s3659_s5  ;;  %s5237_s11 = scalar_lea.vmem %s6625_s4, %s3659_s5 }
  0x69   : > { %v4869_v0 = vmov 0.0  }
  0x6a   : > { %522 = vst [vmem:[#allocation2] sm:$0xff] %v4869_v0  ;;  %523 = vst [vmem:[#allocation2 + $0x8] sm:$0xff] %v4869_v0 }
  0x6b   : > { %524 = vst [vmem:[#allocation3 + $0x8] sm:$0xff] %v4869_v0  ;;  %525 = vst [vmem:[#allocation3] sm:$0xff] %v4869_v0 }
  0x6c PF: > { %v5247_v1 = vld [vmem:[%s6622_s1 + $0xe4] ss:$16 sps:$4 sm:$0xff]   ;;  %v5252_v2 = vld [vmem:[%s6622_s1 + $0xe0] ss:$16 sps:$4 sm:$0xff]   ;;  %v4870_v3 = vmov 0   ;;  %v563_v39 = vld [vmem:[%s5239_s15 + $0x8] sm:$0xff] }
  0x6d   : > { %763 = vmatprep.mubr.bf16.mxu0 %v4870_v3  ;;  %806 = vmatprep.mubr.bf16.mxu1 %v4870_v3  ;;  %v5260_v4 = vld [vmem:[%s6622_s1 + $0xc4] ss:$16 sps:$4 sm:$0xff]   ;;  %v5266_v5 = vld [vmem:[%s6622_s1 + $0xc0] ss:$16 sps:$4 sm:$0xff]   ;;  %v5277_v7 = vld [vmem:[%s6622_s1 + $0xec] ss:$16 sps:$4 sm:$0xff]  }
  0x6e   : > { %731 = vmatprep.subr.bf16.mxu0 %v5247_v1  ;;  %v5272_v6 = vld [vmem:[%s6622_s1 + $0xa4] ss:$16 sps:$4 sm:$0xff]   ;;  %v5282_v8 = vld [vmem:[%s6622_s1 + $0xe8] ss:$16 sps:$4 sm:$0xff]   ;;  %v5288_v9 = vld [vmem:[%s6622_s1 + $0xa0] ss:$16 sps:$4 sm:$0xff]   ;;  %774 = vmatprep.subr.bf16.mxu1 %v5277_v7 }
  0x6f   : > { %732 = vmatpush1.bf16.msra.mxu0 %v5252_v2  ;;  %v5295_v10 = vld [vmem:[%s6622_s1 + $0x84] ss:$16 sps:$4 sm:$0xff]   ;;  %775 = vmatpush1.bf16.msra.mxu1 %v5282_v8  ;;  %v5301_v11 = vld [vmem:[%s6622_s1 + $0xcc] ss:$16 sps:$4 sm:$0xff]   ;;  %v5306_v12 = vld [vmem:[%s6622_s1 + $0xc8] ss:$16 sps:$4 sm:$0xff]  }
  0x70   : > { %733 = vmatprep.subr.bf16.mxu0 %v5260_v4  ;;  %776 = vmatprep.subr.bf16.mxu1 %v5301_v11  ;;  %v5313_v13 = vld [vmem:[%s6622_s1 + $0x80] ss:$16 sps:$4 sm:$0xff]   ;;  %v5318_v14 = vld [vmem:[%s6622_s1 + $0x64] ss:$16 sps:$4 sm:$0xff]   ;;  %v5323_v15 = vld [vmem:[%s6622_s1 + $0xac] ss:$16 sps:$4 sm:$0xff]  }
  0x71   : > { %v5330_v16 = vld [vmem:[%s6622_s1 + $0xa8] ss:$16 sps:$4 sm:$0xff]   ;;  %v5336_v17 = vld [vmem:[%s6622_s1 + $0x8c] ss:$16 sps:$4 sm:$0xff]   ;;  %v5342_v18 = vld [vmem:[%s6622_s1 + $0x60] ss:$16 sps:$4 sm:$0xff]  }
  0x72   : > { %v5348_v19 = vld [vmem:[%s6622_s1 + $0x44] ss:$16 sps:$4 sm:$0xff]   ;;  %v5354_v20 = vld [vmem:[%s6622_s1 + $0x88] ss:$16 sps:$4 sm:$0xff]   ;;  %v5360_v21 = vld [vmem:[%s6622_s1 + $0x6c] ss:$16 sps:$4 sm:$0xff]  }
  0x73   : > { %734 = vmatpush1.bf16.msra.mxu0 %v5266_v5  ;;  %777 = vmatpush1.bf16.msra.mxu1 %v5306_v12  ;;  %v5366_v22 = vld [vmem:[%s6622_s1 + $0x40] ss:$16 sps:$4 sm:$0xff]   ;;  %v5372_v23 = vld [vmem:[%s6622_s1 + $0x24] ss:$16 sps:$4 sm:$0xff]   ;;  %v5378_v24 = vld [vmem:[%s6622_s1 + $0x68] ss:$16 sps:$4 sm:$0xff]  }
  0x74   : > { %735 = vmatprep.subr.bf16.mxu0 %v5272_v6  ;;  %778 = vmatprep.subr.bf16.mxu1 %v5323_v15  ;;  %v5384_v25 = vld [vmem:[%s6622_s1 + $0x4c] ss:$16 sps:$4 sm:$0xff]   ;;  %v5390_v26 = vld [vmem:[%s6622_s1 + $0x20] ss:$16 sps:$4 sm:$0xff]   ;;  %v5396_v27 = vld [vmem:[%s6622_s1 + $0x4] ss:$16 sps:$4 sm:$0xff]  }
  0x75   : > { %v5402_v28 = vld [vmem:[%s6622_s1 + $0x48] ss:$16 sps:$4 sm:$0xff]   ;;  %v5408_v29 = vld [vmem:[%s6622_s1 + $0x2c] ss:$16 sps:$4 sm:$0xff]   ;;  %v5414_v30 = vld [vmem:[%s6622_s1] ss:$16 sps:$4 sm:$0xff]  }
  0x76   : > { %v558_v31 = vld [vmem:[#allocation2] sm:$0xff]  ;;  %v559_v32 = vld [vmem:[#allocation2 + $0x8] sm:$0xff]  ;;  %v565_v56 = vld [vmem:[%s5239_s15 + $0x18] sm:$0xff]  ;;  %p3973_p0 = scmp.ne.s32.totalorder %s4851_s17, 3 }
  0x77   : > { %736 = vmatpush1.bf16.msra.mxu0 %v5288_v9  ;;  %779 = vmatpush1.bf16.msra.mxu1 %v5330_v16  ;;  %v5421_v33 = vld [vmem:[%s6622_s1 + $0x28] ss:$16 sps:$4 sm:$0xff]   ;;  %v5427_v34 = vld [vmem:[%s6622_s1 + $0xc] ss:$16 sps:$4 sm:$0xff]   ;;  %v570_v35 = vpack.c.bf16 %v559_v32, %v558_v31  ;;  %v562_v37 = vld [vmem:[%s5239_s15] sm:$0xff] }
  0x78   : > { %737 = vmatprep.subr.bf16.mxu0 %v5295_v10  ;;  %780 = vmatprep.subr.bf16.mxu1 %v5336_v17  ;;  %v5434_v36 = vld [vmem:[%s6622_s1 + $0x8] ss:$16 sps:$4 sm:$0xff]   ;;  %v566_v42 = vld [vmem:[%s5239_s15 + $0x20] sm:$0xff]  ;;  %v564_v57 = vld [vmem:[%s5239_s15 + $0x10] sm:$0xff] }
  0x79   : > { %v567_v46 = vld [vmem:[%s5239_s15 + $0x28] sm:$0xff]  ;;  %v569_v58 = vld [vmem:[%s5239_s15 + $0x38] sm:$0xff]  ;;  %v568_v32 = vld [vmem:[%s5239_s15 + $0x30] sm:$0xff] }
  0x7b   : > { %738 = vmatpush1.bf16.msra.mxu0 %v5313_v13  ;;  %781 = vmatpush1.bf16.msra.mxu1 %v5354_v20 }
  0x7c   : > { %739 = vmatprep.subr.bf16.mxu0 %v5318_v14  ;;  %782 = vmatprep.subr.bf16.mxu1 %v5360_v21 }
  0x7f   : > { %740 = vmatpush1.bf16.msra.mxu0 %v5342_v18  ;;  %783 = vmatpush1.bf16.msra.mxu1 %v5378_v24 }
  0x80   : > { %741 = vmatprep.subr.bf16.mxu0 %v5348_v19  ;;  %784 = vmatprep.subr.bf16.mxu1 %v5384_v25 }
  0x83   : > { %742 = vmatpush1.bf16.msra.mxu0 %v5366_v22  ;;  %785 = vmatpush1.bf16.msra.mxu1 %v5402_v28 }
  0x84   : > { %743 = vmatprep.subr.bf16.mxu0 %v5372_v23  ;;  %786 = vmatprep.subr.bf16.mxu1 %v5408_v29 }
  0x87   : > { %744 = vmatpush1.bf16.msra.mxu0 %v5390_v26  ;;  %787 = vmatpush1.bf16.msra.mxu1 %v5421_v33 }
  0x88   : > { %745 = vmatprep.subr.bf16.mxu0 %v5396_v27  ;;  %788 = vmatprep.subr.bf16.mxu1 %v5427_v34 }
  0x8b   : > { %746 = vmatpush1.bf16.msra.mxu0 %v5414_v30  ;;  %789 = vmatpush1.bf16.msra.mxu1 %v5434_v36 }
  0x8c   : > { %892 = vmatprep.subr.bf16.mxu0 %v5247_v1  ;;  %935 = vmatprep.subr.bf16.mxu1 %v5277_v7 }
  0x8e   : > { %764 = vmatmul.mubr.bf16.vlgmr.msra.gmra.mxu0 %v570_v35  ;;  %807 = vmatmul.mubr.bf16.vlgmr.msra.gmra.mxu1 %v570_v35 }
  0x8f   : > { %893 = vmatpush1.bf16.msra.mxu0 %v5252_v2  ;;  %924 = vmatprep.mubr.bf16.mxu0 %v4870_v3 }
  0x90   : > { %894 = vmatprep.subr.bf16.mxu0 %v5260_v4  ;;  %936 = vmatpush1.bf16.msra.mxu1 %v5282_v8 }
  0x91   : > { %937 = vmatprep.subr.bf16.mxu1 %v5301_v11  ;;  %967 = vmatprep.mubr.bf16.mxu1 %v4870_v3 }
  0x93   : > { %895 = vmatpush1.bf16.msra.mxu0 %v5266_v5 }
  0x94   : > { %896 = vmatprep.subr.bf16.mxu0 %v5272_v6  ;;  %938 = vmatpush1.bf16.msra.mxu1 %v5306_v12 }
  0x95   : > { %939 = vmatprep.subr.bf16.mxu1 %v5323_v15 }
  0x97   : > { %897 = vmatpush1.bf16.msra.mxu0 %v5288_v9 }
  0x98   : > { %898 = vmatprep.subr.bf16.mxu0 %v5295_v10  ;;  %940 = vmatpush1.bf16.msra.mxu1 %v5330_v16 }
  0x99   : > { %941 = vmatprep.subr.bf16.mxu1 %v5336_v17 }
  0x9b   : > { %899 = vmatpush1.bf16.msra.mxu0 %v5313_v13 }
  0x9c   : > { %900 = vmatprep.subr.bf16.mxu0 %v5318_v14  ;;  %942 = vmatpush1.bf16.msra.mxu1 %v5354_v20 }
  0x9d   : > { %943 = vmatprep.subr.bf16.mxu1 %v5360_v21 }
  0x9f   : > { %901 = vmatpush1.bf16.msra.mxu0 %v5342_v18 }
  0xa0   : > { %902 = vmatprep.subr.bf16.mxu0 %v5348_v19  ;;  %944 = vmatpush1.bf16.msra.mxu1 %v5378_v24 }
  0xa1   : > { %945 = vmatprep.subr.bf16.mxu1 %v5384_v25 }
  0xa3   : > { %903 = vmatpush1.bf16.msra.mxu0 %v5366_v22 }
  0xa4   : > { %904 = vmatprep.subr.bf16.mxu0 %v5372_v23  ;;  %946 = vmatpush1.bf16.msra.mxu1 %v5402_v28 }
  0xa5   : > { %947 = vmatprep.subr.bf16.mxu1 %v5408_v29 }
  0xa7   : > { %905 = vmatpush1.bf16.msra.mxu0 %v5390_v26 }
  0xa8   : > { %906 = vmatprep.subr.bf16.mxu0 %v5396_v27  ;;  %948 = vmatpush1.bf16.msra.mxu1 %v5421_v33 }
  0xa9   : > { %949 = vmatprep.subr.bf16.mxu1 %v5427_v34 }
  0xab   : > { %907 = vmatpush1.bf16.msra.mxu0 %v5414_v30 }
  0xac   : > { %1054 = vmatprep.subr.bf16.mxu0 %v5247_v1  ;;  %950 = vmatpush1.bf16.msra.mxu1 %v5434_v36 }
  0xad   : > { %1097 = vmatprep.subr.bf16.mxu1 %v5277_v7 }
 0x14e   : > { %v765_v38 = vpop.f32.mrf.mxu0  ;;  %v808_v49 = vpop.f32.mrf.mxu1 }
 0x14f   : > { %v817_v40 = vadd.f32 %v765_v38, %v562_v37  ;;  %v819_v61 = vadd.f32 %v808_v49, %v564_v57 }
 0x150   : > { %v767_v41 = vpop.f32.mrf.mxu0  ;;  %v810_v53 = vpop.f32.mrf.mxu1 }
 0x151   : > { %v3695_v43 = vmul.f32 -1.442695, %v817_v40  ;;  %v818_v44 = vadd.f32 %v767_v41, %v563_v39  ;;  %v820_v60 = vadd.f32 %v810_v53, %v565_v56 }
 0x152   : > { %v769_v45 = vpop.f32.mrf.mxu0  ;;  %v812_v55 = vpop.f32.mrf.mxu1 }
 0x153   : > { %4217 = vpow2.f32 %v3695_v43  ;;  %v3697_v47 = vmul.f32 -1.442695, %v818_v44  ;;  %v821_v48 = vadd.f32 %v769_v45, %v566_v42  ;;  %v3699_v0 = vmul.f32 -1.442695, %v820_v60 }
 0x154   : > { %v771_v50 = vpop.f32.mrf.mxu0  ;;  %v814_v59 = vpop.f32.mrf.mxu1  ;;  %v823_v40 = vadd.f32 %v812_v55, %v568_v32 }
 0x155   : > { %4219 = vpow2.f32 %v3697_v47  ;;  %v3696_v51 = vmul.f32 -1.442695, %v821_v48  ;;  %v822_v52 = vadd.f32 %v771_v50, %v567_v46  ;;  %v824_v62 = vadd.f32 %v814_v59, %v569_v58  ;;  %v560_v46 = vld [vmem:[#allocation3 + $0x8] sm:$0xff] }
 0x157   : > { %4221 = vpow2.f32 %v3696_v51  ;;  %v3698_v54 = vmul.f32 -1.442695, %v822_v52  ;;  %v3700_v37 = vmul.f32 -1.442695, %v824_v62 }
 0x159   : > { %4223 = vpow2.f32 %v3698_v54  ;;  %v561_v54 = vld [vmem:[#allocation3] sm:$0xff] }
 0x15a   : > { %4225 = vtanh.f32 %v819_v61 }
 0x160   : > { %v4218_v63 = vpop.eup %4217 }
 0x161   : > { %v831_v31 = vadd.f32 1.0, %v4218_v63 }
 0x162   : > { %v4220_v35 = vpop.eup %4219 }
 0x163   : > { %4227 = vrcp.f32 %v831_v31  ;;  %v843_v38 = vadd.f32 1.0, %v4220_v35 }
 0x164   : > { %v4222_v39 = vpop.eup %4221  ;;  %4229 = vpow2.f32 %v3699_v0 }
 0x165   : > { %4231 = vrcp.f32 %v843_v38  ;;  %v832_v41 = vadd.f32 1.0, %v4222_v39  ;;  %v3703_v38 = vld [vmem:[%s5239_s15 + $0x40] sm:$0xff] }
 0x166   : > { %v4224_v42 = vpop.eup %4223  ;;  %4233 = vpow2.f32 %v3700_v37 }
 0x167   : > { %4235 = vrcp.f32 %v832_v41  ;;  %v844_v43 = vadd.f32 1.0, %v4224_v42  ;;  %v4226_v44 = vpop.eup %4225 }
 0x168   : > { %4237 = vtanh.f32 %v823_v40  ;;  %v3704_v40 = vld [vmem:[%s5239_s15 + $0x48] sm:$0xff] }
 0x169   : > { %4239 = vrcp.f32 %v844_v43 }
 0x170   : > { %v4228_v45 = vpop.eup %4227 }
 0x171   : > { %v4230_v47 = vpop.eup %4229  ;;  %v865_v51 = vmul.f32 %v4228_v45, %v4226_v44  ;;  %v3707_v44 = vld [vmem:[%s5239_s15 + $0x60] sm:$0xff] }
 0x172   : > { %v4232_v48 = vpop.eup %4231  ;;  %v857_v53 = vadd.f32 1.0, %v4230_v47 }
 0x173   : > { %v4234_v49 = vpop.eup %4233  ;;  %v863_v50 = vmul.f32 %v4232_v48, %v560_v46  ;;  %v3708_v48 = vld [vmem:[%s5239_s15 + $0x68] sm:$0xff] }
 0x174   : > { %v4236_v52 = vpop.eup %4235  ;;  %v858_v58 = vadd.f32 1.0, %v4234_v49  ;;  %4241 = vrcp.f32 %v857_v53 }
 0x175   : > { %v4238_v55 = vpop.eup %4237  ;;  %v5482_v56 = vadd.f32 %v865_v51, %v863_v50 }
 0x176   : > { %v4240_v57 = vpop.eup %4239  ;;  %v866_v60 = vmul.f32 %v4238_v55, %v4236_v52 }
 0x177   : > { %v864_v59 = vmul.f32 %v4240_v57, %v561_v54  ;;  %4243 = vtanh.f32 %v5482_v56 }
 0x178   : > { %4245 = vrcp.f32 %v858_v58  ;;  %v3706_v58 = vld [vmem:[%s5239_s15 + $0x58] sm:$0xff] }
 0x179   : > { %v5485_v61 = vadd.f32 %v866_v60, %v864_v59  ;;  %v3705_v59 = vld [vmem:[%s5239_s15 + $0x50] sm:$0xff]  ;;  %v3710_v60 = vld [vmem:[%s5239_s15 + $0x78] sm:$0xff] }
 0x17b   : > { %4247 = vtanh.f32 %v5485_v61 }
 0x181   : > { %v4242_v62 = vpop.eup %4241 }
 0x184   : > { %v4244_v63 = vpop.eup %4243 }
 0x185   : > { %v4246_v0 = vpop.eup %4245  ;;  %v871_v32 = vmul.f32 %v4244_v63, %v4242_v62 }
 0x188   : > { %v4248_v31 = vpop.eup %4247 }
 0x189   : > { %v872_v35 = vmul.f32 %v4248_v31, %v4246_v0 }
 0x18b   : > { %v873_v37 = vpack.c.bf16 %v872_v35, %v871_v32 }
 0x18d   : > { %4020 = vst [vmem:[%s5241_s18] sm:$0xff] %v873_v37   ;;  %925 = vmatmul.mubr.bf16.vlgmr.msra.gmra.mxu0 %v873_v37  ;;  %968 = vmatmul.mubr.bf16.vlgmr.msra.gmra.mxu1 %v873_v37 }
 0x18e   : > { %1055 = vmatpush1.bf16.msra.mxu0 %v5252_v2  ;;  %1098 = vmatpush1.bf16.msra.mxu1 %v5282_v8 }
 0x18f   : > { %1056 = vmatprep.subr.bf16.mxu0 %v5260_v4  ;;  %1099 = vmatprep.subr.bf16.mxu1 %v5301_v11 }
 0x190   : > { %1086 = vmatprep.mubr.bf16.mxu0 %v4870_v3  ;;  %1129 = vmatprep.mubr.bf16.mxu1 %v4870_v3 }
 0x192   : > { %1057 = vmatpush1.bf16.msra.mxu0 %v5266_v5  ;;  %1100 = vmatpush1.bf16.msra.mxu1 %v5306_v12 }
 0x193   : > { %1058 = vmatprep.subr.bf16.mxu0 %v5272_v6  ;;  %1101 = vmatprep.subr.bf16.mxu1 %v5323_v15 }
 0x196   : > { %1059 = vmatpush1.bf16.msra.mxu0 %v5288_v9  ;;  %1102 = vmatpush1.bf16.msra.mxu1 %v5330_v16 }
 0x197   : > { %1060 = vmatprep.subr.bf16.mxu0 %v5295_v10  ;;  %1103 = vmatprep.subr.bf16.mxu1 %v5336_v17 }
 0x19a   : > { %1061 = vmatpush1.bf16.msra.mxu0 %v5313_v13  ;;  %1104 = vmatpush1.bf16.msra.mxu1 %v5354_v20 }
 0x19b   : > { %1062 = vmatprep.subr.bf16.mxu0 %v5318_v14  ;;  %1105 = vmatprep.subr.bf16.mxu1 %v5360_v21 }
 0x19e   : > { %1063 = vmatpush1.bf16.msra.mxu0 %v5342_v18  ;;  %1106 = vmatpush1.bf16.msra.mxu1 %v5378_v24 }
 0x19f   : > { %1064 = vmatprep.subr.bf16.mxu0 %v5348_v19  ;;  %1107 = vmatprep.subr.bf16.mxu1 %v5384_v25 }
 0x1a2   : > { %1065 = vmatpush1.bf16.msra.mxu0 %v5366_v22  ;;  %1108 = vmatpush1.bf16.msra.mxu1 %v5402_v28 }
 0x1a3   : > { %1066 = vmatprep.subr.bf16.mxu0 %v5372_v23  ;;  %1109 = vmatprep.subr.bf16.mxu1 %v5408_v29 }
 0x1a6   : > { %1067 = vmatpush1.bf16.msra.mxu0 %v5390_v26  ;;  %1110 = vmatpush1.bf16.msra.mxu1 %v5421_v33 }
 0x1a7   : > { %1068 = vmatprep.subr.bf16.mxu0 %v5396_v27  ;;  %1111 = vmatprep.subr.bf16.mxu1 %v5427_v34 }
 0x1aa   : > { %1069 = vmatpush1.bf16.msra.mxu0 %v5414_v30  ;;  %1112 = vmatpush1.bf16.msra.mxu1 %v5434_v36 }
 0x1ab   : > { %1216 = vmatprep.subr.bf16.mxu0 %v5247_v1  ;;  %1259 = vmatprep.subr.bf16.mxu1 %v5277_v7 }
 0x24d   : > { %v926_v39 = vpop.f32.mrf.mxu0  ;;  %v969_v42 = vpop.f32.mrf.mxu1 }
 0x24e   : > { %v978_v41 = vadd.f32 %v3703_v38, %v926_v39  ;;  %v980_v0 = vadd.f32 %v3705_v59, %v969_v42  ;;  %v3709_v38 = vld [vmem:[%s5239_s15 + $0x70] sm:$0xff] }
 0x24f   : > { %v928_v43 = vpop.f32.mrf.mxu0  ;;  %v971_v50 = vpop.f32.mrf.mxu1 }
 0x250   : > { %v3711_v45 = vmul.f32 -1.442695, %v978_v41  ;;  %v979_v46 = vadd.f32 %v3704_v40, %v928_v43  ;;  %v981_v63 = vadd.f32 %v3706_v58, %v971_v50 }
 0x251   : > { %v930_v47 = vpop.f32.mrf.mxu0  ;;  %v973_v55 = vpop.f32.mrf.mxu1 }
 0x252   : > { %4249 = vpow2.f32 %v3711_v45  ;;  %v3713_v49 = vmul.f32 -1.442695, %v979_v46  ;;  %v982_v51 = vadd.f32 %v3707_v44, %v930_v47  ;;  %v3715_v35 = vmul.f32 -1.442695, %v981_v63 }
 0x253   : > { %v932_v52 = vpop.f32.mrf.mxu0  ;;  %v975_v62 = vpop.f32.mrf.mxu1  ;;  %v984_v44 = vadd.f32 %v3709_v38, %v973_v55 }
 0x254   : > { %4251 = vpow2.f32 %v3713_v49  ;;  %v3712_v53 = vmul.f32 -1.442695, %v982_v51  ;;  %v983_v54 = vadd.f32 %v3708_v48, %v932_v52  ;;  %v985_v31 = vadd.f32 %v3710_v60, %v975_v62 }
 0x256   : > { %4253 = vpow2.f32 %v3712_v53  ;;  %v3714_v57 = vmul.f32 -1.442695, %v983_v54  ;;  %v3716_v40 = vmul.f32 -1.442695, %v985_v31 }
 0x258   : > { %4255 = vpow2.f32 %v3714_v57 }
 0x259   : > { %4257 = vtanh.f32 %v980_v0 }
 0x25f   : > { %v4250_v32 = vpop.eup %4249 }
 0x260   : > { %v992_v37 = vadd.f32 1.0, %v4250_v32 }
 0x261   : > { %v4252_v39 = vpop.eup %4251 }
 0x262   : > { %4259 = vrcp.f32 %v992_v37  ;;  %v1004_v41 = vadd.f32 1.0, %v4252_v39 }
 0x263   : > { %v4254_v43 = vpop.eup %4253  ;;  %4261 = vpow2.f32 %v3715_v35 }
 0x264   : > { %4263 = vrcp.f32 %v1004_v41  ;;  %v993_v45 = vadd.f32 1.0, %v4254_v43  ;;  %v3722_v41 = vld [vmem:[%s5239_s15 + $0x88] sm:$0xff] }
 0x265   : > { %v4256_v46 = vpop.eup %4255  ;;  %4265 = vpow2.f32 %v3716_v40 }
 0x266   : > { %4267 = vrcp.f32 %v993_v45  ;;  %v1005_v47 = vadd.f32 1.0, %v4256_v46  ;;  %v4258_v42 = vpop.eup %4257  ;;  %v3725_v46 = vld [vmem:[%s5239_s15 + $0xa0] sm:$0xff] }
 0x267   : > { %4269 = vtanh.f32 %v984_v44 }
 0x268   : > { %4271 = vrcp.f32 %v1005_v47 }
 0x26f   : > { %v4260_v48 = vpop.eup %4259 }
 0x270   : > { %v4262_v49 = vpop.eup %4261  ;;  %v1026_v52 = vmul.f32 %v4260_v48, %v4258_v42 }
 0x271   : > { %v4264_v50 = vpop.eup %4263  ;;  %v1018_v57 = vadd.f32 1.0, %v4262_v49  ;;  %v3726_v49 = vld [vmem:[%s5239_s15 + $0xa8] sm:$0xff] }
 0x272   : > { %v4266_v51 = vpop.eup %4265  ;;  %v1024_v53 = vmul.f32 %v4264_v50, %v5482_v56 }
 0x273   : > { %v4268_v54 = vpop.eup %4267  ;;  %v1019_v60 = vadd.f32 1.0, %v4266_v51  ;;  %4273 = vrcp.f32 %v1018_v57 }
 0x274   : > { %v4270_v58 = vpop.eup %4269  ;;  %v5532_v55 = vadd.f32 %v1026_v52, %v1024_v53 }
 0x275   : > { %v4272_v59 = vpop.eup %4271  ;;  %v1027_v62 = vmul.f32 %v4270_v58, %v4268_v54 }
 0x276   : > { %v1025_v63 = vmul.f32 %v4272_v59, %v5485_v61  ;;  %4275 = vtanh.f32 %v5532_v55  ;;  %v3721_v61 = vld [vmem:[%s5239_s15 + $0x80] sm:$0xff] }
 0x277   : > { %4277 = vrcp.f32 %v1019_v60  ;;  %v3724_v60 = vld [vmem:[%s5239_s15 + $0x98] sm:$0xff] }
 0x278   : > { %v5535_v0 = vadd.f32 %v1027_v62, %v1025_v63  ;;  %v3723_v62 = vld [vmem:[%s5239_s15 + $0x90] sm:$0xff]  ;;  %v3728_v63 = vld [vmem:[%s5239_s15 + $0xb8] sm:$0xff] }
 0x27a   : > { %4279 = vtanh.f32 %v5535_v0 }
 0x280   : > { %v4274_v56 = vpop.eup %4273 }
 0x283   : > { %v4276_v31 = vpop.eup %4275 }
 0x284   : > { %v4278_v32 = vpop.eup %4277  ;;  %v1032_v37 = vmul.f32 %v4276_v31, %v4274_v56 }
 0x287   : > { %v4280_v35 = vpop.eup %4279 }
 0x288   : > { %v1033_v38 = vmul.f32 %v4280_v35, %v4278_v32 }
 0x28a   : > { %v1034_v39 = vpack.c.bf16 %v1033_v38, %v1032_v37 }
 0x28c   : > { %4096 = vst [vmem:[%s5241_s18 + $0x8] sm:$0xff] %v1034_v39   ;;  %1087 = vmatmul.mubr.bf16.vlgmr.msra.gmra.mxu0 %v1034_v39  ;;  %1130 = vmatmul.mubr.bf16.vlgmr.msra.gmra.mxu1 %v1034_v39 }
 0x28d   : > { %1217 = vmatpush1.bf16.msra.mxu0 %v5252_v2  ;;  %1260 = vmatpush1.bf16.msra.mxu1 %v5282_v8 }
 0x28e   : > { %1218 = vmatprep.subr.bf16.mxu0 %v5260_v4  ;;  %1261 = vmatprep.subr.bf16.mxu1 %v5301_v11 }
 0x28f   : > { %1248 = vmatprep.mubr.bf16.mxu0 %v4870_v3  ;;  %1291 = vmatprep.mubr.bf16.mxu1 %v4870_v3 }
 0x291   : > { %1219 = vmatpush1.bf16.msra.mxu0 %v5266_v5  ;;  %1262 = vmatpush1.bf16.msra.mxu1 %v5306_v12 }
 0x292   : > { %1220 = vmatprep.subr.bf16.mxu0 %v5272_v6  ;;  %1263 = vmatprep.subr.bf16.mxu1 %v5323_v15 }
 0x295   : > { %1221 = vmatpush1.bf16.msra.mxu0 %v5288_v9  ;;  %1264 = vmatpush1.bf16.msra.mxu1 %v5330_v16 }
 0x296   : > { %1222 = vmatprep.subr.bf16.mxu0 %v5295_v10  ;;  %1265 = vmatprep.subr.bf16.mxu1 %v5336_v17 }
 0x299   : > { %1223 = vmatpush1.bf16.msra.mxu0 %v5313_v13  ;;  %1266 = vmatpush1.bf16.msra.mxu1 %v5354_v20 }
 0x29a   : > { %1224 = vmatprep.subr.bf16.mxu0 %v5318_v14  ;;  %1267 = vmatprep.subr.bf16.mxu1 %v5360_v21 }
 0x29d   : > { %1225 = vmatpush1.bf16.msra.mxu0 %v5342_v18  ;;  %1268 = vmatpush1.bf16.msra.mxu1 %v5378_v24 }
 0x29e   : > { %1226 = vmatprep.subr.bf16.mxu0 %v5348_v19  ;;  %1269 = vmatprep.subr.bf16.mxu1 %v5384_v25 }
 0x2a1   : > { %1227 = vmatpush1.bf16.msra.mxu0 %v5366_v22  ;;  %1270 = vmatpush1.bf16.msra.mxu1 %v5402_v28 }
 0x2a2   : > { %1228 = vmatprep.subr.bf16.mxu0 %v5372_v23  ;;  %1271 = vmatprep.subr.bf16.mxu1 %v5408_v29 }
 0x2a5   : > { %1229 = vmatpush1.bf16.msra.mxu0 %v5390_v26  ;;  %1272 = vmatpush1.bf16.msra.mxu1 %v5421_v33 }
 0x2a6   : > { %1230 = vmatprep.subr.bf16.mxu0 %v5396_v27  ;;  %1273 = vmatprep.subr.bf16.mxu1 %v5427_v34 }
 0x2a9   : > { %1231 = vmatpush1.bf16.msra.mxu0 %v5414_v30  ;;  %1274 = vmatpush1.bf16.msra.mxu1 %v5434_v36 }
 0x2aa   : > { %1378 = vmatprep.subr.bf16.mxu0 %v5247_v1  ;;  %1421 = vmatprep.subr.bf16.mxu1 %v5277_v7 }
 0x34c   : > { %v1088_v40 = vpop.f32.mrf.mxu0  ;;  %v1131_v44 = vpop.f32.mrf.mxu1 }
 0x34d   : > { %v1140_v43 = vadd.f32 %v3721_v61, %v1088_v40  ;;  %v1142_v32 = vadd.f32 %v3723_v62, %v1131_v44  ;;  %v3727_v61 = vld [vmem:[%s5239_s15 + $0xb0] sm:$0xff] }
 0x34e   : > { %v1090_v45 = vpop.f32.mrf.mxu0  ;;  %v1133_v51 = vpop.f32.mrf.mxu1 }
 0x34f   : > { %v3729_v47 = vmul.f32 -1.442695, %v1140_v43  ;;  %v1141_v42 = vadd.f32 %v3722_v41, %v1090_v45  ;;  %v1143_v31 = vadd.f32 %v3724_v60, %v1133_v51 }
 0x350   : > { %v1092_v48 = vpop.f32.mrf.mxu0  ;;  %v1135_v58 = vpop.f32.mrf.mxu1 }
 0x351   : > { %4281 = vpow2.f32 %v3729_v47  ;;  %v3731_v50 = vmul.f32 -1.442695, %v1141_v42  ;;  %v1144_v52 = vadd.f32 %v3725_v46, %v1092_v48  ;;  %v3733_v38 = vmul.f32 -1.442695, %v1143_v31 }
 0x352   : > { %v1094_v53 = vpop.f32.mrf.mxu0  ;;  %v1137_v56 = vpop.f32.mrf.mxu1  ;;  %v1146_v46 = vadd.f32 %v3727_v61, %v1135_v58 }
 0x353   : > { %4283 = vpow2.f32 %v3731_v50  ;;  %v3730_v54 = vmul.f32 -1.442695, %v1144_v52  ;;  %v1145_v57 = vadd.f32 %v3726_v49, %v1094_v53  ;;  %v1147_v35 = vadd.f32 %v3728_v63, %v1137_v56 }
 0x355   : > { %4285 = vpow2.f32 %v3730_v54  ;;  %v3732_v59 = vmul.f32 -1.442695, %v1145_v57  ;;  %v3734_v41 = vmul.f32 -1.442695, %v1147_v35 }
 0x357   : > { %4287 = vpow2.f32 %v3732_v59 }
 0x358   : > { %4289 = vtanh.f32 %v1142_v32 }
 0x35e   : > { %v4282_v37 = vpop.eup %4281 }
 0x35f   : > { %v1154_v39 = vadd.f32 1.0, %v4282_v37 }
 0x360   : > { %v4284_v40 = vpop.eup %4283 }
 0x361   : > { %4291 = vrcp.f32 %v1154_v39  ;;  %v1166_v43 = vadd.f32 1.0, %v4284_v40 }
 0x362   : > { %v4286_v45 = vpop.eup %4285  ;;  %4293 = vpow2.f32 %v3733_v38 }
 0x363   : > { %4295 = vrcp.f32 %v1166_v43  ;;  %v1155_v47 = vadd.f32 1.0, %v4286_v45 }
 0x364   : > { %v4288_v42 = vpop.eup %4287  ;;  %4297 = vpow2.f32 %v3734_v41 }
 0x365   : > { %4299 = vrcp.f32 %v1155_v47  ;;  %v1167_v48 = vadd.f32 1.0, %v4288_v42  ;;  %v4290_v44 = vpop.eup %4289 }
 0x366   : > { %4301 = vtanh.f32 %v1146_v46 }
 0x367   : > { %4303 = vrcp.f32 %v1167_v48  ;;  %v3745_v48 = vld [vmem:[%s5239_s15 + $0xf0] sm:$0xff] }
 0x36e   : > { %v4292_v49 = vpop.eup %4291 }
 0x36f   : > { %v4294_v50 = vpop.eup %4293  ;;  %v1188_v53 = vmul.f32 %v4292_v49, %v4290_v44 }
 0x370   : > { %v4296_v51 = vpop.eup %4295  ;;  %v1180_v59 = vadd.f32 1.0, %v4294_v50 }
 0x371   : > { %v4298_v52 = vpop.eup %4297  ;;  %v1186_v54 = vmul.f32 %v4296_v51, %v5532_v55 }
 0x372   : > { %v4300_v57 = vpop.eup %4299  ;;  %v1181_v63 = vadd.f32 1.0, %v4298_v52  ;;  %4305 = vrcp.f32 %v1180_v59 }
 0x373   : > { %v4302_v60 = vpop.eup %4301  ;;  %v5583_v58 = vadd.f32 %v1188_v53, %v1186_v54 }
 0x374   : > { %v4304_v62 = vpop.eup %4303  ;;  %v1189_v56 = vmul.f32 %v4302_v60, %v4300_v57 }
 0x375   : > { %v1187_v31 = vmul.f32 %v4304_v62, %v5535_v0  ;;  %4307 = vtanh.f32 %v5583_v58 }
 0x376   : > { %4309 = vrcp.f32 %v1181_v63 }
 0x377   : > { %v5586_v32 = vadd.f32 %v1189_v56, %v1187_v31 }
 0x379   : > { %4311 = vtanh.f32 %v5586_v32 }
 0x37f   : > { %v4306_v55 = vpop.eup %4305 }
 0x382   : > { %v4308_v35 = vpop.eup %4307 }
 0x383   : > { %v4310_v37 = vpop.eup %4309  ;;  %v1194_v39 = vmul.f32 %v4308_v35, %v4306_v55 }
 0x386   : > { %v4312_v38 = vpop.eup %4311 }
 0x387   : > { %v1195_v61 = vmul.f32 %v4312_v38, %v4310_v37 }
 0x389   : > { %v1196_v40 = vpack.c.bf16 %v1195_v61, %v1194_v39 }
 0x38b   : > { %4097 = vst [vmem:[%s5241_s18 + $0x10] sm:$0xff] %v1196_v40   ;;  %1249 = vmatmul.mubr.bf16.vlgmr.msra.gmra.mxu0 %v1196_v40  ;;  %1292 = vmatmul.mubr.bf16.vlgmr.msra.gmra.mxu1 %v1196_v40 }
 0x38c   : > { %1379 = vmatpush1.bf16.msra.mxu0 %v5252_v2  ;;  %1422 = vmatpush1.bf16.msra.mxu1 %v5282_v8  ;;  %v3739_v2 = vld [vmem:[%s5239_s15 + $0xc0] sm:$0xff] }
 0x38d   : > { %1380 = vmatprep.subr.bf16.mxu0 %v5260_v4  ;;  %1423 = vmatprep.subr.bf16.mxu1 %v5301_v11 }
 0x38e   : > { %1410 = vmatprep.mubr.bf16.mxu0 %v4870_v3  ;;  %1453 = vmatprep.mubr.bf16.mxu1 %v4870_v3 }
 0x390   : > { %1381 = vmatpush1.bf16.msra.mxu0 %v5266_v5  ;;  %1424 = vmatpush1.bf16.msra.mxu1 %v5306_v12  ;;  %v3740_v5 = vld [vmem:[%s5239_s15 + $0xc8] sm:$0xff] }
 0x391   : > { %1382 = vmatprep.subr.bf16.mxu0 %v5272_v6  ;;  %1425 = vmatprep.subr.bf16.mxu1 %v5323_v15 }
 0x394   : > { %1383 = vmatpush1.bf16.msra.mxu0 %v5288_v9  ;;  %1426 = vmatpush1.bf16.msra.mxu1 %v5330_v16 }
 0x395   : > { %1384 = vmatprep.subr.bf16.mxu0 %v5295_v10  ;;  %1427 = vmatprep.subr.bf16.mxu1 %v5336_v17  ;;  %v3743_v10 = vld [vmem:[%s5239_s15 + $0xe0] sm:$0xff] }
 0x398   : > { %1385 = vmatpush1.bf16.msra.mxu0 %v5313_v13  ;;  %1428 = vmatpush1.bf16.msra.mxu1 %v5354_v20 }
 0x399   : > { %1386 = vmatprep.subr.bf16.mxu0 %v5318_v14  ;;  %1429 = vmatprep.subr.bf16.mxu1 %v5360_v21  ;;  %v3744_v14 = vld [vmem:[%s5239_s15 + $0xe8] sm:$0xff]  ;;  %v3742_v21 = vld [vmem:[%s5239_s15 + $0xd8] sm:$0xff] }
 0x39c   : > { %1387 = vmatpush1.bf16.msra.mxu0 %v5342_v18  ;;  %1430 = vmatpush1.bf16.msra.mxu1 %v5378_v24 }
 0x39d   : > { %1388 = vmatprep.subr.bf16.mxu0 %v5348_v19  ;;  %1431 = vmatprep.subr.bf16.mxu1 %v5384_v25 }
 0x3a0   : > { %1389 = vmatpush1.bf16.msra.mxu0 %v5366_v22  ;;  %1432 = vmatpush1.bf16.msra.mxu1 %v5402_v28  ;;  %v3741_v22 = vld [vmem:[%s5239_s15 + $0xd0] sm:$0xff] }
 0x3a1   : > { %1390 = vmatprep.subr.bf16.mxu0 %v5372_v23  ;;  %1433 = vmatprep.subr.bf16.mxu1 %v5408_v29  ;;  %v3746_v23 = vld [vmem:[%s5239_s15 + $0xf8] sm:$0xff] }
 0x3a4   : > { %1391 = vmatpush1.bf16.msra.mxu0 %v5390_v26  ;;  %1434 = vmatpush1.bf16.msra.mxu1 %v5421_v33 }
 0x3a5   : > { %1392 = vmatprep.subr.bf16.mxu0 %v5396_v27  ;;  %1435 = vmatprep.subr.bf16.mxu1 %v5427_v34 }
 0x3a8   : > { %1393 = vmatpush1.bf16.msra.mxu0 %v5414_v30  ;;  %1436 = vmatpush1.bf16.msra.mxu1 %v5434_v36 }
 0x3a9   : > { %1540 = vmatprep.subr.bf16.mxu0 %v5247_v1  ;;  %1583 = vmatprep.subr.bf16.mxu1 %v5277_v7 }
 0x44b   : > { %v1250_v4 = vpop.f32.mrf.mxu0  ;;  %v1293_v8 = vpop.f32.mrf.mxu1 }
 0x44c   : > { %v1302_v6 = vadd.f32 %v3739_v2, %v1250_v4  ;;  %v1304_v43 = vadd.f32 %v3741_v22, %v1293_v8  ;;  %v5719_v22 = vld [vmem:[%s6622_s1 + $0x80] ss:$16 sps:$4 sm:$0xff]  }
 0x44d   : > { %v1252_v9 = vpop.f32.mrf.mxu0  ;;  %v1295_v16 = vpop.f32.mrf.mxu1 }
 0x44e   : > { %v3747_v11 = vmul.f32 -1.442695, %v1302_v6  ;;  %v1303_v12 = vadd.f32 %v3740_v5, %v1252_v9  ;;  %v1305_v41 = vadd.f32 %v3742_v21, %v1295_v16  ;;  %v5671_v16 = vld [vmem:[%s6622_s1 + $0xc0] ss:$16 sps:$4 sm:$0xff]   ;;  %v5713_v21 = vld [vmem:[%s6622_s1 + $0x8c] ss:$16 sps:$4 sm:$0xff]  }
 0x44f   : > { %v1254_v13 = vpop.f32.mrf.mxu0  ;;  %v1297_v19 = vpop.f32.mrf.mxu1 }
 0x450   : > { %4313 = vpow2.f32 %v3747_v11  ;;  %v3749_v15 = vmul.f32 -1.442695, %v1303_v12  ;;  %v1306_v1 = vadd.f32 %v3743_v10, %v1254_v13  ;;  %v3751_v47 = vmul.f32 -1.442695, %v1305_v41  ;;  %v5651_v13 = vld [vmem:[%s6622_s1 + $0xe8] ss:$16 sps:$4 sm:$0xff]  }
 0x451   : > { %v1256_v17 = vpop.f32.mrf.mxu0  ;;  %v1299_v0 = vpop.f32.mrf.mxu1  ;;  %v1308_v52 = vadd.f32 %v3745_v48, %v1297_v19  ;;  %v5701_v19 = vld [vmem:[%s6622_s1 + $0xa8] ss:$16 sps:$4 sm:$0xff]   ;;  %v5737_v41 = vld [vmem:[%s6622_s1 + $0x6c] ss:$16 sps:$4 sm:$0xff]  }
 0x452   : > { %4315 = vpow2.f32 %v3749_v15  ;;  %v3748_v7 = vmul.f32 -1.442695, %v1306_v1  ;;  %v1307_v18 = vadd.f32 %v3744_v14, %v1256_v17  ;;  %v1309_v45 = vadd.f32 %v3746_v23, %v1299_v0  ;;  %v5657_v14 = vld [vmem:[%s6622_s1 + $0xc4] ss:$16 sps:$4 sm:$0xff]   ;;  %v5663_v15 = vld [vmem:[%s6622_s1 + $0xcc] ss:$16 sps:$4 sm:$0xff]  }
 0x453   : > { %v5677_v1 = vld [vmem:[%s6622_s1 + $0xc8] ss:$16 sps:$4 sm:$0xff]   ;;  %v5683_v17 = vld [vmem:[%s6622_s1 + $0xa4] ss:$16 sps:$4 sm:$0xff]  }
 0x454   : > { %4317 = vpow2.f32 %v3748_v7  ;;  %v3750_v20 = vmul.f32 -1.442695, %v1307_v18  ;;  %v3752_v49 = vmul.f32 -1.442695, %v1309_v45  ;;  %v5689_v7 = vld [vmem:[%s6622_s1 + $0xac] ss:$16 sps:$4 sm:$0xff]  }
 0x455   : > { %v5695_v18 = vld [vmem:[%s6622_s1 + $0xa0] ss:$16 sps:$4 sm:$0xff]   ;;  %v5725_v23 = vld [vmem:[%s6622_s1 + $0x88] ss:$16 sps:$4 sm:$0xff]   ;;  %v5731_v0 = vld [vmem:[%s6622_s1 + $0x64] ss:$16 sps:$4 sm:$0xff]  }
 0x456   : > { %4319 = vpow2.f32 %v3750_v20  ;;  %v5707_v20 = vld [vmem:[%s6622_s1 + $0x84] ss:$16 sps:$4 sm:$0xff]  }
 0x457   : > { %4321 = vtanh.f32 %v1304_v43  ;;  %v5743_v43 = vld [vmem:[%s6622_s1 + $0x60] ss:$16 sps:$4 sm:$0xff]   ;;  %v5750_v45 = vld [vmem:[%s6622_s1 + $0x44] ss:$16 sps:$4 sm:$0xff]  }
 0x45d   : > { %v4314_v46 = vpop.eup %4313 }
 0x45e   : > { %v1316_v42 = vadd.f32 1.0, %v4314_v46  ;;  %v5757_v46 = vld [vmem:[%s6622_s1 + $0x40] ss:$16 sps:$4 sm:$0xff]  }
 0x45f   : > { %v4316_v44 = vpop.eup %4315 }
 0x460   : > { %4323 = vrcp.f32 %v1316_v42  ;;  %v1328_v50 = vadd.f32 1.0, %v4316_v44  ;;  %v3762_v44 = vld [vmem:[%s5239_s15 + $0x128] sm:$0xff] }
 0x461   : > { %v4318_v51 = vpop.eup %4317  ;;  %4325 = vpow2.f32 %v3751_v47 }
 0x462   : > { %4327 = vrcp.f32 %v1328_v50  ;;  %v1317_v53 = vadd.f32 1.0, %v4318_v51 }
 0x463   : > { %v4320_v54 = vpop.eup %4319  ;;  %4329 = vpow2.f32 %v3752_v49 }
 0x464   : > { %4331 = vrcp.f32 %v1317_v53  ;;  %v1329_v57 = vadd.f32 1.0, %v4320_v54  ;;  %v4322_v59 = vpop.eup %4321 }
 0x465   : > { %4333 = vtanh.f32 %v1308_v52 }
 0x466   : > { %4335 = vrcp.f32 %v1329_v57 }
 0x46d   : > { %v4324_v60 = vpop.eup %4323 }
 0x46e   : > { %v4326_v62 = vpop.eup %4325  ;;  %v1350_v31 = vmul.f32 %v4324_v60, %v4322_v59  ;;  %v3760_v60 = vld [vmem:[%s5239_s15 + $0x118] sm:$0xff] }
 0x46f   : > { %v4328_v63 = vpop.eup %4327  ;;  %v1342_v37 = vadd.f32 1.0, %v4326_v62  ;;  %v3759_v62 = vld [vmem:[%s5239_s15 + $0x110] sm:$0xff] }
 0x470   : > { %v4330_v56 = vpop.eup %4329  ;;  %v1348_v55 = vmul.f32 %v4328_v63, %v5583_v58  ;;  %v3764_v63 = vld [vmem:[%s5239_s15 + $0x138] sm:$0xff] }
 0x471   : > { %v4332_v35 = vpop.eup %4331  ;;  %v1343_v40 = vadd.f32 1.0, %v4330_v56  ;;  %4337 = vrcp.f32 %v1342_v37 }
 0x472   : > { %v4334_v38 = vpop.eup %4333  ;;  %v5634_v39 = vadd.f32 %v1350_v31, %v1348_v55 }
 0x473   : > { %v4336_v61 = vpop.eup %4335  ;;  %v1351_v2 = vmul.f32 %v4334_v38, %v4332_v35 }
 0x474   : > { %v1349_v4 = vmul.f32 %v4336_v61, %v5586_v32  ;;  %4339 = vtanh.f32 %v5634_v39  ;;  %v5645_v32 = vld [vmem:[%s6622_s1 + $0xe0] ss:$16 sps:$4 sm:$0xff]  }
 0x475   : > { %4341 = vrcp.f32 %v1343_v40  ;;  %v3763_v40 = vld [vmem:[%s5239_s15 + $0x130] sm:$0xff] }
 0x476   : > { %v5637_v5 = vadd.f32 %v1351_v2, %v1349_v4 }
 0x478   : > { %4343 = vtanh.f32 %v5637_v5 }
 0x47e   : > { %v4338_v58 = vpop.eup %4337 }
 0x481   : > { %v4340_v6 = vpop.eup %4339 }
 0x482   : > { %v4342_v8 = vpop.eup %4341  ;;  %v1356_v10 = vmul.f32 %v4340_v6, %v4338_v58 }
 0x485   : > { %v4344_v9 = vpop.eup %4343 }
 0x486   : > { %v1357_v11 = vmul.f32 %v4344_v9, %v4342_v8 }
 0x488   : > { %v1358_v12 = vpack.c.bf16 %v1357_v11, %v1356_v10 }
 0x48a   : > { %4098 = vst [vmem:[%s5241_s18 + $0x18] sm:$0xff] %v1358_v12   ;;  %1411 = vmatmul.mubr.bf16.vlgmr.msra.gmra.mxu0 %v1358_v12  ;;  %1454 = vmatmul.mubr.bf16.vlgmr.msra.gmra.mxu1 %v1358_v12 }
 0x48b   : > { %1541 = vmatpush1.bf16.msra.mxu0 %v5645_v32  ;;  %1584 = vmatpush1.bf16.msra.mxu1 %v5651_v13 }
 0x48c   : > { %1542 = vmatprep.subr.bf16.mxu0 %v5657_v14  ;;  %1585 = vmatprep.subr.bf16.mxu1 %v5663_v15 }
 0x48d   : > { %1572 = vmatprep.mubr.bf16.mxu0 %v4870_v3  ;;  %1615 = vmatprep.mubr.bf16.mxu1 %v4870_v3 }
 0x48f   : > { %1543 = vmatpush1.bf16.msra.mxu0 %v5671_v16  ;;  %1586 = vmatpush1.bf16.msra.mxu1 %v5677_v1 }
 0x490   : > { %1544 = vmatprep.subr.bf16.mxu0 %v5683_v17  ;;  %1587 = vmatprep.subr.bf16.mxu1 %v5689_v7 }
 0x493   : > { %1545 = vmatpush1.bf16.msra.mxu0 %v5695_v18  ;;  %1588 = vmatpush1.bf16.msra.mxu1 %v5701_v19 }
 0x494   : > { %1546 = vmatprep.subr.bf16.mxu0 %v5707_v20  ;;  %1589 = vmatprep.subr.bf16.mxu1 %v5713_v21 }
 0x497   : > { %1547 = vmatpush1.bf16.msra.mxu0 %v5719_v22  ;;  %1590 = vmatpush1.bf16.msra.mxu1 %v5725_v23 }
 0x498   : > { %1548 = vmatprep.subr.bf16.mxu0 %v5731_v0  ;;  %1591 = vmatprep.subr.bf16.mxu1 %v5737_v41 }
 0x49b   : > { %1549 = vmatpush1.bf16.msra.mxu0 %v5743_v43  ;;  %1592 = vmatpush1.bf16.msra.mxu1 %v5378_v24  ;;  %v5764_v24 = vld [vmem:[%s6622_s1 + $0x24] ss:$16 sps:$4 sm:$0xff]  }
 0x49c   : > { %1550 = vmatprep.subr.bf16.mxu0 %v5750_v45  ;;  %1593 = vmatprep.subr.bf16.mxu1 %v5384_v25  ;;  %v5777_v25 = vld [vmem:[%s6622_s1 + $0xe4] ss:$16 sps:$4 sm:$0xff]  }
 0x49f   : > { %1551 = vmatpush1.bf16.msra.mxu0 %v5757_v46  ;;  %1594 = vmatpush1.bf16.msra.mxu1 %v5402_v28 }
 0x4a0   : > { %1552 = vmatprep.subr.bf16.mxu0 %v5764_v24  ;;  %1595 = vmatprep.subr.bf16.mxu1 %v5408_v29  ;;  %v3758_v29 = vld [vmem:[%s5239_s15 + $0x108] sm:$0xff] }
 0x4a3   : > { %1553 = vmatpush1.bf16.msra.mxu0 %v5390_v26  ;;  %1596 = vmatpush1.bf16.msra.mxu1 %v5421_v33  ;;  %v5783_v26 = vld [vmem:[%s6622_s1 + $0xec] ss:$16 sps:$4 sm:$0xff]  }
 0x4a4   : > { %1554 = vmatprep.subr.bf16.mxu0 %v5396_v27  ;;  %1597 = vmatprep.subr.bf16.mxu1 %v5427_v34  ;;  %v3757_v27 = vld [vmem:[%s5239_s15 + $0x100] sm:$0xff] }
 0x4a7   : > { %1555 = vmatpush1.bf16.msra.mxu0 %v5414_v30  ;;  %1598 = vmatpush1.bf16.msra.mxu1 %v5434_v36  ;;  %v3761_v36 = vld [vmem:[%s5239_s15 + $0x120] sm:$0xff] }
 0x4a8   : > { %1702 = vmatprep.subr.bf16.mxu0 %v5777_v25  ;;  %1745 = vmatprep.subr.bf16.mxu1 %v5783_v26 }
 0x54a   : > { %v1412_v28 = vpop.f32.mrf.mxu0  ;;  %v1455_v33 = vpop.f32.mrf.mxu1 }
 0x54b   : > { %v1464_v30 = vadd.f32 %v3757_v27, %v1412_v28  ;;  %v1466_v55 = vadd.f32 %v3759_v62, %v1455_v33 }
 0x54c   : > { %v1414_v34 = vpop.f32.mrf.mxu0  ;;  %v1457_v50 = vpop.f32.mrf.mxu1 }
 0x54d   : > { %v3765_v47 = vmul.f32 -1.442695, %v1464_v30  ;;  %v1465_v42 = vadd.f32 %v3758_v29, %v1414_v34  ;;  %v1467_v31 = vadd.f32 %v3760_v60, %v1457_v50 }
 0x54e   : > { %v1416_v48 = vpop.f32.mrf.mxu0  ;;  %v1459_v57 = vpop.f32.mrf.mxu1 }
 0x54f   : > { %4345 = vpow2.f32 %v3765_v47  ;;  %v3767_v49 = vmul.f32 -1.442695, %v1465_v42  ;;  %v1468_v51 = vadd.f32 %v3761_v36, %v1416_v48  ;;  %v3769_v38 = vmul.f32 -1.442695, %v1467_v31  ;;  %v5846_v31 = vld [vmem:[%s6622_s1 + $0x2c] ss:$16 sps:$4 sm:$0xff]  }
 0x550   : > { %v1418_v52 = vpop.f32.mrf.mxu0  ;;  %v1461_v56 = vpop.f32.mrf.mxu1  ;;  %v1470_v8 = vadd.f32 %v3763_v40, %v1459_v57  ;;  %v5882_v40 = vld [vmem:[%s6622_s1 + $0x8] ss:$16 sps:$4 sm:$0xff]  }
 0x551   : > { %4347 = vpow2.f32 %v3767_v49  ;;  %v3766_v53 = vmul.f32 -1.442695, %v1468_v51  ;;  %v1469_v54 = vadd.f32 %v3762_v44, %v1418_v52  ;;  %v1471_v35 = vadd.f32 %v3764_v63, %v1461_v56  ;;  %v5832_v63 = vld [vmem:[%s6622_s1 + $0x4c] ss:$16 sps:$4 sm:$0xff]   ;;  %v5839_v56 = vld [vmem:[%s6622_s1 + $0x48] ss:$16 sps:$4 sm:$0xff]  }
 0x553   : > { %4349 = vpow2.f32 %v3766_v53  ;;  %v3768_v59 = vmul.f32 -1.442695, %v1469_v54  ;;  %v3770_v4 = vmul.f32 -1.442695, %v1471_v35  ;;  %v5858_v35 = vld [vmem:[%s6622_s1 + $0x28] ss:$16 sps:$4 sm:$0xff]  }
 0x555   : > { %4351 = vpow2.f32 %v3768_v59 }
 0x556   : > { %4353 = vtanh.f32 %v1466_v55  ;;  %v5852_v55 = vld [vmem:[%s6622_s1 + $0x20] ss:$16 sps:$4 sm:$0xff]  }
 0x55c   : > { %v4346_v37 = vpop.eup %4345 }
 0x55d   : > { %v1478_v61 = vadd.f32 1.0, %v4346_v37  ;;  %v5864_v37 = vld [vmem:[%s6622_s1 + $0x4] ss:$16 sps:$4 sm:$0xff]  }
 0x55e   : > { %v4348_v2 = vpop.eup %4347 }
 0x55f   : > { %4355 = vrcp.f32 %v1478_v61  ;;  %v1490_v58 = vadd.f32 1.0, %v4348_v2  ;;  %v5876_v61 = vld [vmem:[%s6622_s1] ss:$16 sps:$4 sm:$0xff]  }
 0x560   : > { %v4350_v6 = vpop.eup %4349  ;;  %4357 = vpow2.f32 %v3769_v38  ;;  %v5870_v38 = vld [vmem:[%s6622_s1 + $0xc] ss:$16 sps:$4 sm:$0xff]   ;;  %v3775_v2 = vld [vmem:[%s5239_s15 + $0x140] sm:$0xff] }
 0x561   : > { %4359 = vrcp.f32 %v1490_v58  ;;  %v1479_v9 = vadd.f32 1.0, %v4350_v6  ;;  %v3776_v58 = vld [vmem:[%s5239_s15 + $0x148] sm:$0xff] }
 0x562   : > { %v4352_v10 = vpop.eup %4351  ;;  %4361 = vpow2.f32 %v3770_v4 }
 0x563   : > { %4363 = vrcp.f32 %v1479_v9  ;;  %v1491_v11 = vadd.f32 1.0, %v4352_v10  ;;  %v4354_v12 = vpop.eup %4353  ;;  %v3779_v10 = vld [vmem:[%s5239_s15 + $0x160] sm:$0xff] }
 0x564   : > { %4365 = vtanh.f32 %v1470_v8 }
 0x565   : > { %4367 = vrcp.f32 %v1491_v11 }
 0x56c   : > { %v4356_v27 = vpop.eup %4355 }
 0x56d   : > { %v4358_v28 = vpop.eup %4357  ;;  %v1512_v33 = vmul.f32 %v4356_v27, %v4354_v12 }
 0x56e   : > { %v4360_v29 = vpop.eup %4359  ;;  %v1504_v47 = vadd.f32 1.0, %v4358_v28  ;;  %v3780_v28 = vld [vmem:[%s5239_s15 + $0x168] sm:$0xff] }
 0x56f   : > { %v4362_v30 = vpop.eup %4361  ;;  %v1510_v34 = vmul.f32 %v4360_v29, %v5634_v39 }
 0x570   : > { %v4364_v36 = vpop.eup %4363  ;;  %v1505_v49 = vadd.f32 1.0, %v4362_v30  ;;  %4369 = vrcp.f32 %v1504_v47 }
 0x571   : > { %v4366_v42 = vpop.eup %4365  ;;  %v5795_v48 = vadd.f32 %v1512_v33, %v1510_v34 }
 0x572   : > { %v4368_v44 = vpop.eup %4367  ;;  %v1513_v50 = vmul.f32 %v4366_v42, %v4364_v36 }
 0x573   : > { %v1511_v51 = vmul.f32 %v4368_v44, %v5637_v5  ;;  %4371 = vtanh.f32 %v5795_v48  ;;  %v5825_v5 = vld [vmem:[%s6622_s1 + $0x68] ss:$16 sps:$4 sm:$0xff]  }
 0x574   : > { %4373 = vrcp.f32 %v1505_v49  ;;  %v3778_v49 = vld [vmem:[%s5239_s15 + $0x158] sm:$0xff] }
 0x575   : > { %v5798_v52 = vadd.f32 %v1513_v50, %v1511_v51  ;;  %v3777_v50 = vld [vmem:[%s5239_s15 + $0x150] sm:$0xff]  ;;  %v3782_v51 = vld [vmem:[%s5239_s15 + $0x178] sm:$0xff] }
 0x577   : > { %4375 = vtanh.f32 %v5798_v52 }
 0x57d   : > { %v4370_v39 = vpop.eup %4369 }
 0x580   : > { %v4372_v53 = vpop.eup %4371 }
 0x581   : > { %v4374_v54 = vpop.eup %4373  ;;  %v1518_v59 = vmul.f32 %v4372_v53, %v4370_v39 }
 0x584   : > { %v4376_v57 = vpop.eup %4375 }
 0x585   : > { %v1519_v60 = vmul.f32 %v4376_v57, %v4374_v54 }
 0x587   : > { %v1520_v62 = vpack.c.bf16 %v1519_v60, %v1518_v59 }
 0x589   : > { %4099 = vst [vmem:[%s5241_s18 + $0x20] sm:$0xff] %v1520_v62   ;;  %1573 = vmatmul.mubr.bf16.vlgmr.msra.gmra.mxu0 %v1520_v62  ;;  %1616 = vmatmul.mubr.bf16.vlgmr.msra.gmra.mxu1 %v1520_v62 }
 0x58a   : > { %1703 = vmatpush1.bf16.msra.mxu0 %v5645_v32  ;;  %1746 = vmatpush1.bf16.msra.mxu1 %v5651_v13 }
 0x58b   : > { %1704 = vmatprep.subr.bf16.mxu0 %v5657_v14  ;;  %1747 = vmatprep.subr.bf16.mxu1 %v5663_v15 }
 0x58c   : > { %1734 = vmatprep.mubr.bf16.mxu0 %v4870_v3  ;;  %1777 = vmatprep.mubr.bf16.mxu1 %v4870_v3 }
 0x58e   : > { %1705 = vmatpush1.bf16.msra.mxu0 %v5671_v16  ;;  %1748 = vmatpush1.bf16.msra.mxu1 %v5677_v1 }
 0x58f   : > { %1706 = vmatprep.subr.bf16.mxu0 %v5683_v17  ;;  %1749 = vmatprep.subr.bf16.mxu1 %v5689_v7 }
 0x592   : > { %1707 = vmatpush1.bf16.msra.mxu0 %v5695_v18  ;;  %1750 = vmatpush1.bf16.msra.mxu1 %v5701_v19 }
 0x593   : > { %1708 = vmatprep.subr.bf16.mxu0 %v5707_v20  ;;  %1751 = vmatprep.subr.bf16.mxu1 %v5713_v21 }
 0x596   : > { %1709 = vmatpush1.bf16.msra.mxu0 %v5719_v22  ;;  %1752 = vmatpush1.bf16.msra.mxu1 %v5725_v23 }
 0x597   : > { %1710 = vmatprep.subr.bf16.mxu0 %v5731_v0  ;;  %1753 = vmatprep.subr.bf16.mxu1 %v5737_v41 }
 0x59a   : > { %1711 = vmatpush1.bf16.msra.mxu0 %v5743_v43  ;;  %1754 = vmatpush1.bf16.msra.mxu1 %v5825_v5 }
 0x59b   : > { %1712 = vmatprep.subr.bf16.mxu0 %v5750_v45  ;;  %1755 = vmatprep.subr.bf16.mxu1 %v5832_v63 }
 0x59e   : > { %1713 = vmatpush1.bf16.msra.mxu0 %v5757_v46  ;;  %1756 = vmatpush1.bf16.msra.mxu1 %v5839_v56 }
 0x59f   : > { %1714 = vmatprep.subr.bf16.mxu0 %v5764_v24  ;;  %1757 = vmatprep.subr.bf16.mxu1 %v5846_v31 }
 0x5a2   : > { %1715 = vmatpush1.bf16.msra.mxu0 %v5852_v55  ;;  %1758 = vmatpush1.bf16.msra.mxu1 %v5858_v35 }
 0x5a3   : > { %1716 = vmatprep.subr.bf16.mxu0 %v5864_v37  ;;  %1759 = vmatprep.subr.bf16.mxu1 %v5870_v38 }
 0x5a6   : > { %1717 = vmatpush1.bf16.msra.mxu0 %v5876_v61  ;;  %1760 = vmatpush1.bf16.msra.mxu1 %v5882_v40 }
 0x5a7   : > { %1864 = vmatprep.subr.bf16.mxu0 %v5777_v25  ;;  %1907 = vmatprep.subr.bf16.mxu1 %v5783_v26 }
 0x649   : > { %v1574_v4 = vpop.f32.mrf.mxu0  ;;  %v1617_v8 = vpop.f32.mrf.mxu1 }
 0x64a   : > { %v1626_v6 = vadd.f32 %v3775_v2, %v1574_v4  ;;  %v1628_v54 = vadd.f32 %v3777_v50, %v1617_v8  ;;  %v3781_v2 = vld [vmem:[%s5239_s15 + $0x170] sm:$0xff] }
 0x64b   : > { %v1576_v9 = vpop.f32.mrf.mxu0  ;;  %v1619_v30 = vpop.f32.mrf.mxu1 }
 0x64c   : > { %v3783_v11 = vmul.f32 -1.442695, %v1626_v6  ;;  %v1627_v12 = vadd.f32 %v3776_v58, %v1576_v9  ;;  %v1629_v53 = vadd.f32 %v3778_v49, %v1619_v30 }
 0x64d   : > { %v1578_v27 = vpop.f32.mrf.mxu0  ;;  %v1621_v42 = vpop.f32.mrf.mxu1 }
 0x64e   : > { %4377 = vpow2.f32 %v3783_v11  ;;  %v3785_v29 = vmul.f32 -1.442695, %v1627_v12  ;;  %v1630_v33 = vadd.f32 %v3779_v10, %v1578_v27  ;;  %v3787_v60 = vmul.f32 -1.442695, %v1629_v53 }
 0x64f   : > { %v1580_v34 = vpop.f32.mrf.mxu0  ;;  %v1623_v39 = vpop.f32.mrf.mxu1  ;;  %v1632_v10 = vadd.f32 %v3781_v2, %v1621_v42 }
 0x650   : > { %4379 = vpow2.f32 %v3785_v29  ;;  %v3784_v36 = vmul.f32 -1.442695, %v1630_v33  ;;  %v1631_v47 = vadd.f32 %v3780_v28, %v1580_v34  ;;  %v1633_v57 = vadd.f32 %v3782_v51, %v1623_v39 }
 0x652   : > { %4381 = vpow2.f32 %v3784_v36  ;;  %v3786_v44 = vmul.f32 -1.442695, %v1631_v47  ;;  %v3788_v58 = vmul.f32 -1.442695, %v1633_v57 }
 0x654   : > { %4383 = vpow2.f32 %v3786_v44 }
 0x655   : > { %4385 = vtanh.f32 %v1628_v54 }
 0x65b   : > { %v4378_v59 = vpop.eup %4377 }
 0x65c   : > { %v1640_v62 = vadd.f32 1.0, %v4378_v59 }
 0x65d   : > { %v4380_v4 = vpop.eup %4379 }
 0x65e   : > { %4387 = vrcp.f32 %v1640_v62  ;;  %v1652_v6 = vadd.f32 1.0, %v4380_v4 }
 0x65f   : > { %v4382_v9 = vpop.eup %4381  ;;  %4389 = vpow2.f32 %v3787_v60 }
 0x660   : > { %4391 = vrcp.f32 %v1652_v6  ;;  %v1641_v11 = vadd.f32 1.0, %v4382_v9  ;;  %v3794_v6 = vld [vmem:[%s5239_s15 + $0x188] sm:$0xff] }
 0x661   : > { %v4384_v12 = vpop.eup %4383  ;;  %4393 = vpow2.f32 %v3788_v58 }
 0x662   : > { %4395 = vrcp.f32 %v1641_v11  ;;  %v1653_v27 = vadd.f32 1.0, %v4384_v12  ;;  %v4386_v8 = vpop.eup %4385  ;;  %v3797_v12 = vld [vmem:[%s5239_s15 + $0x1a0] sm:$0xff] }
 0x663   : > { %4397 = vtanh.f32 %v1632_v10 }
 0x664   : > { %4399 = vrcp.f32 %v1653_v27 }
 0x66b   : > { %v4388_v28 = vpop.eup %4387 }
 0x66c   : > { %v4390_v29 = vpop.eup %4389  ;;  %v1674_v34 = vmul.f32 %v4388_v28, %v4386_v8 }
 0x66d   : > { %v4392_v30 = vpop.eup %4391  ;;  %v1666_v44 = vadd.f32 1.0, %v4390_v29  ;;  %v3798_v29 = vld [vmem:[%s5239_s15 + $0x1a8] sm:$0xff] }
 0x66e   : > { %v4394_v33 = vpop.eup %4393  ;;  %v1672_v36 = vmul.f32 %v4392_v30, %v5795_v48 }
 0x66f   : > { %v4396_v47 = vpop.eup %4395  ;;  %v1667_v51 = vadd.f32 1.0, %v4394_v33  ;;  %4401 = vrcp.f32 %v1666_v44 }
 0x670   : > { %v4398_v49 = vpop.eup %4397  ;;  %v5896_v42 = vadd.f32 %v1674_v34, %v1672_v36 }
 0x671   : > { %v4400_v50 = vpop.eup %4399  ;;  %v1675_v39 = vmul.f32 %v4398_v49, %v4396_v47 }
 0x672   : > { %v1673_v53 = vmul.f32 %v4400_v50, %v5798_v52  ;;  %4403 = vtanh.f32 %v5896_v42  ;;  %v3793_v52 = vld [vmem:[%s5239_s15 + $0x180] sm:$0xff] }
 0x673   : > { %4405 = vrcp.f32 %v1667_v51  ;;  %v3796_v51 = vld [vmem:[%s5239_s15 + $0x198] sm:$0xff] }
 0x674   : > { %v5899_v54 = vadd.f32 %v1675_v39, %v1673_v53  ;;  %v3795_v39 = vld [vmem:[%s5239_s15 + $0x190] sm:$0xff]  ;;  %v3800_v53 = vld [vmem:[%s5239_s15 + $0x1b8] sm:$0xff] }
 0x676   : > { %4407 = vtanh.f32 %v5899_v54 }
 0x67c   : > { %v4402_v48 = vpop.eup %4401 }
 0x67f   : > { %v4404_v57 = vpop.eup %4403 }
 0x680   : > { %v4406_v59 = vpop.eup %4405  ;;  %v1680_v62 = vmul.f32 %v4404_v57, %v4402_v48 }
 0x683   : > { %v4408_v60 = vpop.eup %4407 }
 0x684   : > { %v1681_v2 = vmul.f32 %v4408_v60, %v4406_v59 }
 0x686   : > { %v1682_v4 = vpack.c.bf16 %v1681_v2, %v1680_v62 }
 0x688   : > { %4100 = vst [vmem:[%s5241_s18 + $0x28] sm:$0xff] %v1682_v4   ;;  %1735 = vmatmul.mubr.bf16.vlgmr.msra.gmra.mxu0 %v1682_v4  ;;  %1778 = vmatmul.mubr.bf16.vlgmr.msra.gmra.mxu1 %v1682_v4 }
 0x689   : > { %1865 = vmatpush1.bf16.msra.mxu0 %v5645_v32  ;;  %1908 = vmatpush1.bf16.msra.mxu1 %v5651_v13 }
 0x68a   : > { %1866 = vmatprep.subr.bf16.mxu0 %v5657_v14  ;;  %1909 = vmatprep.subr.bf16.mxu1 %v5663_v15 }
 0x68b   : > { %1896 = vmatprep.mubr.bf16.mxu0 %v4870_v3  ;;  %1939 = vmatprep.mubr.bf16.mxu1 %v4870_v3 }
 0x68d   : > { %1867 = vmatpush1.bf16.msra.mxu0 %v5671_v16  ;;  %1910 = vmatpush1.bf16.msra.mxu1 %v5677_v1 }
 0x68e   : > { %1868 = vmatprep.subr.bf16.mxu0 %v5683_v17  ;;  %1911 = vmatprep.subr.bf16.mxu1 %v5689_v7 }
 0x691   : > { %1869 = vmatpush1.bf16.msra.mxu0 %v5695_v18  ;;  %1912 = vmatpush1.bf16.msra.mxu1 %v5701_v19 }
 0x692   : > { %1870 = vmatprep.subr.bf16.mxu0 %v5707_v20  ;;  %1913 = vmatprep.subr.bf16.mxu1 %v5713_v21 }
 0x695   : > { %1871 = vmatpush1.bf16.msra.mxu0 %v5719_v22  ;;  %1914 = vmatpush1.bf16.msra.mxu1 %v5725_v23 }
 0x696   : > { %1872 = vmatprep.subr.bf16.mxu0 %v5731_v0  ;;  %1915 = vmatprep.subr.bf16.mxu1 %v5737_v41 }
 0x699   : > { %1873 = vmatpush1.bf16.msra.mxu0 %v5743_v43  ;;  %1916 = vmatpush1.bf16.msra.mxu1 %v5825_v5 }
 0x69a   : > { %1874 = vmatprep.subr.bf16.mxu0 %v5750_v45  ;;  %1917 = vmatprep.subr.bf16.mxu1 %v5832_v63 }
 0x69d   : > { %1875 = vmatpush1.bf16.msra.mxu0 %v5757_v46  ;;  %1918 = vmatpush1.bf16.msra.mxu1 %v5839_v56 }
 0x69e   : > { %1876 = vmatprep.subr.bf16.mxu0 %v5764_v24  ;;  %1919 = vmatprep.subr.bf16.mxu1 %v5846_v31 }
 0x6a1   : > { %1877 = vmatpush1.bf16.msra.mxu0 %v5852_v55  ;;  %1920 = vmatpush1.bf16.msra.mxu1 %v5858_v35 }
 0x6a2   : > { %1878 = vmatprep.subr.bf16.mxu0 %v5864_v37  ;;  %1921 = vmatprep.subr.bf16.mxu1 %v5870_v38 }
 0x6a5   : > { %1879 = vmatpush1.bf16.msra.mxu0 %v5876_v61  ;;  %1922 = vmatpush1.bf16.msra.mxu1 %v5882_v40 }
 0x6a6   : > { %2026 = vmatprep.subr.bf16.mxu0 %v5777_v25  ;;  %2069 = vmatprep.subr.bf16.mxu1 %v5783_v26 }
 0x748   : > { %v1736_v58 = vpop.f32.mrf.mxu0  ;;  %v1779_v10 = vpop.f32.mrf.mxu1 }
 0x749   : > { %v1788_v9 = vadd.f32 %v3793_v52, %v1736_v58  ;;  %v1790_v59 = vadd.f32 %v3795_v39, %v1779_v10  ;;  %v3799_v52 = vld [vmem:[%s5239_s15 + $0x1b0] sm:$0xff] }
 0x74a   : > { %v1738_v11 = vpop.f32.mrf.mxu0  ;;  %v1781_v33 = vpop.f32.mrf.mxu1 }
 0x74b   : > { %v3801_v27 = vmul.f32 -1.442695, %v1788_v9  ;;  %v1789_v8 = vadd.f32 %v3794_v6, %v1738_v11  ;;  %v1791_v57 = vadd.f32 %v3796_v51, %v1781_v33 }
 0x74c   : > { %v1740_v28 = vpop.f32.mrf.mxu0  ;;  %v1783_v49 = vpop.f32.mrf.mxu1 }
 0x74d   : > { %4409 = vpow2.f32 %v3801_v27  ;;  %v3803_v30 = vmul.f32 -1.442695, %v1789_v8  ;;  %v1792_v34 = vadd.f32 %v3797_v12, %v1740_v28  ;;  %v3805_v2 = vmul.f32 -1.442695, %v1791_v57 }
 0x74e   : > { %v1742_v36 = vpop.f32.mrf.mxu0  ;;  %v1785_v48 = vpop.f32.mrf.mxu1  ;;  %v1794_v12 = vadd.f32 %v3799_v52, %v1783_v49 }
 0x74f   : > { %4411 = vpow2.f32 %v3803_v30  ;;  %v3802_v47 = vmul.f32 -1.442695, %v1792_v34  ;;  %v1793_v44 = vadd.f32 %v3798_v29, %v1742_v36  ;;  %v1795_v60 = vadd.f32 %v3800_v53, %v1785_v48 }
 0x751   : > { %4413 = vpow2.f32 %v3802_v47  ;;  %v3804_v50 = vmul.f32 -1.442695, %v1793_v44  ;;  %v3806_v6 = vmul.f32 -1.442695, %v1795_v60 }
 0x753   : > { %4415 = vpow2.f32 %v3804_v50 }
 0x754   : > { %4417 = vtanh.f32 %v1790_v59 }
 0x75a   : > { %v4410_v62 = vpop.eup %4409 }
 0x75b   : > { %v1802_v4 = vadd.f32 1.0, %v4410_v62 }
 0x75c   : > { %v4412_v58 = vpop.eup %4411 }
 0x75d   : > { %4419 = vrcp.f32 %v1802_v4  ;;  %v1814_v9 = vadd.f32 1.0, %v4412_v58 }
 0x75e   : > { %v4414_v11 = vpop.eup %4413  ;;  %4421 = vpow2.f32 %v3805_v2 }
 0x75f   : > { %4423 = vrcp.f32 %v1814_v9  ;;  %v1803_v27 = vadd.f32 1.0, %v4414_v11  ;;  %v3812_v9 = vld [vmem:[%s5239_s15 + $0x1c8] sm:$0xff] }
 0x760   : > { %v4416_v8 = vpop.eup %4415  ;;  %4425 = vpow2.f32 %v3806_v6 }
 0x761   : > { %4427 = vrcp.f32 %v1803_v27  ;;  %v1815_v28 = vadd.f32 1.0, %v4416_v8  ;;  %v4418_v10 = vpop.eup %4417  ;;  %v3815_v8 = vld [vmem:[%s5239_s15 + $0x1e0] sm:$0xff] }
 0x762   : > { %4429 = vtanh.f32 %v1794_v12 }
 0x763   : > { %4431 = vrcp.f32 %v1815_v28 }
 0x76a   : > { %v4420_v29 = vpop.eup %4419 }
 0x76b   : > { %v4422_v30 = vpop.eup %4421  ;;  %v1836_v36 = vmul.f32 %v4420_v29, %v4418_v10 }
 0x76c   : > { %v4424_v33 = vpop.eup %4423  ;;  %v1828_v50 = vadd.f32 1.0, %v4422_v30  ;;  %v3816_v30 = vld [vmem:[%s5239_s15 + $0x1e8] sm:$0xff] }
 0x76d   : > { %v4426_v34 = vpop.eup %4425  ;;  %v1834_v47 = vmul.f32 %v4424_v33, %v5896_v42 }
 0x76e   : > { %v4428_v44 = vpop.eup %4427  ;;  %v1829_v53 = vadd.f32 1.0, %v4426_v34  ;;  %4433 = vrcp.f32 %v1828_v50 }
 0x76f   : > { %v4430_v51 = vpop.eup %4429  ;;  %v5947_v49 = vadd.f32 %v1836_v36, %v1834_v47 }
 0x770   : > { %v4432_v39 = vpop.eup %4431  ;;  %v1837_v48 = vmul.f32 %v4430_v51, %v4428_v44 }
 0x771   : > { %v1835_v57 = vmul.f32 %v4432_v39, %v5899_v54  ;;  %4435 = vtanh.f32 %v5947_v49  ;;  %v3811_v54 = vld [vmem:[%s5239_s15 + $0x1c0] sm:$0xff] }
 0x772   : > { %4437 = vrcp.f32 %v1829_v53  ;;  %v3814_v53 = vld [vmem:[%s5239_s15 + $0x1d8] sm:$0xff] }
 0x773   : > { %v5950_v59 = vadd.f32 %v1837_v48, %v1835_v57  ;;  %v3813_v48 = vld [vmem:[%s5239_s15 + $0x1d0] sm:$0xff]  ;;  %v3818_v57 = vld [vmem:[%s5239_s15 + $0x1f8] sm:$0xff] }
 0x775   : > { %4439 = vtanh.f32 %v5950_v59 }
 0x77b   : > { %v4434_v42 = vpop.eup %4433 }
 0x77e   : > { %v4436_v60 = vpop.eup %4435 }
 0x77f   : > { %v4438_v62 = vpop.eup %4437  ;;  %v1842_v4 = vmul.f32 %v4436_v60, %v4434_v42 }
 0x782   : > { %v4440_v2 = vpop.eup %4439 }
 0x783   : > { %v1843_v52 = vmul.f32 %v4440_v2, %v4438_v62 }
 0x785   : > { %v1844_v58 = vpack.c.bf16 %v1843_v52, %v1842_v4 }
 0x787   : > { %4101 = vst [vmem:[%s5241_s18 + $0x30] sm:$0xff] %v1844_v58   ;;  %1897 = vmatmul.mubr.bf16.vlgmr.msra.gmra.mxu0 %v1844_v58  ;;  %1940 = vmatmul.mubr.bf16.vlgmr.msra.gmra.mxu1 %v1844_v58 }
 0x788   : > { %2027 = vmatpush1.bf16.msra.mxu0 %v5645_v32  ;;  %2070 = vmatpush1.bf16.msra.mxu1 %v5651_v13 }
 0x789   : > { %2028 = vmatprep.subr.bf16.mxu0 %v5657_v14  ;;  %2071 = vmatprep.subr.bf16.mxu1 %v5663_v15 }
 0x78a   : > { %2058 = vmatprep.mubr.bf16.mxu0 %v4870_v3  ;;  %2101 = vmatprep.mubr.bf16.mxu1 %v4870_v3 }
 0x78c   : > { %2029 = vmatpush1.bf16.msra.mxu0 %v5671_v16  ;;  %2072 = vmatpush1.bf16.msra.mxu1 %v5677_v1 }
 0x78d   : > { %2030 = vmatprep.subr.bf16.mxu0 %v5683_v17  ;;  %2073 = vmatprep.subr.bf16.mxu1 %v5689_v7 }
 0x790   : > { %2031 = vmatpush1.bf16.msra.mxu0 %v5695_v18  ;;  %2074 = vmatpush1.bf16.msra.mxu1 %v5701_v19 }
 0x791   : > { %2032 = vmatprep.subr.bf16.mxu0 %v5707_v20  ;;  %2075 = vmatprep.subr.bf16.mxu1 %v5713_v21 }
 0x794   : > { %2033 = vmatpush1.bf16.msra.mxu0 %v5719_v22  ;;  %2076 = vmatpush1.bf16.msra.mxu1 %v5725_v23 }
 0x795   : > { %2034 = vmatprep.subr.bf16.mxu0 %v5731_v0  ;;  %2077 = vmatprep.subr.bf16.mxu1 %v5737_v41 }
 0x798   : > { %2035 = vmatpush1.bf16.msra.mxu0 %v5743_v43  ;;  %2078 = vmatpush1.bf16.msra.mxu1 %v5825_v5 }
 0x799   : > { %2036 = vmatprep.subr.bf16.mxu0 %v5750_v45  ;;  %2079 = vmatprep.subr.bf16.mxu1 %v5832_v63 }
 0x79c   : > { %2037 = vmatpush1.bf16.msra.mxu0 %v5757_v46  ;;  %2080 = vmatpush1.bf16.msra.mxu1 %v5839_v56 }
 0x79d   : > { %2038 = vmatprep.subr.bf16.mxu0 %v5764_v24  ;;  %2081 = vmatprep.subr.bf16.mxu1 %v5846_v31 }
 0x7a0   : > { %2039 = vmatpush1.bf16.msra.mxu0 %v5852_v55  ;;  %2082 = vmatpush1.bf16.msra.mxu1 %v5858_v35 }
 0x7a1   : > { %2040 = vmatprep.subr.bf16.mxu0 %v5864_v37  ;;  %2083 = vmatprep.subr.bf16.mxu1 %v5870_v38 }
 0x7a4   : > { %2041 = vmatpush1.bf16.msra.mxu0 %v5876_v61  ;;  %2084 = vmatpush1.bf16.msra.mxu1 %v5882_v40 }
 0x7a5   : > { %2188 = vmatprep.subr.bf16.mxu0 %v5777_v25  ;;  %2231 = vmatprep.subr.bf16.mxu1 %v5783_v26 }
 0x847   : > { %v1898_v6 = vpop.f32.mrf.mxu0  ;;  %v1941_v12 = vpop.f32.mrf.mxu1 }
 0x848   : > { %v1950_v11 = vadd.f32 %v3811_v54, %v1898_v6  ;;  %v1952_v62 = vadd.f32 %v3813_v48, %v1941_v12  ;;  %v3817_v54 = vld [vmem:[%s5239_s15 + $0x1f0] sm:$0xff] }
 0x849   : > { %v1900_v27 = vpop.f32.mrf.mxu0  ;;  %v1943_v34 = vpop.f32.mrf.mxu1 }
 0x84a   : > { %v3819_v28 = vmul.f32 -1.442695, %v1950_v11  ;;  %v1951_v10 = vadd.f32 %v3812_v9, %v1900_v27  ;;  %v1953_v60 = vadd.f32 %v3814_v53, %v1943_v34 }
 0x84b   : > { %v1902_v29 = vpop.f32.mrf.mxu0  ;;  %v1945_v51 = vpop.f32.mrf.mxu1 }
 0x84c   : > { %4441 = vpow2.f32 %v3819_v28  ;;  %v3821_v33 = vmul.f32 -1.442695, %v1951_v10  ;;  %v1954_v36 = vadd.f32 %v3815_v8, %v1902_v29  ;;  %v3823_v52 = vmul.f32 -1.442695, %v1953_v60 }
 0x84d   : > { %v1904_v47 = vpop.f32.mrf.mxu0  ;;  %v1947_v42 = vpop.f32.mrf.mxu1  ;;  %v1956_v8 = vadd.f32 %v3817_v54, %v1945_v51 }
 0x84e   : > { %4443 = vpow2.f32 %v3821_v33  ;;  %v3820_v44 = vmul.f32 -1.442695, %v1954_v36  ;;  %v1955_v50 = vadd.f32 %v3816_v30, %v1904_v47  ;;  %v1957_v2 = vadd.f32 %v3818_v57, %v1947_v42 }
 0x850   : > { %4445 = vpow2.f32 %v3820_v44  ;;  %v3822_v39 = vmul.f32 -1.442695, %v1955_v50  ;;  %v3824_v9 = vmul.f32 -1.442695, %v1957_v2 }
 0x852   : > { %4447 = vpow2.f32 %v3822_v39 }
 0x853   : > { %4449 = vtanh.f32 %v1952_v62 }
 0x859   : > { %v4442_v4 = vpop.eup %4441 }
 0x85a   : > { %v1964_v58 = vadd.f32 1.0, %v4442_v4 }
 0x85b   : > { %v4444_v6 = vpop.eup %4443 }
 0x85c   : > { %4451 = vrcp.f32 %v1964_v58  ;;  %v1976_v11 = vadd.f32 1.0, %v4444_v6 }
 0x85d   : > { %v4446_v27 = vpop.eup %4445  ;;  %4453 = vpow2.f32 %v3823_v52 }
 0x85e   : > { %4455 = vrcp.f32 %v1976_v11  ;;  %v1965_v28 = vadd.f32 1.0, %v4446_v27 }
 0x85f   : > { %v4448_v10 = vpop.eup %4447  ;;  %4457 = vpow2.f32 %v3824_v9 }
 0x860   : > { %4459 = vrcp.f32 %v1965_v28  ;;  %v1977_v29 = vadd.f32 1.0, %v4448_v10  ;;  %v4450_v12 = vpop.eup %4449 }
 0x861   : > { %4461 = vtanh.f32 %v1956_v8 }
 0x862   : > { %4463 = vrcp.f32 %v1977_v29  ;;  %v3835_v29 = vld [vmem:[%s5239_s15 + $0x230] sm:$0xff] }
 0x869   : > { %v4452_v30 = vpop.eup %4451 }
 0x86a   : > { %v4454_v33 = vpop.eup %4453  ;;  %v1998_v47 = vmul.f32 %v4452_v30, %v4450_v12 }
 0x86b   : > { %v4456_v34 = vpop.eup %4455  ;;  %v1990_v39 = vadd.f32 1.0, %v4454_v33 }
 0x86c   : > { %v4458_v36 = vpop.eup %4457  ;;  %v1996_v44 = vmul.f32 %v4456_v34, %v5947_v49 }
 0x86d   : > { %v4460_v50 = vpop.eup %4459  ;;  %v1991_v57 = vadd.f32 1.0, %v4458_v36  ;;  %4465 = vrcp.f32 %v1990_v39 }
 0x86e   : > { %v4462_v53 = vpop.eup %4461  ;;  %v5998_v51 = vadd.f32 %v1998_v47, %v1996_v44 }
 0x86f   : > { %v4464_v48 = vpop.eup %4463  ;;  %v1999_v42 = vmul.f32 %v4462_v53, %v4460_v50 }
 0x870   : > { %v1997_v60 = vmul.f32 %v4464_v48, %v5950_v59  ;;  %4467 = vtanh.f32 %v5998_v51 }
 0x871   : > { %4469 = vrcp.f32 %v1991_v57 }
 0x872   : > { %v6001_v62 = vadd.f32 %v1999_v42, %v1997_v60 }
 0x874   : > { %4471 = vtanh.f32 %v6001_v62 }
 0x87a   : > { %v4466_v49 = vpop.eup %4465 }
 0x87d   : > { %v4468_v2 = vpop.eup %4467 }
 0x87e   : > { %v4470_v4 = vpop.eup %4469  ;;  %v2004_v58 = vmul.f32 %v4468_v2, %v4466_v49 }
 0x881   : > { %v4472_v52 = vpop.eup %4471 }
 0x882   : > { %v2005_v54 = vmul.f32 %v4472_v52, %v4470_v4 }
 0x884   : > { %v2006_v6 = vpack.c.bf16 %v2005_v54, %v2004_v58 }
 0x886   : > { %4102 = vst [vmem:[%s5241_s18 + $0x38] sm:$0xff] %v2006_v6   ;;  %2059 = vmatmul.mubr.bf16.vlgmr.msra.gmra.mxu0 %v2006_v6  ;;  %2102 = vmatmul.mubr.bf16.vlgmr.msra.gmra.mxu1 %v2006_v6 }
 0x887   : > { %2189 = vmatpush1.bf16.msra.mxu0 %v5645_v32  ;;  %2232 = vmatpush1.bf16.msra.mxu1 %v5651_v13  ;;  %v3829_v32 = vld [vmem:[%s5239_s15 + $0x200] sm:$0xff] }
 0x888   : > { %2190 = vmatprep.subr.bf16.mxu0 %v5657_v14  ;;  %2233 = vmatprep.subr.bf16.mxu1 %v5663_v15  ;;  %v3830_v14 = vld [vmem:[%s5239_s15 + $0x208] sm:$0xff] }
 0x889   : > { %2220 = vmatprep.mubr.bf16.mxu0 %v4870_v3  ;;  %2263 = vmatprep.mubr.bf16.mxu1 %v4870_v3 }
 0x88b   : > { %2191 = vmatpush1.bf16.msra.mxu0 %v5671_v16  ;;  %2234 = vmatpush1.bf16.msra.mxu1 %v5677_v1 }
 0x88c   : > { %2192 = vmatprep.subr.bf16.mxu0 %v5683_v17  ;;  %2235 = vmatprep.subr.bf16.mxu1 %v5689_v7  ;;  %v3833_v17 = vld [vmem:[%s5239_s15 + $0x220] sm:$0xff] }
 0x88f   : > { %2193 = vmatpush1.bf16.msra.mxu0 %v5695_v18  ;;  %2236 = vmatpush1.bf16.msra.mxu1 %v5701_v19 }
 0x890   : > { %2194 = vmatprep.subr.bf16.mxu0 %v5707_v20  ;;  %2237 = vmatprep.subr.bf16.mxu1 %v5713_v21  ;;  %v3834_v20 = vld [vmem:[%s5239_s15 + $0x228] sm:$0xff] }
 0x893   : > { %2195 = vmatpush1.bf16.msra.mxu0 %v5719_v22  ;;  %2238 = vmatpush1.bf16.msra.mxu1 %v5725_v23 }
 0x894   : > { %2196 = vmatprep.subr.bf16.mxu0 %v5731_v0  ;;  %2239 = vmatprep.subr.bf16.mxu1 %v5737_v41 }
 0x897   : > { %2197 = vmatpush1.bf16.msra.mxu0 %v5743_v43  ;;  %2240 = vmatpush1.bf16.msra.mxu1 %v5825_v5 }
 0x898   : > { %2198 = vmatprep.subr.bf16.mxu0 %v5750_v45  ;;  %2241 = vmatprep.subr.bf16.mxu1 %v5832_v63 }
 0x89b   : > { %2199 = vmatpush1.bf16.msra.mxu0 %v5757_v46  ;;  %2242 = vmatpush1.bf16.msra.mxu1 %v5839_v56 }
 0x89c   : > { %2200 = vmatprep.subr.bf16.mxu0 %v5764_v24  ;;  %2243 = vmatprep.subr.bf16.mxu1 %v5846_v31  ;;  %v3832_v24 = vld [vmem:[%s5239_s15 + $0x218] sm:$0xff] }
 0x89f   : > { %2201 = vmatpush1.bf16.msra.mxu0 %v5852_v55  ;;  %2244 = vmatpush1.bf16.msra.mxu1 %v5858_v35 }
 0x8a0   : > { %2202 = vmatprep.subr.bf16.mxu0 %v5864_v37  ;;  %2245 = vmatprep.subr.bf16.mxu1 %v5870_v38 }
 0x8a3   : > { %2203 = vmatpush1.bf16.msra.mxu0 %v5876_v61  ;;  %2246 = vmatpush1.bf16.msra.mxu1 %v5882_v40 }
 0x8a4   : > { %2350 = vmatprep.subr.bf16.mxu0 %v5777_v25  ;;  %2393 = vmatprep.subr.bf16.mxu1 %v5783_v26  ;;  %v3831_v25 = vld [vmem:[%s5239_s15 + $0x210] sm:$0xff]  ;;  %v3836_v26 = vld [vmem:[%s5239_s15 + $0x238] sm:$0xff] }
 0x946   : > { %v2060_v13 = vpop.f32.mrf.mxu0  ;;  %v2103_v16 = vpop.f32.mrf.mxu1 }
 0x947   : > { %v2112_v15 = vadd.f32 %v3829_v32, %v2060_v13  ;;  %v2114_v11 = vadd.f32 %v3831_v25, %v2103_v16  ;;  %v6134_v25 = vld [vmem:[%s6622_s1 + $0x80] ss:$16 sps:$4 sm:$0xff]  }
 0x948   : > { %v2062_v1 = vpop.f32.mrf.mxu0  ;;  %v2105_v22 = vpop.f32.mrf.mxu1 }
 0x949   : > { %v3837_v7 = vmul.f32 -1.442695, %v2112_v15  ;;  %v2113_v18 = vadd.f32 %v3830_v14, %v2062_v1  ;;  %v2115_v9 = vadd.f32 %v3832_v24, %v2105_v22  ;;  %v6086_v22 = vld [vmem:[%s6622_s1 + $0xc0] ss:$16 sps:$4 sm:$0xff]   ;;  %v6128_v24 = vld [vmem:[%s6622_s1 + $0x8c] ss:$16 sps:$4 sm:$0xff]  }
 0x94a   : > { %v2064_v19 = vpop.f32.mrf.mxu0  ;;  %v2107_v45 = vpop.f32.mrf.mxu1 }
 0x94b   : > { %4473 = vpow2.f32 %v3837_v7  ;;  %v3839_v21 = vmul.f32 -1.442695, %v2113_v18  ;;  %v2116_v23 = vadd.f32 %v3833_v17, %v2064_v19  ;;  %v3841_v28 = vmul.f32 -1.442695, %v2115_v9  ;;  %v6066_v19 = vld [vmem:[%s6622_s1 + $0xe8] ss:$16 sps:$4 sm:$0xff]  }
 0x94c   : > { %v2066_v0 = vpop.f32.mrf.mxu0  ;;  %v2109_v59 = vpop.f32.mrf.mxu1  ;;  %v2118_v36 = vadd.f32 %v3835_v29, %v2107_v45  ;;  %v6116_v45 = vld [vmem:[%s6622_s1 + $0xa8] ss:$16 sps:$4 sm:$0xff]   ;;  %v6152_v9 = vld [vmem:[%s6622_s1 + $0x6c] ss:$16 sps:$4 sm:$0xff]  }
 0x94d   : > { %4475 = vpow2.f32 %v3839_v21  ;;  %v3838_v41 = vmul.f32 -1.442695, %v2116_v23  ;;  %v2117_v43 = vadd.f32 %v3834_v20, %v2066_v0  ;;  %v2119_v27 = vadd.f32 %v3836_v26, %v2109_v59  ;;  %v6072_v20 = vld [vmem:[%s6622_s1 + $0xc4] ss:$16 sps:$4 sm:$0xff]   ;;  %v6078_v21 = vld [vmem:[%s6622_s1 + $0xcc] ss:$16 sps:$4 sm:$0xff]  }
 0x94e   : > { %v6092_v23 = vld [vmem:[%s6622_s1 + $0xc8] ss:$16 sps:$4 sm:$0xff]   ;;  %v6098_v0 = vld [vmem:[%s6622_s1 + $0xa4] ss:$16 sps:$4 sm:$0xff]  }
 0x94f   : > { %4477 = vpow2.f32 %v3838_v41  ;;  %v3840_v46 = vmul.f32 -1.442695, %v2117_v43  ;;  %v3842_v30 = vmul.f32 -1.442695, %v2119_v27  ;;  %v6104_v41 = vld [vmem:[%s6622_s1 + $0xac] ss:$16 sps:$4 sm:$0xff]  }
 0x950   : > { %v6110_v43 = vld [vmem:[%s6622_s1 + $0xa0] ss:$16 sps:$4 sm:$0xff]   ;;  %v6140_v26 = vld [vmem:[%s6622_s1 + $0x88] ss:$16 sps:$4 sm:$0xff]   ;;  %v6146_v59 = vld [vmem:[%s6622_s1 + $0x64] ss:$16 sps:$4 sm:$0xff]  }
 0x951   : > { %4479 = vpow2.f32 %v3840_v46  ;;  %v6122_v46 = vld [vmem:[%s6622_s1 + $0x84] ss:$16 sps:$4 sm:$0xff]  }
 0x952   : > { %4481 = vtanh.f32 %v2114_v11  ;;  %v6158_v11 = vld [vmem:[%s6622_s1 + $0x60] ss:$16 sps:$4 sm:$0xff]   ;;  %v6165_v27 = vld [vmem:[%s6622_s1 + $0x44] ss:$16 sps:$4 sm:$0xff]  }
 0x958   : > { %v4474_v8 = vpop.eup %4473 }
 0x959   : > { %v2126_v10 = vadd.f32 1.0, %v4474_v8  ;;  %v6172_v8 = vld [vmem:[%s6622_s1 + $0x40] ss:$16 sps:$4 sm:$0xff]  }
 0x95a   : > { %v4476_v12 = vpop.eup %4475 }
 0x95b   : > { %4483 = vrcp.f32 %v2126_v10  ;;  %v2138_v33 = vadd.f32 1.0, %v4476_v12  ;;  %v3852_v12 = vld [vmem:[%s5239_s15 + $0x268] sm:$0xff] }
 0x95c   : > { %v4478_v34 = vpop.eup %4477  ;;  %4485 = vpow2.f32 %v3841_v28 }
 0x95d   : > { %4487 = vrcp.f32 %v2138_v33  ;;  %v2127_v47 = vadd.f32 1.0, %v4478_v34 }
 0x95e   : > { %v4480_v44 = vpop.eup %4479  ;;  %4489 = vpow2.f32 %v3842_v30 }
 0x95f   : > { %4491 = vrcp.f32 %v2127_v47  ;;  %v2139_v50 = vadd.f32 1.0, %v4480_v44  ;;  %v4482_v39 = vpop.eup %4481 }
 0x960   : > { %4493 = vtanh.f32 %v2118_v36 }
 0x961   : > { %4495 = vrcp.f32 %v2139_v50 }
 0x968   : > { %v4484_v53 = vpop.eup %4483 }
 0x969   : > { %v4486_v48 = vpop.eup %4485  ;;  %v2160_v60 = vmul.f32 %v4484_v53, %v4482_v39  ;;  %v3850_v53 = vld [vmem:[%s5239_s15 + $0x258] sm:$0xff] }
 0x96a   : > { %v4488_v57 = vpop.eup %4487  ;;  %v2152_v4 = vadd.f32 1.0, %v4486_v48  ;;  %v3849_v48 = vld [vmem:[%s5239_s15 + $0x250] sm:$0xff] }
 0x96b   : > { %v4490_v42 = vpop.eup %4489  ;;  %v2158_v49 = vmul.f32 %v4488_v57, %v5998_v51  ;;  %v3854_v57 = vld [vmem:[%s5239_s15 + $0x278] sm:$0xff] }
 0x96c   : > { %v4492_v2 = vpop.eup %4491  ;;  %v2153_v6 = vadd.f32 1.0, %v4490_v42  ;;  %4497 = vrcp.f32 %v2152_v4 }
 0x96d   : > { %v4494_v52 = vpop.eup %4493  ;;  %v6049_v58 = vadd.f32 %v2160_v60, %v2158_v49 }
 0x96e   : > { %v4496_v54 = vpop.eup %4495  ;;  %v2161_v32 = vmul.f32 %v4494_v52, %v4492_v2 }
 0x96f   : > { %v2159_v13 = vmul.f32 %v4496_v54, %v6001_v62  ;;  %4499 = vtanh.f32 %v6049_v58  ;;  %v6060_v62 = vld [vmem:[%s6622_s1 + $0xe0] ss:$16 sps:$4 sm:$0xff]  }
 0x970   : > { %4501 = vrcp.f32 %v2153_v6  ;;  %v3853_v6 = vld [vmem:[%s5239_s15 + $0x270] sm:$0xff] }
 0x971   : > { %v6052_v14 = vadd.f32 %v2161_v32, %v2159_v13 }
 0x973   : > { %4503 = vtanh.f32 %v6052_v14 }
 0x979   : > { %v4498_v51 = vpop.eup %4497 }
 0x97c   : > { %v4500_v15 = vpop.eup %4499 }
 0x97d   : > { %v4502_v16 = vpop.eup %4501  ;;  %v2166_v17 = vmul.f32 %v4500_v15, %v4498_v51 }
 0x980   : > { %v4504_v1 = vpop.eup %4503 }
 0x981   : > { %v2167_v7 = vmul.f32 %v4504_v1, %v4502_v16 }
 0x983   : > { %v2168_v18 = vpack.c.bf16 %v2167_v7, %v2166_v17 }
 0x985   : > { %4103 = vst [vmem:[%s5241_s18 + $0x40] sm:$0xff] %v2168_v18   ;;  %2221 = vmatmul.mubr.bf16.vlgmr.msra.gmra.mxu0 %v2168_v18  ;;  %2264 = vmatmul.mubr.bf16.vlgmr.msra.gmra.mxu1 %v2168_v18 }
 0x986   : > { %2351 = vmatpush1.bf16.msra.mxu0 %v6060_v62  ;;  %2394 = vmatpush1.bf16.msra.mxu1 %v6066_v19 }
 0x987   : > { %2352 = vmatprep.subr.bf16.mxu0 %v6072_v20  ;;  %2395 = vmatprep.subr.bf16.mxu1 %v6078_v21 }
 0x988   : > { %2382 = vmatprep.mubr.bf16.mxu0 %v4870_v3  ;;  %2425 = vmatprep.mubr.bf16.mxu1 %v4870_v3 }
 0x98a   : > { %2353 = vmatpush1.bf16.msra.mxu0 %v6086_v22  ;;  %2396 = vmatpush1.bf16.msra.mxu1 %v6092_v23 }
 0x98b   : > { %2354 = vmatprep.subr.bf16.mxu0 %v6098_v0  ;;  %2397 = vmatprep.subr.bf16.mxu1 %v6104_v41 }
 0x98e   : > { %2355 = vmatpush1.bf16.msra.mxu0 %v6110_v43  ;;  %2398 = vmatpush1.bf16.msra.mxu1 %v6116_v45 }
 0x98f   : > { %2356 = vmatprep.subr.bf16.mxu0 %v6122_v46  ;;  %2399 = vmatprep.subr.bf16.mxu1 %v6128_v24 }
 0x992   : > { %2357 = vmatpush1.bf16.msra.mxu0 %v6134_v25  ;;  %2400 = vmatpush1.bf16.msra.mxu1 %v6140_v26 }
 0x993   : > { %2358 = vmatprep.subr.bf16.mxu0 %v6146_v59  ;;  %2401 = vmatprep.subr.bf16.mxu1 %v6152_v9 }
 0x996   : > { %2359 = vmatpush1.bf16.msra.mxu0 %v6158_v11  ;;  %2402 = vmatpush1.bf16.msra.mxu1 %v5825_v5  ;;  %v6179_v5 = vld [vmem:[%s6622_s1 + $0x24] ss:$16 sps:$4 sm:$0xff]  }
 0x997   : > { %2360 = vmatprep.subr.bf16.mxu0 %v6165_v27  ;;  %2403 = vmatprep.subr.bf16.mxu1 %v5832_v63  ;;  %v6192_v63 = vld [vmem:[%s6622_s1 + $0xe4] ss:$16 sps:$4 sm:$0xff]  }
 0x99a   : > { %2361 = vmatpush1.bf16.msra.mxu0 %v6172_v8  ;;  %2404 = vmatpush1.bf16.msra.mxu1 %v5839_v56  ;;  %v6198_v56 = vld [vmem:[%s6622_s1 + $0xec] ss:$16 sps:$4 sm:$0xff]  }
 0x99b   : > { %2362 = vmatprep.subr.bf16.mxu0 %v6179_v5  ;;  %2405 = vmatprep.subr.bf16.mxu1 %v5846_v31  ;;  %v3847_v31 = vld [vmem:[%s5239_s15 + $0x240] sm:$0xff] }
 0x99e   : > { %2363 = vmatpush1.bf16.msra.mxu0 %v5852_v55  ;;  %2406 = vmatpush1.bf16.msra.mxu1 %v5858_v35  ;;  %v3848_v35 = vld [vmem:[%s5239_s15 + $0x248] sm:$0xff] }
 0x99f   : > { %2364 = vmatprep.subr.bf16.mxu0 %v5864_v37  ;;  %2407 = vmatprep.subr.bf16.mxu1 %v5870_v38 }
 0x9a2   : > { %2365 = vmatpush1.bf16.msra.mxu0 %v5876_v61  ;;  %2408 = vmatpush1.bf16.msra.mxu1 %v5882_v40  ;;  %v3851_v40 = vld [vmem:[%s5239_s15 + $0x260] sm:$0xff] }
 0x9a3   : > { %2512 = vmatprep.subr.bf16.mxu0 %v6192_v63  ;;  %2555 = vmatprep.subr.bf16.mxu1 %v6198_v56 }
 0xa45   : > { %v2222_v55 = vpop.f32.mrf.mxu0  ;;  %v2265_v38 = vpop.f32.mrf.mxu1 }
 0xa46   : > { %v2274_v37 = vadd.f32 %v3847_v31, %v2222_v55  ;;  %v2276_v49 = vadd.f32 %v3849_v48, %v2265_v38 }
 0xa47   : > { %v2224_v61 = vpop.f32.mrf.mxu0  ;;  %v2267_v33 = vpop.f32.mrf.mxu1 }
 0xa48   : > { %v3855_v28 = vmul.f32 -1.442695, %v2274_v37  ;;  %v2275_v10 = vadd.f32 %v3848_v35, %v2224_v61  ;;  %v2277_v60 = vadd.f32 %v3850_v53, %v2267_v33 }
 0xa49   : > { %v2226_v29 = vpop.f32.mrf.mxu0  ;;  %v2269_v50 = vpop.f32.mrf.mxu1 }
 0xa4a   : > { %4505 = vpow2.f32 %v3855_v28  ;;  %v3857_v30 = vmul.f32 -1.442695, %v2275_v10  ;;  %v2278_v34 = vadd.f32 %v3851_v40, %v2226_v29  ;;  %v3859_v52 = vmul.f32 -1.442695, %v2277_v60  ;;  %v6261_v60 = vld [vmem:[%s6622_s1 + $0x2c] ss:$16 sps:$4 sm:$0xff]  }
 0xa4b   : > { %v2228_v36 = vpop.f32.mrf.mxu0  ;;  %v2271_v42 = vpop.f32.mrf.mxu1  ;;  %v2280_v16 = vadd.f32 %v3853_v6, %v2269_v50  ;;  %v6297_v6 = vld [vmem:[%s6622_s1 + $0x8] ss:$16 sps:$4 sm:$0xff]  }
 0xa4c   : > { %4507 = vpow2.f32 %v3857_v30  ;;  %v3856_v47 = vmul.f32 -1.442695, %v2278_v34  ;;  %v2279_v44 = vadd.f32 %v3852_v12, %v2228_v36  ;;  %v2281_v2 = vadd.f32 %v3854_v57, %v2271_v42  ;;  %v6247_v57 = vld [vmem:[%s6622_s1 + $0x4c] ss:$16 sps:$4 sm:$0xff]   ;;  %v6254_v42 = vld [vmem:[%s6622_s1 + $0x48] ss:$16 sps:$4 sm:$0xff]  }
 0xa4e   : > { %4509 = vpow2.f32 %v3856_v47  ;;  %v3858_v39 = vmul.f32 -1.442695, %v2279_v44  ;;  %v3860_v13 = vmul.f32 -1.442695, %v2281_v2  ;;  %v6273_v2 = vld [vmem:[%s6622_s1 + $0x28] ss:$16 sps:$4 sm:$0xff]  }
 0xa50   : > { %4511 = vpow2.f32 %v3858_v39 }
 0xa51   : > { %4513 = vtanh.f32 %v2276_v49  ;;  %v6267_v49 = vld [vmem:[%s6622_s1 + $0x20] ss:$16 sps:$4 sm:$0xff]  }
 0xa57   : > { %v4506_v4 = vpop.eup %4505 }
 0xa58   : > { %v2288_v54 = vadd.f32 1.0, %v4506_v4  ;;  %v6279_v4 = vld [vmem:[%s6622_s1 + $0x4] ss:$16 sps:$4 sm:$0xff]  }
 0xa59   : > { %v4508_v32 = vpop.eup %4507 }
 0xa5a   : > { %4515 = vrcp.f32 %v2288_v54  ;;  %v2300_v51 = vadd.f32 1.0, %v4508_v32  ;;  %v6291_v54 = vld [vmem:[%s6622_s1] ss:$16 sps:$4 sm:$0xff]  }
 0xa5b   : > { %v4510_v15 = vpop.eup %4509  ;;  %4517 = vpow2.f32 %v3859_v52  ;;  %v6285_v52 = vld [vmem:[%s6622_s1 + $0xc] ss:$16 sps:$4 sm:$0xff]   ;;  %v3865_v32 = vld [vmem:[%s5239_s15 + $0x280] sm:$0xff] }
 0xa5c   : > { %4519 = vrcp.f32 %v2300_v51  ;;  %v2289_v1 = vadd.f32 1.0, %v4510_v15  ;;  %v3866_v51 = vld [vmem:[%s5239_s15 + $0x288] sm:$0xff] }
 0xa5d   : > { %v4512_v17 = vpop.eup %4511  ;;  %4521 = vpow2.f32 %v3860_v13 }
 0xa5e   : > { %4523 = vrcp.f32 %v2289_v1  ;;  %v2301_v7 = vadd.f32 1.0, %v4512_v17  ;;  %v4514_v18 = vpop.eup %4513  ;;  %v3869_v17 = vld [vmem:[%s5239_s15 + $0x2a0] sm:$0xff] }
 0xa5f   : > { %4525 = vtanh.f32 %v2280_v16 }
 0xa60   : > { %4527 = vrcp.f32 %v2301_v7 }
 0xa67   : > { %v4516_v31 = vpop.eup %4515 }
 0xa68   : > { %v4518_v55 = vpop.eup %4517  ;;  %v2322_v38 = vmul.f32 %v4516_v31, %v4514_v18 }
 0xa69   : > { %v4520_v35 = vpop.eup %4519  ;;  %v2314_v28 = vadd.f32 1.0, %v4518_v55  ;;  %v3870_v55 = vld [vmem:[%s5239_s15 + $0x2a8] sm:$0xff] }
 0xa6a   : > { %v4522_v37 = vpop.eup %4521  ;;  %v2320_v61 = vmul.f32 %v4520_v35, %v6049_v58 }
 0xa6b   : > { %v4524_v40 = vpop.eup %4523  ;;  %v2315_v30 = vadd.f32 1.0, %v4522_v37  ;;  %4529 = vrcp.f32 %v2314_v28 }
 0xa6c   : > { %v4526_v10 = vpop.eup %4525  ;;  %v6210_v29 = vadd.f32 %v2322_v38, %v2320_v61 }
 0xa6d   : > { %v4528_v12 = vpop.eup %4527  ;;  %v2323_v33 = vmul.f32 %v4526_v10, %v4524_v40 }
 0xa6e   : > { %v2321_v34 = vmul.f32 %v4528_v12, %v6052_v14  ;;  %4531 = vtanh.f32 %v6210_v29  ;;  %v6240_v14 = vld [vmem:[%s6622_s1 + $0x68] ss:$16 sps:$4 sm:$0xff]  }
 0xa6f   : > { %4533 = vrcp.f32 %v2315_v30  ;;  %v3868_v30 = vld [vmem:[%s5239_s15 + $0x298] sm:$0xff] }
 0xa70   : > { %v6213_v36 = vadd.f32 %v2323_v33, %v2321_v34  ;;  %v3867_v33 = vld [vmem:[%s5239_s15 + $0x290] sm:$0xff]  ;;  %v3872_v34 = vld [vmem:[%s5239_s15 + $0x2b8] sm:$0xff] }
 0xa72   : > { %4535 = vtanh.f32 %v6213_v36 }
 0xa78   : > { %v4530_v58 = vpop.eup %4529 }
 0xa7b   : > { %v4532_v47 = vpop.eup %4531 }
 0xa7c   : > { %v4534_v44 = vpop.eup %4533  ;;  %v2328_v39 = vmul.f32 %v4532_v47, %v4530_v58 }
 0xa7f   : > { %v4536_v50 = vpop.eup %4535 }
 0xa80   : > { %v2329_v53 = vmul.f32 %v4536_v50, %v4534_v44 }
 0xa82   : > { %v2330_v48 = vpack.c.bf16 %v2329_v53, %v2328_v39 }
 0xa84   : > { %4104 = vst [vmem:[%s5241_s18 + $0x48] sm:$0xff] %v2330_v48   ;;  %2383 = vmatmul.mubr.bf16.vlgmr.msra.gmra.mxu0 %v2330_v48  ;;  %2426 = vmatmul.mubr.bf16.vlgmr.msra.gmra.mxu1 %v2330_v48 }
 0xa85   : > { %2513 = vmatpush1.bf16.msra.mxu0 %v6060_v62  ;;  %2556 = vmatpush1.bf16.msra.mxu1 %v6066_v19 }
 0xa86   : > { %2514 = vmatprep.subr.bf16.mxu0 %v6072_v20  ;;  %2557 = vmatprep.subr.bf16.mxu1 %v6078_v21 }
 0xa87   : > { %2544 = vmatprep.mubr.bf16.mxu0 %v4870_v3  ;;  %2587 = vmatprep.mubr.bf16.mxu1 %v4870_v3 }
 0xa89   : > { %2515 = vmatpush1.bf16.msra.mxu0 %v6086_v22  ;;  %2558 = vmatpush1.bf16.msra.mxu1 %v6092_v23 }
 0xa8a   : > { %2516 = vmatprep.subr.bf16.mxu0 %v6098_v0  ;;  %2559 = vmatprep.subr.bf16.mxu1 %v6104_v41 }
 0xa8d   : > { %2517 = vmatpush1.bf16.msra.mxu0 %v6110_v43  ;;  %2560 = vmatpush1.bf16.msra.mxu1 %v6116_v45 }
 0xa8e   : > { %2518 = vmatprep.subr.bf16.mxu0 %v6122_v46  ;;  %2561 = vmatprep.subr.bf16.mxu1 %v6128_v24 }
 0xa91   : > { %2519 = vmatpush1.bf16.msra.mxu0 %v6134_v25  ;;  %2562 = vmatpush1.bf16.msra.mxu1 %v6140_v26 }
 0xa92   : > { %2520 = vmatprep.subr.bf16.mxu0 %v6146_v59  ;;  %2563 = vmatprep.subr.bf16.mxu1 %v6152_v9 }
 0xa95   : > { %2521 = vmatpush1.bf16.msra.mxu0 %v6158_v11  ;;  %2564 = vmatpush1.bf16.msra.mxu1 %v6240_v14 }
 0xa96   : > { %2522 = vmatprep.subr.bf16.mxu0 %v6165_v27  ;;  %2565 = vmatprep.subr.bf16.mxu1 %v6247_v57 }
 0xa99   : > { %2523 = vmatpush1.bf16.msra.mxu0 %v6172_v8  ;;  %2566 = vmatpush1.bf16.msra.mxu1 %v6254_v42 }
 0xa9a   : > { %2524 = vmatprep.subr.bf16.mxu0 %v6179_v5  ;;  %2567 = vmatprep.subr.bf16.mxu1 %v6261_v60 }
 0xa9d   : > { %2525 = vmatpush1.bf16.msra.mxu0 %v6267_v49  ;;  %2568 = vmatpush1.bf16.msra.mxu1 %v6273_v2 }
 0xa9e   : > { %2526 = vmatprep.subr.bf16.mxu0 %v6279_v4  ;;  %2569 = vmatprep.subr.bf16.mxu1 %v6285_v52 }
 0xaa1   : > { %2527 = vmatpush1.bf16.msra.mxu0 %v6291_v54  ;;  %2570 = vmatpush1.bf16.msra.mxu1 %v6297_v6 }
 0xaa2   : > { %2674 = vmatprep.subr.bf16.mxu0 %v6192_v63  ;;  %2717 = vmatprep.subr.bf16.mxu1 %v6198_v56 }
 0xb44   : > { %v2384_v13 = vpop.f32.mrf.mxu0  ;;  %v2427_v16 = vpop.f32.mrf.mxu1 }
 0xb45   : > { %v2436_v15 = vadd.f32 %v3865_v32, %v2384_v13  ;;  %v2438_v44 = vadd.f32 %v3867_v33, %v2427_v16  ;;  %v3871_v32 = vld [vmem:[%s5239_s15 + $0x2b0] sm:$0xff] }
 0xb46   : > { %v2386_v1 = vpop.f32.mrf.mxu0  ;;  %v2429_v37 = vpop.f32.mrf.mxu1 }
 0xb47   : > { %v3873_v7 = vmul.f32 -1.442695, %v2436_v15  ;;  %v2437_v18 = vadd.f32 %v3866_v51, %v2386_v1  ;;  %v2439_v47 = vadd.f32 %v3868_v30, %v2429_v37 }
 0xb48   : > { %v2388_v31 = vpop.f32.mrf.mxu0  ;;  %v2431_v10 = vpop.f32.mrf.mxu1 }
 0xb49   : > { %4537 = vpow2.f32 %v3873_v7  ;;  %v3875_v35 = vmul.f32 -1.442695, %v2437_v18  ;;  %v2440_v38 = vadd.f32 %v3869_v17, %v2388_v31  ;;  %v3877_v53 = vmul.f32 -1.442695, %v2439_v47 }
 0xb4a   : > { %v2390_v61 = vpop.f32.mrf.mxu0  ;;  %v2433_v58 = vpop.f32.mrf.mxu1  ;;  %v2442_v17 = vadd.f32 %v3871_v32, %v2431_v10 }
 0xb4b   : > { %4539 = vpow2.f32 %v3875_v35  ;;  %v3874_v40 = vmul.f32 -1.442695, %v2440_v38  ;;  %v2441_v28 = vadd.f32 %v3870_v55, %v2390_v61  ;;  %v2443_v50 = vadd.f32 %v3872_v34, %v2433_v58 }
 0xb4d   : > { %4541 = vpow2.f32 %v3874_v40  ;;  %v3876_v12 = vmul.f32 -1.442695, %v2441_v28  ;;  %v3878_v51 = vmul.f32 -1.442695, %v2443_v50 }
 0xb4f   : > { %4543 = vpow2.f32 %v3876_v12 }
 0xb50   : > { %4545 = vtanh.f32 %v2438_v44 }
 0xb56   : > { %v4538_v39 = vpop.eup %4537 }
 0xb57   : > { %v2450_v48 = vadd.f32 1.0, %v4538_v39 }
 0xb58   : > { %v4540_v13 = vpop.eup %4539 }
 0xb59   : > { %4547 = vrcp.f32 %v2450_v48  ;;  %v2462_v15 = vadd.f32 1.0, %v4540_v13 }
 0xb5a   : > { %v4542_v1 = vpop.eup %4541  ;;  %4549 = vpow2.f32 %v3877_v53 }
 0xb5b   : > { %4551 = vrcp.f32 %v2462_v15  ;;  %v2451_v7 = vadd.f32 1.0, %v4542_v1  ;;  %v3884_v15 = vld [vmem:[%s5239_s15 + $0x2c8] sm:$0xff] }
 0xb5c   : > { %v4544_v18 = vpop.eup %4543  ;;  %4553 = vpow2.f32 %v3878_v51 }
 0xb5d   : > { %4555 = vrcp.f32 %v2451_v7  ;;  %v2463_v31 = vadd.f32 1.0, %v4544_v18  ;;  %v4546_v16 = vpop.eup %4545  ;;  %v3887_v18 = vld [vmem:[%s5239_s15 + $0x2e0] sm:$0xff] }
 0xb5e   : > { %4557 = vtanh.f32 %v2442_v17 }
 0xb5f   : > { %4559 = vrcp.f32 %v2463_v31 }
 0xb66   : > { %v4548_v55 = vpop.eup %4547 }
 0xb67   : > { %v4550_v35 = vpop.eup %4549  ;;  %v2484_v61 = vmul.f32 %v4548_v55, %v4546_v16 }
 0xb68   : > { %v4552_v37 = vpop.eup %4551  ;;  %v2476_v12 = vadd.f32 1.0, %v4550_v35  ;;  %v3888_v35 = vld [vmem:[%s5239_s15 + $0x2e8] sm:$0xff] }
 0xb69   : > { %v4554_v38 = vpop.eup %4553  ;;  %v2482_v40 = vmul.f32 %v4552_v37, %v6210_v29 }
 0xb6a   : > { %v4556_v28 = vpop.eup %4555  ;;  %v2477_v34 = vadd.f32 1.0, %v4554_v38  ;;  %4561 = vrcp.f32 %v2476_v12 }
 0xb6b   : > { %v4558_v30 = vpop.eup %4557  ;;  %v6311_v10 = vadd.f32 %v2484_v61, %v2482_v40 }
 0xb6c   : > { %v4560_v33 = vpop.eup %4559  ;;  %v2485_v58 = vmul.f32 %v4558_v30, %v4556_v28 }
 0xb6d   : > { %v2483_v47 = vmul.f32 %v4560_v33, %v6213_v36  ;;  %4563 = vtanh.f32 %v6311_v10  ;;  %v3883_v36 = vld [vmem:[%s5239_s15 + $0x2c0] sm:$0xff] }
 0xb6e   : > { %4565 = vrcp.f32 %v2477_v34  ;;  %v3886_v34 = vld [vmem:[%s5239_s15 + $0x2d8] sm:$0xff] }
 0xb6f   : > { %v6314_v44 = vadd.f32 %v2485_v58, %v2483_v47  ;;  %v3885_v58 = vld [vmem:[%s5239_s15 + $0x2d0] sm:$0xff]  ;;  %v3890_v47 = vld [vmem:[%s5239_s15 + $0x2f8] sm:$0xff] }
 0xb71   : > { %4567 = vtanh.f32 %v6314_v44 }
 0xb77   : > { %v4562_v29 = vpop.eup %4561 }
 0xb7a   : > { %v4564_v50 = vpop.eup %4563 }
 0xb7b   : > { %v4566_v39 = vpop.eup %4565  ;;  %v2490_v48 = vmul.f32 %v4564_v50, %v4562_v29 }
 0xb7e   : > { %v4568_v53 = vpop.eup %4567 }
 0xb7f   : > { %v2491_v32 = vmul.f32 %v4568_v53, %v4566_v39 }
 0xb81   : > { %v2492_v13 = vpack.c.bf16 %v2491_v32, %v2490_v48 }
 0xb83   : > { %4105 = vst [vmem:[%s5241_s18 + $0x50] sm:$0xff] %v2492_v13   ;;  %2545 = vmatmul.mubr.bf16.vlgmr.msra.gmra.mxu0 %v2492_v13  ;;  %2588 = vmatmul.mubr.bf16.vlgmr.msra.gmra.mxu1 %v2492_v13 }
 0xb84   : > { %2675 = vmatpush1.bf16.msra.mxu0 %v6060_v62  ;;  %2718 = vmatpush1.bf16.msra.mxu1 %v6066_v19 }
 0xb85   : > { %2676 = vmatprep.subr.bf16.mxu0 %v6072_v20  ;;  %2719 = vmatprep.subr.bf16.mxu1 %v6078_v21 }
 0xb86   : > { %2706 = vmatprep.mubr.bf16.mxu0 %v4870_v3  ;;  %2749 = vmatprep.mubr.bf16.mxu1 %v4870_v3 }
 0xb88   : > { %2677 = vmatpush1.bf16.msra.mxu0 %v6086_v22  ;;  %2720 = vmatpush1.bf16.msra.mxu1 %v6092_v23 }
 0xb89   : > { %2678 = vmatprep.subr.bf16.mxu0 %v6098_v0  ;;  %2721 = vmatprep.subr.bf16.mxu1 %v6104_v41 }
 0xb8c   : > { %2679 = vmatpush1.bf16.msra.mxu0 %v6110_v43  ;;  %2722 = vmatpush1.bf16.msra.mxu1 %v6116_v45 }
 0xb8d   : > { %2680 = vmatprep.subr.bf16.mxu0 %v6122_v46  ;;  %2723 = vmatprep.subr.bf16.mxu1 %v6128_v24 }
 0xb90   : > { %2681 = vmatpush1.bf16.msra.mxu0 %v6134_v25  ;;  %2724 = vmatpush1.bf16.msra.mxu1 %v6140_v26 }
 0xb91   : > { %2682 = vmatprep.subr.bf16.mxu0 %v6146_v59  ;;  %2725 = vmatprep.subr.bf16.mxu1 %v6152_v9 }
 0xb94   : > { %2683 = vmatpush1.bf16.msra.mxu0 %v6158_v11  ;;  %2726 = vmatpush1.bf16.msra.mxu1 %v6240_v14 }
 0xb95   : > { %2684 = vmatprep.subr.bf16.mxu0 %v6165_v27  ;;  %2727 = vmatprep.subr.bf16.mxu1 %v6247_v57 }
 0xb98   : > { %2685 = vmatpush1.bf16.msra.mxu0 %v6172_v8  ;;  %2728 = vmatpush1.bf16.msra.mxu1 %v6254_v42 }
 0xb99   : > { %2686 = vmatprep.subr.bf16.mxu0 %v6179_v5  ;;  %2729 = vmatprep.subr.bf16.mxu1 %v6261_v60 }
 0xb9c   : > { %2687 = vmatpush1.bf16.msra.mxu0 %v6267_v49  ;;  %2730 = vmatpush1.bf16.msra.mxu1 %v6273_v2 }
 0xb9d   : > { %2688 = vmatprep.subr.bf16.mxu0 %v6279_v4  ;;  %2731 = vmatprep.subr.bf16.mxu1 %v6285_v52 }
 0xba0   : > { %2689 = vmatpush1.bf16.msra.mxu0 %v6291_v54  ;;  %2732 = vmatpush1.bf16.msra.mxu1 %v6297_v6 }
 0xba1   : > { %2836 = vmatprep.subr.bf16.mxu0 %v6192_v63  ;;  %2879 = vmatprep.subr.bf16.mxu1 %v6198_v56 }
 0xc43   : > { %v2546_v51 = vpop.f32.mrf.mxu0  ;;  %v2589_v17 = vpop.f32.mrf.mxu1 }
 0xc44   : > { %v2598_v1 = vadd.f32 %v3883_v36, %v2546_v51  ;;  %v2600_v39 = vadd.f32 %v3885_v58, %v2589_v17  ;;  %v3889_v36 = vld [vmem:[%s5239_s15 + $0x2f0] sm:$0xff] }
 0xc45   : > { %v2548_v7 = vpop.f32.mrf.mxu0  ;;  %v2591_v38 = vpop.f32.mrf.mxu1 }
 0xc46   : > { %v3891_v31 = vmul.f32 -1.442695, %v2598_v1  ;;  %v2599_v16 = vadd.f32 %v3884_v15, %v2548_v7  ;;  %v2601_v50 = vadd.f32 %v3886_v34, %v2591_v38 }
 0xc47   : > { %v2550_v55 = vpop.f32.mrf.mxu0  ;;  %v2593_v30 = vpop.f32.mrf.mxu1 }
 0xc48   : > { %4569 = vpow2.f32 %v3891_v31  ;;  %v3893_v37 = vmul.f32 -1.442695, %v2599_v16  ;;  %v2602_v61 = vadd.f32 %v3887_v18, %v2550_v55  ;;  %v3895_v32 = vmul.f32 -1.442695, %v2601_v50 }
 0xc49   : > { %v2552_v40 = vpop.f32.mrf.mxu0  ;;  %v2595_v29 = vpop.f32.mrf.mxu1  ;;  %v2604_v18 = vadd.f32 %v3889_v36, %v2593_v30 }
 0xc4a   : > { %4571 = vpow2.f32 %v3893_v37  ;;  %v3892_v28 = vmul.f32 -1.442695, %v2602_v61  ;;  %v2603_v12 = vadd.f32 %v3888_v35, %v2552_v40  ;;  %v2605_v53 = vadd.f32 %v3890_v47, %v2595_v29 }
 0xc4c   : > { %4573 = vpow2.f32 %v3892_v28  ;;  %v3894_v33 = vmul.f32 -1.442695, %v2603_v12  ;;  %v3896_v15 = vmul.f32 -1.442695, %v2605_v53 }
 0xc4e   : > { %4575 = vpow2.f32 %v3894_v33 }
 0xc4f   : > { %4577 = vtanh.f32 %v2600_v39 }
 0xc55   : > { %v4570_v48 = vpop.eup %4569 }
 0xc56   : > { %v2612_v13 = vadd.f32 1.0, %v4570_v48 }
 0xc57   : > { %v4572_v51 = vpop.eup %4571 }
 0xc58   : > { %4579 = vrcp.f32 %v2612_v13  ;;  %v2624_v1 = vadd.f32 1.0, %v4572_v51 }
 0xc59   : > { %v4574_v7 = vpop.eup %4573  ;;  %4581 = vpow2.f32 %v3895_v32 }
 0xc5a   : > { %4583 = vrcp.f32 %v2624_v1  ;;  %v2613_v31 = vadd.f32 1.0, %v4574_v7  ;;  %v3902_v1 = vld [vmem:[%s5239_s15 + $0x308] sm:$0xff] }
 0xc5b   : > { %v4576_v16 = vpop.eup %4575  ;;  %4585 = vpow2.f32 %v3896_v15 }
 0xc5c   : > { %4587 = vrcp.f32 %v2613_v31  ;;  %v2625_v55 = vadd.f32 1.0, %v4576_v16  ;;  %v4578_v17 = vpop.eup %4577  ;;  %v3905_v16 = vld [vmem:[%s5239_s15 + $0x320] sm:$0xff] }
 0xc5d   : > { %4589 = vtanh.f32 %v2604_v18 }
 0xc5e   : > { %4591 = vrcp.f32 %v2625_v55 }
 0xc65   : > { %v4580_v35 = vpop.eup %4579 }
 0xc66   : > { %v4582_v37 = vpop.eup %4581  ;;  %v2646_v40 = vmul.f32 %v4580_v35, %v4578_v17 }
 0xc67   : > { %v4584_v38 = vpop.eup %4583  ;;  %v2638_v33 = vadd.f32 1.0, %v4582_v37  ;;  %v3906_v37 = vld [vmem:[%s5239_s15 + $0x328] sm:$0xff] }
 0xc68   : > { %v4586_v61 = vpop.eup %4585  ;;  %v2644_v28 = vmul.f32 %v4584_v38, %v6311_v10 }
 0xc69   : > { %v4588_v12 = vpop.eup %4587  ;;  %v2639_v47 = vadd.f32 1.0, %v4586_v61  ;;  %4593 = vrcp.f32 %v2638_v33 }
 0xc6a   : > { %v4590_v34 = vpop.eup %4589  ;;  %v6362_v30 = vadd.f32 %v2646_v40, %v2644_v28 }
 0xc6b   : > { %v4592_v58 = vpop.eup %4591  ;;  %v2647_v29 = vmul.f32 %v4590_v34, %v4588_v12 }
 0xc6c   : > { %v2645_v50 = vmul.f32 %v4592_v58, %v6314_v44  ;;  %4595 = vtanh.f32 %v6362_v30  ;;  %v3901_v44 = vld [vmem:[%s5239_s15 + $0x300] sm:$0xff] }
 0xc6d   : > { %4597 = vrcp.f32 %v2639_v47  ;;  %v3904_v47 = vld [vmem:[%s5239_s15 + $0x318] sm:$0xff] }
 0xc6e   : > { %v6365_v39 = vadd.f32 %v2647_v29, %v2645_v50  ;;  %v3903_v29 = vld [vmem:[%s5239_s15 + $0x310] sm:$0xff]  ;;  %v3908_v50 = vld [vmem:[%s5239_s15 + $0x338] sm:$0xff] }
 0xc70   : > { %4599 = vtanh.f32 %v6365_v39 }
 0xc76   : > { %v4594_v10 = vpop.eup %4593 }
 0xc79   : > { %v4596_v53 = vpop.eup %4595 }
 0xc7a   : > { %v4598_v48 = vpop.eup %4597  ;;  %v2652_v13 = vmul.f32 %v4596_v53, %v4594_v10 }
 0xc7d   : > { %v4600_v32 = vpop.eup %4599 }
 0xc7e   : > { %v2653_v36 = vmul.f32 %v4600_v32, %v4598_v48 }
 0xc80   : > { %v2654_v51 = vpack.c.bf16 %v2653_v36, %v2652_v13 }
 0xc82   : > { %4106 = vst [vmem:[%s5241_s18 + $0x58] sm:$0xff] %v2654_v51   ;;  %2707 = vmatmul.mubr.bf16.vlgmr.msra.gmra.mxu0 %v2654_v51  ;;  %2750 = vmatmul.mubr.bf16.vlgmr.msra.gmra.mxu1 %v2654_v51 }
 0xc83   : > { %2837 = vmatpush1.bf16.msra.mxu0 %v6060_v62  ;;  %2880 = vmatpush1.bf16.msra.mxu1 %v6066_v19 }
 0xc84   : > { %2838 = vmatprep.subr.bf16.mxu0 %v6072_v20  ;;  %2881 = vmatprep.subr.bf16.mxu1 %v6078_v21 }
 0xc85   : > { %2868 = vmatprep.mubr.bf16.mxu0 %v4870_v3  ;;  %2911 = vmatprep.mubr.bf16.mxu1 %v4870_v3 }
 0xc87   : > { %2839 = vmatpush1.bf16.msra.mxu0 %v6086_v22  ;;  %2882 = vmatpush1.bf16.msra.mxu1 %v6092_v23 }
 0xc88   : > { %2840 = vmatprep.subr.bf16.mxu0 %v6098_v0  ;;  %2883 = vmatprep.subr.bf16.mxu1 %v6104_v41 }
 0xc8b   : > { %2841 = vmatpush1.bf16.msra.mxu0 %v6110_v43  ;;  %2884 = vmatpush1.bf16.msra.mxu1 %v6116_v45 }
 0xc8c   : > { %2842 = vmatprep.subr.bf16.mxu0 %v6122_v46  ;;  %2885 = vmatprep.subr.bf16.mxu1 %v6128_v24 }
 0xc8f   : > { %2843 = vmatpush1.bf16.msra.mxu0 %v6134_v25  ;;  %2886 = vmatpush1.bf16.msra.mxu1 %v6140_v26 }
 0xc90   : > { %2844 = vmatprep.subr.bf16.mxu0 %v6146_v59  ;;  %2887 = vmatprep.subr.bf16.mxu1 %v6152_v9 }
 0xc93   : > { %2845 = vmatpush1.bf16.msra.mxu0 %v6158_v11  ;;  %2888 = vmatpush1.bf16.msra.mxu1 %v6240_v14 }
 0xc94   : > { %2846 = vmatprep.subr.bf16.mxu0 %v6165_v27  ;;  %2889 = vmatprep.subr.bf16.mxu1 %v6247_v57 }
 0xc97   : > { %2847 = vmatpush1.bf16.msra.mxu0 %v6172_v8  ;;  %2890 = vmatpush1.bf16.msra.mxu1 %v6254_v42 }
 0xc98   : > { %2848 = vmatprep.subr.bf16.mxu0 %v6179_v5  ;;  %2891 = vmatprep.subr.bf16.mxu1 %v6261_v60 }
 0xc9b   : > { %2849 = vmatpush1.bf16.msra.mxu0 %v6267_v49  ;;  %2892 = vmatpush1.bf16.msra.mxu1 %v6273_v2 }
 0xc9c   : > { %2850 = vmatprep.subr.bf16.mxu0 %v6279_v4  ;;  %2893 = vmatprep.subr.bf16.mxu1 %v6285_v52 }
 0xc9f   : > { %2851 = vmatpush1.bf16.msra.mxu0 %v6291_v54  ;;  %2894 = vmatpush1.bf16.msra.mxu1 %v6297_v6 }
 0xca0   : > { %2998 = vmatprep.subr.bf16.mxu0 %v6192_v63  ;;  %3041 = vmatprep.subr.bf16.mxu1 %v6198_v56 }
 0xd42   : > { %v2708_v15 = vpop.f32.mrf.mxu0  ;;  %v2751_v18 = vpop.f32.mrf.mxu1 }
 0xd43   : > { %v2760_v7 = vadd.f32 %v3901_v44, %v2708_v15  ;;  %v2762_v48 = vadd.f32 %v3903_v29, %v2751_v18  ;;  %v3907_v44 = vld [vmem:[%s5239_s15 + $0x330] sm:$0xff] }
 0xd44   : > { %v2710_v31 = vpop.f32.mrf.mxu0  ;;  %v2753_v61 = vpop.f32.mrf.mxu1 }
 0xd45   : > { %v3909_v55 = vmul.f32 -1.442695, %v2760_v7  ;;  %v2761_v17 = vadd.f32 %v3902_v1, %v2710_v31  ;;  %v2763_v53 = vadd.f32 %v3904_v47, %v2753_v61 }
 0xd46   : > { %v2712_v35 = vpop.f32.mrf.mxu0  ;;  %v2755_v34 = vpop.f32.mrf.mxu1 }
 0xd47   : > { %4601 = vpow2.f32 %v3909_v55  ;;  %v3911_v38 = vmul.f32 -1.442695, %v2761_v17  ;;  %v2764_v40 = vadd.f32 %v3905_v16, %v2712_v35  ;;  %v3913_v36 = vmul.f32 -1.442695, %v2763_v53 }
 0xd48   : > { %v2714_v28 = vpop.f32.mrf.mxu0  ;;  %v2757_v10 = vpop.f32.mrf.mxu1  ;;  %v2766_v16 = vadd.f32 %v3907_v44, %v2755_v34 }
 0xd49   : > { %4603 = vpow2.f32 %v3911_v38  ;;  %v3910_v12 = vmul.f32 -1.442695, %v2764_v40  ;;  %v2765_v33 = vadd.f32 %v3906_v37, %v2714_v28  ;;  %v2767_v32 = vadd.f32 %v3908_v50, %v2757_v10 }
 0xd4b   : > { %4605 = vpow2.f32 %v3910_v12  ;;  %v3912_v58 = vmul.f32 -1.442695, %v2765_v33  ;;  %v3914_v1 = vmul.f32 -1.442695, %v2767_v32 }
 0xd4d   : > { %4607 = vpow2.f32 %v3912_v58 }
 0xd4e   : > { %4609 = vtanh.f32 %v2762_v48 }
 0xd54   : > { %v4602_v13 = vpop.eup %4601 }
 0xd55   : > { %v2774_v51 = vadd.f32 1.0, %v4602_v13 }
 0xd56   : > { %v4604_v15 = vpop.eup %4603 }
 0xd57   : > { %4611 = vrcp.f32 %v2774_v51  ;;  %v2786_v7 = vadd.f32 1.0, %v4604_v15 }
 0xd58   : > { %v4606_v31 = vpop.eup %4605  ;;  %4613 = vpow2.f32 %v3913_v36 }
 0xd59   : > { %4615 = vrcp.f32 %v2786_v7  ;;  %v2775_v55 = vadd.f32 1.0, %v4606_v31 }
 0xd5a   : > { %v4608_v17 = vpop.eup %4607  ;;  %4617 = vpow2.f32 %v3914_v1 }
 0xd5b   : > { %4619 = vrcp.f32 %v2775_v55  ;;  %v2787_v35 = vadd.f32 1.0, %v4608_v17  ;;  %v4610_v18 = vpop.eup %4609 }
 0xd5c   : > { %4621 = vtanh.f32 %v2766_v16 }
 0xd5d   : > { %4623 = vrcp.f32 %v2787_v35  ;;  %v3925_v35 = vld [vmem:[%s5239_s15 + $0x370] sm:$0xff] }
 0xd64   : > { %v4612_v37 = vpop.eup %4611 }
 0xd65   : > { %v4614_v38 = vpop.eup %4613  ;;  %v2808_v28 = vmul.f32 %v4612_v37, %v4610_v18 }
 0xd66   : > { %v4616_v61 = vpop.eup %4615  ;;  %v2800_v58 = vadd.f32 1.0, %v4614_v38 }
 0xd67   : > { %v4618_v40 = vpop.eup %4617  ;;  %v2806_v12 = vmul.f32 %v4616_v61, %v6362_v30 }
 0xd68   : > { %v4620_v33 = vpop.eup %4619  ;;  %v2801_v50 = vadd.f32 1.0, %v4618_v40  ;;  %4625 = vrcp.f32 %v2800_v58 }
 0xd69   : > { %v4622_v47 = vpop.eup %4621  ;;  %v6413_v34 = vadd.f32 %v2808_v28, %v2806_v12 }
 0xd6a   : > { %v4624_v29 = vpop.eup %4623  ;;  %v2809_v10 = vmul.f32 %v4622_v47, %v4620_v33 }
 0xd6b   : > { %v2807_v53 = vmul.f32 %v4624_v29, %v6365_v39  ;;  %4627 = vtanh.f32 %v6413_v34 }
 0xd6c   : > { %4629 = vrcp.f32 %v2801_v50 }
 0xd6d   : > { %v6416_v48 = vadd.f32 %v2809_v10, %v2807_v53 }
 0xd6f   : > { %4631 = vtanh.f32 %v6416_v48 }
 0xd75   : > { %v4626_v30 = vpop.eup %4625 }
 0xd78   : > { %v4628_v32 = vpop.eup %4627 }
 0xd79   : > { %v4630_v13 = vpop.eup %4629  ;;  %v2814_v51 = vmul.f32 %v4628_v32, %v4626_v30 }
 0xd7c   : > { %v4632_v36 = vpop.eup %4631 }
 0xd7d   : > { %v2815_v44 = vmul.f32 %v4632_v36, %v4630_v13 }
 0xd7f   : > { %v2816_v15 = vpack.c.bf16 %v2815_v44, %v2814_v51 }
 0xd81   : > { %4107 = vst [vmem:[%s5241_s18 + $0x60] sm:$0xff] %v2816_v15   ;;  %2869 = vmatmul.mubr.bf16.vlgmr.msra.gmra.mxu0 %v2816_v15  ;;  %2912 = vmatmul.mubr.bf16.vlgmr.msra.gmra.mxu1 %v2816_v15 }
 0xd82   : > { %2999 = vmatpush1.bf16.msra.mxu0 %v6060_v62  ;;  %3042 = vmatpush1.bf16.msra.mxu1 %v6066_v19  ;;  %v3919_v62 = vld [vmem:[%s5239_s15 + $0x340] sm:$0xff] }
 0xd83   : > { %3000 = vmatprep.subr.bf16.mxu0 %v6072_v20  ;;  %3043 = vmatprep.subr.bf16.mxu1 %v6078_v21  ;;  %v3920_v20 = vld [vmem:[%s5239_s15 + $0x348] sm:$0xff] }
 0xd84   : > { %3030 = vmatprep.mubr.bf16.mxu0 %v4870_v3  ;;  %3073 = vmatprep.mubr.bf16.mxu1 %v4870_v3 }
 0xd86   : > { %3001 = vmatpush1.bf16.msra.mxu0 %v6086_v22  ;;  %3044 = vmatpush1.bf16.msra.mxu1 %v6092_v23 }
 0xd87   : > { %3002 = vmatprep.subr.bf16.mxu0 %v6098_v0  ;;  %3045 = vmatprep.subr.bf16.mxu1 %v6104_v41  ;;  %v3923_v0 = vld [vmem:[%s5239_s15 + $0x360] sm:$0xff] }
 0xd8a   : > { %3003 = vmatpush1.bf16.msra.mxu0 %v6110_v43  ;;  %3046 = vmatpush1.bf16.msra.mxu1 %v6116_v45 }
 0xd8b   : > { %3004 = vmatprep.subr.bf16.mxu0 %v6122_v46  ;;  %3047 = vmatprep.subr.bf16.mxu1 %v6128_v24  ;;  %v3924_v46 = vld [vmem:[%s5239_s15 + $0x368] sm:$0xff] }
 0xd8e   : > { %3005 = vmatpush1.bf16.msra.mxu0 %v6134_v25  ;;  %3048 = vmatpush1.bf16.msra.mxu1 %v6140_v26 }
 0xd8f   : > { %3006 = vmatprep.subr.bf16.mxu0 %v6146_v59  ;;  %3049 = vmatprep.subr.bf16.mxu1 %v6152_v9 }
 0xd92   : > { %3007 = vmatpush1.bf16.msra.mxu0 %v6158_v11  ;;  %3050 = vmatpush1.bf16.msra.mxu1 %v6240_v14 }
 0xd93   : > { %3008 = vmatprep.subr.bf16.mxu0 %v6165_v27  ;;  %3051 = vmatprep.subr.bf16.mxu1 %v6247_v57 }
 0xd96   : > { %3009 = vmatpush1.bf16.msra.mxu0 %v6172_v8  ;;  %3052 = vmatpush1.bf16.msra.mxu1 %v6254_v42 }
 0xd97   : > { %3010 = vmatprep.subr.bf16.mxu0 %v6179_v5  ;;  %3053 = vmatprep.subr.bf16.mxu1 %v6261_v60  ;;  %v3922_v5 = vld [vmem:[%s5239_s15 + $0x358] sm:$0xff] }
 0xd9a   : > { %3011 = vmatpush1.bf16.msra.mxu0 %v6267_v49  ;;  %3054 = vmatpush1.bf16.msra.mxu1 %v6273_v2 }
 0xd9b   : > { %3012 = vmatprep.subr.bf16.mxu0 %v6279_v4  ;;  %3055 = vmatprep.subr.bf16.mxu1 %v6285_v52 }
 0xd9e   : > { %3013 = vmatpush1.bf16.msra.mxu0 %v6291_v54  ;;  %3056 = vmatpush1.bf16.msra.mxu1 %v6297_v6 }
 0xd9f   : > { %3160 = vmatprep.subr.bf16.mxu0 %v6192_v63  ;;  %3203 = vmatprep.subr.bf16.mxu1 %v6198_v56  ;;  %v3921_v63 = vld [vmem:[%s5239_s15 + $0x350] sm:$0xff]  ;;  %v3926_v56 = vld [vmem:[%s5239_s15 + $0x378] sm:$0xff] }
 0xe41   : > { %v2870_v19 = vpop.f32.mrf.mxu0  ;;  %v2913_v22 = vpop.f32.mrf.mxu1 }
 0xe42   : > { %v2922_v21 = vadd.f32 %v3919_v62, %v2870_v19  ;;  %v2924_v7 = vadd.f32 %v3921_v63, %v2913_v22  ;;  %v4806_v63 = vld [vmem:[%s6622_s1 + $0x88] ss:$16 sps:$4 sm:$0xff]  }
 0xe43   : > { %v2872_v23 = vpop.f32.mrf.mxu0  ;;  %v2915_v25 = vpop.f32.mrf.mxu1 }
 0xe44   : > { %v3927_v41 = vmul.f32 -1.442695, %v2922_v21  ;;  %v2923_v43 = vadd.f32 %v3920_v20, %v2872_v23  ;;  %v2925_v1 = vadd.f32 %v3922_v5, %v2915_v25  ;;  %v4797_v25 = vld [vmem:[%s6622_s1 + $0xc0] ss:$16 sps:$4 sm:$0xff]  }
 0xe45   : > { %v2874_v45 = vpop.f32.mrf.mxu0  ;;  %v2917_v27 = vpop.f32.mrf.mxu1  ;;  %v4805_v5 = vld [vmem:[%s6622_s1 + $0x80] ss:$16 sps:$4 sm:$0xff]  }
 0xe46   : > { %4633 = vpow2.f32 %v3927_v41  ;;  %v3929_v24 = vmul.f32 -1.442695, %v2923_v43  ;;  %v2926_v26 = vadd.f32 %v3923_v0, %v2874_v45  ;;  %v3931_v55 = vmul.f32 -1.442695, %v2925_v1  ;;  %v4794_v45 = vld [vmem:[%s6622_s1 + $0xe8] ss:$16 sps:$4 sm:$0xff]  }
 0xe47   : > { %v2876_v59 = vpop.f32.mrf.mxu0  ;;  %v2919_v39 = vpop.f32.mrf.mxu1  ;;  %v2928_v40 = vadd.f32 %v3925_v35, %v2917_v27  ;;  %v4803_v27 = vld [vmem:[%s6622_s1 + $0x84] ss:$16 sps:$4 sm:$0xff]   ;;  %v4809_v1 = vld [vmem:[%s6622_s1 + $0x60] ss:$16 sps:$4 sm:$0xff]  }
 0xe48   : > { %4635 = vpow2.f32 %v3929_v24  ;;  %v3928_v9 = vmul.f32 -1.442695, %v2926_v26  ;;  %v2927_v11 = vadd.f32 %v3924_v46, %v2876_v59  ;;  %v2929_v31 = vadd.f32 %v3926_v56, %v2919_v39  ;;  %v4795_v46 = vld [vmem:[%s6622_s1 + $0xc4] ss:$16 sps:$4 sm:$0xff]   ;;  %v4796_v24 = vld [vmem:[%s6622_s1 + $0xcc] ss:$16 sps:$4 sm:$0xff]  }
 0xe49   : > { %v4798_v26 = vld [vmem:[%s6622_s1 + $0xc8] ss:$16 sps:$4 sm:$0xff]   ;;  %v4799_v59 = vld [vmem:[%s6622_s1 + $0xa4] ss:$16 sps:$4 sm:$0xff]   ;;  %v4808_v39 = vld [vmem:[%s6622_s1 + $0x6c] ss:$16 sps:$4 sm:$0xff]  }
 0xe4a   : > { %4637 = vpow2.f32 %v3928_v9  ;;  %v3930_v8 = vmul.f32 -1.442695, %v2927_v11  ;;  %v3932_v37 = vmul.f32 -1.442695, %v2929_v31  ;;  %v4800_v9 = vld [vmem:[%s6622_s1 + $0xac] ss:$16 sps:$4 sm:$0xff]  }
 0xe4b   : > { %v4802_v11 = vld [vmem:[%s6622_s1 + $0xa8] ss:$16 sps:$4 sm:$0xff]   ;;  %v4807_v56 = vld [vmem:[%s6622_s1 + $0x64] ss:$16 sps:$4 sm:$0xff]   ;;  %v4811_v31 = vld [vmem:[%s6622_s1 + $0x40] ss:$16 sps:$4 sm:$0xff]  }
 0xe4c   : > { %4639 = vpow2.f32 %v3930_v8  ;;  %v4804_v8 = vld [vmem:[%s6622_s1 + $0x8c] ss:$16 sps:$4 sm:$0xff]  }
 0xe4d   : > { %4641 = vtanh.f32 %v2924_v7  ;;  %v4810_v7 = vld [vmem:[%s6622_s1 + $0x44] ss:$16 sps:$4 sm:$0xff]  }
 0xe53   : > { %v4634_v16 = vpop.eup %4633 }
 0xe54   : > { %v2936_v17 = vadd.f32 1.0, %v4634_v16  ;;  %v3938_v16 = vld [vmem:[%s5239_s15 + $0x388] sm:$0xff] }
 0xe55   : > { %v4636_v18 = vpop.eup %4635 }
 0xe56   : > { %4643 = vrcp.f32 %v2936_v17  ;;  %v2948_v38 = vadd.f32 1.0, %v4636_v18 }
 0xe57   : > { %v4638_v61 = vpop.eup %4637  ;;  %4645 = vpow2.f32 %v3931_v55 }
 0xe58   : > { %4647 = vrcp.f32 %v2948_v38  ;;  %v2937_v28 = vadd.f32 1.0, %v4638_v61 }
 0xe59   : > { %v4640_v12 = vpop.eup %4639  ;;  %4649 = vpow2.f32 %v3932_v37 }
 0xe5a   : > { %4651 = vrcp.f32 %v2937_v28  ;;  %v2949_v33 = vadd.f32 1.0, %v4640_v12  ;;  %v4642_v58 = vpop.eup %4641  ;;  %v3940_v12 = vld [vmem:[%s5239_s15 + $0x398] sm:$0xff] }
 0xe5b   : > { %4653 = vtanh.f32 %v2928_v40 }
 0xe5c   : > { %4655 = vrcp.f32 %v2949_v33  ;;  %v3939_v33 = vld [vmem:[%s5239_s15 + $0x390] sm:$0xff] }
 0xe63   : > { %v4644_v47 = vpop.eup %4643 }
 0xe64   : > { %v4646_v29 = vpop.eup %4645  ;;  %v2970_v53 = vmul.f32 %v4644_v47, %v4642_v58  ;;  %v3944_v58 = vld [vmem:[%s5239_s15 + $0x3b8] sm:$0xff] }
 0xe65   : > { %v4648_v50 = vpop.eup %4647  ;;  %v2962_v13 = vadd.f32 1.0, %v4646_v29 }
 0xe66   : > { %v4650_v10 = vpop.eup %4649  ;;  %v2968_v30 = vmul.f32 %v4648_v50, %v6413_v34 }
 0xe67   : > { %v4652_v32 = vpop.eup %4651  ;;  %v2963_v15 = vadd.f32 1.0, %v4650_v10  ;;  %4657 = vrcp.f32 %v2962_v13  ;;  %v3943_v13 = vld [vmem:[%s5239_s15 + $0x3b0] sm:$0xff] }
 0xe68   : > { %v4654_v36 = vpop.eup %4653  ;;  %v6464_v51 = vadd.f32 %v2970_v53, %v2968_v30 }
 0xe69   : > { %v4656_v44 = vpop.eup %4655  ;;  %v2971_v62 = vmul.f32 %v4654_v36, %v4652_v32 }
 0xe6a   : > { %v2969_v19 = vmul.f32 %v4656_v44, %v6416_v48  ;;  %4659 = vtanh.f32 %v6464_v51  ;;  %v4793_v48 = vld [vmem:[%s6622_s1 + $0xe0] ss:$16 sps:$4 sm:$0xff]  }
 0xe6b   : > { %4661 = vrcp.f32 %v2963_v15 }
 0xe6c   : > { %v6467_v20 = vadd.f32 %v2971_v62, %v2969_v19 }
 0xe6e   : > { %4663 = vtanh.f32 %v6467_v20 }
 0xe74   : > { %v4658_v34 = vpop.eup %4657 }
 0xe77   : > { %v4660_v21 = vpop.eup %4659 }
 0xe78   : > { %v4662_v22 = vpop.eup %4661  ;;  %v2976_v0 = vmul.f32 %v4660_v21, %v4658_v34 }
 0xe7b   : > { %v4664_v23 = vpop.eup %4663 }
 0xe7c   : > { %v2977_v41 = vmul.f32 %v4664_v23, %v4662_v22 }
 0xe7e   : > { %v2978_v43 = vpack.c.bf16 %v2977_v41, %v2976_v0 }
 0xe80   : > { %4108 = vst [vmem:[%s5241_s18 + $0x68] sm:$0xff] %v2978_v43   ;;  %3031 = vmatmul.mubr.bf16.vlgmr.msra.gmra.mxu0 %v2978_v43  ;;  %3074 = vmatmul.mubr.bf16.vlgmr.msra.gmra.mxu1 %v2978_v43 }
 0xe81   : > { %3161 = vmatpush1.bf16.msra.mxu0 %v4793_v48  ;;  %3204 = vmatpush1.bf16.msra.mxu1 %v4794_v45 }
 0xe82   : > { %3162 = vmatprep.subr.bf16.mxu0 %v4795_v46  ;;  %3205 = vmatprep.subr.bf16.mxu1 %v4796_v24 }
 0xe83   : > { %3192 = vmatprep.mubr.bf16.mxu0 %v4870_v3  ;;  %3235 = vmatprep.mubr.bf16.mxu1 %v4870_v3  ;;  %v4801_v3 = vld [vmem:[%s6622_s1 + $0xa0] ss:$16 sps:$4 sm:$0xff]  }
 0xe85   : > { %3163 = vmatpush1.bf16.msra.mxu0 %v4797_v25  ;;  %3206 = vmatpush1.bf16.msra.mxu1 %v4798_v26 }
 0xe86   : > { %3164 = vmatprep.subr.bf16.mxu0 %v4799_v59  ;;  %3207 = vmatprep.subr.bf16.mxu1 %v4800_v9 }
 0xe89   : > { %3165 = vmatpush1.bf16.msra.mxu0 %v4801_v3  ;;  %3208 = vmatpush1.bf16.msra.mxu1 %v4802_v11 }
 0xe8a   : > { %3166 = vmatprep.subr.bf16.mxu0 %v4803_v27  ;;  %3209 = vmatprep.subr.bf16.mxu1 %v4804_v8 }
 0xe8d   : > { %3167 = vmatpush1.bf16.msra.mxu0 %v4805_v5  ;;  %3210 = vmatpush1.bf16.msra.mxu1 %v4806_v63 }
 0xe8e   : > { %3168 = vmatprep.subr.bf16.mxu0 %v4807_v56  ;;  %3211 = vmatprep.subr.bf16.mxu1 %v4808_v39 }
 0xe91   : > { %3169 = vmatpush1.bf16.msra.mxu0 %v4809_v1  ;;  %3212 = vmatpush1.bf16.msra.mxu1 %v6240_v14  ;;  %v4812_v14 = vld [vmem:[%s6622_s1 + $0x24] ss:$16 sps:$4 sm:$0xff]  }
 0xe92   : > { %3170 = vmatprep.subr.bf16.mxu0 %v4810_v7  ;;  %3213 = vmatprep.subr.bf16.mxu1 %v6247_v57  ;;  %v3937_v57 = vld [vmem:[%s5239_s15 + $0x380] sm:$0xff] }
 0xe95   : > { %3171 = vmatpush1.bf16.msra.mxu0 %v4811_v31  ;;  %3214 = vmatpush1.bf16.msra.mxu1 %v6254_v42 }
 0xe96   : > { %3172 = vmatprep.subr.bf16.mxu0 %v4812_v14  ;;  %3215 = vmatprep.subr.bf16.mxu1 %v6261_v60  ;;  %v3941_v60 = vld [vmem:[%s5239_s15 + $0x3a0] sm:$0xff]  ;;  %v3956_v14 = vld [vmem:[%s5239_s15 + $0x3c8] sm:$0xff] }
 0xe99   : > { %3173 = vmatpush1.bf16.msra.mxu0 %v6267_v49  ;;  %3216 = vmatpush1.bf16.msra.mxu1 %v6273_v2 }
 0xe9a   : > { %3174 = vmatprep.subr.bf16.mxu0 %v6279_v4  ;;  %3217 = vmatprep.subr.bf16.mxu1 %v6285_v52  ;;  %v3942_v4 = vld [vmem:[%s5239_s15 + $0x3a8] sm:$0xff] }
 0xe9d   : > { %3175 = vmatpush1.bf16.msra.mxu0 %v6291_v54  ;;  %3218 = vmatpush1.bf16.msra.mxu1 %v6297_v6 }
 0xf40   : > { %v3032_v42 = vpop.f32.mrf.mxu0  ;;  %v3075_v17 = vpop.f32.mrf.mxu1 }
 0xf41   : > { %v3084_v55 = vadd.f32 %v3937_v57, %v3032_v42  ;;  %v3086_v50 = vadd.f32 %v3939_v33, %v3075_v17  ;;  %v3957_v33 = vld [vmem:[%s5239_s15 + $0x3d0] sm:$0xff] }
 0xf42   : > { %v3034_v35 = vpop.f32.mrf.mxu0  ;;  %v3077_v37 = vpop.f32.mrf.mxu1 }
 0xf43   : > { %v3945_v49 = vmul.f32 -1.442695, %v3084_v55  ;;  %v3085_v18 = vadd.f32 %v3938_v16, %v3034_v35  ;;  %v3087_v29 = vadd.f32 %v3940_v12, %v3077_v37  ;;  %v3959_v55 = vld [vmem:[%s5239_s15 + $0x3e0] sm:$0xff] }
 0xf44   : > { %v3036_v2 = vpop.f32.mrf.mxu0  ;;  %v3079_v40 = vpop.f32.mrf.mxu1 }
 0xf45   : > { %4665 = vpow2.f32 %v3945_v49  ;;  %v3947_v52 = vmul.f32 -1.442695, %v3085_v18  ;;  %v3088_v54 = vadd.f32 %v3941_v60, %v3036_v2  ;;  %v3949_v30 = vmul.f32 -1.442695, %v3087_v29  ;;  %v3960_v49 = vld [vmem:[%s5239_s15 + $0x3e8] sm:$0xff] }
 0xf46   : > { %v3038_v38 = vpop.f32.mrf.mxu0  ;;  %v3081_v47 = vpop.f32.mrf.mxu1  ;;  %v3090_v19 = vadd.f32 %v3943_v13, %v3079_v40 }
 0xf47   : > { %4667 = vpow2.f32 %v3947_v52  ;;  %v3946_v6 = vmul.f32 -1.442695, %v3088_v54  ;;  %v3089_v61 = vadd.f32 %v3942_v4, %v3038_v38  ;;  %v3091_v10 = vadd.f32 %v3944_v58, %v3081_v47  ;;  %v3958_v38 = vld [vmem:[%s5239_s15 + $0x3d8] sm:$0xff] }
 0xf49   : > { %4669 = vpow2.f32 %v3946_v6  ;;  %v3948_v28 = vmul.f32 -1.442695, %v3089_v61  ;;  %v3950_v44 = vmul.f32 -1.442695, %v3091_v10 }
 0xf4b   : > { %4671 = vpow2.f32 %v3948_v28  ;;  %v3962_v28 = vld [vmem:[%s5239_s15 + $0x3f8] sm:$0xff] }
 0xf4c   : > { %4673 = vtanh.f32 %v3086_v50 }
 0xf52   : > { %v4666_v53 = vpop.eup %4665 }
 0xf53   : > { %v3098_v32 = vadd.f32 1.0, %v4666_v53  ;;  %v3961_v53 = vld [vmem:[%s5239_s15 + $0x3f0] sm:$0xff] }
 0xf54   : > { %v4668_v36 = vpop.eup %4667 }
 0xf55   : > { %4675 = vrcp.f32 %v3098_v32  ;;  %v3110_v15 = vadd.f32 1.0, %v4668_v36 }
 0xf56   : > { %v4670_v62 = vpop.eup %4669  ;;  %4677 = vpow2.f32 %v3949_v30 }
 0xf57   : > { %4679 = vrcp.f32 %v3110_v15  ;;  %v3099_v34 = vadd.f32 1.0, %v4670_v62 }
 0xf58   : > { %v4672_v21 = vpop.eup %4671  ;;  %4681 = vpow2.f32 %v3950_v44 }
 0xf59   : > { %4683 = vrcp.f32 %v3099_v34  ;;  %v3111_v22 = vadd.f32 1.0, %v4672_v21  ;;  %v4674_v23 = vpop.eup %4673 }
 0xf5a   : > { %4685 = vtanh.f32 %v3090_v19 }
 0xf5b   : > { %4687 = vrcp.f32 %v3111_v22 }
 0xf62   : > { %v4676_v0 = vpop.eup %4675 }
 0xf63   : > { %v4678_v41 = vpop.eup %4677  ;;  %v3132_v45 = vmul.f32 %v4676_v0, %v4674_v23 }
 0xf64   : > { %v4680_v43 = vpop.eup %4679  ;;  %v3124_v25 = vadd.f32 1.0, %v4678_v41 }
 0xf65   : > { %v4682_v48 = vpop.eup %4681  ;;  %v3130_v46 = vmul.f32 %v4680_v43, %v6464_v51 }
 0xf66   : > { %v4684_v24 = vpop.eup %4683  ;;  %v3125_v3 = vadd.f32 1.0, %v4682_v48  ;;  %4689 = vrcp.f32 %v3124_v25 }
 0xf67   : > { %v4686_v26 = vpop.eup %4685  ;;  %v6553_v59 = vadd.f32 %v3132_v45, %v3130_v46 }
 0xf68   : > { %v4688_v9 = vpop.eup %4687  ;;  %v3133_v11 = vmul.f32 %v4686_v26, %v4684_v24 }
 0xf69   : > { %v3131_v27 = vmul.f32 %v4688_v9, %v6467_v20  ;;  %4691 = vtanh.f32 %v6553_v59  ;;  %v3955_v20 = vld [vmem:[%s5239_s15 + $0x3c0] sm:$0xff] }
 0xf6a   : > { %4693 = vrcp.f32 %v3125_v3 }
 0xf6b   : > { %v6556_v8 = vadd.f32 %v3133_v11, %v3131_v27 }
 0xf6d   : > { %4695 = vtanh.f32 %v6556_v8 }
 0xf73   : > { %v4690_v51 = vpop.eup %4689 }
 0xf76   : > { %v4692_v5 = vpop.eup %4691 }
 0xf77   : > { %v4694_v63 = vpop.eup %4693  ;;  %v3138_v39 = vmul.f32 %v4692_v5, %v4690_v51 }
 0xf7a   : > { %v4696_v56 = vpop.eup %4695 }
 0xf7b   : > { %v3139_v1 = vmul.f32 %v4696_v56, %v4694_v63 }
 0xf7d   : > { %v3140_v7 = vpack.c.bf16 %v3139_v1, %v3138_v39 }
 0xf7f   : > { %4109 = vst [vmem:[%s5241_s18 + $0x70] sm:$0xff] %v3140_v7   ;;  %3193 = vmatmul.mubr.bf16.vlgmr.msra.gmra.mxu0 %v3140_v7  ;;  %3236 = vmatmul.mubr.bf16.vlgmr.msra.gmra.mxu1 %v3140_v7 }
0x103f   : > { %v3194_v31 = vpop.f32.mrf.mxu0  ;;  %v3237_v42 = vpop.f32.mrf.mxu1 }
0x1040   : > { %v3246_v57 = vadd.f32 %v3955_v20, %v3194_v31  ;;  %v3248_v50 = vadd.f32 %v3957_v33, %v3237_v42 }
0x1041   : > { %v3196_v16 = vpop.f32.mrf.mxu0  ;;  %v3239_v2 = vpop.f32.mrf.mxu1 }
0x1042   : > { %v3963_v17 = vmul.f32 -1.442695, %v3246_v57  ;;  %v3247_v35 = vadd.f32 %v3956_v14, %v3196_v16  ;;  %v3249_v40 = vadd.f32 %v3958_v38, %v3239_v2 }
0x1043   : > { %v3198_v60 = vpop.f32.mrf.mxu0  ;;  %v3241_v6 = vpop.f32.mrf.mxu1 }
0x1044   : > { %4697 = vpow2.f32 %v3963_v17  ;;  %v3965_v18 = vmul.f32 -1.442695, %v3247_v35  ;;  %v3250_v4 = vadd.f32 %v3959_v55, %v3198_v60  ;;  %v3967_v58 = vmul.f32 -1.442695, %v3249_v40 }
0x1045   : > { %v3200_v52 = vpop.f32.mrf.mxu0  ;;  %v3243_v12 = vpop.f32.mrf.mxu1  ;;  %v3252_v44 = vadd.f32 %v3961_v53, %v3241_v6 }
0x1046   : > { %4699 = vpow2.f32 %v3965_v18  ;;  %v3964_v37 = vmul.f32 -1.442695, %v3250_v4  ;;  %v3251_v54 = vadd.f32 %v3960_v49, %v3200_v52  ;;  %v3253_v47 = vadd.f32 %v3962_v28, %v3243_v12 }
0x1048   : > { %4701 = vpow2.f32 %v3964_v37  ;;  %v3966_v61 = vmul.f32 -1.442695, %v3251_v54  ;;  %v3968_v32 = vmul.f32 -1.442695, %v3253_v47 }
0x104a   : > { %4703 = vpow2.f32 %v3966_v61 }
0x104b   : > { %4705 = vpow2.f32 %v3967_v58 }
0x1051   : > { %v4698_v29 = vpop.eup %4697 }
0x1052   : > { %v3260_v10 = vadd.f32 1.0, %v4698_v29 }
0x1053   : > { %v4700_v30 = vpop.eup %4699 }
0x1054   : > { %4707 = vrcp.f32 %v3260_v10  ;;  %v3272_v13 = vadd.f32 1.0, %v4700_v30 }
0x1055   : > { %v4702_v36 = vpop.eup %4701  ;;  %4709 = vtanh.f32 %v3248_v50 }
0x1056   : > { %4711 = vrcp.f32 %v3272_v13  ;;  %v3261_v15 = vadd.f32 1.0, %v4702_v36 }
0x1057   : > { %v4704_v62 = vpop.eup %4703  ;;  %4713 = vpow2.f32 %v3968_v32 }
0x1058   : > { %4715 = vrcp.f32 %v3261_v15  ;;  %v3273_v19 = vadd.f32 1.0, %v4704_v62  ;;  %v4706_v34 = vpop.eup %4705 }
0x1059   : > { %4717 = vtanh.f32 %v3252_v44  ;;  %v3286_v0 = vadd.f32 1.0, %v4706_v34 }
0x105a   : > { %4719 = vrcp.f32 %v3273_v19 }
0x105b   : > { %4721 = vrcp.f32 %v3286_v0 }
0x1061   : > { %v4708_v21 = vpop.eup %4707 }
0x1062   : > { %v4710_v22 = vpop.eup %4709 }
0x1063   : > { %v4712_v23 = vpop.eup %4711  ;;  %v3294_v43 = vmul.f32 %v4710_v22, %v4708_v21 }
0x1064   : > { %v4714_v41 = vpop.eup %4713  ;;  %v3292_v48 = vmul.f32 %v4712_v23, %v6553_v59 }
0x1065   : > { %v4716_v45 = vpop.eup %4715  ;;  %v3287_v26 = vadd.f32 1.0, %v4714_v41 }
0x1066   : > { %v4718_v46 = vpop.eup %4717  ;;  %v3296_v24 = vadd.f32 %v3294_v43, %v3292_v48 }
0x1067   : > { %v4720_v25 = vpop.eup %4719  ;;  %v3295_v9 = vmul.f32 %v4718_v46, %v4716_v45 }
0x1068   : > { %4723 = vtanh.f32 %v3296_v24  ;;  %3315 = vst [vmem:[#allocation3 + $0x8] sm:$0xff] %v3296_v24  ;;  %v3293_v3 = vmul.f32 %v4720_v25, %v6556_v8  ;;  %v4722_v27 = vpop.eup %4721 }
0x1069   : > { %4725 = vrcp.f32 %v3287_v26 }
0x106a   : > { %v3297_v11 = vadd.f32 %v3295_v9, %v3293_v3 }
0x106c   : > { %4727 = vtanh.f32 %v3297_v11  ;;  %3316 = vst [vmem:[#allocation3] sm:$0xff] %v3297_v11 }
0x1075   : > { %v4724_v51 = vpop.eup %4723 }
0x1076   : > { %v3300_v5 = vmul.f32 %v4724_v51, %v4722_v27  ;;  %v4726_v59 = vpop.eup %4725 }
0x1078   : > { %3313 = vst [vmem:[#allocation2] sm:$0xff] %v3300_v5 }
0x1079   : > { %v4728_v63 = vpop.eup %4727 }
0x107a   : > { %v3301_v56 = vmul.f32 %v4728_v63, %v4726_v59  ;;  %3320 = sbr.rel (%p3973_p0) target bundleno = 4225 (0x1081), region = 59 }
0x107c   : > { %v4094_v39 = vpack.c.bf16 %v3301_v56, %v3300_v5  ;;  %3314 = vst [vmem:[#allocation2 + $0x8] sm:$0xff] %v3301_v56 }
0x107e   : > { %4110 = vst [vmem:[%s5241_s18 + $0x78] sm:$0xff] %v4094_v39  }
0x107f   : > { %3321 = vst [vmem:[%s5232_s8] sm:$0xff] %v3300_v5  ;;  %3323 = vst [vmem:[%s5237_s11] sm:$0xff] %v3296_v24 }
0x1080   : > { %3322 = vst [vmem:[%s5232_s8 + $0x8] sm:$0xff] %v3301_v56  ;;  %3324 = vst [vmem:[%s5237_s11 + $0x8] sm:$0xff] %v3297_v11 }
0x1081 PF: > { %3341 = sbr.rel (!%p4944_p6) target bundleno = 4237 (0x108d), region = 63  ;;  %s4015_s8 = sshll.u32 (%p4944_p6), %s4851_s17, 6  ;;  %v3364_v8 = vld [vmem:[%s5241_s18] sm:$0xff] (%p4944_p6)   ;;  %v3368_v1 = vld [vmem:[%s5241_s18 + $0x8] sm:$0xff] (%p4944_p6)   ;;  %v3372_v7 = vld [vmem:[%s5241_s18 + $0x10] sm:$0xff] (%p4944_p6)  }
0x1082   : > { %s3345_s26 = sadd.s32 (%p4944_p6), %s4015_s8, %s5225_s25  ;;  %v3376_v20 = vld [vmem:[%s5241_s18 + $0x18] sm:$0xff] (%p4944_p6)   ;;  %v3380_v31 = vld [vmem:[%s5241_s18 + $0x20] sm:$0xff] (%p4944_p6)   ;;  %v3384_v14 = vld [vmem:[%s5241_s18 + $0x28] sm:$0xff] (%p4944_p6)  }
0x1083   : > { %s3978_s11 = sshll.u32 (%p4944_p6), %s3345_s26, 2  ;;  %v3388_v57 = vld [vmem:[%s5241_s18 + $0x30] sm:$0xff] (%p4944_p6)   ;;  %v3392_v42 = vld [vmem:[%s5241_s18 + $0x38] sm:$0xff] (%p4944_p6)   ;;  %v3396_v16 = vld [vmem:[%s5241_s18 + $0x40] sm:$0xff] (%p4944_p6)  }
0x1084   : > { %s3347_s28 = scalar_lea.vmem (%p4944_p6), %s6623_s2, %s3978_s11  ;;  %v3400_v55 = vld [vmem:[%s5241_s18 + $0x48] sm:$0xff] (%p4944_p6)   ;;  %v3404_v17 = vld [vmem:[%s5241_s18 + $0x50] sm:$0xff] (%p4944_p6)   ;;  %v3408_v35 = vld [vmem:[%s5241_s18 + $0x58] sm:$0xff] (%p4944_p6)  }
0x1085   : > { %3365 = vst [vmem:[%s3347_s28] sm:$0xff] (%p4944_p6), %v3364_v8   ;;  %3369 = vst [vmem:[%s3347_s28 + $0x10] sm:$0xff] (%p4944_p6), %v3368_v1   ;;  %v3412_v60 = vld [vmem:[%s5241_s18 + $0x60] sm:$0xff] (%p4944_p6)   ;;  %v3416_v49 = vld [vmem:[%s5241_s18 + $0x68] sm:$0xff] (%p4944_p6)  }
0x1086   : > { %3373 = vst [vmem:[%s3347_s28 + $0x20] sm:$0xff] %v3372_v7   ;;  %3377 = vst [vmem:[%s3347_s28 + $0x30] sm:$0xff] %v3376_v20   ;;  %v3420_v18 = vld [vmem:[%s5241_s18 + $0x70] sm:$0xff]  }
0x1087   : > { %3381 = vst [vmem:[%s3347_s28 + $0x40] sm:$0xff] %v3380_v31   ;;  %3385 = vst [vmem:[%s3347_s28 + $0x50] sm:$0xff] %v3384_v14   ;;  %v3424_v2 = vld [vmem:[%s5241_s18 + $0x78] sm:$0xff]  }
0x1088   : > { %3389 = vst [vmem:[%s3347_s28 + $0x60] sm:$0xff] %v3388_v57   ;;  %3393 = vst [vmem:[%s3347_s28 + $0x70] sm:$0xff] %v3392_v42  }
0x1089   : > { %3397 = vst [vmem:[%s3347_s28 + $0x80] sm:$0xff] %v3396_v16   ;;  %3401 = vst [vmem:[%s3347_s28 + $0x90] sm:$0xff] %v3400_v55  }
0x108a   : > { %3405 = vst [vmem:[%s3347_s28 + $0xa0] sm:$0xff] %v3404_v17   ;;  %3409 = vst [vmem:[%s3347_s28 + $0xb0] sm:$0xff] %v3408_v35  }
0x108b   : > { %3413 = vst [vmem:[%s3347_s28 + $0xc0] sm:$0xff] %v3412_v60   ;;  %3417 = vst [vmem:[%s3347_s28 + $0xd0] sm:$0xff] %v3416_v49  }
0x108c   : > { %3421 = vst [vmem:[%s3347_s28 + $0xe0] sm:$0xff] %v3420_v18   ;;  %3425 = vst [vmem:[%s3347_s28 + $0xf0] sm:$0xff] %v3424_v2  }
0x108d PF: > { %s15_s21 = sadd.s32 1, %s4867_s21   ;;  %s6627_s15 = smov %s4847_s16 }
0x108e   : > { %p12_p1 = scmp.ge.s32.totalorder %s15_s21, 10   ;;  %s6628_s16 = smov %s4952_s30 }
0x108f   : > { %s6629_s17 = smov %s4859_s19  ;;  %s6630_s18 = smov %s4863_s20 }
0x1090   : > { %s6631_s19 = smov %s6634_s22  ;;  %s6632_s20 = smov %s6638_s23 }
0x1091   :  { %14 = sbr.rel (!%p12_p1) target bundleno = 4 (0x4), region = 189 }

</bundles_post_ra>
